<compile_context>
chip_gen: v5e
topology: v5e:2x2
jax: 0.10.0
libtpu: 0.0.40
codegen_flags: <defaults>
</compile_context>

<pallas_src>
import functools

import jax
import jax.numpy as jnp
from jax.experimental import pallas as pl
from jax.experimental.pallas import tpu as pltpu


def _ru(x, m):
    return (x + m - 1) // m * m


def _pick_tile(padded_dim, base, cap):
    """Largest multiple of `base` <= cap that divides padded_dim."""
    for cand in range(min(cap, padded_dim), 0, -base):
        if padded_dim % cand == 0:
            return cand
    return base


# ----------------------------- Pallas kernels -----------------------------

def _mm_kernel(a_ref, b_ref, psc_ref, psh_ref, esc_ref, esh_ref,
               o_ref, acc_ref, *, prologue, epilogue):
    """Tiled matmul with optional fused BN+ReLU prologue / epilogue."""
    k = pl.program_id(2)

    @pl.when(k == 0)
    def _init():
        acc_ref[...] = jnp.zeros_like(acc_ref)

    a = a_ref[...]
    if prologue:  # per-input-channel BN + ReLU on the A tile (f32, then bf16)
        a = jnp.maximum(a.astype(jnp.float32) * psc_ref[...] + psh_ref[...], 0.0)
        a = a.astype(jnp.bfloat16)
    acc_ref[...] += jnp.dot(a, b_ref[...], preferred_element_type=jnp.float32)

    @pl.when(k == pl.num_programs(2) - 1)
    def _finalize():
        acc = acc_ref[...]
        if epilogue == "bn_relu":          # per-output-channel BN + ReLU
            acc = jnp.maximum(acc * esc_ref[...] + esh_ref[...], 0.0)
        elif epilogue == "bias_sigmoid":   # classifier head
            y = acc + esh_ref[...]
            z = jnp.exp(-jnp.abs(y))       # numerically safe sigmoid
            acc = jnp.where(y >= 0, 1.0 / (1.0 + z), z / (1.0 + z))
        o_ref[...] = acc.astype(o_ref.dtype)


def _pool_kernel(x_ref, o_ref, *, mode, inv):
    """(P, tm, C) -> (tm, C) reduced over the leading patch axis."""
    x = x_ref[...].astype(jnp.float32)
    if mode == "max":
        r = jnp.max(x, axis=0)
    else:
        r = jnp.sum(x, axis=0) * inv
    o_ref[...] = r.astype(o_ref.dtype)


def _gap_bn_relu_kernel(x_ref, sc_ref, sh_ref, o_ref, *, inv):
    """Fused norm5+ReLU+global-average-pool for one image."""
    x = x_ref[0].astype(jnp.float32)                       # (HW, C)
    x = jnp.maximum(x * sc_ref[...] + sh_ref[...], 0.0)
    o_ref[0] = (jnp.sum(x, axis=0, keepdims=True) * inv).astype(o_ref.dtype)


# ----------------------------- kernel wrappers -----------------------------

def matmul_fused(a, b, *, p_scale=None, p_shift=None,
                 e_scale=None, e_shift=None, epilogue="none",
                 out_dtype=jnp.bfloat16):
    """(M,K)@(K,N) on the MXU with optional fused BN+ReLU / bias+sigmoid."""
    M, K = a.shape
    Kb, N = b.shape
    assert K == Kb
    a = a.astype(jnp.bfloat16)
    b = b.astype(jnp.bfloat16)

    Mp, Np, Kp = _ru(M, 8), _ru(N, 128), _ru(K, 128)
    tm = _pick_tile(Mp, 8, 256)
    tn = _pick_tile(Np, 128, 256)
    tk = _pick_tile(Kp, 128, 512)
    if (Mp, Kp) != (M, K):
        a = jnp.pad(a, ((0, Mp - M), (0, Kp - K)))
    if (Kp, Np) != (K, N):
        b = jnp.pad(b, ((0, Kp - K), (0, Np - N)))

    def _vec(v, length):
        r = jnp.zeros((1, length), jnp.float32)
        if v is not None:
            r = r.at[0, :v.shape[0]].set(v.astype(jnp.float32))
        return r

    psc, psh = _vec(p_scale, Kp), _vec(p_shift, Kp)
    esc, esh = _vec(e_scale, Np), _vec(e_shift, Np)
    prologue = p_scale is not None

    kernel = functools.partial(_mm_kernel, prologue=prologue, epilogue=epilogue)
    out = pl.pallas_call(
        kernel,
        out_shape=jax.ShapeDtypeStruct((Mp, Np), out_dtype),
        grid=(Mp // tm, Np // tn, Kp // tk),
        in_specs=[
            pl.BlockSpec((tm, tk), lambda i, j, k: (i, k)),
            pl.BlockSpec((tk, tn), lambda i, j, k: (k, j)),
            pl.BlockSpec((1, tk), lambda i, j, k: (0, k)),
            pl.BlockSpec((1, tk), lambda i, j, k: (0, k)),
            pl.BlockSpec((1, tn), lambda i, j, k: (0, j)),
            pl.BlockSpec((1, tn), lambda i, j, k: (0, j)),
        ],
        out_specs=pl.BlockSpec((tm, tn), lambda i, j, k: (i, j)),
        scratch_shapes=[pltpu.VMEM((tm, tn), jnp.float32)],
        compiler_params=pltpu.CompilerParams(
            dimension_semantics=("parallel", "parallel", "arbitrary")),
    )(a, b, psc, psh, esc, esh)
    if (Mp, Np) != (M, N):
        out = out[:M, :N]
    return out


def _pool(p, mode):
    """p: (P, M, C) -> (M, C) reduced over P, tiled over M."""
    P, M, C = p.shape
    Mp = _ru(M, 8)
    if Mp != M:
        p = jnp.pad(p, ((0, 0), (0, Mp - M), (0, 0)))
    tm = _pick_tile(Mp, 8, 256)
    kernel = functools.partial(_pool_kernel, mode=mode, inv=1.0 / P)
    out = pl.pallas_call(
        kernel,
        out_shape=jax.ShapeDtypeStruct((Mp, C), p.dtype),
        grid=(Mp // tm,),
        in_specs=[pl.BlockSpec((P, tm, C), lambda i: (0, i, 0))],
        out_specs=pl.BlockSpec((tm, C), lambda i: (i, 0)),
        compiler_params=pltpu.CompilerParams(
            dimension_semantics=("parallel",)),
    )(p)
    return out[:M] if Mp != M else out


def global_avg_pool_bn_relu(x, scale, shift):
    """relu(bn(x)) then global average pool -> (N, C)."""
    N, H, W, C = x.shape
    hw = H * W
    xr = x.reshape(N, hw, C)
    sc = scale.astype(jnp.float32).reshape(1, C)
    sh = shift.astype(jnp.float32).reshape(1, C)
    kernel = functools.partial(_gap_bn_relu_kernel, inv=1.0 / hw)
    out = pl.pallas_call(
        kernel,
        out_shape=jax.ShapeDtypeStruct((N, 1, C), jnp.bfloat16),
        grid=(N,),
        in_specs=[pl.BlockSpec((1, hw, C), lambda n: (n, 0, 0)),
                  pl.BlockSpec((1, C), lambda n: (0, 0)),
                  pl.BlockSpec((1, C), lambda n: (0, 0))],
        out_specs=pl.BlockSpec((1, 1, C), lambda n: (n, 0, 0)),
        compiler_params=pltpu.CompilerParams(
            dimension_semantics=("parallel",)),
    )(xr, sc, sh)
    return out.reshape(N, C)


# ----------------------------- NHWC glue ops -----------------------------

def _im2col(x, kh, kw, stride, pad):
    # TODO(synk): a tap-loop 3x3 conv (manual DMA / Element-offset windows) would
    # avoid materializing the 9 shifted copies; patches are still built by XLA.
    if pad:
        x = jnp.pad(x, ((0, 0), (pad, pad), (pad, pad), (0, 0)))
    _, H, W, _ = x.shape
    oh = (H - kh) // stride + 1
    ow = (W - kw) // stride + 1
    cols = [x[:, i:i + stride * oh:stride, j:j + stride * ow:stride, :]
            for i in range(kh) for j in range(kw)]
    return jnp.concatenate(cols, axis=-1), oh, ow


def conv2d_fused(x, w_oihw, stride=1, pad=0,
                 p_scale=None, p_shift=None,
                 e_scale=None, e_shift=None, epilogue="none"):
    """PyTorch-layout weights (C_out, C_in, kh, kw), no conv bias."""
    c_out, c_in, kh, kw = w_oihw.shape
    n = x.shape[0]
    if kh == 1 and kw == 1 and stride == 1 and pad == 0:
        oh, ow = x.shape[1], x.shape[2]
        a = x.reshape(n * oh * ow, c_in)
        w = w_oihw.reshape(c_out, c_in).T
    else:
        assert p_scale is None, "prologue fusion only supported for 1x1 convs"
        patches, oh, ow = _im2col(x, kh, kw, stride, pad)
        a = patches.reshape(n * oh * ow, kh * kw * c_in)
        w = jnp.transpose(w_oihw, (2, 3, 1, 0)).reshape(kh * kw * c_in, c_out)
    out = matmul_fused(a, w, p_scale=p_scale, p_shift=p_shift,
                       e_scale=e_scale, e_shift=e_shift, epilogue=epilogue)
    return out.reshape(n, oh, ow, c_out)


def max_pool_3x3_s2_p1(x):
    N, H, W, C = x.shape
    oh = (H + 2 - 3) // 2 + 1
    ow = (W + 2 - 3) // 2 + 1
    xp = jnp.pad(x, ((0, 0), (1, 1), (1, 1), (0, 0)),
                 constant_values=-jnp.inf)
    patches = [xp[:, i:i + 2 * oh:2, j:j + 2 * ow:2, :]
               for i in range(3) for j in range(3)]
    p = jnp.stack(patches, axis=0).reshape(9, N * oh * ow, C)
    return _pool(p, "max").reshape(N, oh, ow, C)


def avg_pool_2x2(x):
    N, H, W, C = x.shape
    oh, ow = H // 2, W // 2
    patches = [x[:, i:i + 2 * oh:2, j:j + 2 * ow:2, :]
               for i in range(2) for j in range(2)]
    p = jnp.stack(patches, axis=0).reshape(4, N * oh * ow, C)
    return _pool(p, "avg").reshape(N, oh, ow, C)


def _bn_scale_shift(bn, eps=1e-5):
    scale = bn["gamma"] / jnp.sqrt(bn["var"] + eps)
    shift = bn["beta"] - bn["mean"] * scale
    return scale, shift


# ----------------------------- parameters -----------------------------

def _conv_params(key, c_out, c_in, kh, kw):
    std = (2.0 / (c_in * kh * kw)) ** 0.5
    return jax.random.normal(key, (c_out, c_in, kh, kw), jnp.float32) * std


def _bn_params(key, c):
    k1, k2 = jax.random.split(key)
    return dict(gamma=1.0 + 0.01 * jax.random.normal(k1, (c,), jnp.float32),
                beta=0.01 * jax.random.normal(k2, (c,), jnp.float32),
                mean=jnp.zeros((c,), jnp.float32),
                var=jnp.ones((c,), jnp.float32))


def build_densenet121_params(key):
    growth, bn_size = 32, 4
    block_config = (6, 12, 24, 16)
    num_init = 64
    keys = iter(jax.random.split(key, 512))
    params = {"conv0": _conv_params(next(keys), num_init, 3, 7, 7),
              "norm0": _bn_params(next(keys), num_init)}
    c = num_init
    blocks = []
    for bi, n_layers in enumerate(block_config):
        layers = []
        for _ in range(n_layers):
            layers.append(dict(
                norm1=_bn_params(next(keys), c),
                conv1=_conv_params(next(keys), bn_size * growth, c, 1, 1),
                norm2=_bn_params(next(keys), bn_size * growth),
                conv2=_conv_params(next(keys), growth, bn_size * growth, 3, 3)))
            c += growth
        blocks.append(layers)
        if bi != len(block_config) - 1:
            params[f"transition{bi + 1}"] = dict(
                norm=_bn_params(next(keys), c),
                conv=_conv_params(next(keys), c // 2, c, 1, 1))
            c = c // 2
    params["blocks"] = blocks
    params["norm5"] = _bn_params(next(keys), c)   # c == 1024
    kw_, kb_ = jax.random.split(next(keys))
    params["classifier_w"] = jax.random.normal(kw_, (c, 15), jnp.float32) / (c ** 0.5)
    params["classifier_b"] = 0.01 * jax.random.normal(kb_, (15,), jnp.float32)
    return params


# ----------------------------- forward pass -----------------------------

def dense_block(x, layers, growth=32):
    """Preallocated channel slab; each layer writes its 32 channels in place."""
    N, H, W, C0 = x.shape
    c_final = C0 + growth * len(layers)
    slab = jnp.zeros((N, H, W, c_final), jnp.bfloat16)
    slab = jax.lax.dynamic_update_slice(slab, x.astype(jnp.bfloat16),
                                        (0, 0, 0, 0))
    c = C0
    for lyr in layers:
        s1, h1 = _bn_scale_shift(lyr["norm1"])
        s2, h2 = _bn_scale_shift(lyr["norm2"])
        # Zero-pad the bottleneck weight / norm1 affine to the full slab width:
        # trailing slab channels are still zero, so they contribute nothing,
        # and K stays 128-aligned (no per-layer slice/pad copies).
        pad_c = c_final - c
        w1 = jnp.pad(lyr["conv1"], ((0, 0), (0, pad_c), (0, 0), (0, 0)))
        s1 = jnp.pad(s1, (0, pad_c))
        h1 = jnp.pad(h1, (0, pad_c))
        # norm1->relu (prologue) -> conv1 1x1 -> norm2->relu (epilogue)
        y = conv2d_fused(slab, w1, p_scale=s1, p_shift=h1,
                         e_scale=s2, e_shift=h2, epilogue="bn_relu")
        # conv2 3x3 (raw output; next consumer's prologue applies its BN)
        y = conv2d_fused(y, lyr["conv2"], stride=1, pad=1)
        slab = jax.lax.dynamic_update_slice(slab, y, (0, 0, 0, c))
        c += growth
    return slab


def densenet121_forward(params, x_nchw):
    x = jnp.transpose(x_nchw, (0, 2, 3, 1)).astype(jnp.bfloat16)  # NCHW -> NHWC
    # stem: conv0 -> norm0 -> relu (fused epilogue) -> maxpool
    s0, h0 = _bn_scale_shift(params["norm0"])
    x = conv2d_fused(x, params["conv0"], stride=2, pad=3,
                     e_scale=s0, e_shift=h0, epilogue="bn_relu")
    x = max_pool_3x3_s2_p1(x)
    # dense blocks + transitions
    n_blocks = len(params["blocks"])
    for bi, layers in enumerate(params["blocks"]):
        x = dense_block(x, layers)
        if bi != n_blocks - 1:
            t = params[f"transition{bi + 1}"]
            st, ht = _bn_scale_shift(t["norm"])
            # norm -> relu (prologue) -> 1x1 conv, then 2x2 avg pool
            x = conv2d_fused(x, t["conv"], p_scale=st, p_shift=ht)
            x = avg_pool_2x2(x)
    # head: norm5 -> relu -> global avg pool (fused) -> Linear(1024,15)+Sigmoid
    s5, h5 = _bn_scale_shift(params["norm5"])
    feat = global_avg_pool_bn_relu(x, s5, h5)                    # (N, 1024)
    return matmul_fused(feat, params["classifier_w"],
                        e_shift=params["classifier_b"],
                        epilogue="bias_sigmoid", out_dtype=jnp.float32)


if __name__ == "__main__":
    key = jax.random.PRNGKey(0)
    pkey, xkey = jax.random.split(key)
    params = build_densenet121_params(pkey)
    x = jax.random.normal(xkey, (2, 3, 32, 32), jnp.float32)   # small NCHW input

    fwd = jax.jit(densenet121_forward)
    out = jax.block_until_ready(fwd(params, x))

    assert out.shape == (2, 15), out.shape
    assert bool(jnp.all(jnp.isfinite(out)))
    assert bool(jnp.all((out >= 0.0) & (out <= 1.0)))   # sigmoid range
    print("KERNEL_OK")
</pallas_src>

<mosaic_0001>
module attributes {stable_mosaic.version = 11 : i64} {
  func.func @_mm_kernel(%arg0: i32, %arg1: i32, %arg2: i32, %arg3: memref<256x256xbf16, #tpu.memory_space<vmem>>, %arg4: memref<256x128xbf16, #tpu.memory_space<vmem>>, %arg5: memref<1x256xf32, #tpu.memory_space<vmem>>, %arg6: memref<1x256xf32, #tpu.memory_space<vmem>>, %arg7: memref<1x128xf32, #tpu.memory_space<vmem>>, %arg8: memref<1x128xf32, #tpu.memory_space<vmem>>, %arg9: memref<256x128xbf16, #tpu.memory_space<vmem>>, %arg10: memref<256x128xf32, #tpu.memory_space<vmem>>) attributes {dimension_semantics = [#tpu.dimension_semantics<parallel>, #tpu.dimension_semantics<parallel>, #tpu.dimension_semantics<arbitrary>], iteration_bounds = array<i64: 2, 1, 1>, scalar_prefetch = 0 : i64, scratch_operands = 1 : i64, tpu.core_type = #tpu.core_type<tc>, window_params = [{transform_indices = @transform_0, window_bounds = array<i64: 256, 256>}, {transform_indices = @transform_1, window_bounds = array<i64: 256, 128>}, {transform_indices = @transform_2, window_bounds = array<i64: 1, 256>}, {transform_indices = @transform_3, window_bounds = array<i64: 1, 256>}, {transform_indices = @transform_4, window_bounds = array<i64: 1, 128>}, {transform_indices = @transform_5, window_bounds = array<i64: 1, 128>}, {transform_indices = @transform_6, window_bounds = array<i64: 256, 128>}]} {
    %c0_i32 = arith.constant 0 : i32
    %0 = arith.cmpi eq, %arg2, %c0_i32 : i32
    %1 = arith.extui %0 : i1 to i32
    %c0_i32_0 = arith.constant 0 : i32
    %2 = arith.cmpi ne, %1, %c0_i32_0 : i32
    scf.if %2 {
      %cst_10 = arith.constant 0.000000e+00 : f32
      %12 = vector.broadcast %cst_10 : f32 to vector<256x128xf32>
      %c0_11 = arith.constant 0 : index
      %c0_12 = arith.constant 0 : index
      %13 = vector.load %arg10[%c0_11, %c0_12] : memref<256x128xf32, #tpu.memory_space<vmem>>, vector<256x128xf32>
      tpu.vector_store %arg10[%c0_11, %c0_12], %12 {strides = array<i32>} : memref<256x128xf32, #tpu.memory_space<vmem>>, vector<256x128xf32>,
    } else {
    }
    %c0 = arith.constant 0 : index
    %c0_1 = arith.constant 0 : index
    %3 = vector.load %arg3[%c0, %c0_1] : memref<256x256xbf16, #tpu.memory_space<vmem>>, vector<256x256xbf16>
    %c0_2 = arith.constant 0 : index
    %c0_3 = arith.constant 0 : index
    %4 = vector.load %arg10[%c0_2, %c0_3] : memref<256x128xf32, #tpu.memory_space<vmem>>, vector<256x128xf32>
    %c0_4 = arith.constant 0 : index
    %c0_5 = arith.constant 0 : index
    %5 = vector.load %arg4[%c0_4, %c0_5] : memref<256x128xbf16, #tpu.memory_space<vmem>>, vector<256x128xbf16>
    %cst = arith.constant dense<0.000000e+00> : vector<256x128xf32>
    %6 = tpu.matmul %3, %5, %cst {dimension_numbers = #tpu.dot_dimension_numbers<[1], [0], [0], [1], [0, 0, 1, 1], [], []>} : vector<256x256xbf16>, vector<256x128xbf16>, vector<256x128xf32> -> vector<256x128xf32>
    %7 = arith.addf %4, %6 : vector<256x128xf32>
    %c0_6 = arith.constant 0 : index
    %c0_7 = arith.constant 0 : index
    %8 = vector.load %arg10[%c0_6, %c0_7] : memref<256x128xf32, #tpu.memory_space<vmem>>, vector<256x128xf32>
    tpu.vector_store %arg10[%c0_6, %c0_7], %7 {strides = array<i32>} : memref<256x128xf32, #tpu.memory_space<vmem>>, vector<256x128xf32>,
    %c0_i32_8 = arith.constant 0 : i32
    %9 = arith.cmpi eq, %arg2, %c0_i32_8 : i32
    %10 = arith.extui %9 : i1 to i32
    %c0_i32_9 = arith.constant 0 : i32
    %11 = arith.cmpi ne, %10, %c0_i32_9 : i32
    scf.if %11 {
      %c0_10 = arith.constant 0 : index
      %c0_11 = arith.constant 0 : index
      %12 = vector.load %arg10[%c0_10, %c0_11] : memref<256x128xf32, #tpu.memory_space<vmem>>, vector<256x128xf32>
      %c0_12 = arith.constant 0 : index
      %c0_13 = arith.constant 0 : index
      %13 = vector.load %arg7[%c0_12, %c0_13] : memref<1x128xf32, #tpu.memory_space<vmem>>, vector<1x128xf32>
      %14 = vector.broadcast %13 : vector<1x128xf32> to vector<256x128xf32>
      %15 = arith.mulf %12, %14 : vector<256x128xf32>
      %c0_14 = arith.constant 0 : index
      %c0_15 = arith.constant 0 : index
      %16 = vector.load %arg8[%c0_14, %c0_15] : memref<1x128xf32, #tpu.memory_space<vmem>>, vector<1x128xf32>
      %17 = vector.broadcast %16 : vector<1x128xf32> to vector<256x128xf32>
      %18 = arith.addf %15, %17 : vector<256x128xf32>
      %cst_16 = arith.constant 0.000000e+00 : f32
      %19 = vector.broadcast %cst_16 : f32 to vector<256x128xf32>
      %20 = arith.maximumf %18, %19 : vector<256x128xf32>
      %21 = arith.truncf %20 : vector<256x128xf32> to vector<256x128xbf16>
      %c0_17 = arith.constant 0 : index
      %c0_18 = arith.constant 0 : index
      %22 = vector.load %arg9[%c0_17, %c0_18] : memref<256x128xbf16, #tpu.memory_space<vmem>>, vector<256x128xbf16>
      tpu.vector_store %arg9[%c0_17, %c0_18], %21 {strides = array<i32>} : memref<256x128xbf16, #tpu.memory_space<vmem>>, vector<256x128xbf16>,
    } else {
    }
    return
  }
  func.func @transform_0(%arg0: i32, %arg1: i32, %arg2: i32) -> (i32, i32) {
    %c0_i32 = arith.constant 0 : i32
    return %arg0, %arg2 : i32, i32
  }
  func.func @transform_1(%arg0: i32, %arg1: i32, %arg2: i32) -> (i32, i32) {
    %c0_i32 = arith.constant 0 : i32
    return %arg2, %arg1 : i32, i32
  }
  func.func @transform_2(%arg0: i32, %arg1: i32, %arg2: i32) -> (i32, i32) {
    %c0_i32 = arith.constant 0 : i32
    %c0_i32_0 = arith.constant 0 : i32
    return %c0_i32, %arg2 : i32, i32
  }
  func.func @transform_3(%arg0: i32, %arg1: i32, %arg2: i32) -> (i32, i32) {
    %c0_i32 = arith.constant 0 : i32
    %c0_i32_0 = arith.constant 0 : i32
    return %c0_i32, %arg2 : i32, i32
  }
  func.func @transform_4(%arg0: i32, %arg1: i32, %arg2: i32) -> (i32, i32) {
    %c0_i32 = arith.constant 0 : i32
    %c0_i32_0 = arith.constant 0 : i32
    return %c0_i32, %arg1 : i32, i32
  }
  func.func @transform_5(%arg0: i32, %arg1: i32, %arg2: i32) -> (i32, i32) {
    %c0_i32 = arith.constant 0 : i32
    %c0_i32_0 = arith.constant 0 : i32
    return %c0_i32, %arg1 : i32, i32
  }
  func.func @transform_6(%arg0: i32, %arg1: i32, %arg2: i32) -> (i32, i32) {
    %c0_i32 = arith.constant 0 : i32
    return %arg0, %arg1 : i32, i32
  }
}

module attributes {stable_mosaic.version = 11 : i64} {
  func.func @_pool_kernel(%arg0: i32, %arg1: memref<9x128x64xbf16, #tpu.memory_space<vmem>>, %arg2: memref<128x64xbf16, #tpu.memory_space<vmem>>) attributes {dimension_semantics = [#tpu.dimension_semantics<parallel>], iteration_bounds = array<i64: 1>, scalar_prefetch = 0 : i64, scratch_operands = 0 : i64, tpu.core_type = #tpu.core_type<tc>, window_params = [{transform_indices = @transform_0, window_bounds = array<i64: 9, 128, 64>}, {transform_indices = @transform_1, window_bounds = array<i64: 128, 64>}]} {
    %c0 = arith.constant 0 : index
    %c0_0 = arith.constant 0 : index
    %c0_1 = arith.constant 0 : index
    %0 = vector.load %arg1[%c0, %c0_0, %c0_1] : memref<9x128x64xbf16, #tpu.memory_space<vmem>>, vector<9x128x64xbf16>
    %1 = arith.extf %0 : vector<9x128x64xbf16> to vector<9x128x64xf32>
    %cst = arith.constant dense<0xFF800000> : vector<128x64xf32>
    %2 = vector.multi_reduction <maximumf>, %1, %cst [0] : vector<9x128x64xf32> to vector<128x64xf32>
    %3 = arith.truncf %2 : vector<128x64xf32> to vector<128x64xbf16>
    %c0_2 = arith.constant 0 : index
    %c0_3 = arith.constant 0 : index
    %4 = vector.load %arg2[%c0_2, %c0_3] : memref<128x64xbf16, #tpu.memory_space<vmem>>, vector<128x64xbf16>
    tpu.vector_store %arg2[%c0_2, %c0_3], %3 {strides = array<i32>} : memref<128x64xbf16, #tpu.memory_space<vmem>>, vector<128x64xbf16>,
    return
  }
  func.func @transform_0(%arg0: i32) -> (i32, i32, i32) {
    %c0_i32 = arith.constant 0 : i32
    %c0_i32_0 = arith.constant 0 : i32
    %c0_i32_1 = arith.constant 0 : i32
    return %c0_i32, %arg0, %c0_i32_0 : i32, i32, i32
  }
  func.func @transform_1(%arg0: i32) -> (i32, i32) {
    %c0_i32 = arith.constant 0 : i32
    %c0_i32_0 = arith.constant 0 : i32
    return %arg0, %c0_i32 : i32, i32
  }
}

module attributes {stable_mosaic.version = 11 : i64} {
  func.func @_mm_kernel(%arg0: i32, %arg1: i32, %arg2: i32, %arg3: memref<128x256xbf16, #tpu.memory_space<vmem>>, %arg4: memref<256x128xbf16, #tpu.memory_space<vmem>>, %arg5: memref<1x256xf32, #tpu.memory_space<vmem>>, %arg6: memref<1x256xf32, #tpu.memory_space<vmem>>, %arg7: memref<1x128xf32, #tpu.memory_space<vmem>>, %arg8: memref<1x128xf32, #tpu.memory_space<vmem>>, %arg9: memref<128x128xbf16, #tpu.memory_space<vmem>>, %arg10: memref<128x128xf32, #tpu.memory_space<vmem>>) attributes {dimension_semantics = [#tpu.dimension_semantics<parallel>, #tpu.dimension_semantics<parallel>, #tpu.dimension_semantics<arbitrary>], iteration_bounds = array<i64: 1, 1, 1>, scalar_prefetch = 0 : i64, scratch_operands = 1 : i64, tpu.core_type = #tpu.core_type<tc>, window_params = [{transform_indices = @transform_0, window_bounds = array<i64: 128, 256>}, {transform_indices = @transform_1, window_bounds = array<i64: 256, 128>}, {transform_indices = @transform_2, window_bounds = array<i64: 1, 256>}, {transform_indices = @transform_3, window_bounds = array<i64: 1, 256>}, {transform_indices = @transform_4, window_bounds = array<i64: 1, 128>}, {transform_indices = @transform_5, window_bounds = array<i64: 1, 128>}, {transform_indices = @transform_6, window_bounds = array<i64: 128, 128>}]} {
    %c0_i32 = arith.constant 0 : i32
    %0 = arith.cmpi eq, %arg2, %c0_i32 : i32
    %1 = arith.extui %0 : i1 to i32
    %c0_i32_0 = arith.constant 0 : i32
    %2 = arith.cmpi ne, %1, %c0_i32_0 : i32
    scf.if %2 {
      %cst_15 = arith.constant 0.000000e+00 : f32
      %22 = vector.broadcast %cst_15 : f32 to vector<128x128xf32>
      %c0_16 = arith.constant 0 : index
      %c0_17 = arith.constant 0 : index
      %23 = vector.load %arg10[%c0_16, %c0_17] : memref<128x128xf32, #tpu.memory_space<vmem>>, vector<128x128xf32>
      tpu.vector_store %arg10[%c0_16, %c0_17], %22 {strides = array<i32>} : memref<128x128xf32, #tpu.memory_space<vmem>>, vector<128x128xf32>,
    } else {
    }
    %c0 = arith.constant 0 : index
    %c0_1 = arith.constant 0 : index
    %3 = vector.load %arg3[%c0, %c0_1] : memref<128x256xbf16, #tpu.memory_space<vmem>>, vector<128x256xbf16>
    %4 = arith.extf %3 : vector<128x256xbf16> to vector<128x256xf32>
    %c0_2 = arith.constant 0 : index
    %c0_3 = arith.constant 0 : index
    %5 = vector.load %arg5[%c0_2, %c0_3] : memref<1x256xf32, #tpu.memory_space<vmem>>, vector<1x256xf32>
    %6 = vector.broadcast %5 : vector<1x256xf32> to vector<128x256xf32>
    %7 = arith.mulf %4, %6 : vector<128x256xf32>
    %c0_4 = arith.constant 0 : index
    %c0_5 = arith.constant 0 : index
    %8 = vector.load %arg6[%c0_4, %c0_5] : memref<1x256xf32, #tpu.memory_space<vmem>>, vector<1x256xf32>
    %9 = vector.broadcast %8 : vector<1x256xf32> to vector<128x256xf32>
    %10 = arith.addf %7, %9 : vector<128x256xf32>
    %cst = arith.constant 0.000000e+00 : f32
    %11 = vector.broadcast %cst : f32 to vector<128x256xf32>
    %12 = arith.maximumf %10, %11 : vector<128x256xf32>
    %13 = arith.truncf %12 : vector<128x256xf32> to vector<128x256xbf16>
    %c0_6 = arith.constant 0 : index
    %c0_7 = arith.constant 0 : index
    %14 = vector.load %arg10[%c0_6, %c0_7] : memref<128x128xf32, #tpu.memory_space<vmem>>, vector<128x128xf32>
    %c0_8 = arith.constant 0 : index
    %c0_9 = arith.constant 0 : index
    %15 = vector.load %arg4[%c0_8, %c0_9] : memref<256x128xbf16, #tpu.memory_space<vmem>>, vector<256x128xbf16>
    %cst_10 = arith.constant dense<0.000000e+00> : vector<128x128xf32>
    %16 = tpu.matmul %13, %15, %cst_10 {dimension_numbers = #tpu.dot_dimension_numbers<[1], [0], [0], [1], [0, 0, 1, 1], [], []>} : vector<128x256xbf16>, vector<256x128xbf16>, vector<128x128xf32> -> vector<128x128xf32>
    %17 = arith.addf %14, %16 : vector<128x128xf32>
    %c0_11 = arith.constant 0 : index
    %c0_12 = arith.constant 0 : index
    %18 = vector.load %arg10[%c0_11, %c0_12] : memref<128x128xf32, #tpu.memory_space<vmem>>, vector<128x128xf32>
    tpu.vector_store %arg10[%c0_11, %c0_12], %17 {strides = array<i32>} : memref<128x128xf32, #tpu.memory_space<vmem>>, vector<128x128xf32>,
    %c0_i32_13 = arith.constant 0 : i32
    %19 = arith.cmpi eq, %arg2, %c0_i32_13 : i32
    %20 = arith.extui %19 : i1 to i32
    %c0_i32_14 = arith.constant 0 : i32
    %21 = arith.cmpi ne, %20, %c0_i32_14 : i32
    scf.if %21 {
      %c0_15 = arith.constant 0 : index
      %c0_16 = arith.constant 0 : index
      %22 = vector.load %arg10[%c0_15, %c0_16] : memref<128x128xf32, #tpu.memory_space<vmem>>, vector<128x128xf32>
      %c0_17 = arith.constant 0 : index
      %c0_18 = arith.constant 0 : index
      %23 = vector.load %arg7[%c0_17, %c0_18] : memref<1x128xf32, #tpu.memory_space<vmem>>, vector<1x128xf32>
      %24 = vector.broadcast %23 : vector<1x128xf32> to vector<128x128xf32>
      %25 = arith.mulf %22, %24 : vector<128x128xf32>
      %c0_19 = arith.constant 0 : index
      %c0_20 = arith.constant 0 : index
      %26 = vector.load %arg8[%c0_19, %c0_20] : memref<1x128xf32, #tpu.memory_space<vmem>>, vector<1x128xf32>
      %27 = vector.broadcast %26 : vector<1x128xf32> to vector<128x128xf32>
      %28 = arith.addf %25, %27 : vector<128x128xf32>
      %cst_21 = arith.constant 0.000000e+00 : f32
      %29 = vector.broadcast %cst_21 : f32 to vector<128x128xf32>
      %30 = arith.maximumf %28, %29 : vector<128x128xf32>
      %31 = arith.truncf %30 : vector<128x128xf32> to vector<128x128xbf16>
      %c0_22 = arith.constant 0 : index
      %c0_23 = arith.constant 0 : index
      %32 = vector.load %arg9[%c0_22, %c0_23] : memref<128x128xbf16, #tpu.memory_space<vmem>>, vector<128x128xbf16>
      tpu.vector_store %arg9[%c0_22, %c0_23], %31 {strides = array<i32>} : memref<128x128xbf16, #tpu.memory_space<vmem>>, vector<128x128xbf16>,
    } else {
    }
    return
  }
  func.func @transform_0(%arg0: i32, %arg1: i32, %arg2: i32) -> (i32, i32) {
    %c0_i32 = arith.constant 0 : i32
    return %arg0, %arg2 : i32, i32
  }
  func.func @transform_1(%arg0: i32, %arg1: i32, %arg2: i32) -> (i32, i32) {
    %c0_i32 = arith.constant 0 : i32
    return %arg2, %arg1 : i32, i32
  }
  func.func @transform_2(%arg0: i32, %arg1: i32, %arg2: i32) -> (i32, i32) {
    %c0_i32 = arith.constant 0 : i32
    %c0_i32_0 = arith.constant 0 : i32
    return %c0_i32, %arg2 : i32, i32
  }
  func.func @transform_3(%arg0: i32, %arg1: i32, %arg2: i32) -> (i32, i32) {
    %c0_i32 = arith.constant 0 : i32
    %c0_i32_0 = arith.constant 0 : i32
    return %c0_i32, %arg2 : i32, i32
  }
  func.func @transform_4(%arg0: i32, %arg1: i32, %arg2: i32) -> (i32, i32) {
    %c0_i32 = arith.constant 0 : i32
    %c0_i32_0 = arith.constant 0 : i32
    return %c0_i32, %arg1 : i32, i32
  }
  func.func @transform_5(%arg0: i32, %arg1: i32, %arg2: i32) -> (i32, i32) {
    %c0_i32 = arith.constant 0 : i32
    %c0_i32_0 = arith.constant 0 : i32
    return %c0_i32, %arg1 : i32, i32
  }
  func.func @transform_6(%arg0: i32, %arg1: i32, %arg2: i32) -> (i32, i32) {
    %c0_i32 = arith.constant 0 : i32
    return %arg0, %arg1 : i32, i32
  }
}

module attributes {stable_mosaic.version = 11 : i64} {
  func.func @_mm_kernel(%arg0: i32, %arg1: i32, %arg2: i32, %arg3: memref<128x384xbf16, #tpu.memory_space<vmem>>, %arg4: memref<384x128xbf16, #tpu.memory_space<vmem>>, %arg5: memref<1x384xf32, #tpu.memory_space<vmem>>, %arg6: memref<1x384xf32, #tpu.memory_space<vmem>>, %arg7: memref<1x128xf32, #tpu.memory_space<vmem>>, %arg8: memref<1x128xf32, #tpu.memory_space<vmem>>, %arg9: memref<128x128xbf16, #tpu.memory_space<vmem>>, %arg10: memref<128x128xf32, #tpu.memory_space<vmem>>) attributes {dimension_semantics = [#tpu.dimension_semantics<parallel>, #tpu.dimension_semantics<parallel>, #tpu.dimension_semantics<arbitrary>], iteration_bounds = array<i64: 1, 1, 3>, scalar_prefetch = 0 : i64, scratch_operands = 1 : i64, tpu.core_type = #tpu.core_type<tc>, window_params = [{transform_indices = @transform_0, window_bounds = array<i64: 128, 384>}, {transform_indices = @transform_1, window_bounds = array<i64: 384, 128>}, {transform_indices = @transform_2, window_bounds = array<i64: 1, 384>}, {transform_indices = @transform_3, window_bounds = array<i64: 1, 384>}, {transform_indices = @transform_4, window_bounds = array<i64: 1, 128>}, {transform_indices = @transform_5, window_bounds = array<i64: 1, 128>}, {transform_indices = @transform_6, window_bounds = array<i64: 128, 128>}]} {
    %c0_i32 = arith.constant 0 : i32
    %0 = arith.cmpi eq, %arg2, %c0_i32 : i32
    %1 = arith.extui %0 : i1 to i32
    %c0_i32_0 = arith.constant 0 : i32
    %2 = arith.cmpi ne, %1, %c0_i32_0 : i32
    scf.if %2 {
      %cst_9 = arith.constant 0.000000e+00 : f32
      %12 = vector.broadcast %cst_9 : f32 to vector<128x128xf32>
      %c0_10 = arith.constant 0 : index
      %c0_11 = arith.constant 0 : index
      %13 = vector.load %arg10[%c0_10, %c0_11] : memref<128x128xf32, #tpu.memory_space<vmem>>, vector<128x128xf32>
      tpu.vector_store %arg10[%c0_10, %c0_11], %12 {strides = array<i32>} : memref<128x128xf32, #tpu.memory_space<vmem>>, vector<128x128xf32>,
    } else {
    }
    %c0 = arith.constant 0 : index
    %c0_1 = arith.constant 0 : index
    %3 = vector.load %arg3[%c0, %c0_1] : memref<128x384xbf16, #tpu.memory_space<vmem>>, vector<128x384xbf16>
    %c0_2 = arith.constant 0 : index
    %c0_3 = arith.constant 0 : index
    %4 = vector.load %arg10[%c0_2, %c0_3] : memref<128x128xf32, #tpu.memory_space<vmem>>, vector<128x128xf32>
    %c0_4 = arith.constant 0 : index
    %c0_5 = arith.constant 0 : index
    %5 = vector.load %arg4[%c0_4, %c0_5] : memref<384x128xbf16, #tpu.memory_space<vmem>>, vector<384x128xbf16>
    %cst = arith.constant dense<0.000000e+00> : vector<128x128xf32>
    %6 = tpu.matmul %3, %5, %cst {dimension_numbers = #tpu.dot_dimension_numbers<[1], [0], [0], [1], [0, 0, 1, 1], [], []>} : vector<128x384xbf16>, vector<384x128xbf16>, vector<128x128xf32> -> vector<128x128xf32>
    %7 = arith.addf %4, %6 : vector<128x128xf32>
    %c0_6 = arith.constant 0 : index
    %c0_7 = arith.constant 0 : index
    %8 = vector.load %arg10[%c0_6, %c0_7] : memref<128x128xf32, #tpu.memory_space<vmem>>, vector<128x128xf32>
    tpu.vector_store %arg10[%c0_6, %c0_7], %7 {strides = array<i32>} : memref<128x128xf32, #tpu.memory_space<vmem>>, vector<128x128xf32>,
    %c2_i32 = arith.constant 2 : i32
    %9 = arith.cmpi eq, %arg2, %c2_i32 : i32
    %10 = arith.extui %9 : i1 to i32
    %c0_i32_8 = arith.constant 0 : i32
    %11 = arith.cmpi ne, %10, %c0_i32_8 : i32
    scf.if %11 {
      %c0_9 = arith.constant 0 : index
      %c0_10 = arith.constant 0 : index
      %12 = vector.load %arg10[%c0_9, %c0_10] : memref<128x128xf32, #tpu.memory_space<vmem>>, vector<128x128xf32>
      %13 = arith.truncf %12 : vector<128x128xf32> to vector<128x128xbf16>
      %c0_11 = arith.constant 0 : index
      %c0_12 = arith.constant 0 : index
      %14 = vector.load %arg9[%c0_11, %c0_12] : memref<128x128xbf16, #tpu.memory_space<vmem>>, vector<128x128xbf16>
      tpu.vector_store %arg9[%c0_11, %c0_12], %13 {strides = array<i32>} : memref<128x128xbf16, #tpu.memory_space<vmem>>, vector<128x128xbf16>,
    } else {
    }
    return
  }
  func.func @transform_0(%arg0: i32, %arg1: i32, %arg2: i32) -> (i32, i32) {
    %c0_i32 = arith.constant 0 : i32
    return %arg0, %arg2 : i32, i32
  }
  func.func @transform_1(%arg0: i32, %arg1: i32, %arg2: i32) -> (i32, i32) {
    %c0_i32 = arith.constant 0 : i32
    return %arg2, %arg1 : i32, i32
  }
  func.func @transform_2(%arg0: i32, %arg1: i32, %arg2: i32) -> (i32, i32) {
    %c0_i32 = arith.constant 0 : i32
    %c0_i32_0 = arith.constant 0 : i32
    return %c0_i32, %arg2 : i32, i32
  }
  func.func @transform_3(%arg0: i32, %arg1: i32, %arg2: i32) -> (i32, i32) {
    %c0_i32 = arith.constant 0 : i32
    %c0_i32_0 = arith.constant 0 : i32
    return %c0_i32, %arg2 : i32, i32
  }
  func.func @transform_4(%arg0: i32, %arg1: i32, %arg2: i32) -> (i32, i32) {
    %c0_i32 = arith.constant 0 : i32
    %c0_i32_0 = arith.constant 0 : i32
    return %c0_i32, %arg1 : i32, i32
  }
  func.func @transform_5(%arg0: i32, %arg1: i32, %arg2: i32) -> (i32, i32) {
    %c0_i32 = arith.constant 0 : i32
    %c0_i32_0 = arith.constant 0 : i32
    return %c0_i32, %arg1 : i32, i32
  }
  func.func @transform_6(%arg0: i32, %arg1: i32, %arg2: i32) -> (i32, i32) {
    %c0_i32 = arith.constant 0 : i32
    return %arg0, %arg1 : i32, i32
  }
}

module attributes {stable_mosaic.version = 11 : i64} {
  func.func @_mm_kernel(%arg0: i32, %arg1: i32, %arg2: i32, %arg3: memref<128x256xbf16, #tpu.memory_space<vmem>>, %arg4: memref<256x128xbf16, #tpu.memory_space<vmem>>, %arg5: memref<1x256xf32, #tpu.memory_space<vmem>>, %arg6: memref<1x256xf32, #tpu.memory_space<vmem>>, %arg7: memref<1x128xf32, #tpu.memory_space<vmem>>, %arg8: memref<1x128xf32, #tpu.memory_space<vmem>>, %arg9: memref<128x128xbf16, #tpu.memory_space<vmem>>, %arg10: memref<128x128xf32, #tpu.memory_space<vmem>>) attributes {dimension_semantics = [#tpu.dimension_semantics<parallel>, #tpu.dimension_semantics<parallel>, #tpu.dimension_semantics<arbitrary>], iteration_bounds = array<i64: 1, 1, 1>, scalar_prefetch = 0 : i64, scratch_operands = 1 : i64, tpu.core_type = #tpu.core_type<tc>, window_params = [{transform_indices = @transform_0, window_bounds = array<i64: 128, 256>}, {transform_indices = @transform_1, window_bounds = array<i64: 256, 128>}, {transform_indices = @transform_2, window_bounds = array<i64: 1, 256>}, {transform_indices = @transform_3, window_bounds = array<i64: 1, 256>}, {transform_indices = @transform_4, window_bounds = array<i64: 1, 128>}, {transform_indices = @transform_5, window_bounds = array<i64: 1, 128>}, {transform_indices = @transform_6, window_bounds = array<i64: 128, 128>}]} {
    %c0_i32 = arith.constant 0 : i32
    %0 = arith.cmpi eq, %arg2, %c0_i32 : i32
    %1 = arith.extui %0 : i1 to i32
    %c0_i32_0 = arith.constant 0 : i32
    %2 = arith.cmpi ne, %1, %c0_i32_0 : i32
    scf.if %2 {
      %cst_15 = arith.constant 0.000000e+00 : f32
      %22 = vector.broadcast %cst_15 : f32 to vector<128x128xf32>
      %c0_16 = arith.constant 0 : index
      %c0_17 = arith.constant 0 : index
      %23 = vector.load %arg10[%c0_16, %c0_17] : memref<128x128xf32, #tpu.memory_space<vmem>>, vector<128x128xf32>
      tpu.vector_store %arg10[%c0_16, %c0_17], %22 {strides = array<i32>} : memref<128x128xf32, #tpu.memory_space<vmem>>, vector<128x128xf32>,
    } else {
    }
    %c0 = arith.constant 0 : index
    %c0_1 = arith.constant 0 : index
    %3 = vector.load %arg3[%c0, %c0_1] : memref<128x256xbf16, #tpu.memory_space<vmem>>, vector<128x256xbf16>
    %4 = arith.extf %3 : vector<128x256xbf16> to vector<128x256xf32>
    %c0_2 = arith.constant 0 : index
    %c0_3 = arith.constant 0 : index
    %5 = vector.load %arg5[%c0_2, %c0_3] : memref<1x256xf32, #tpu.memory_space<vmem>>, vector<1x256xf32>
    %6 = vector.broadcast %5 : vector<1x256xf32> to vector<128x256xf32>
    %7 = arith.mulf %4, %6 : vector<128x256xf32>
    %c0_4 = arith.constant 0 : index
    %c0_5 = arith.constant 0 : index
    %8 = vector.load %arg6[%c0_4, %c0_5] : memref<1x256xf32, #tpu.memory_space<vmem>>, vector<1x256xf32>
    %9 = vector.broadcast %8 : vector<1x256xf32> to vector<128x256xf32>
    %10 = arith.addf %7, %9 : vector<128x256xf32>
    %cst = arith.constant 0.000000e+00 : f32
    %11 = vector.broadcast %cst : f32 to vector<128x256xf32>
    %12 = arith.maximumf %10, %11 : vector<128x256xf32>
    %13 = arith.truncf %12 : vector<128x256xf32> to vector<128x256xbf16>
    %c0_6 = arith.constant 0 : index
    %c0_7 = arith.constant 0 : index
    %14 = vector.load %arg10[%c0_6, %c0_7] : memref<128x128xf32, #tpu.memory_space<vmem>>, vector<128x128xf32>
    %c0_8 = arith.constant 0 : index
    %c0_9 = arith.constant 0 : index
    %15 = vector.load %arg4[%c0_8, %c0_9] : memref<256x128xbf16, #tpu.memory_space<vmem>>, vector<256x128xbf16>
    %cst_10 = arith.constant dense<0.000000e+00> : vector<128x128xf32>
    %16 = tpu.matmul %13, %15, %cst_10 {dimension_numbers = #tpu.dot_dimension_numbers<[1], [0], [0], [1], [0, 0, 1, 1], [], []>} : vector<128x256xbf16>, vector<256x128xbf16>, vector<128x128xf32> -> vector<128x128xf32>
    %17 = arith.addf %14, %16 : vector<128x128xf32>
    %c0_11 = arith.constant 0 : index
    %c0_12 = arith.constant 0 : index
    %18 = vector.load %arg10[%c0_11, %c0_12] : memref<128x128xf32, #tpu.memory_space<vmem>>, vector<128x128xf32>
    tpu.vector_store %arg10[%c0_11, %c0_12], %17 {strides = array<i32>} : memref<128x128xf32, #tpu.memory_space<vmem>>, vector<128x128xf32>,
    %c0_i32_13 = arith.constant 0 : i32
    %19 = arith.cmpi eq, %arg2, %c0_i32_13 : i32
    %20 = arith.extui %19 : i1 to i32
    %c0_i32_14 = arith.constant 0 : i32
    %21 = arith.cmpi ne, %20, %c0_i32_14 : i32
    scf.if %21 {
      %c0_15 = arith.constant 0 : index
      %c0_16 = arith.constant 0 : index
      %22 = vector.load %arg10[%c0_15, %c0_16] : memref<128x128xf32, #tpu.memory_space<vmem>>, vector<128x128xf32>
      %23 = arith.truncf %22 : vector<128x128xf32> to vector<128x128xbf16>
      %c0_17 = arith.constant 0 : index
      %c0_18 = arith.constant 0 : index
      %24 = vector.load %arg9[%c0_17, %c0_18] : memref<128x128xbf16, #tpu.memory_space<vmem>>, vector<128x128xbf16>
      tpu.vector_store %arg9[%c0_17, %c0_18], %23 {strides = array<i32>} : memref<128x128xbf16, #tpu.memory_space<vmem>>, vector<128x128xbf16>,
    } else {
    }
    return
  }
  func.func @transform_0(%arg0: i32, %arg1: i32, %arg2: i32) -> (i32, i32) {
    %c0_i32 = arith.constant 0 : i32
    return %arg0, %arg2 : i32, i32
  }
  func.func @transform_1(%arg0: i32, %arg1: i32, %arg2: i32) -> (i32, i32) {
    %c0_i32 = arith.constant 0 : i32
    return %arg2, %arg1 : i32, i32
  }
  func.func @transform_2(%arg0: i32, %arg1: i32, %arg2: i32) -> (i32, i32) {
    %c0_i32 = arith.constant 0 : i32
    %c0_i32_0 = arith.constant 0 : i32
    return %c0_i32, %arg2 : i32, i32
  }
  func.func @transform_3(%arg0: i32, %arg1: i32, %arg2: i32) -> (i32, i32) {
    %c0_i32 = arith.constant 0 : i32
    %c0_i32_0 = arith.constant 0 : i32
    return %c0_i32, %arg2 : i32, i32
  }
  func.func @transform_4(%arg0: i32, %arg1: i32, %arg2: i32) -> (i32, i32) {
    %c0_i32 = arith.constant 0 : i32
    %c0_i32_0 = arith.constant 0 : i32
    return %c0_i32, %arg1 : i32, i32
  }
  func.func @transform_5(%arg0: i32, %arg1: i32, %arg2: i32) -> (i32, i32) {
    %c0_i32 = arith.constant 0 : i32
    %c0_i32_0 = arith.constant 0 : i32
    return %c0_i32, %arg1 : i32, i32
  }
  func.func @transform_6(%arg0: i32, %arg1: i32, %arg2: i32) -> (i32, i32) {
    %c0_i32 = arith.constant 0 : i32
    return %arg0, %arg1 : i32, i32
  }
}

module attributes {stable_mosaic.version = 11 : i64} {
  func.func @_pool_kernel(%arg0: i32, %arg1: memref<4x32x128xbf16, #tpu.memory_space<vmem>>, %arg2: memref<32x128xbf16, #tpu.memory_space<vmem>>) attributes {dimension_semantics = [#tpu.dimension_semantics<parallel>], iteration_bounds = array<i64: 1>, scalar_prefetch = 0 : i64, scratch_operands = 0 : i64, tpu.core_type = #tpu.core_type<tc>, window_params = [{transform_indices = @transform_0, window_bounds = array<i64: 4, 32, 128>}, {transform_indices = @transform_1, window_bounds = array<i64: 32, 128>}]} {
    %c0 = arith.constant 0 : index
    %c0_0 = arith.constant 0 : index
    %c0_1 = arith.constant 0 : index
    %0 = vector.load %arg1[%c0, %c0_0, %c0_1] : memref<4x32x128xbf16, #tpu.memory_space<vmem>>, vector<4x32x128xbf16>
    %1 = arith.extf %0 : vector<4x32x128xbf16> to vector<4x32x128xf32>
    %cst = arith.constant dense<0.000000e+00> : vector<32x128xf32>
    %2 = vector.multi_reduction <add>, %1, %cst [0] : vector<4x32x128xf32> to vector<32x128xf32>
    %cst_2 = arith.constant 2.500000e-01 : f32
    %3 = vector.broadcast %cst_2 : f32 to vector<32x128xf32>
    %4 = arith.mulf %2, %3 : vector<32x128xf32>
    %5 = arith.truncf %4 : vector<32x128xf32> to vector<32x128xbf16>
    %c0_3 = arith.constant 0 : index
    %c0_4 = arith.constant 0 : index
    %6 = vector.load %arg2[%c0_3, %c0_4] : memref<32x128xbf16, #tpu.memory_space<vmem>>, vector<32x128xbf16>
    tpu.vector_store %arg2[%c0_3, %c0_4], %5 {strides = array<i32>} : memref<32x128xbf16, #tpu.memory_space<vmem>>, vector<32x128xbf16>,
    return
  }
  func.func @transform_0(%arg0: i32) -> (i32, i32, i32) {
    %c0_i32 = arith.constant 0 : i32
    %c0_i32_0 = arith.constant 0 : i32
    %c0_i32_1 = arith.constant 0 : i32
    return %c0_i32, %arg0, %c0_i32_0 : i32, i32, i32
  }
  func.func @transform_1(%arg0: i32) -> (i32, i32) {
    %c0_i32 = arith.constant 0 : i32
    %c0_i32_0 = arith.constant 0 : i32
    return %arg0, %c0_i32 : i32, i32
  }
}

module attributes {stable_mosaic.version = 11 : i64} {
  func.func @_mm_kernel(%arg0: i32, %arg1: i32, %arg2: i32, %arg3: memref<32x512xbf16, #tpu.memory_space<vmem>>, %arg4: memref<512x128xbf16, #tpu.memory_space<vmem>>, %arg5: memref<1x512xf32, #tpu.memory_space<vmem>>, %arg6: memref<1x512xf32, #tpu.memory_space<vmem>>, %arg7: memref<1x128xf32, #tpu.memory_space<vmem>>, %arg8: memref<1x128xf32, #tpu.memory_space<vmem>>, %arg9: memref<32x128xbf16, #tpu.memory_space<vmem>>, %arg10: memref<32x128xf32, #tpu.memory_space<vmem>>) attributes {dimension_semantics = [#tpu.dimension_semantics<parallel>, #tpu.dimension_semantics<parallel>, #tpu.dimension_semantics<arbitrary>], iteration_bounds = array<i64: 1, 1, 1>, scalar_prefetch = 0 : i64, scratch_operands = 1 : i64, tpu.core_type = #tpu.core_type<tc>, window_params = [{transform_indices = @transform_0, window_bounds = array<i64: 32, 512>}, {transform_indices = @transform_1, window_bounds = array<i64: 512, 128>}, {transform_indices = @transform_2, window_bounds = array<i64: 1, 512>}, {transform_indices = @transform_3, window_bounds = array<i64: 1, 512>}, {transform_indices = @transform_4, window_bounds = array<i64: 1, 128>}, {transform_indices = @transform_5, window_bounds = array<i64: 1, 128>}, {transform_indices = @transform_6, window_bounds = array<i64: 32, 128>}]} {
    %c0_i32 = arith.constant 0 : i32
    %0 = arith.cmpi eq, %arg2, %c0_i32 : i32
    %1 = arith.extui %0 : i1 to i32
    %c0_i32_0 = arith.constant 0 : i32
    %2 = arith.cmpi ne, %1, %c0_i32_0 : i32
    scf.if %2 {
      %cst_15 = arith.constant 0.000000e+00 : f32
      %22 = vector.broadcast %cst_15 : f32 to vector<32x128xf32>
      %c0_16 = arith.constant 0 : index
      %c0_17 = arith.constant 0 : index
      %23 = vector.load %arg10[%c0_16, %c0_17] : memref<32x128xf32, #tpu.memory_space<vmem>>, vector<32x128xf32>
      tpu.vector_store %arg10[%c0_16, %c0_17], %22 {strides = array<i32>} : memref<32x128xf32, #tpu.memory_space<vmem>>, vector<32x128xf32>,
    } else {
    }
    %c0 = arith.constant 0 : index
    %c0_1 = arith.constant 0 : index
    %3 = vector.load %arg3[%c0, %c0_1] : memref<32x512xbf16, #tpu.memory_space<vmem>>, vector<32x512xbf16>
    %4 = arith.extf %3 : vector<32x512xbf16> to vector<32x512xf32>
    %c0_2 = arith.constant 0 : index
    %c0_3 = arith.constant 0 : index
    %5 = vector.load %arg5[%c0_2, %c0_3] : memref<1x512xf32, #tpu.memory_space<vmem>>, vector<1x512xf32>
    %6 = vector.broadcast %5 : vector<1x512xf32> to vector<32x512xf32>
    %7 = arith.mulf %4, %6 : vector<32x512xf32>
    %c0_4 = arith.constant 0 : index
    %c0_5 = arith.constant 0 : index
    %8 = vector.load %arg6[%c0_4, %c0_5] : memref<1x512xf32, #tpu.memory_space<vmem>>, vector<1x512xf32>
    %9 = vector.broadcast %8 : vector<1x512xf32> to vector<32x512xf32>
    %10 = arith.addf %7, %9 : vector<32x512xf32>
    %cst = arith.constant 0.000000e+00 : f32
    %11 = vector.broadcast %cst : f32 to vector<32x512xf32>
    %12 = arith.maximumf %10, %11 : vector<32x512xf32>
    %13 = arith.truncf %12 : vector<32x512xf32> to vector<32x512xbf16>
    %c0_6 = arith.constant 0 : index
    %c0_7 = arith.constant 0 : index
    %14 = vector.load %arg10[%c0_6, %c0_7] : memref<32x128xf32, #tpu.memory_space<vmem>>, vector<32x128xf32>
    %c0_8 = arith.constant 0 : index
    %c0_9 = arith.constant 0 : index
    %15 = vector.load %arg4[%c0_8, %c0_9] : memref<512x128xbf16, #tpu.memory_space<vmem>>, vector<512x128xbf16>
    %cst_10 = arith.constant dense<0.000000e+00> : vector<32x128xf32>
    %16 = tpu.matmul %13, %15, %cst_10 {dimension_numbers = #tpu.dot_dimension_numbers<[1], [0], [0], [1], [0, 0, 1, 1], [], []>} : vector<32x512xbf16>, vector<512x128xbf16>, vector<32x128xf32> -> vector<32x128xf32>
    %17 = arith.addf %14, %16 : vector<32x128xf32>
    %c0_11 = arith.constant 0 : index
    %c0_12 = arith.constant 0 : index
    %18 = vector.load %arg10[%c0_11, %c0_12] : memref<32x128xf32, #tpu.memory_space<vmem>>, vector<32x128xf32>
    tpu.vector_store %arg10[%c0_11, %c0_12], %17 {strides = array<i32>} : memref<32x128xf32, #tpu.memory_space<vmem>>, vector<32x128xf32>,
    %c0_i32_13 = arith.constant 0 : i32
    %19 = arith.cmpi eq, %arg2, %c0_i32_13 : i32
    %20 = arith.extui %19 : i1 to i32
    %c0_i32_14 = arith.constant 0 : i32
    %21 = arith.cmpi ne, %20, %c0_i32_14 : i32
    scf.if %21 {
      %c0_15 = arith.constant 0 : index
      %c0_16 = arith.constant 0 : index
      %22 = vector.load %arg10[%c0_15, %c0_16] : memref<32x128xf32, #tpu.memory_space<vmem>>, vector<32x128xf32>
      %c0_17 = arith.constant 0 : index
      %c0_18 = arith.constant 0 : index
      %23 = vector.load %arg7[%c0_17, %c0_18] : memref<1x128xf32, #tpu.memory_space<vmem>>, vector<1x128xf32>
      %24 = vector.broadcast %23 : vector<1x128xf32> to vector<32x128xf32>
      %25 = arith.mulf %22, %24 : vector<32x128xf32>
      %c0_19 = arith.constant 0 : index
      %c0_20 = arith.constant 0 : index
      %26 = vector.load %arg8[%c0_19, %c0_20] : memref<1x128xf32, #tpu.memory_space<vmem>>, vector<1x128xf32>
      %27 = vector.broadcast %26 : vector<1x128xf32> to vector<32x128xf32>
      %28 = arith.addf %25, %27 : vector<32x128xf32>
      %cst_21 = arith.constant 0.000000e+00 : f32
      %29 = vector.broadcast %cst_21 : f32 to vector<32x128xf32>
      %30 = arith.maximumf %28, %29 : vector<32x128xf32>
      %31 = arith.truncf %30 : vector<32x128xf32> to vector<32x128xbf16>
      %c0_22 = arith.constant 0 : index
      %c0_23 = arith.constant 0 : index
      %32 = vector.load %arg9[%c0_22, %c0_23] : memref<32x128xbf16, #tpu.memory_space<vmem>>, vector<32x128xbf16>
      tpu.vector_store %arg9[%c0_22, %c0_23], %31 {strides = array<i32>} : memref<32x128xbf16, #tpu.memory_space<vmem>>, vector<32x128xbf16>,
    } else {
    }
    return
  }
  func.func @transform_0(%arg0: i32, %arg1: i32, %arg2: i32) -> (i32, i32) {
    %c0_i32 = arith.constant 0 : i32
    return %arg0, %arg2 : i32, i32
  }
  func.func @transform_1(%arg0: i32, %arg1: i32, %arg2: i32) -> (i32, i32) {
    %c0_i32 = arith.constant 0 : i32
    return %arg2, %arg1 : i32, i32
  }
  func.func @transform_2(%arg0: i32, %arg1: i32, %arg2: i32) -> (i32, i32) {
    %c0_i32 = arith.constant 0 : i32
    %c0_i32_0 = arith.constant 0 : i32
    return %c0_i32, %arg2 : i32, i32
  }
  func.func @transform_3(%arg0: i32, %arg1: i32, %arg2: i32) -> (i32, i32) {
    %c0_i32 = arith.constant 0 : i32
    %c0_i32_0 = arith.constant 0 : i32
    return %c0_i32, %arg2 : i32, i32
  }
  func.func @transform_4(%arg0: i32, %arg1: i32, %arg2: i32) -> (i32, i32) {
    %c0_i32 = arith.constant 0 : i32
    %c0_i32_0 = arith.constant 0 : i32
    return %c0_i32, %arg1 : i32, i32
  }
  func.func @transform_5(%arg0: i32, %arg1: i32, %arg2: i32) -> (i32, i32) {
    %c0_i32 = arith.constant 0 : i32
    %c0_i32_0 = arith.constant 0 : i32
    return %c0_i32, %arg1 : i32, i32
  }
  func.func @transform_6(%arg0: i32, %arg1: i32, %arg2: i32) -> (i32, i32) {
    %c0_i32 = arith.constant 0 : i32
    return %arg0, %arg1 : i32, i32
  }
}

module attributes {stable_mosaic.version = 11 : i64} {
  func.func @_mm_kernel(%arg0: i32, %arg1: i32, %arg2: i32, %arg3: memref<32x384xbf16, #tpu.memory_space<vmem>>, %arg4: memref<384x128xbf16, #tpu.memory_space<vmem>>, %arg5: memref<1x384xf32, #tpu.memory_space<vmem>>, %arg6: memref<1x384xf32, #tpu.memory_space<vmem>>, %arg7: memref<1x128xf32, #tpu.memory_space<vmem>>, %arg8: memref<1x128xf32, #tpu.memory_space<vmem>>, %arg9: memref<32x128xbf16, #tpu.memory_space<vmem>>, %arg10: memref<32x128xf32, #tpu.memory_space<vmem>>) attributes {dimension_semantics = [#tpu.dimension_semantics<parallel>, #tpu.dimension_semantics<parallel>, #tpu.dimension_semantics<arbitrary>], iteration_bounds = array<i64: 1, 1, 3>, scalar_prefetch = 0 : i64, scratch_operands = 1 : i64, tpu.core_type = #tpu.core_type<tc>, window_params = [{transform_indices = @transform_0, window_bounds = array<i64: 32, 384>}, {transform_indices = @transform_1, window_bounds = array<i64: 384, 128>}, {transform_indices = @transform_2, window_bounds = array<i64: 1, 384>}, {transform_indices = @transform_3, window_bounds = array<i64: 1, 384>}, {transform_indices = @transform_4, window_bounds = array<i64: 1, 128>}, {transform_indices = @transform_5, window_bounds = array<i64: 1, 128>}, {transform_indices = @transform_6, window_bounds = array<i64: 32, 128>}]} {
    %c0_i32 = arith.constant 0 : i32
    %0 = arith.cmpi eq, %arg2, %c0_i32 : i32
    %1 = arith.extui %0 : i1 to i32
    %c0_i32_0 = arith.constant 0 : i32
    %2 = arith.cmpi ne, %1, %c0_i32_0 : i32
    scf.if %2 {
      %cst_9 = arith.constant 0.000000e+00 : f32
      %12 = vector.broadcast %cst_9 : f32 to vector<32x128xf32>
      %c0_10 = arith.constant 0 : index
      %c0_11 = arith.constant 0 : index
      %13 = vector.load %arg10[%c0_10, %c0_11] : memref<32x128xf32, #tpu.memory_space<vmem>>, vector<32x128xf32>
      tpu.vector_store %arg10[%c0_10, %c0_11], %12 {strides = array<i32>} : memref<32x128xf32, #tpu.memory_space<vmem>>, vector<32x128xf32>,
    } else {
    }
    %c0 = arith.constant 0 : index
    %c0_1 = arith.constant 0 : index
    %3 = vector.load %arg3[%c0, %c0_1] : memref<32x384xbf16, #tpu.memory_space<vmem>>, vector<32x384xbf16>
    %c0_2 = arith.constant 0 : index
    %c0_3 = arith.constant 0 : index
    %4 = vector.load %arg10[%c0_2, %c0_3] : memref<32x128xf32, #tpu.memory_space<vmem>>, vector<32x128xf32>
    %c0_4 = arith.constant 0 : index
    %c0_5 = arith.constant 0 : index
    %5 = vector.load %arg4[%c0_4, %c0_5] : memref<384x128xbf16, #tpu.memory_space<vmem>>, vector<384x128xbf16>
    %cst = arith.constant dense<0.000000e+00> : vector<32x128xf32>
    %6 = tpu.matmul %3, %5, %cst {dimension_numbers = #tpu.dot_dimension_numbers<[1], [0], [0], [1], [0, 0, 1, 1], [], []>} : vector<32x384xbf16>, vector<384x128xbf16>, vector<32x128xf32> -> vector<32x128xf32>
    %7 = arith.addf %4, %6 : vector<32x128xf32>
    %c0_6 = arith.constant 0 : index
    %c0_7 = arith.constant 0 : index
    %8 = vector.load %arg10[%c0_6, %c0_7] : memref<32x128xf32, #tpu.memory_space<vmem>>, vector<32x128xf32>
    tpu.vector_store %arg10[%c0_6, %c0_7], %7 {strides = array<i32>} : memref<32x128xf32, #tpu.memory_space<vmem>>, vector<32x128xf32>,
    %c2_i32 = arith.constant 2 : i32
    %9 = arith.cmpi eq, %arg2, %c2_i32 : i32
    %10 = arith.extui %9 : i1 to i32
    %c0_i32_8 = arith.constant 0 : i32
    %11 = arith.cmpi ne, %10, %c0_i32_8 : i32
    scf.if %11 {
      %c0_9 = arith.constant 0 : index
      %c0_10 = arith.constant 0 : index
      %12 = vector.load %arg10[%c0_9, %c0_10] : memref<32x128xf32, #tpu.memory_space<vmem>>, vector<32x128xf32>
      %13 = arith.truncf %12 : vector<32x128xf32> to vector<32x128xbf16>
      %c0_11 = arith.constant 0 : index
      %c0_12 = arith.constant 0 : index
      %14 = vector.load %arg9[%c0_11, %c0_12] : memref<32x128xbf16, #tpu.memory_space<vmem>>, vector<32x128xbf16>
      tpu.vector_store %arg9[%c0_11, %c0_12], %13 {strides = array<i32>} : memref<32x128xbf16, #tpu.memory_space<vmem>>, vector<32x128xbf16>,
    } else {
    }
    return
  }
  func.func @transform_0(%arg0: i32, %arg1: i32, %arg2: i32) -> (i32, i32) {
    %c0_i32 = arith.constant 0 : i32
    return %arg0, %arg2 : i32, i32
  }
  func.func @transform_1(%arg0: i32, %arg1: i32, %arg2: i32) -> (i32, i32) {
    %c0_i32 = arith.constant 0 : i32
    return %arg2, %arg1 : i32, i32
  }
  func.func @transform_2(%arg0: i32, %arg1: i32, %arg2: i32) -> (i32, i32) {
    %c0_i32 = arith.constant 0 : i32
    %c0_i32_0 = arith.constant 0 : i32
    return %c0_i32, %arg2 : i32, i32
  }
  func.func @transform_3(%arg0: i32, %arg1: i32, %arg2: i32) -> (i32, i32) {
    %c0_i32 = arith.constant 0 : i32
    %c0_i32_0 = arith.constant 0 : i32
    return %c0_i32, %arg2 : i32, i32
  }
  func.func @transform_4(%arg0: i32, %arg1: i32, %arg2: i32) -> (i32, i32) {
    %c0_i32 = arith.constant 0 : i32
    %c0_i32_0 = arith.constant 0 : i32
    return %c0_i32, %arg1 : i32, i32
  }
  func.func @transform_5(%arg0: i32, %arg1: i32, %arg2: i32) -> (i32, i32) {
    %c0_i32 = arith.constant 0 : i32
    %c0_i32_0 = arith.constant 0 : i32
    return %c0_i32, %arg1 : i32, i32
  }
  func.func @transform_6(%arg0: i32, %arg1: i32, %arg2: i32) -> (i32, i32) {
    %c0_i32 = arith.constant 0 : i32
    return %arg0, %arg1 : i32, i32
  }
}

module attributes {stable_mosaic.version = 11 : i64} {
  func.func @_mm_kernel(%arg0: i32, %arg1: i32, %arg2: i32, %arg3: memref<32x512xbf16, #tpu.memory_space<vmem>>, %arg4: memref<512x256xbf16, #tpu.memory_space<vmem>>, %arg5: memref<1x512xf32, #tpu.memory_space<vmem>>, %arg6: memref<1x512xf32, #tpu.memory_space<vmem>>, %arg7: memref<1x256xf32, #tpu.memory_space<vmem>>, %arg8: memref<1x256xf32, #tpu.memory_space<vmem>>, %arg9: memref<32x256xbf16, #tpu.memory_space<vmem>>, %arg10: memref<32x256xf32, #tpu.memory_space<vmem>>) attributes {dimension_semantics = [#tpu.dimension_semantics<parallel>, #tpu.dimension_semantics<parallel>, #tpu.dimension_semantics<arbitrary>], iteration_bounds = array<i64: 1, 1, 1>, scalar_prefetch = 0 : i64, scratch_operands = 1 : i64, tpu.core_type = #tpu.core_type<tc>, window_params = [{transform_indices = @transform_0, window_bounds = array<i64: 32, 512>}, {transform_indices = @transform_1, window_bounds = array<i64: 512, 256>}, {transform_indices = @transform_2, window_bounds = array<i64: 1, 512>}, {transform_indices = @transform_3, window_bounds = array<i64: 1, 512>}, {transform_indices = @transform_4, window_bounds = array<i64: 1, 256>}, {transform_indices = @transform_5, window_bounds = array<i64: 1, 256>}, {transform_indices = @transform_6, window_bounds = array<i64: 32, 256>}]} {
    %c0_i32 = arith.constant 0 : i32
    %0 = arith.cmpi eq, %arg2, %c0_i32 : i32
    %1 = arith.extui %0 : i1 to i32
    %c0_i32_0 = arith.constant 0 : i32
    %2 = arith.cmpi ne, %1, %c0_i32_0 : i32
    scf.if %2 {
      %cst_15 = arith.constant 0.000000e+00 : f32
      %22 = vector.broadcast %cst_15 : f32 to vector<32x256xf32>
      %c0_16 = arith.constant 0 : index
      %c0_17 = arith.constant 0 : index
      %23 = vector.load %arg10[%c0_16, %c0_17] : memref<32x256xf32, #tpu.memory_space<vmem>>, vector<32x256xf32>
      tpu.vector_store %arg10[%c0_16, %c0_17], %22 {strides = array<i32>} : memref<32x256xf32, #tpu.memory_space<vmem>>, vector<32x256xf32>,
    } else {
    }
    %c0 = arith.constant 0 : index
    %c0_1 = arith.constant 0 : index
    %3 = vector.load %arg3[%c0, %c0_1] : memref<32x512xbf16, #tpu.memory_space<vmem>>, vector<32x512xbf16>
    %4 = arith.extf %3 : vector<32x512xbf16> to vector<32x512xf32>
    %c0_2 = arith.constant 0 : index
    %c0_3 = arith.constant 0 : index
    %5 = vector.load %arg5[%c0_2, %c0_3] : memref<1x512xf32, #tpu.memory_space<vmem>>, vector<1x512xf32>
    %6 = vector.broadcast %5 : vector<1x512xf32> to vector<32x512xf32>
    %7 = arith.mulf %4, %6 : vector<32x512xf32>
    %c0_4 = arith.constant 0 : index
    %c0_5 = arith.constant 0 : index
    %8 = vector.load %arg6[%c0_4, %c0_5] : memref<1x512xf32, #tpu.memory_space<vmem>>, vector<1x512xf32>
    %9 = vector.broadcast %8 : vector<1x512xf32> to vector<32x512xf32>
    %10 = arith.addf %7, %9 : vector<32x512xf32>
    %cst = arith.constant 0.000000e+00 : f32
    %11 = vector.broadcast %cst : f32 to vector<32x512xf32>
    %12 = arith.maximumf %10, %11 : vector<32x512xf32>
    %13 = arith.truncf %12 : vector<32x512xf32> to vector<32x512xbf16>
    %c0_6 = arith.constant 0 : index
    %c0_7 = arith.constant 0 : index
    %14 = vector.load %arg10[%c0_6, %c0_7] : memref<32x256xf32, #tpu.memory_space<vmem>>, vector<32x256xf32>
    %c0_8 = arith.constant 0 : index
    %c0_9 = arith.constant 0 : index
    %15 = vector.load %arg4[%c0_8, %c0_9] : memref<512x256xbf16, #tpu.memory_space<vmem>>, vector<512x256xbf16>
    %cst_10 = arith.constant dense<0.000000e+00> : vector<32x256xf32>
    %16 = tpu.matmul %13, %15, %cst_10 {dimension_numbers = #tpu.dot_dimension_numbers<[1], [0], [0], [1], [0, 0, 1, 1], [], []>} : vector<32x512xbf16>, vector<512x256xbf16>, vector<32x256xf32> -> vector<32x256xf32>
    %17 = arith.addf %14, %16 : vector<32x256xf32>
    %c0_11 = arith.constant 0 : index
    %c0_12 = arith.constant 0 : index
    %18 = vector.load %arg10[%c0_11, %c0_12] : memref<32x256xf32, #tpu.memory_space<vmem>>, vector<32x256xf32>
    tpu.vector_store %arg10[%c0_11, %c0_12], %17 {strides = array<i32>} : memref<32x256xf32, #tpu.memory_space<vmem>>, vector<32x256xf32>,
    %c0_i32_13 = arith.constant 0 : i32
    %19 = arith.cmpi eq, %arg2, %c0_i32_13 : i32
    %20 = arith.extui %19 : i1 to i32
    %c0_i32_14 = arith.constant 0 : i32
    %21 = arith.cmpi ne, %20, %c0_i32_14 : i32
    scf.if %21 {
      %c0_15 = arith.constant 0 : index
      %c0_16 = arith.constant 0 : index
      %22 = vector.load %arg10[%c0_15, %c0_16] : memref<32x256xf32, #tpu.memory_space<vmem>>, vector<32x256xf32>
      %23 = arith.truncf %22 : vector<32x256xf32> to vector<32x256xbf16>
      %c0_17 = arith.constant 0 : index
      %c0_18 = arith.constant 0 : index
      %24 = vector.load %arg9[%c0_17, %c0_18] : memref<32x256xbf16, #tpu.memory_space<vmem>>, vector<32x256xbf16>
      tpu.vector_store %arg9[%c0_17, %c0_18], %23 {strides = array<i32>} : memref<32x256xbf16, #tpu.memory_space<vmem>>, vector<32x256xbf16>,
    } else {
    }
    return
  }
  func.func @transform_0(%arg0: i32, %arg1: i32, %arg2: i32) -> (i32, i32) {
    %c0_i32 = arith.constant 0 : i32
    return %arg0, %arg2 : i32, i32
  }
  func.func @transform_1(%arg0: i32, %arg1: i32, %arg2: i32) -> (i32, i32) {
    %c0_i32 = arith.constant 0 : i32
    return %arg2, %arg1 : i32, i32
  }
  func.func @transform_2(%arg0: i32, %arg1: i32, %arg2: i32) -> (i32, i32) {
    %c0_i32 = arith.constant 0 : i32
    %c0_i32_0 = arith.constant 0 : i32
    return %c0_i32, %arg2 : i32, i32
  }
  func.func @transform_3(%arg0: i32, %arg1: i32, %arg2: i32) -> (i32, i32) {
    %c0_i32 = arith.constant 0 : i32
    %c0_i32_0 = arith.constant 0 : i32
    return %c0_i32, %arg2 : i32, i32
  }
  func.func @transform_4(%arg0: i32, %arg1: i32, %arg2: i32) -> (i32, i32) {
    %c0_i32 = arith.constant 0 : i32
    %c0_i32_0 = arith.constant 0 : i32
    return %c0_i32, %arg1 : i32, i32
  }
  func.func @transform_5(%arg0: i32, %arg1: i32, %arg2: i32) -> (i32, i32) {
    %c0_i32 = arith.constant 0 : i32
    %c0_i32_0 = arith.constant 0 : i32
    return %c0_i32, %arg1 : i32, i32
  }
  func.func @transform_6(%arg0: i32, %arg1: i32, %arg2: i32) -> (i32, i32) {
    %c0_i32 = arith.constant 0 : i32
    return %arg0, %arg1 : i32, i32
  }
}

module attributes {stable_mosaic.version = 11 : i64} {
  func.func @_pool_kernel(%arg0: i32, %arg1: memref<4x8x256xbf16, #tpu.memory_space<vmem>>, %arg2: memref<8x256xbf16, #tpu.memory_space<vmem>>) attributes {dimension_semantics = [#tpu.dimension_semantics<parallel>], iteration_bounds = array<i64: 1>, scalar_prefetch = 0 : i64, scratch_operands = 0 : i64, tpu.core_type = #tpu.core_type<tc>, window_params = [{transform_indices = @transform_0, window_bounds = array<i64: 4, 8, 256>}, {transform_indices = @transform_1, window_bounds = array<i64: 8, 256>}]} {
    %c0 = arith.constant 0 : index
    %c0_0 = arith.constant 0 : index
    %c0_1 = arith.constant 0 : index
    %0 = vector.load %arg1[%c0, %c0_0, %c0_1] : memref<4x8x256xbf16, #tpu.memory_space<vmem>>, vector<4x8x256xbf16>
    %1 = arith.extf %0 : vector<4x8x256xbf16> to vector<4x8x256xf32>
    %cst = arith.constant dense<0.000000e+00> : vector<8x256xf32>
    %2 = vector.multi_reduction <add>, %1, %cst [0] : vector<4x8x256xf32> to vector<8x256xf32>
    %cst_2 = arith.constant 2.500000e-01 : f32
    %3 = vector.broadcast %cst_2 : f32 to vector<8x256xf32>
    %4 = arith.mulf %2, %3 : vector<8x256xf32>
    %5 = arith.truncf %4 : vector<8x256xf32> to vector<8x256xbf16>
    %c0_3 = arith.constant 0 : index
    %c0_4 = arith.constant 0 : index
    %6 = vector.load %arg2[%c0_3, %c0_4] : memref<8x256xbf16, #tpu.memory_space<vmem>>, vector<8x256xbf16>
    tpu.vector_store %arg2[%c0_3, %c0_4], %5 {strides = array<i32>} : memref<8x256xbf16, #tpu.memory_space<vmem>>, vector<8x256xbf16>,
    return
  }
  func.func @transform_0(%arg0: i32) -> (i32, i32, i32) {
    %c0_i32 = arith.constant 0 : i32
    %c0_i32_0 = arith.constant 0 : i32
    %c0_i32_1 = arith.constant 0 : i32
    return %c0_i32, %arg0, %c0_i32_0 : i32, i32, i32
  }
  func.func @transform_1(%arg0: i32) -> (i32, i32) {
    %c0_i32 = arith.constant 0 : i32
    %c0_i32_0 = arith.constant 0 : i32
    return %arg0, %c0_i32 : i32, i32
  }
}

module attributes {stable_mosaic.version = 11 : i64} {
  func.func @_mm_kernel(%arg0: i32, %arg1: i32, %arg2: i32, %arg3: memref<8x512xbf16, #tpu.memory_space<vmem>>, %arg4: memref<512x128xbf16, #tpu.memory_space<vmem>>, %arg5: memref<1x512xf32, #tpu.memory_space<vmem>>, %arg6: memref<1x512xf32, #tpu.memory_space<vmem>>, %arg7: memref<1x128xf32, #tpu.memory_space<vmem>>, %arg8: memref<1x128xf32, #tpu.memory_space<vmem>>, %arg9: memref<8x128xbf16, #tpu.memory_space<vmem>>, %arg10: memref<8x128xf32, #tpu.memory_space<vmem>>) attributes {dimension_semantics = [#tpu.dimension_semantics<parallel>, #tpu.dimension_semantics<parallel>, #tpu.dimension_semantics<arbitrary>], iteration_bounds = array<i64: 1, 1, 2>, scalar_prefetch = 0 : i64, scratch_operands = 1 : i64, tpu.core_type = #tpu.core_type<tc>, window_params = [{transform_indices = @transform_0, window_bounds = array<i64: 8, 512>}, {transform_indices = @transform_1, window_bounds = array<i64: 512, 128>}, {transform_indices = @transform_2, window_bounds = array<i64: 1, 512>}, {transform_indices = @transform_3, window_bounds = array<i64: 1, 512>}, {transform_indices = @transform_4, window_bounds = array<i64: 1, 128>}, {transform_indices = @transform_5, window_bounds = array<i64: 1, 128>}, {transform_indices = @transform_6, window_bounds = array<i64: 8, 128>}]} {
    %c0_i32 = arith.constant 0 : i32
    %0 = arith.cmpi eq, %arg2, %c0_i32 : i32
    %1 = arith.extui %0 : i1 to i32
    %c0_i32_0 = arith.constant 0 : i32
    %2 = arith.cmpi ne, %1, %c0_i32_0 : i32
    scf.if %2 {
      %cst_14 = arith.constant 0.000000e+00 : f32
      %22 = vector.broadcast %cst_14 : f32 to vector<8x128xf32>
      %c0_15 = arith.constant 0 : index
      %c0_16 = arith.constant 0 : index
      %23 = vector.load %arg10[%c0_15, %c0_16] : memref<8x128xf32, #tpu.memory_space<vmem>>, vector<8x128xf32>
      tpu.vector_store %arg10[%c0_15, %c0_16], %22 {strides = array<i32>} : memref<8x128xf32, #tpu.memory_space<vmem>>, vector<8x128xf32>,
    } else {
    }
    %c0 = arith.constant 0 : index
    %c0_1 = arith.constant 0 : index
    %3 = vector.load %arg3[%c0, %c0_1] : memref<8x512xbf16, #tpu.memory_space<vmem>>, vector<8x512xbf16>
    %4 = arith.extf %3 : vector<8x512xbf16> to vector<8x512xf32>
    %c0_2 = arith.constant 0 : index
    %c0_3 = arith.constant 0 : index
    %5 = vector.load %arg5[%c0_2, %c0_3] : memref<1x512xf32, #tpu.memory_space<vmem>>, vector<1x512xf32>
    %6 = vector.broadcast %5 : vector<1x512xf32> to vector<8x512xf32>
    %7 = arith.mulf %4, %6 : vector<8x512xf32>
    %c0_4 = arith.constant 0 : index
    %c0_5 = arith.constant 0 : index
    %8 = vector.load %arg6[%c0_4, %c0_5] : memref<1x512xf32, #tpu.memory_space<vmem>>, vector<1x512xf32>
    %9 = vector.broadcast %8 : vector<1x512xf32> to vector<8x512xf32>
    %10 = arith.addf %7, %9 : vector<8x512xf32>
    %cst = arith.constant 0.000000e+00 : f32
    %11 = vector.broadcast %cst : f32 to vector<8x512xf32>
    %12 = arith.maximumf %10, %11 : vector<8x512xf32>
    %13 = arith.truncf %12 : vector<8x512xf32> to vector<8x512xbf16>
    %c0_6 = arith.constant 0 : index
    %c0_7 = arith.constant 0 : index
    %14 = vector.load %arg10[%c0_6, %c0_7] : memref<8x128xf32, #tpu.memory_space<vmem>>, vector<8x128xf32>
    %c0_8 = arith.constant 0 : index
    %c0_9 = arith.constant 0 : index
    %15 = vector.load %arg4[%c0_8, %c0_9] : memref<512x128xbf16, #tpu.memory_space<vmem>>, vector<512x128xbf16>
    %cst_10 = arith.constant dense<0.000000e+00> : vector<8x128xf32>
    %16 = tpu.matmul %13, %15, %cst_10 {dimension_numbers = #tpu.dot_dimension_numbers<[1], [0], [0], [1], [0, 0, 1, 1], [], []>} : vector<8x512xbf16>, vector<512x128xbf16>, vector<8x128xf32> -> vector<8x128xf32>
    %17 = arith.addf %14, %16 : vector<8x128xf32>
    %c0_11 = arith.constant 0 : index
    %c0_12 = arith.constant 0 : index
    %18 = vector.load %arg10[%c0_11, %c0_12] : memref<8x128xf32, #tpu.memory_space<vmem>>, vector<8x128xf32>
    tpu.vector_store %arg10[%c0_11, %c0_12], %17 {strides = array<i32>} : memref<8x128xf32, #tpu.memory_space<vmem>>, vector<8x128xf32>,
    %c1_i32 = arith.constant 1 : i32
    %19 = arith.cmpi eq, %arg2, %c1_i32 : i32
    %20 = arith.extui %19 : i1 to i32
    %c0_i32_13 = arith.constant 0 : i32
    %21 = arith.cmpi ne, %20, %c0_i32_13 : i32
    scf.if %21 {
      %c0_14 = arith.constant 0 : index
      %c0_15 = arith.constant 0 : index
      %22 = vector.load %arg10[%c0_14, %c0_15] : memref<8x128xf32, #tpu.memory_space<vmem>>, vector<8x128xf32>
      %c0_16 = arith.constant 0 : index
      %c0_17 = arith.constant 0 : index
      %23 = vector.load %arg7[%c0_16, %c0_17] : memref<1x128xf32, #tpu.memory_space<vmem>>, vector<1x128xf32>
      %24 = vector.broadcast %23 : vector<1x128xf32> to vector<8x128xf32>
      %25 = arith.mulf %22, %24 : vector<8x128xf32>
      %c0_18 = arith.constant 0 : index
      %c0_19 = arith.constant 0 : index
      %26 = vector.load %arg8[%c0_18, %c0_19] : memref<1x128xf32, #tpu.memory_space<vmem>>, vector<1x128xf32>
      %27 = vector.broadcast %26 : vector<1x128xf32> to vector<8x128xf32>
      %28 = arith.addf %25, %27 : vector<8x128xf32>
      %cst_20 = arith.constant 0.000000e+00 : f32
      %29 = vector.broadcast %cst_20 : f32 to vector<8x128xf32>
      %30 = arith.maximumf %28, %29 : vector<8x128xf32>
      %31 = arith.truncf %30 : vector<8x128xf32> to vector<8x128xbf16>
      %c0_21 = arith.constant 0 : index
      %c0_22 = arith.constant 0 : index
      %32 = vector.load %arg9[%c0_21, %c0_22] : memref<8x128xbf16, #tpu.memory_space<vmem>>, vector<8x128xbf16>
      tpu.vector_store %arg9[%c0_21, %c0_22], %31 {strides = array<i32>} : memref<8x128xbf16, #tpu.memory_space<vmem>>, vector<8x128xbf16>,
    } else {
    }
    return
  }
  func.func @transform_0(%arg0: i32, %arg1: i32, %arg2: i32) -> (i32, i32) {
    %c0_i32 = arith.constant 0 : i32
    return %arg0, %arg2 : i32, i32
  }
  func.func @transform_1(%arg0: i32, %arg1: i32, %arg2: i32) -> (i32, i32) {
    %c0_i32 = arith.constant 0 : i32
    return %arg2, %arg1 : i32, i32
  }
  func.func @transform_2(%arg0: i32, %arg1: i32, %arg2: i32) -> (i32, i32) {
    %c0_i32 = arith.constant 0 : i32
    %c0_i32_0 = arith.constant 0 : i32
    return %c0_i32, %arg2 : i32, i32
  }
  func.func @transform_3(%arg0: i32, %arg1: i32, %arg2: i32) -> (i32, i32) {
    %c0_i32 = arith.constant 0 : i32
    %c0_i32_0 = arith.constant 0 : i32
    return %c0_i32, %arg2 : i32, i32
  }
  func.func @transform_4(%arg0: i32, %arg1: i32, %arg2: i32) -> (i32, i32) {
    %c0_i32 = arith.constant 0 : i32
    %c0_i32_0 = arith.constant 0 : i32
    return %c0_i32, %arg1 : i32, i32
  }
  func.func @transform_5(%arg0: i32, %arg1: i32, %arg2: i32) -> (i32, i32) {
    %c0_i32 = arith.constant 0 : i32
    %c0_i32_0 = arith.constant 0 : i32
    return %c0_i32, %arg1 : i32, i32
  }
  func.func @transform_6(%arg0: i32, %arg1: i32, %arg2: i32) -> (i32, i32) {
    %c0_i32 = arith.constant 0 : i32
    return %arg0, %arg1 : i32, i32
  }
}

module attributes {stable_mosaic.version = 11 : i64} {
  func.func @_mm_kernel(%arg0: i32, %arg1: i32, %arg2: i32, %arg3: memref<8x384xbf16, #tpu.memory_space<vmem>>, %arg4: memref<384x128xbf16, #tpu.memory_space<vmem>>, %arg5: memref<1x384xf32, #tpu.memory_space<vmem>>, %arg6: memref<1x384xf32, #tpu.memory_space<vmem>>, %arg7: memref<1x128xf32, #tpu.memory_space<vmem>>, %arg8: memref<1x128xf32, #tpu.memory_space<vmem>>, %arg9: memref<8x128xbf16, #tpu.memory_space<vmem>>, %arg10: memref<8x128xf32, #tpu.memory_space<vmem>>) attributes {dimension_semantics = [#tpu.dimension_semantics<parallel>, #tpu.dimension_semantics<parallel>, #tpu.dimension_semantics<arbitrary>], iteration_bounds = array<i64: 1, 1, 3>, scalar_prefetch = 0 : i64, scratch_operands = 1 : i64, tpu.core_type = #tpu.core_type<tc>, window_params = [{transform_indices = @transform_0, window_bounds = array<i64: 8, 384>}, {transform_indices = @transform_1, window_bounds = array<i64: 384, 128>}, {transform_indices = @transform_2, window_bounds = array<i64: 1, 384>}, {transform_indices = @transform_3, window_bounds = array<i64: 1, 384>}, {transform_indices = @transform_4, window_bounds = array<i64: 1, 128>}, {transform_indices = @transform_5, window_bounds = array<i64: 1, 128>}, {transform_indices = @transform_6, window_bounds = array<i64: 8, 128>}]} {
    %c0_i32 = arith.constant 0 : i32
    %0 = arith.cmpi eq, %arg2, %c0_i32 : i32
    %1 = arith.extui %0 : i1 to i32
    %c0_i32_0 = arith.constant 0 : i32
    %2 = arith.cmpi ne, %1, %c0_i32_0 : i32
    scf.if %2 {
      %cst_9 = arith.constant 0.000000e+00 : f32
      %12 = vector.broadcast %cst_9 : f32 to vector<8x128xf32>
      %c0_10 = arith.constant 0 : index
      %c0_11 = arith.constant 0 : index
      %13 = vector.load %arg10[%c0_10, %c0_11] : memref<8x128xf32, #tpu.memory_space<vmem>>, vector<8x128xf32>
      tpu.vector_store %arg10[%c0_10, %c0_11], %12 {strides = array<i32>} : memref<8x128xf32, #tpu.memory_space<vmem>>, vector<8x128xf32>,
    } else {
    }
    %c0 = arith.constant 0 : index
    %c0_1 = arith.constant 0 : index
    %3 = vector.load %arg3[%c0, %c0_1] : memref<8x384xbf16, #tpu.memory_space<vmem>>, vector<8x384xbf16>
    %c0_2 = arith.constant 0 : index
    %c0_3 = arith.constant 0 : index
    %4 = vector.load %arg10[%c0_2, %c0_3] : memref<8x128xf32, #tpu.memory_space<vmem>>, vector<8x128xf32>
    %c0_4 = arith.constant 0 : index
    %c0_5 = arith.constant 0 : index
    %5 = vector.load %arg4[%c0_4, %c0_5] : memref<384x128xbf16, #tpu.memory_space<vmem>>, vector<384x128xbf16>
    %cst = arith.constant dense<0.000000e+00> : vector<8x128xf32>
    %6 = tpu.matmul %3, %5, %cst {dimension_numbers = #tpu.dot_dimension_numbers<[1], [0], [0], [1], [0, 0, 1, 1], [], []>} : vector<8x384xbf16>, vector<384x128xbf16>, vector<8x128xf32> -> vector<8x128xf32>
    %7 = arith.addf %4, %6 : vector<8x128xf32>
    %c0_6 = arith.constant 0 : index
    %c0_7 = arith.constant 0 : index
    %8 = vector.load %arg10[%c0_6, %c0_7] : memref<8x128xf32, #tpu.memory_space<vmem>>, vector<8x128xf32>
    tpu.vector_store %arg10[%c0_6, %c0_7], %7 {strides = array<i32>} : memref<8x128xf32, #tpu.memory_space<vmem>>, vector<8x128xf32>,
    %c2_i32 = arith.constant 2 : i32
    %9 = arith.cmpi eq, %arg2, %c2_i32 : i32
    %10 = arith.extui %9 : i1 to i32
    %c0_i32_8 = arith.constant 0 : i32
    %11 = arith.cmpi ne, %10, %c0_i32_8 : i32
    scf.if %11 {
      %c0_9 = arith.constant 0 : index
      %c0_10 = arith.constant 0 : index
      %12 = vector.load %arg10[%c0_9, %c0_10] : memref<8x128xf32, #tpu.memory_space<vmem>>, vector<8x128xf32>
      %13 = arith.truncf %12 : vector<8x128xf32> to vector<8x128xbf16>
      %c0_11 = arith.constant 0 : index
      %c0_12 = arith.constant 0 : index
      %14 = vector.load %arg9[%c0_11, %c0_12] : memref<8x128xbf16, #tpu.memory_space<vmem>>, vector<8x128xbf16>
      tpu.vector_store %arg9[%c0_11, %c0_12], %13 {strides = array<i32>} : memref<8x128xbf16, #tpu.memory_space<vmem>>, vector<8x128xbf16>,
    } else {
    }
    return
  }
  func.func @transform_0(%arg0: i32, %arg1: i32, %arg2: i32) -> (i32, i32) {
    %c0_i32 = arith.constant 0 : i32
    return %arg0, %arg2 : i32, i32
  }
  func.func @transform_1(%arg0: i32, %arg1: i32, %arg2: i32) -> (i32, i32) {
    %c0_i32 = arith.constant 0 : i32
    return %arg2, %arg1 : i32, i32
  }
  func.func @transform_2(%arg0: i32, %arg1: i32, %arg2: i32) -> (i32, i32) {
    %c0_i32 = arith.constant 0 : i32
    %c0_i32_0 = arith.constant 0 : i32
    return %c0_i32, %arg2 : i32, i32
  }
  func.func @transform_3(%arg0: i32, %arg1: i32, %arg2: i32) -> (i32, i32) {
    %c0_i32 = arith.constant 0 : i32
    %c0_i32_0 = arith.constant 0 : i32
    return %c0_i32, %arg2 : i32, i32
  }
  func.func @transform_4(%arg0: i32, %arg1: i32, %arg2: i32) -> (i32, i32) {
    %c0_i32 = arith.constant 0 : i32
    %c0_i32_0 = arith.constant 0 : i32
    return %c0_i32, %arg1 : i32, i32
  }
  func.func @transform_5(%arg0: i32, %arg1: i32, %arg2: i32) -> (i32, i32) {
    %c0_i32 = arith.constant 0 : i32
    %c0_i32_0 = arith.constant 0 : i32
    return %c0_i32, %arg1 : i32, i32
  }
  func.func @transform_6(%arg0: i32, %arg1: i32, %arg2: i32) -> (i32, i32) {
    %c0_i32 = arith.constant 0 : i32
    return %arg0, %arg1 : i32, i32
  }
}

module attributes {stable_mosaic.version = 11 : i64} {
  func.func @_mm_kernel(%arg0: i32, %arg1: i32, %arg2: i32, %arg3: memref<8x512xbf16, #tpu.memory_space<vmem>>, %arg4: memref<512x256xbf16, #tpu.memory_space<vmem>>, %arg5: memref<1x512xf32, #tpu.memory_space<vmem>>, %arg6: memref<1x512xf32, #tpu.memory_space<vmem>>, %arg7: memref<1x256xf32, #tpu.memory_space<vmem>>, %arg8: memref<1x256xf32, #tpu.memory_space<vmem>>, %arg9: memref<8x256xbf16, #tpu.memory_space<vmem>>, %arg10: memref<8x256xf32, #tpu.memory_space<vmem>>) attributes {dimension_semantics = [#tpu.dimension_semantics<parallel>, #tpu.dimension_semantics<parallel>, #tpu.dimension_semantics<arbitrary>], iteration_bounds = array<i64: 1, 2, 2>, scalar_prefetch = 0 : i64, scratch_operands = 1 : i64, tpu.core_type = #tpu.core_type<tc>, window_params = [{transform_indices = @transform_0, window_bounds = array<i64: 8, 512>}, {transform_indices = @transform_1, window_bounds = array<i64: 512, 256>}, {transform_indices = @transform_2, window_bounds = array<i64: 1, 512>}, {transform_indices = @transform_3, window_bounds = array<i64: 1, 512>}, {transform_indices = @transform_4, window_bounds = array<i64: 1, 256>}, {transform_indices = @transform_5, window_bounds = array<i64: 1, 256>}, {transform_indices = @transform_6, window_bounds = array<i64: 8, 256>}]} {
    %c0_i32 = arith.constant 0 : i32
    %0 = arith.cmpi eq, %arg2, %c0_i32 : i32
    %1 = arith.extui %0 : i1 to i32
    %c0_i32_0 = arith.constant 0 : i32
    %2 = arith.cmpi ne, %1, %c0_i32_0 : i32
    scf.if %2 {
      %cst_14 = arith.constant 0.000000e+00 : f32
      %22 = vector.broadcast %cst_14 : f32 to vector<8x256xf32>
      %c0_15 = arith.constant 0 : index
      %c0_16 = arith.constant 0 : index
      %23 = vector.load %arg10[%c0_15, %c0_16] : memref<8x256xf32, #tpu.memory_space<vmem>>, vector<8x256xf32>
      tpu.vector_store %arg10[%c0_15, %c0_16], %22 {strides = array<i32>} : memref<8x256xf32, #tpu.memory_space<vmem>>, vector<8x256xf32>,
    } else {
    }
    %c0 = arith.constant 0 : index
    %c0_1 = arith.constant 0 : index
    %3 = vector.load %arg3[%c0, %c0_1] : memref<8x512xbf16, #tpu.memory_space<vmem>>, vector<8x512xbf16>
    %4 = arith.extf %3 : vector<8x512xbf16> to vector<8x512xf32>
    %c0_2 = arith.constant 0 : index
    %c0_3 = arith.constant 0 : index
    %5 = vector.load %arg5[%c0_2, %c0_3] : memref<1x512xf32, #tpu.memory_space<vmem>>, vector<1x512xf32>
    %6 = vector.broadcast %5 : vector<1x512xf32> to vector<8x512xf32>
    %7 = arith.mulf %4, %6 : vector<8x512xf32>
    %c0_4 = arith.constant 0 : index
    %c0_5 = arith.constant 0 : index
    %8 = vector.load %arg6[%c0_4, %c0_5] : memref<1x512xf32, #tpu.memory_space<vmem>>, vector<1x512xf32>
    %9 = vector.broadcast %8 : vector<1x512xf32> to vector<8x512xf32>
    %10 = arith.addf %7, %9 : vector<8x512xf32>
    %cst = arith.constant 0.000000e+00 : f32
    %11 = vector.broadcast %cst : f32 to vector<8x512xf32>
    %12 = arith.maximumf %10, %11 : vector<8x512xf32>
    %13 = arith.truncf %12 : vector<8x512xf32> to vector<8x512xbf16>
    %c0_6 = arith.constant 0 : index
    %c0_7 = arith.constant 0 : index
    %14 = vector.load %arg10[%c0_6, %c0_7] : memref<8x256xf32, #tpu.memory_space<vmem>>, vector<8x256xf32>
    %c0_8 = arith.constant 0 : index
    %c0_9 = arith.constant 0 : index
    %15 = vector.load %arg4[%c0_8, %c0_9] : memref<512x256xbf16, #tpu.memory_space<vmem>>, vector<512x256xbf16>
    %cst_10 = arith.constant dense<0.000000e+00> : vector<8x256xf32>
    %16 = tpu.matmul %13, %15, %cst_10 {dimension_numbers = #tpu.dot_dimension_numbers<[1], [0], [0], [1], [0, 0, 1, 1], [], []>} : vector<8x512xbf16>, vector<512x256xbf16>, vector<8x256xf32> -> vector<8x256xf32>
    %17 = arith.addf %14, %16 : vector<8x256xf32>
    %c0_11 = arith.constant 0 : index
    %c0_12 = arith.constant 0 : index
    %18 = vector.load %arg10[%c0_11, %c0_12] : memref<8x256xf32, #tpu.memory_space<vmem>>, vector<8x256xf32>
    tpu.vector_store %arg10[%c0_11, %c0_12], %17 {strides = array<i32>} : memref<8x256xf32, #tpu.memory_space<vmem>>, vector<8x256xf32>,
    %c1_i32 = arith.constant 1 : i32
    %19 = arith.cmpi eq, %arg2, %c1_i32 : i32
    %20 = arith.extui %19 : i1 to i32
    %c0_i32_13 = arith.constant 0 : i32
    %21 = arith.cmpi ne, %20, %c0_i32_13 : i32
    scf.if %21 {
      %c0_14 = arith.constant 0 : index
      %c0_15 = arith.constant 0 : index
      %22 = vector.load %arg10[%c0_14, %c0_15] : memref<8x256xf32, #tpu.memory_space<vmem>>, vector<8x256xf32>
      %23 = arith.truncf %22 : vector<8x256xf32> to vector<8x256xbf16>
      %c0_16 = arith.constant 0 : index
      %c0_17 = arith.constant 0 : index
      %24 = vector.load %arg9[%c0_16, %c0_17] : memref<8x256xbf16, #tpu.memory_space<vmem>>, vector<8x256xbf16>
      tpu.vector_store %arg9[%c0_16, %c0_17], %23 {strides = array<i32>} : memref<8x256xbf16, #tpu.memory_space<vmem>>, vector<8x256xbf16>,
    } else {
    }
    return
  }
  func.func @transform_0(%arg0: i32, %arg1: i32, %arg2: i32) -> (i32, i32) {
    %c0_i32 = arith.constant 0 : i32
    return %arg0, %arg2 : i32, i32
  }
  func.func @transform_1(%arg0: i32, %arg1: i32, %arg2: i32) -> (i32, i32) {
    %c0_i32 = arith.constant 0 : i32
    return %arg2, %arg1 : i32, i32
  }
  func.func @transform_2(%arg0: i32, %arg1: i32, %arg2: i32) -> (i32, i32) {
    %c0_i32 = arith.constant 0 : i32
    %c0_i32_0 = arith.constant 0 : i32
    return %c0_i32, %arg2 : i32, i32
  }
  func.func @transform_3(%arg0: i32, %arg1: i32, %arg2: i32) -> (i32, i32) {
    %c0_i32 = arith.constant 0 : i32
    %c0_i32_0 = arith.constant 0 : i32
    return %c0_i32, %arg2 : i32, i32
  }
  func.func @transform_4(%arg0: i32, %arg1: i32, %arg2: i32) -> (i32, i32) {
    %c0_i32 = arith.constant 0 : i32
    %c0_i32_0 = arith.constant 0 : i32
    return %c0_i32, %arg1 : i32, i32
  }
  func.func @transform_5(%arg0: i32, %arg1: i32, %arg2: i32) -> (i32, i32) {
    %c0_i32 = arith.constant 0 : i32
    %c0_i32_0 = arith.constant 0 : i32
    return %c0_i32, %arg1 : i32, i32
  }
  func.func @transform_6(%arg0: i32, %arg1: i32, %arg2: i32) -> (i32, i32) {
    %c0_i32 = arith.constant 0 : i32
    return %arg0, %arg1 : i32, i32
  }
}

module attributes {stable_mosaic.version = 11 : i64} {
  func.func @_pool_kernel(%arg0: i32, %arg1: memref<4x8x512xbf16, #tpu.memory_space<vmem>>, %arg2: memref<8x512xbf16, #tpu.memory_space<vmem>>) attributes {dimension_semantics = [#tpu.dimension_semantics<parallel>], iteration_bounds = array<i64: 1>, scalar_prefetch = 0 : i64, scratch_operands = 0 : i64, tpu.core_type = #tpu.core_type<tc>, window_params = [{transform_indices = @transform_0, window_bounds = array<i64: 4, 8, 512>}, {transform_indices = @transform_1, window_bounds = array<i64: 8, 512>}]} {
    %c0 = arith.constant 0 : index
    %c0_0 = arith.constant 0 : index
    %c0_1 = arith.constant 0 : index
    %0 = vector.load %arg1[%c0, %c0_0, %c0_1] : memref<4x8x512xbf16, #tpu.memory_space<vmem>>, vector<4x8x512xbf16>
    %1 = arith.extf %0 : vector<4x8x512xbf16> to vector<4x8x512xf32>
    %cst = arith.constant dense<0.000000e+00> : vector<8x512xf32>
    %2 = vector.multi_reduction <add>, %1, %cst [0] : vector<4x8x512xf32> to vector<8x512xf32>
    %cst_2 = arith.constant 2.500000e-01 : f32
    %3 = vector.broadcast %cst_2 : f32 to vector<8x512xf32>
    %4 = arith.mulf %2, %3 : vector<8x512xf32>
    %5 = arith.truncf %4 : vector<8x512xf32> to vector<8x512xbf16>
    %c0_3 = arith.constant 0 : index
    %c0_4 = arith.constant 0 : index
    %6 = vector.load %arg2[%c0_3, %c0_4] : memref<8x512xbf16, #tpu.memory_space<vmem>>, vector<8x512xbf16>
    tpu.vector_store %arg2[%c0_3, %c0_4], %5 {strides = array<i32>} : memref<8x512xbf16, #tpu.memory_space<vmem>>, vector<8x512xbf16>,
    return
  }
  func.func @transform_0(%arg0: i32) -> (i32, i32, i32) {
    %c0_i32 = arith.constant 0 : i32
    %c0_i32_0 = arith.constant 0 : i32
    %c0_i32_1 = arith.constant 0 : i32
    return %c0_i32, %arg0, %c0_i32_0 : i32, i32, i32
  }
  func.func @transform_1(%arg0: i32) -> (i32, i32) {
    %c0_i32 = arith.constant 0 : i32
    %c0_i32_0 = arith.constant 0 : i32
    return %arg0, %c0_i32 : i32, i32
  }
}

module attributes {stable_mosaic.version = 11 : i64} {
  func.func @_gap_bn_relu_kernel(%arg0: i32, %arg1: memref<1x1x1024xbf16, #tpu.memory_space<vmem>>, %arg2: memref<1x1024xf32, #tpu.memory_space<vmem>>, %arg3: memref<1x1024xf32, #tpu.memory_space<vmem>>, %arg4: memref<1x1x1024xbf16, #tpu.memory_space<vmem>>) attributes {dimension_semantics = [#tpu.dimension_semantics<parallel>], iteration_bounds = array<i64: 2>, scalar_prefetch = 0 : i64, scratch_operands = 0 : i64, tpu.core_type = #tpu.core_type<tc>, window_params = [{transform_indices = @transform_0, window_bounds = array<i64: 1, 1, 1024>}, {pipeline_mode = #tpu.pipeline_mode<synchronous>, transform_indices = @transform_1, window_bounds = array<i64: 1, 1024>}, {pipeline_mode = #tpu.pipeline_mode<synchronous>, transform_indices = @transform_2, window_bounds = array<i64: 1, 1024>}, {transform_indices = @transform_3, window_bounds = array<i64: 1, 1, 1024>}]} {
    %c0 = arith.constant 0 : index
    %c0_0 = arith.constant 0 : index
    %c0_1 = arith.constant 0 : index
    %0 = vector.load %arg1[%c0, %c0_0, %c0_1] : memref<1x1x1024xbf16, #tpu.memory_space<vmem>>, vector<1x1x1024xbf16>
    %1 = vector.shape_cast %0 : vector<1x1x1024xbf16> to vector<1x1024xbf16>
    %2 = arith.extf %1 : vector<1x1024xbf16> to vector<1x1024xf32>
    %c0_2 = arith.constant 0 : index
    %c0_3 = arith.constant 0 : index
    %3 = vector.load %arg2[%c0_2, %c0_3] : memref<1x1024xf32, #tpu.memory_space<vmem>>, vector<1x1024xf32>
    %4 = arith.mulf %2, %3 : vector<1x1024xf32>
    %c0_4 = arith.constant 0 : index
    %c0_5 = arith.constant 0 : index
    %5 = vector.load %arg3[%c0_4, %c0_5] : memref<1x1024xf32, #tpu.memory_space<vmem>>, vector<1x1024xf32>
    %6 = arith.addf %4, %5 : vector<1x1024xf32>
    %cst = arith.constant 0.000000e+00 : f32
    %7 = vector.broadcast %cst : f32 to vector<1x1024xf32>
    %8 = arith.maximumf %6, %7 : vector<1x1024xf32>
    %cst_6 = arith.constant dense<0.000000e+00> : vector<1024xf32>
    %9 = vector.multi_reduction <add>, %8, %cst_6 [0] : vector<1x1024xf32> to vector<1024xf32>
    %10 = vector.shape_cast %9 : vector<1024xf32> to vector<1x1024xf32>
    %cst_7 = arith.constant 1.000000e+00 : f32
    %11 = vector.broadcast %cst_7 : f32 to vector<1x1024xf32>
    %12 = arith.mulf %10, %11 : vector<1x1024xf32>
    %13 = arith.truncf %12 : vector<1x1024xf32> to vector<1x1024xbf16>
    %c0_8 = arith.constant 0 : index
    %c0_9 = arith.constant 0 : index
    %c0_10 = arith.constant 0 : index
    %14 = vector.load %arg4[%c0_8, %c0_9, %c0_10] : memref<1x1x1024xbf16, #tpu.memory_space<vmem>>, vector<1x1x1024xbf16>
    %15 = vector.shape_cast %14 : vector<1x1x1024xbf16> to vector<1x1024xbf16>
    %16 = vector.shape_cast %13 : vector<1x1024xbf16> to vector<1x1x1024xbf16>
    tpu.vector_store %arg4[%c0_8, %c0_9, %c0_10], %16 {strides = array<i32>} : memref<1x1x1024xbf16, #tpu.memory_space<vmem>>, vector<1x1x1024xbf16>,
    return
  }
  func.func @transform_0(%arg0: i32) -> (i32, i32, i32) {
    %c0_i32 = arith.constant 0 : i32
    %c0_i32_0 = arith.constant 0 : i32
    %c0_i32_1 = arith.constant 0 : i32
    return %arg0, %c0_i32, %c0_i32_0 : i32, i32, i32
  }
  func.func @transform_1(%arg0: i32) -> (i32, i32) {
    %c0_i32 = arith.constant 0 : i32
    %c0_i32_0 = arith.constant 0 : i32
    %c0_i32_1 = arith.constant 0 : i32
    return %c0_i32, %c0_i32_0 : i32, i32
  }
  func.func @transform_2(%arg0: i32) -> (i32, i32) {
    %c0_i32 = arith.constant 0 : i32
    %c0_i32_0 = arith.constant 0 : i32
    %c0_i32_1 = arith.constant 0 : i32
    return %c0_i32, %c0_i32_0 : i32, i32
  }
  func.func @transform_3(%arg0: i32) -> (i32, i32, i32) {
    %c0_i32 = arith.constant 0 : i32
    %c0_i32_0 = arith.constant 0 : i32
    %c0_i32_1 = arith.constant 0 : i32
    return %arg0, %c0_i32, %c0_i32_0 : i32, i32, i32
  }
}

module attributes {stable_mosaic.version = 11 : i64} {
  func.func @_mm_kernel(%arg0: i32, %arg1: i32, %arg2: i32, %arg3: memref<8x512xbf16, #tpu.memory_space<vmem>>, %arg4: memref<512x128xbf16, #tpu.memory_space<vmem>>, %arg5: memref<1x512xf32, #tpu.memory_space<vmem>>, %arg6: memref<1x512xf32, #tpu.memory_space<vmem>>, %arg7: memref<1x128xf32, #tpu.memory_space<vmem>>, %arg8: memref<1x128xf32, #tpu.memory_space<vmem>>, %arg9: memref<8x128xf32, #tpu.memory_space<vmem>>, %arg10: memref<8x128xf32, #tpu.memory_space<vmem>>) attributes {dimension_semantics = [#tpu.dimension_semantics<parallel>, #tpu.dimension_semantics<parallel>, #tpu.dimension_semantics<arbitrary>], iteration_bounds = array<i64: 1, 1, 2>, scalar_prefetch = 0 : i64, scratch_operands = 1 : i64, tpu.core_type = #tpu.core_type<tc>, window_params = [{transform_indices = @transform_0, window_bounds = array<i64: 8, 512>}, {transform_indices = @transform_1, window_bounds = array<i64: 512, 128>}, {transform_indices = @transform_2, window_bounds = array<i64: 1, 512>}, {transform_indices = @transform_3, window_bounds = array<i64: 1, 512>}, {transform_indices = @transform_4, window_bounds = array<i64: 1, 128>}, {transform_indices = @transform_5, window_bounds = array<i64: 1, 128>}, {transform_indices = @transform_6, window_bounds = array<i64: 8, 128>}]} {
    %c0_i32 = arith.constant 0 : i32
    %0 = arith.cmpi eq, %arg2, %c0_i32 : i32
    %1 = arith.extui %0 : i1 to i32
    %c0_i32_0 = arith.constant 0 : i32
    %2 = arith.cmpi ne, %1, %c0_i32_0 : i32
    scf.if %2 {
      %cst_9 = arith.constant 0.000000e+00 : f32
      %12 = vector.broadcast %cst_9 : f32 to vector<8x128xf32>
      %c0_10 = arith.constant 0 : index
      %c0_11 = arith.constant 0 : index
      %13 = vector.load %arg10[%c0_10, %c0_11] : memref<8x128xf32, #tpu.memory_space<vmem>>, vector<8x128xf32>
      tpu.vector_store %arg10[%c0_10, %c0_11], %12 {strides = array<i32>} : memref<8x128xf32, #tpu.memory_space<vmem>>, vector<8x128xf32>,
    } else {
    }
    %c0 = arith.constant 0 : index
    %c0_1 = arith.constant 0 : index
    %3 = vector.load %arg3[%c0, %c0_1] : memref<8x512xbf16, #tpu.memory_space<vmem>>, vector<8x512xbf16>
    %c0_2 = arith.constant 0 : index
    %c0_3 = arith.constant 0 : index
    %4 = vector.load %arg10[%c0_2, %c0_3] : memref<8x128xf32, #tpu.memory_space<vmem>>, vector<8x128xf32>
    %c0_4 = arith.constant 0 : index
    %c0_5 = arith.constant 0 : index
    %5 = vector.load %arg4[%c0_4, %c0_5] : memref<512x128xbf16, #tpu.memory_space<vmem>>, vector<512x128xbf16>
    %cst = arith.constant dense<0.000000e+00> : vector<8x128xf32>
    %6 = tpu.matmul %3, %5, %cst {dimension_numbers = #tpu.dot_dimension_numbers<[1], [0], [0], [1], [0, 0, 1, 1], [], []>} : vector<8x512xbf16>, vector<512x128xbf16>, vector<8x128xf32> -> vector<8x128xf32>
    %7 = arith.addf %4, %6 : vector<8x128xf32>
    %c0_6 = arith.constant 0 : index
    %c0_7 = arith.constant 0 : index
    %8 = vector.load %arg10[%c0_6, %c0_7] : memref<8x128xf32, #tpu.memory_space<vmem>>, vector<8x128xf32>
    tpu.vector_store %arg10[%c0_6, %c0_7], %7 {strides = array<i32>} : memref<8x128xf32, #tpu.memory_space<vmem>>, vector<8x128xf32>,
    %c1_i32 = arith.constant 1 : i32
    %9 = arith.cmpi eq, %arg2, %c1_i32 : i32
    %10 = arith.extui %9 : i1 to i32
    %c0_i32_8 = arith.constant 0 : i32
    %11 = arith.cmpi ne, %10, %c0_i32_8 : i32
    scf.if %11 {
      %c0_9 = arith.constant 0 : index
      %c0_10 = arith.constant 0 : index
      %12 = vector.load %arg10[%c0_9, %c0_10] : memref<8x128xf32, #tpu.memory_space<vmem>>, vector<8x128xf32>
      %c0_11 = arith.constant 0 : index
      %c0_12 = arith.constant 0 : index
      %13 = vector.load %arg8[%c0_11, %c0_12] : memref<1x128xf32, #tpu.memory_space<vmem>>, vector<1x128xf32>
      %14 = vector.broadcast %13 : vector<1x128xf32> to vector<8x128xf32>
      %15 = arith.addf %12, %14 : vector<8x128xf32>
      %16 = math.absf %15 : vector<8x128xf32>
      %cst_13 = arith.constant 0.000000e+00 : f32
      %17 = vector.broadcast %cst_13 : f32 to vector<8x128xf32>
      %18 = arith.subf %17, %16 : vector<8x128xf32>
      %19 = math.exp %18 : vector<8x128xf32>
      %cst_14 = arith.constant 0.000000e+00 : f32
      %20 = vector.broadcast %cst_14 : f32 to vector<8x128xf32>
      %21 = arith.cmpf oge, %15, %20 : vector<8x128xf32>
      %cst_15 = arith.constant 1.000000e+00 : f32
      %22 = vector.broadcast %cst_15 : f32 to vector<8x128xf32>
      %23 = arith.addf %22, %19 : vector<8x128xf32>
      %cst_16 = arith.constant 1.000000e+00 : f32
      %24 = vector.broadcast %cst_16 : f32 to vector<8x128xf32>
      %25 = arith.divf %24, %23 : vector<8x128xf32>
      %cst_17 = arith.constant 1.000000e+00 : f32
      %26 = vector.broadcast %cst_17 : f32 to vector<8x128xf32>
      %27 = arith.addf %26, %19 : vector<8x128xf32>
      %28 = arith.divf %19, %27 : vector<8x128xf32>
      %29 = arith.select %21, %25, %28 : vector<8x128xi1>, vector<8x128xf32>
      %c0_18 = arith.constant 0 : index
      %c0_19 = arith.constant 0 : index
      %30 = vector.load %arg9[%c0_18, %c0_19] : memref<8x128xf32, #tpu.memory_space<vmem>>, vector<8x128xf32>
      tpu.vector_store %arg9[%c0_18, %c0_19], %29 {strides = array<i32>} : memref<8x128xf32, #tpu.memory_space<vmem>>, vector<8x128xf32>,
    } else {
    }
    return
  }
  func.func @transform_0(%arg0: i32, %arg1: i32, %arg2: i32) -> (i32, i32) {
    %c0_i32 = arith.constant 0 : i32
    return %arg0, %arg2 : i32, i32
  }
  func.func @transform_1(%arg0: i32, %arg1: i32, %arg2: i32) -> (i32, i32) {
    %c0_i32 = arith.constant 0 : i32
    return %arg2, %arg1 : i32, i32
  }
  func.func @transform_2(%arg0: i32, %arg1: i32, %arg2: i32) -> (i32, i32) {
    %c0_i32 = arith.constant 0 : i32
    %c0_i32_0 = arith.constant 0 : i32
    return %c0_i32, %arg2 : i32, i32
  }
  func.func @transform_3(%arg0: i32, %arg1: i32, %arg2: i32) -> (i32, i32) {
    %c0_i32 = arith.constant 0 : i32
    %c0_i32_0 = arith.constant 0 : i32
    return %c0_i32, %arg2 : i32, i32
  }
  func.func @transform_4(%arg0: i32, %arg1: i32, %arg2: i32) -> (i32, i32) {
    %c0_i32 = arith.constant 0 : i32
    %c0_i32_0 = arith.constant 0 : i32
    return %c0_i32, %arg1 : i32, i32
  }
  func.func @transform_5(%arg0: i32, %arg1: i32, %arg2: i32) -> (i32, i32) {
    %c0_i32 = arith.constant 0 : i32
    %c0_i32_0 = arith.constant 0 : i32
    return %c0_i32, %arg1 : i32, i32
  }
  func.func @transform_6(%arg0: i32, %arg1: i32, %arg2: i32) -> (i32, i32) {
    %c0_i32 = arith.constant 0 : i32
    return %arg0, %arg1 : i32, i32
  }
}

</mosaic_0001>

<bundles_post_ra>
// kernel: densenet121_forward.126
= control target key start
LH: loop header
LB: loop body
LE: loop exit
PB: predicated region body
PF: predicated region fallthrough
CT: control target
= control target key end

     0   :  { %s1837_s21 = smov 0   ;;  %s1839_s22 = smov 0   ;;  %s2083_s0 = inlined_call_operand.vmem [shape: bf16[512,256], index: 0, kind: input, shape index: {}]   ;;  %s2084_s1 = inlined_call_operand.vmem [shape: bf16[256,128], index: 1, kind: input, shape index: {}]   ;;  %s2085_s2 = inlined_call_operand.vmem [shape: f32[1,256], index: 2, kind: input, shape index: {}, may-alias: {2,3}]   ;;  %s2086_s3 = inlined_call_operand.vmem [shape: f32[1,256], index: 3, kind: input, shape index: {}, may-alias: {2,3}]   ;;  %s2087_s4 = inlined_call_operand.vmem [shape: f32[1,128], index: 4, kind: input, shape index: {}]   ;;  %s2088_s5 = inlined_call_operand.vmem [shape: f32[1,128], index: 5, kind: input, shape index: {}]   ;;  %s2089_s6 = inlined_call_operand.vmem [shape: bf16[512,128], index: 6, kind: output, shape index: {}]  }
   0x1   :  { %s1841_s23 = smov 0  }
   0x2 LB: > { %s35_s2 = sadd.s32 1, %s1796_s22  ;;  %p1392_p0 = scmp.ge.s32.totalorder %s1800_s23, 1  ;;  %s1800_s23 = sphi %s1841_s23, %s16_s23   ;;  %s1796_s22 = sphi %s1839_s22, %s2091_s22   ;;  %s1792_s21 = sphi %s1837_s21, %s2090_s21  }
   0x3   : > { %p37_p1 = scmp.ge.s32.totalorder %s35_s2, 2  ;;  %p294_p2 = scmp.lt.s32.totalorder %s1800_s23, 3 }
   0x5   : > { %s2093_s2 = smov (%p37_p1, %s35_s2), 0  ;;  %p295_p3 = pnand %p1392_p0, %p294_p2 }
   0x6   : > { %s1393_s11 = sshll.u32 (!%p295_p3), %s1792_s21, 5 }
   0x7   : > { %298 = sbr.rel (%p295_p3) target bundleno = 308 (0x134), region = 44  ;;  %p356_p4 = scmp.lt.s32.totalorder (!%p295_p3), %s1393_s11, 63 }
   0xc   : > { %v1632_v0 = vld [vmem:[%s2084_s1 + $0x38] sm:$0xff]  ;;  %v1631_v2 = vld [vmem:[%s2084_s1 + $0x30] sm:$0xff]  ;;  %v1630_v4 = vld [vmem:[%s2084_s1 + $0x28] sm:$0xff]  ;;  %s2095_s11 = smov (!%p356_p4, %s1393_s11), 63 }
   0xd   : > { %v1640_v1 = vld [vmem:[%s2084_s1 + $0x78] sm:$0xff]  ;;  %788 = vmatpush.bf16.msra.mxu0 %v1632_v0  ;;  %1736 = vmatpush.bf16.msra.mxu2 %v1632_v0  ;;  %v1639_v3 = vld [vmem:[%s2084_s1 + $0x70] sm:$0xff]  ;;  %v1638_v5 = vld [vmem:[%s2084_s1 + $0x68] sm:$0xff]  ;;  %s1592_s25 = sshll.u32 %s2095_s11, 3  ;;  %s1397_s18 = sshll.u32 %s2095_s11, 2 }
   0xe   : > { %877 = vmatpush.bf16.msra.mxu1 %v1640_v1  ;;  %1744 = vmatpush.bf16.msra.mxu3 %v1640_v1  ;;  %v1629_v6 = vld [vmem:[%s2084_s1 + $0x20] sm:$0xff]  ;;  %v1628_v8 = vld [vmem:[%s2084_s1 + $0x18] sm:$0xff]  ;;  %v1627_v10 = vld [vmem:[%s2084_s1 + $0x10] sm:$0xff]  ;;  %s1903_s30 = scalar_lea.vmem %s2083_s0, %s1592_s25  ;;  %s1997_s21 = scalar_lea.vmem %s2089_s6, %s1397_s18 }
   0xf   : > { %v1637_v7 = vld [vmem:[%s2084_s1 + $0x60] sm:$0xff]  ;;  %v1636_v9 = vld [vmem:[%s2084_s1 + $0x58] sm:$0xff]  ;;  %v1635_v11 = vld [vmem:[%s2084_s1 + $0x50] sm:$0xff] }
  0x10   : > { %v1626_v12 = vld [vmem:[%s2084_s1 + $0x8] sm:$0xff]  ;;  %v1625_v14 = vld [vmem:[%s2084_s1] sm:$0xff]  ;;  %v1408_v28 = vld [vmem:[%s1903_s30 + $0x10] sm:$0xf] }
  0x11   : > { %789 = vmatpush.bf16.msra.mxu0 %v1631_v2  ;;  %1737 = vmatpush.bf16.msra.mxu2 %v1631_v2  ;;  %v1634_v13 = vld [vmem:[%s2084_s1 + $0x48] sm:$0xff]  ;;  %v1633_v15 = vld [vmem:[%s2084_s1 + $0x40] sm:$0xff]  ;;  %v1596_v29 = vld [vmem:[%s1903_s30 + $0x14] sm:$0xf0] }
  0x12   : > { %878 = vmatpush.bf16.msra.mxu1 %v1639_v3  ;;  %1745 = vmatpush.bf16.msra.mxu3 %v1639_v3  ;;  %v1400_v16 = vld [vmem:[%s1903_s30] sm:$0xf]  ;;  %v1594_v17 = vld [vmem:[%s1903_s30 + $0x4] sm:$0xf0]  ;;  %v1593_v20 = vld [vmem:[%s1903_s30 + $0x4] sm:$0xf]  ;;  %v1409_v36 = vor.u32 %v1596_v29, %v1408_v28 }
  0x13   : > { %v1464_v18 = vld [vmem:[%s1903_s30 + $0x80] sm:$0xf]  ;;  %v1610_v19 = vld [vmem:[%s1903_s30 + $0x84] sm:$0xf0]  ;;  %v1402_v21 = vld [vmem:[%s1903_s30 + $0x8] sm:$0xf0]  ;;  %v1401_v24 = vor.u32 %v1594_v17, %v1400_v16 }
  0x14   : > { %v1609_v22 = vld [vmem:[%s1903_s30 + $0x84] sm:$0xf]  ;;  %v1466_v23 = vld [vmem:[%s1903_s30 + $0x88] sm:$0xf0]  ;;  %v1465_v25 = vor.u32 %v1610_v19, %v1464_v18  ;;  %v1405_v26 = vor.u32 %v1593_v20, %v1402_v21  ;;  %v1472_v30 = vld [vmem:[%s1903_s30 + $0x90] sm:$0xf] }
  0x15   : > { %790 = vmatpush.bf16.msra.mxu0 %v1630_v4  ;;  %1738 = vmatpush.bf16.msra.mxu2 %v1630_v4  ;;  %v1469_v27 = vor.u32 %v1609_v22, %v1466_v23  ;;  %v1612_v31 = vld [vmem:[%s1903_s30 + $0x94] sm:$0xf0]  ;;  %v1595_v32 = vld [vmem:[%s1903_s30 + $0x14] sm:$0xf]  ;;  %v1410_v33 = vld [vmem:[%s1903_s30 + $0x18] sm:$0xf0] }
  0x16   : > { %879 = vmatpush.bf16.msra.mxu1 %v1638_v5  ;;  %1746 = vmatpush.bf16.msra.mxu3 %v1638_v5  ;;  %v1611_v34 = vld [vmem:[%s1903_s30 + $0x94] sm:$0xf]  ;;  %v1474_v35 = vld [vmem:[%s1903_s30 + $0x98] sm:$0xf0]  ;;  %v1473_v37 = vor.u32 %v1612_v31, %v1472_v30  ;;  %v1413_v38 = vor.u32 %v1595_v32, %v1410_v33  ;;  %v1416_v40 = vld [vmem:[%s1903_s30 + $0x20] sm:$0xf] }
  0x17   : > { %v1477_v39 = vor.u32 %v1611_v34, %v1474_v35  ;;  %v1598_v41 = vld [vmem:[%s1903_s30 + $0x24] sm:$0xf0]  ;;  %v1480_v42 = vld [vmem:[%s1903_s30 + $0xa0] sm:$0xf]  ;;  %v1597_v44 = vld [vmem:[%s1903_s30 + $0x24] sm:$0xf] }
  0x18   : > { %v1614_v43 = vld [vmem:[%s1903_s30 + $0xa4] sm:$0xf0]  ;;  %v1418_v45 = vld [vmem:[%s1903_s30 + $0x28] sm:$0xf0]  ;;  %v1613_v46 = vld [vmem:[%s1903_s30 + $0xa4] sm:$0xf]  ;;  %v1417_v48 = vor.u32 %v1598_v41, %v1416_v40 }
  0x19   : > { %791 = vmatpush.bf16.msra.mxu0 %v1629_v6  ;;  %1739 = vmatpush.bf16.msra.mxu2 %v1629_v6  ;;  %v1482_v47 = vld [vmem:[%s1903_s30 + $0xa8] sm:$0xf0]  ;;  %v1481_v49 = vor.u32 %v1614_v43, %v1480_v42  ;;  %v1421_v50 = vor.u32 %v1597_v44, %v1418_v45  ;;  %v1424_v52 = vld [vmem:[%s1903_s30 + $0x30] sm:$0xf]  ;;  %v1600_v53 = vld [vmem:[%s1903_s30 + $0x34] sm:$0xf0] }
  0x1a   : > { %880 = vmatpush.bf16.msra.mxu1 %v1637_v7  ;;  %1747 = vmatpush.bf16.msra.mxu3 %v1637_v7  ;;  %v1485_v51 = vor.u32 %v1613_v46, %v1482_v47  ;;  %v1488_v54 = vld [vmem:[%s1903_s30 + $0xb0] sm:$0xf]  ;;  %v1616_v55 = vld [vmem:[%s1903_s30 + $0xb4] sm:$0xf0]  ;;  %v1599_v56 = vld [vmem:[%s1903_s30 + $0x34] sm:$0xf]  ;;  %v1425_v60 = vor.u32 %v1600_v53, %v1424_v52 }
  0x1b   : > { %v1426_v57 = vld [vmem:[%s1903_s30 + $0x38] sm:$0xf0]  ;;  %v1615_v58 = vld [vmem:[%s1903_s30 + $0xb4] sm:$0xf]  ;;  %v1489_v61 = vor.u32 %v1616_v55, %v1488_v54  ;;  %v1432_v0 = vld [vmem:[%s1903_s30 + $0x40] sm:$0xf] }
  0x1c   : > { %v1490_v59 = vld [vmem:[%s1903_s30 + $0xb8] sm:$0xf0]  ;;  %v1429_v62 = vor.u32 %v1599_v56, %v1426_v57  ;;  %v1602_v1 = vld [vmem:[%s1903_s30 + $0x44] sm:$0xf0]  ;;  %v1496_v2 = vld [vmem:[%s1903_s30 + $0xc0] sm:$0xf] }
  0x1d   : > { %792 = vmatpush.bf16.msra.mxu0 %v1628_v8  ;;  %1740 = vmatpush.bf16.msra.mxu2 %v1628_v8  ;;  %v1493_v63 = vor.u32 %v1615_v58, %v1490_v59  ;;  %v1618_v3 = vld [vmem:[%s1903_s30 + $0xc4] sm:$0xf0]  ;;  %v1601_v4 = vld [vmem:[%s1903_s30 + $0x44] sm:$0xf]  ;;  %v1434_v5 = vld [vmem:[%s1903_s30 + $0x48] sm:$0xf0]  ;;  %v1433_v8 = vor.u32 %v1602_v1, %v1432_v0 }
  0x1e   : > { %881 = vmatpush.bf16.msra.mxu1 %v1636_v9  ;;  %1748 = vmatpush.bf16.msra.mxu3 %v1636_v9  ;;  %v1617_v6 = vld [vmem:[%s1903_s30 + $0xc4] sm:$0xf]  ;;  %v1498_v7 = vld [vmem:[%s1903_s30 + $0xc8] sm:$0xf0]  ;;  %v1497_v9 = vor.u32 %v1618_v3, %v1496_v2  ;;  %v1603_v16 = vld [vmem:[%s1903_s30 + $0x54] sm:$0xf] }
  0x1f   : > { %v1442_v17 = vld [vmem:[%s1903_s30 + $0x58] sm:$0xf0]  ;;  %v1619_v18 = vld [vmem:[%s1903_s30 + $0xd4] sm:$0xf]  ;;  %v1605_v28 = vld [vmem:[%s1903_s30 + $0x64] sm:$0xf] }
  0x20   : > { %v1506_v19 = vld [vmem:[%s1903_s30 + $0xd8] sm:$0xf0]  ;;  %v1445_v22 = vor.u32 %v1603_v16, %v1442_v17  ;;  %v1450_v29 = vld [vmem:[%s1903_s30 + $0x68] sm:$0xf0]  ;;  %v1621_v30 = vld [vmem:[%s1903_s30 + $0xe4] sm:$0xf] }
  0x21   : > { %793 = vmatpush.bf16.msra.mxu0 %v1627_v10  ;;  %1741 = vmatpush.bf16.msra.mxu2 %v1627_v10  ;;  %v1437_v10 = vor.u32 %v1601_v4, %v1434_v5  ;;  %v1509_v23 = vor.u32 %v1619_v18, %v1506_v19  ;;  %v1514_v31 = vld [vmem:[%s1903_s30 + $0xe8] sm:$0xf0]  ;;  %v1453_v34 = vor.u32 %v1605_v28, %v1450_v29  ;;  %v1607_v40 = vld [vmem:[%s1903_s30 + $0x74] sm:$0xf]  ;;  %v1458_v41 = vld [vmem:[%s1903_s30 + $0x78] sm:$0xf0] }
  0x22   : > { %882 = vmatpush.bf16.msra.mxu1 %v1635_v11  ;;  %1749 = vmatpush.bf16.msra.mxu3 %v1635_v11  ;;  %v1501_v11 = vor.u32 %v1617_v6, %v1498_v7  ;;  %v1517_v35 = vor.u32 %v1621_v30, %v1514_v31  ;;  %v1623_v42 = vld [vmem:[%s1903_s30 + $0xf4] sm:$0xf]  ;;  %v1522_v43 = vld [vmem:[%s1903_s30 + $0xf8] sm:$0xf0]  ;;  %v1461_v46 = vor.u32 %v1607_v40, %v1458_v41  ;;  %v1987_v55 = vld [vmem:[%s2088_s5] ss:$0 sm:$0xff] }
  0x23   : > { %v1525_v47 = vor.u32 %v1623_v42, %v1522_v43 }
  0x25   : > { %794 = vmatpush.bf16.msra.mxu0 %v1626_v12  ;;  %1742 = vmatpush.bf16.msra.mxu2 %v1626_v12  ;;  %v1440_v12 = vld [vmem:[%s1903_s30 + $0x50] sm:$0xf] }
  0x26   : > { %883 = vmatpush.bf16.msra.mxu1 %v1634_v13  ;;  %1750 = vmatpush.bf16.msra.mxu3 %v1634_v13  ;;  %v1604_v13 = vld [vmem:[%s1903_s30 + $0x54] sm:$0xf0] }
  0x27   : > { %v1441_v20 = vor.u32 %v1604_v13, %v1440_v12 }
  0x29   : > { %795 = vmatpush.bf16.msra.mxu0 %v1625_v14  ;;  %1743 = vmatpush.bf16.msra.mxu2 %v1625_v14  ;;  %v1504_v14 = vld [vmem:[%s1903_s30 + $0xd0] sm:$0xf] }
  0x2a   : > { %884 = vmatpush.bf16.msra.mxu1 %v1633_v15  ;;  %1751 = vmatpush.bf16.msra.mxu3 %v1633_v15  ;;  %v1620_v15 = vld [vmem:[%s1903_s30 + $0xd4] sm:$0xf0] }
  0x2b   : > { %v1505_v21 = vor.u32 %v1620_v15, %v1504_v14 }
  0x2c   : > { %796 = vmatmul.bf16.vlgmr.msra.gmra.mxu0 %v1401_v24  ;;  %836 = vmatmul.bf16.vlgmr.msra.gmra.mxu2 %v1465_v25  ;;  %v1448_v24 = vld [vmem:[%s1903_s30 + $0x60] sm:$0xf]  ;;  %v1606_v25 = vld [vmem:[%s1903_s30 + $0x64] sm:$0xf0] }
  0x2d   : > { %885 = vmatmul.bf16.vlgmr.msra.gmra.mxu1 %v1405_v26  ;;  %925 = vmatmul.bf16.vlgmr.msra.gmra.mxu3 %v1469_v27  ;;  %v1512_v26 = vld [vmem:[%s1903_s30 + $0xe0] sm:$0xf]  ;;  %v1622_v27 = vld [vmem:[%s1903_s30 + $0xe4] sm:$0xf0]  ;;  %v1449_v32 = vor.u32 %v1606_v25, %v1448_v24 }
  0x2e   : > { %v1513_v33 = vor.u32 %v1622_v27, %v1512_v26 }
  0x3c   : > { %801 = vmatmul.bf16.gmra.mxu0 %v1409_v36  ;;  %841 = vmatmul.bf16.gmra.mxu2 %v1473_v37  ;;  %v1456_v36 = vld [vmem:[%s1903_s30 + $0x70] sm:$0xf]  ;;  %v1608_v37 = vld [vmem:[%s1903_s30 + $0x74] sm:$0xf0] }
  0x3d   : > { %890 = vmatmul.bf16.gmra.mxu1 %v1413_v38  ;;  %930 = vmatmul.bf16.gmra.mxu3 %v1477_v39  ;;  %v1520_v38 = vld [vmem:[%s1903_s30 + $0xf0] sm:$0xf]  ;;  %v1624_v39 = vld [vmem:[%s1903_s30 + $0xf4] sm:$0xf0]  ;;  %v1457_v44 = vor.u32 %v1608_v37, %v1456_v36 }
  0x3e   : > { %v1521_v45 = vor.u32 %v1624_v39, %v1520_v38 }
  0x4c   : > { %806 = vmatmul.bf16.gmra.mxu0 %v1417_v48  ;;  %846 = vmatmul.bf16.gmra.mxu2 %v1481_v49 }
  0x4d   : > { %895 = vmatmul.bf16.gmra.mxu1 %v1421_v50  ;;  %935 = vmatmul.bf16.gmra.mxu3 %v1485_v51  ;;  %v1981_v51 = vld [vmem:[%s2087_s4] ss:$0 sm:$0xff] }
  0x5c   : > { %811 = vmatmul.bf16.gmra.mxu0 %v1425_v60  ;;  %851 = vmatmul.bf16.gmra.mxu2 %v1489_v61 }
  0x5d   : > { %900 = vmatmul.bf16.gmra.mxu1 %v1429_v62  ;;  %940 = vmatmul.bf16.gmra.mxu3 %v1493_v63 }
  0x6c   : > { %816 = vmatmul.bf16.gmra.mxu0 %v1433_v8  ;;  %856 = vmatmul.bf16.gmra.mxu2 %v1497_v9 }
  0x6d   : > { %905 = vmatmul.bf16.gmra.mxu1 %v1437_v10  ;;  %945 = vmatmul.bf16.gmra.mxu3 %v1501_v11 }
  0x7c   : > { %821 = vmatmul.bf16.gmra.mxu0 %v1441_v20  ;;  %861 = vmatmul.bf16.gmra.mxu2 %v1505_v21 }
  0x7d   : > { %910 = vmatmul.bf16.gmra.mxu1 %v1445_v22  ;;  %950 = vmatmul.bf16.gmra.mxu3 %v1509_v23 }
  0x8c   : > { %826 = vmatmul.bf16.gmra.mxu0 %v1449_v32  ;;  %866 = vmatmul.bf16.gmra.mxu2 %v1513_v33 }
  0x8d   : > { %915 = vmatmul.bf16.gmra.mxu1 %v1453_v34  ;;  %955 = vmatmul.bf16.gmra.mxu3 %v1517_v35 }
  0x9c   : > { %831 = vmatmul.bf16.gmra.mxu0 %v1457_v44  ;;  %871 = vmatmul.bf16.gmra.mxu2 %v1521_v45 }
  0x9d   : > { %920 = vmatmul.bf16.gmra.mxu1 %v1461_v46  ;;  %960 = vmatmul.bf16.gmra.mxu3 %v1525_v47 }
  0xa9   : > { %v797_v48 = vpop.f32.mrf.mxu0 }
  0xaa   : > { %v886_v49 = vpop.f32.mrf.mxu1 }
  0xab   : > { %v887_v50 = vadd.f32 %v886_v49, %v797_v48 }
  0xad   : > { %v1069_v54 = vmul.f32 %v1981_v51, %v887_v50 }
  0xaf   : > { %v837_v52 = vpop.f32.mrf.mxu2  ;;  %v1105_v60 = vadd.f32 %v1987_v55, %v1069_v54 }
  0xb0   : > { %v926_v53 = vpop.f32.mrf.mxu3 }
  0xb1   : > { %v799_v56 = vpop.f32.mrf.mxu0  ;;  %v927_v58 = vadd.f32 %v926_v53, %v837_v52  ;;  %v1137_v2 = vmax.f32 %v1105_v60, 0.0 }
  0xb2   : > { %v888_v57 = vpop.f32.mrf.mxu1 }
  0xb3   : > { %v889_v59 = vadd.f32 %v888_v57, %v799_v56  ;;  %v1085_v62 = vmul.f32 %v1981_v51, %v927_v58 }
  0xb5   : > { %v1070_v61 = vmul.f32 %v1981_v51, %v889_v59  ;;  %v1121_v7 = vadd.f32 %v1987_v55, %v1085_v62 }
  0xb7   : > { %v1106_v63 = vadd.f32 %v1987_v55, %v1070_v61  ;;  %v839_v0 = vpop.f32.mrf.mxu2  ;;  %v1153_v12 = vmax.f32 %v1121_v7, 0.0 }
  0xb8   : > { %v928_v1 = vpop.f32.mrf.mxu3 }
  0xb9   : > { %v1138_v3 = vmax.f32 %v1106_v63, 0.0  ;;  %v929_v4 = vadd.f32 %v928_v1, %v839_v0  ;;  %v802_v5 = vpop.f32.mrf.mxu0 }
  0xba   : > { %v891_v6 = vpop.f32.mrf.mxu1 }
  0xbb   : > { %v1644_v8 = vpack.c.bf16 %v1138_v3, %v1137_v2  ;;  %v1086_v9 = vmul.f32 %v1981_v51, %v929_v4  ;;  %v892_v11 = vadd.f32 %v891_v6, %v802_v5 }
  0xbd   : > { %1645 = vst [vmem:[%s1997_s21] sm:$0xff] %v1644_v8   ;;  %v1122_v10 = vadd.f32 %v1987_v55, %v1086_v9  ;;  %v1071_v17 = vmul.f32 %v1981_v51, %v892_v11 }
  0xbf   : > { %v1154_v13 = vmax.f32 %v1122_v10, 0.0  ;;  %v842_v14 = vpop.f32.mrf.mxu2  ;;  %v1107_v22 = vadd.f32 %v1987_v55, %v1071_v17 }
  0xc0   : > { %v931_v15 = vpop.f32.mrf.mxu3 }
  0xc1   : > { %v1684_v16 = vpack.c.bf16 %v1154_v13, %v1153_v12  ;;  %v804_v18 = vpop.f32.mrf.mxu0  ;;  %v932_v20 = vadd.f32 %v931_v15, %v842_v14  ;;  %v1139_v28 = vmax.f32 %v1107_v22, 0.0 }
  0xc2   : > { %v893_v19 = vpop.f32.mrf.mxu1 }
  0xc3   : > { %1728 = vst [vmem:[%s1997_s21 + $0x40] sm:$0xff] %v1684_v16   ;;  %v894_v21 = vadd.f32 %v893_v19, %v804_v18  ;;  %v1087_v24 = vmul.f32 %v1981_v51, %v932_v20 }
  0xc5   : > { %v1072_v23 = vmul.f32 %v1981_v51, %v894_v21  ;;  %v1123_v33 = vadd.f32 %v1987_v55, %v1087_v24 }
  0xc7   : > { %v1108_v25 = vadd.f32 %v1987_v55, %v1072_v23  ;;  %v844_v26 = vpop.f32.mrf.mxu2  ;;  %v1155_v38 = vmax.f32 %v1123_v33, 0.0 }
  0xc8   : > { %v933_v27 = vpop.f32.mrf.mxu3 }
  0xc9   : > { %v1140_v29 = vmax.f32 %v1108_v25, 0.0  ;;  %v934_v30 = vadd.f32 %v933_v27, %v844_v26  ;;  %v807_v31 = vpop.f32.mrf.mxu0 }
  0xca   : > { %v896_v32 = vpop.f32.mrf.mxu1 }
  0xcb   : > { %v1649_v34 = vpack.c.bf16 %v1140_v29, %v1139_v28  ;;  %v1088_v35 = vmul.f32 %v1981_v51, %v934_v30  ;;  %v897_v37 = vadd.f32 %v896_v32, %v807_v31 }
  0xcd   : > { %1721 = vst [vmem:[%s1997_s21 + $0x8] sm:$0xff] %v1649_v34   ;;  %v1124_v36 = vadd.f32 %v1987_v55, %v1088_v35  ;;  %v1073_v43 = vmul.f32 %v1981_v51, %v897_v37 }
  0xcf   : > { %v1156_v39 = vmax.f32 %v1124_v36, 0.0  ;;  %v847_v40 = vpop.f32.mrf.mxu2  ;;  %v1109_v48 = vadd.f32 %v1987_v55, %v1073_v43 }
  0xd0   : > { %v936_v41 = vpop.f32.mrf.mxu3 }
  0xd1   : > { %v1689_v42 = vpack.c.bf16 %v1156_v39, %v1155_v38  ;;  %v809_v44 = vpop.f32.mrf.mxu0  ;;  %v937_v46 = vadd.f32 %v936_v41, %v847_v40  ;;  %v1141_v56 = vmax.f32 %v1109_v48, 0.0 }
  0xd2   : > { %v898_v45 = vpop.f32.mrf.mxu1 }
  0xd3   : > { %1729 = vst [vmem:[%s1997_s21 + $0x48] sm:$0xff] %v1689_v42   ;;  %v899_v47 = vadd.f32 %v898_v45, %v809_v44  ;;  %v1089_v50 = vmul.f32 %v1981_v51, %v937_v46 }
  0xd5   : > { %v1074_v49 = vmul.f32 %v1981_v51, %v899_v47  ;;  %v1125_v61 = vadd.f32 %v1987_v55, %v1089_v50 }
  0xd7   : > { %v1110_v52 = vadd.f32 %v1987_v55, %v1074_v49  ;;  %v849_v53 = vpop.f32.mrf.mxu2  ;;  %v1157_v2 = vmax.f32 %v1125_v61, 0.0 }
  0xd8   : > { %v938_v54 = vpop.f32.mrf.mxu3 }
  0xd9   : > { %v1142_v57 = vmax.f32 %v1110_v52, 0.0  ;;  %v939_v58 = vadd.f32 %v938_v54, %v849_v53  ;;  %v812_v59 = vpop.f32.mrf.mxu0 }
  0xda   : > { %v901_v60 = vpop.f32.mrf.mxu1 }
  0xdb   : > { %v1654_v62 = vpack.c.bf16 %v1142_v57, %v1141_v56  ;;  %v1090_v63 = vmul.f32 %v1981_v51, %v939_v58  ;;  %v902_v1 = vadd.f32 %v901_v60, %v812_v59 }
  0xdd   : > { %1722 = vst [vmem:[%s1997_s21 + $0x10] sm:$0xff] %v1654_v62   ;;  %v1126_v0 = vadd.f32 %v1987_v55, %v1090_v63  ;;  %v1075_v7 = vmul.f32 %v1981_v51, %v902_v1 }
  0xdf   : > { %v1158_v3 = vmax.f32 %v1126_v0, 0.0  ;;  %v852_v4 = vpop.f32.mrf.mxu2  ;;  %v1111_v12 = vadd.f32 %v1987_v55, %v1075_v7 }
  0xe0   : > { %v941_v5 = vpop.f32.mrf.mxu3 }
  0xe1   : > { %v1694_v6 = vpack.c.bf16 %v1158_v3, %v1157_v2  ;;  %v814_v8 = vpop.f32.mrf.mxu0  ;;  %v942_v10 = vadd.f32 %v941_v5, %v852_v4  ;;  %v1143_v18 = vmax.f32 %v1111_v12, 0.0 }
  0xe2   : > { %v903_v9 = vpop.f32.mrf.mxu1 }
  0xe3   : > { %1730 = vst [vmem:[%s1997_s21 + $0x50] sm:$0xff] %v1694_v6   ;;  %v904_v11 = vadd.f32 %v903_v9, %v814_v8  ;;  %v1091_v14 = vmul.f32 %v1981_v51, %v942_v10 }
  0xe5   : > { %v1076_v13 = vmul.f32 %v1981_v51, %v904_v11  ;;  %v1127_v23 = vadd.f32 %v1987_v55, %v1091_v14 }
  0xe7   : > { %v1112_v15 = vadd.f32 %v1987_v55, %v1076_v13  ;;  %v854_v16 = vpop.f32.mrf.mxu2  ;;  %v1159_v28 = vmax.f32 %v1127_v23, 0.0 }
  0xe8   : > { %v943_v17 = vpop.f32.mrf.mxu3 }
  0xe9   : > { %v1144_v19 = vmax.f32 %v1112_v15, 0.0  ;;  %v944_v20 = vadd.f32 %v943_v17, %v854_v16  ;;  %v817_v21 = vpop.f32.mrf.mxu0 }
  0xea   : > { %v906_v22 = vpop.f32.mrf.mxu1 }
  0xeb   : > { %v1659_v24 = vpack.c.bf16 %v1144_v19, %v1143_v18  ;;  %v1092_v25 = vmul.f32 %v1981_v51, %v944_v20  ;;  %v907_v27 = vadd.f32 %v906_v22, %v817_v21 }
  0xed   : > { %1723 = vst [vmem:[%s1997_s21 + $0x18] sm:$0xff] %v1659_v24   ;;  %v1128_v26 = vadd.f32 %v1987_v55, %v1092_v25  ;;  %v1077_v33 = vmul.f32 %v1981_v51, %v907_v27 }
  0xef   : > { %v1160_v29 = vmax.f32 %v1128_v26, 0.0  ;;  %v857_v30 = vpop.f32.mrf.mxu2  ;;  %v1113_v38 = vadd.f32 %v1987_v55, %v1077_v33 }
  0xf0   : > { %v946_v31 = vpop.f32.mrf.mxu3 }
  0xf1   : > { %v1699_v32 = vpack.c.bf16 %v1160_v29, %v1159_v28  ;;  %v819_v34 = vpop.f32.mrf.mxu0  ;;  %v947_v36 = vadd.f32 %v946_v31, %v857_v30  ;;  %v1145_v44 = vmax.f32 %v1113_v38, 0.0 }
  0xf2   : > { %v908_v35 = vpop.f32.mrf.mxu1 }
  0xf3   : > { %1731 = vst [vmem:[%s1997_s21 + $0x58] sm:$0xff] %v1699_v32   ;;  %v909_v37 = vadd.f32 %v908_v35, %v819_v34  ;;  %v1093_v40 = vmul.f32 %v1981_v51, %v947_v36 }
  0xf5   : > { %v1078_v39 = vmul.f32 %v1981_v51, %v909_v37  ;;  %v1129_v49 = vadd.f32 %v1987_v55, %v1093_v40 }
  0xf7   : > { %v1114_v41 = vadd.f32 %v1987_v55, %v1078_v39  ;;  %v859_v42 = vpop.f32.mrf.mxu2  ;;  %v1161_v56 = vmax.f32 %v1129_v49, 0.0 }
  0xf8   : > { %v948_v43 = vpop.f32.mrf.mxu3 }
  0xf9   : > { %v1146_v45 = vmax.f32 %v1114_v41, 0.0  ;;  %v949_v46 = vadd.f32 %v948_v43, %v859_v42  ;;  %v822_v47 = vpop.f32.mrf.mxu0 }
  0xfa   : > { %v911_v48 = vpop.f32.mrf.mxu1 }
  0xfb   : > { %v1664_v50 = vpack.c.bf16 %v1146_v45, %v1145_v44  ;;  %v1094_v52 = vmul.f32 %v1981_v51, %v949_v46  ;;  %v912_v54 = vadd.f32 %v911_v48, %v822_v47 }
  0xfd   : > { %1724 = vst [vmem:[%s1997_s21 + $0x20] sm:$0xff] %v1664_v50   ;;  %v1130_v53 = vadd.f32 %v1987_v55, %v1094_v52  ;;  %v1079_v61 = vmul.f32 %v1981_v51, %v912_v54 }
  0xff   : > { %v1162_v57 = vmax.f32 %v1130_v53, 0.0  ;;  %v862_v58 = vpop.f32.mrf.mxu2  ;;  %v1115_v2 = vadd.f32 %v1987_v55, %v1079_v61 }
 0x100   : > { %v951_v59 = vpop.f32.mrf.mxu3 }
 0x101   : > { %v1704_v60 = vpack.c.bf16 %v1162_v57, %v1161_v56  ;;  %v824_v62 = vpop.f32.mrf.mxu0  ;;  %v952_v0 = vadd.f32 %v951_v59, %v862_v58  ;;  %v1147_v8 = vmax.f32 %v1115_v2, 0.0 }
 0x102   : > { %v913_v63 = vpop.f32.mrf.mxu1 }
 0x103   : > { %1732 = vst [vmem:[%s1997_s21 + $0x60] sm:$0xff] %v1704_v60   ;;  %v914_v1 = vadd.f32 %v913_v63, %v824_v62  ;;  %v1095_v4 = vmul.f32 %v1981_v51, %v952_v0 }
 0x105   : > { %v1080_v3 = vmul.f32 %v1981_v51, %v914_v1  ;;  %v1131_v13 = vadd.f32 %v1987_v55, %v1095_v4 }
 0x107   : > { %v1116_v5 = vadd.f32 %v1987_v55, %v1080_v3  ;;  %v864_v6 = vpop.f32.mrf.mxu2  ;;  %v1163_v18 = vmax.f32 %v1131_v13, 0.0 }
 0x108   : > { %v953_v7 = vpop.f32.mrf.mxu3 }
 0x109   : > { %v1148_v9 = vmax.f32 %v1116_v5, 0.0  ;;  %v954_v10 = vadd.f32 %v953_v7, %v864_v6  ;;  %v827_v11 = vpop.f32.mrf.mxu0 }
 0x10a   : > { %v916_v12 = vpop.f32.mrf.mxu1 }
 0x10b   : > { %v1669_v14 = vpack.c.bf16 %v1148_v9, %v1147_v8  ;;  %v1096_v15 = vmul.f32 %v1981_v51, %v954_v10  ;;  %v917_v17 = vadd.f32 %v916_v12, %v827_v11 }
 0x10d   : > { %1725 = vst [vmem:[%s1997_s21 + $0x28] sm:$0xff] %v1669_v14   ;;  %v1132_v16 = vadd.f32 %v1987_v55, %v1096_v15  ;;  %v1081_v23 = vmul.f32 %v1981_v51, %v917_v17 }
 0x10f   : > { %v1164_v19 = vmax.f32 %v1132_v16, 0.0  ;;  %v867_v20 = vpop.f32.mrf.mxu2  ;;  %v1117_v28 = vadd.f32 %v1987_v55, %v1081_v23 }
 0x110   : > { %v956_v21 = vpop.f32.mrf.mxu3 }
 0x111   : > { %v1709_v22 = vpack.c.bf16 %v1164_v19, %v1163_v18  ;;  %v829_v24 = vpop.f32.mrf.mxu0  ;;  %v957_v26 = vadd.f32 %v956_v21, %v867_v20  ;;  %v1149_v34 = vmax.f32 %v1117_v28, 0.0 }
 0x112   : > { %v918_v25 = vpop.f32.mrf.mxu1 }
 0x113   : > { %1733 = vst [vmem:[%s1997_s21 + $0x68] sm:$0xff] %v1709_v22   ;;  %v919_v27 = vadd.f32 %v918_v25, %v829_v24  ;;  %v1097_v30 = vmul.f32 %v1981_v51, %v957_v26 }
 0x115   : > { %v1082_v29 = vmul.f32 %v1981_v51, %v919_v27  ;;  %v1133_v39 = vadd.f32 %v1987_v55, %v1097_v30 }
 0x117   : > { %v1118_v31 = vadd.f32 %v1987_v55, %v1082_v29  ;;  %v869_v32 = vpop.f32.mrf.mxu2  ;;  %v1165_v44 = vmax.f32 %v1133_v39, 0.0 }
 0x118   : > { %v958_v33 = vpop.f32.mrf.mxu3 }
 0x119   : > { %v1150_v35 = vmax.f32 %v1118_v31, 0.0  ;;  %v959_v36 = vadd.f32 %v958_v33, %v869_v32  ;;  %v832_v37 = vpop.f32.mrf.mxu0 }
 0x11a   : > { %v921_v38 = vpop.f32.mrf.mxu1 }
 0x11b   : > { %v1674_v40 = vpack.c.bf16 %v1150_v35, %v1149_v34  ;;  %v1098_v41 = vmul.f32 %v1981_v51, %v959_v36  ;;  %v922_v43 = vadd.f32 %v921_v38, %v832_v37 }
 0x11d   : > { %1726 = vst [vmem:[%s1997_s21 + $0x30] sm:$0xff] %v1674_v40   ;;  %v1134_v42 = vadd.f32 %v1987_v55, %v1098_v41  ;;  %v1083_v49 = vmul.f32 %v1981_v51, %v922_v43 }
 0x11f   : > { %v1166_v45 = vmax.f32 %v1134_v42, 0.0  ;;  %v872_v46 = vpop.f32.mrf.mxu2  ;;  %v1119_v56 = vadd.f32 %v1987_v55, %v1083_v49 }
 0x120   : > { %v961_v47 = vpop.f32.mrf.mxu3 }
 0x121   : > { %v1714_v48 = vpack.c.bf16 %v1166_v45, %v1165_v44  ;;  %v834_v50 = vpop.f32.mrf.mxu0  ;;  %v962_v53 = vadd.f32 %v961_v47, %v872_v46  ;;  %v1151_v62 = vmax.f32 %v1119_v56, 0.0 }
 0x122   : > { %v923_v52 = vpop.f32.mrf.mxu1 }
 0x123   : > { %1734 = vst [vmem:[%s1997_s21 + $0x70] sm:$0xff] %v1714_v48   ;;  %v924_v54 = vadd.f32 %v923_v52, %v834_v50  ;;  %v1099_v58 = vmul.f32 %v1981_v51, %v962_v53 }
 0x125   : > { %v1084_v57 = vmul.f32 %v1981_v51, %v924_v54  ;;  %v1135_v1 = vadd.f32 %v1987_v55, %v1099_v58 }
 0x127   : > { %v1120_v59 = vadd.f32 %v1987_v55, %v1084_v57  ;;  %v874_v60 = vpop.f32.mrf.mxu2  ;;  %v1167_v5 = vmax.f32 %v1135_v1, 0.0 }
 0x128   : > { %v963_v61 = vpop.f32.mrf.mxu3 }
 0x129   : > { %v1152_v63 = vmax.f32 %v1120_v59, 0.0  ;;  %v964_v0 = vadd.f32 %v963_v61, %v874_v60 }
 0x12b   : > { %v1679_v2 = vpack.c.bf16 %v1152_v63, %v1151_v62  ;;  %v1100_v3 = vmul.f32 %v1981_v51, %v964_v0 }
 0x12d   : > { %1727 = vst [vmem:[%s1997_s21 + $0x38] sm:$0xff] %v1679_v2   ;;  %v1136_v4 = vadd.f32 %v1987_v55, %v1100_v3 }
 0x12f   : > { %v1168_v6 = vmax.f32 %v1136_v4, 0.0 }
 0x131   : > { %v1719_v7 = vpack.c.bf16 %v1168_v6, %v1167_v5 }
 0x133   : > { %1735 = vst [vmem:[%s1997_s21 + $0x78] sm:$0xff] %v1719_v7  }
 0x134 PF: > { %s16_s23 = sadd.s32 1, %s1800_s23   ;;  %s2090_s21 = smov %s1796_s22 }
 0x135   : > { %p13_p5 = scmp.ge.s32.totalorder %s16_s23, 4   ;;  %s2091_s22 = smov %s2093_s2 }
 0x137   :  { %15 = sbr.rel (!%p13_p5) target bundleno = 2 (0x2), region = 97 }

// kernel: densenet121_forward.127
= control target key start
LH: loop header
LB: loop body
LE: loop exit
PB: predicated region body
PF: predicated region fallthrough
CT: control target
= control target key end

     0   :  { %vm296_vm0 = vcmask 523264   ;;  %vm585_vm1 = vcmask 519168   ;;  %s1539_s0 = inlined_call_operand.vmem [shape: bf16[9,128,64], index: 0, kind: input, shape index: {}]   ;;  %s1540_s1 = inlined_call_operand.vmem [shape: bf16[128,64], index: 1, kind: output, shape index: {}]  }
   0x1   :  { %v607_v0 = vld [vmem:[%s1539_s0] sm:$0xff]   ;;  %v1018_v35 = vld [vmem:[%s1539_s0 + $0x8] sm:$0xff]  }
   0x2   :  { %v901_v1 = vld [vmem:[%s1539_s0 + $0x40] sm:$0xff]   ;;  %v608_v3 = vunpack.c.l.bf16 %v607_v0  ;;  %v609_v19 = vunpack.c.h.bf16 %v607_v0  ;;  %v1023_v36 = vld [vmem:[%s1539_s0 + $0x48] sm:$0xff]   ;;  %v612_v49 = vunpack.c.l.bf16 %v1018_v35 }
   0x3   :  { %v909_v2 = vld [vmem:[%s1539_s0 + $0x80] sm:$0xff]   ;;  %v640_v4 = vunpack.c.l.bf16 %v901_v1  ;;  %v641_v20 = vunpack.c.h.bf16 %v901_v1  ;;  %v910_v41 = vld [vmem:[%s1539_s0 + $0x88] sm:$0xff]   ;;  %v644_v50 = vunpack.c.l.bf16 %v1023_v36 }
   0x4   :  { %v672_v5 = vunpack.c.l.bf16 %v909_v2  ;;  %v917_v6 = vld [vmem:[%s1539_s0 + $0xc0] sm:$0xff]   ;;  %v297_v16 = vsel %vm296_vm0, %v608_v3, -inf  ;;  %v673_v25 = vunpack.c.h.bf16 %v909_v2  ;;  %v314_v32 = vsel %vm296_vm0, %v609_v19, -inf  ;;  %v1031_v42 = vld [vmem:[%s1539_s0 + $0xc8] sm:$0xff]  }
   0x5   :  { %v925_v7 = vld [vmem:[%s1539_s0 + $0x100] sm:$0xff]   ;;  %v704_v9 = vunpack.c.l.bf16 %v917_v6  ;;  %v298_v17 = vsel %vm296_vm0, %v640_v4, -inf  ;;  %v705_v26 = vunpack.c.h.bf16 %v917_v6  ;;  %v315_v33 = vsel %vm296_vm0, %v641_v20, -inf  ;;  %v1041_v51 = vld [vmem:[%s1539_s0 + $0x108] sm:$0xff]  }
   0x6   :  { %v933_v8 = vld [vmem:[%s1539_s0 + $0x140] sm:$0xff]   ;;  %v736_v12 = vunpack.c.l.bf16 %v925_v7  ;;  %v300_v18 = vsel %vm296_vm0, %v672_v5, -inf  ;;  %v299_v22 = vmax.f32 %v297_v16, %v298_v17  ;;  %v737_v31 = vunpack.c.h.bf16 %v925_v7  ;;  %v1051_v60 = vld [vmem:[%s1539_s0 + $0x148] sm:$0xff]  }
   0x7   :  { %v941_v10 = vld [vmem:[%s1539_s0 + $0x180] sm:$0xff]   ;;  %v768_v13 = vunpack.c.l.bf16 %v933_v8  ;;  %v302_v24 = vsel %vm296_vm0, %v704_v9, -inf  ;;  %v317_v34 = vsel %vm296_vm0, %v673_v25, -inf  ;;  %v769_v38 = vunpack.c.h.bf16 %v933_v8  ;;  %v1056_v61 = vld [vmem:[%s1539_s0 + $0x188] sm:$0xff]  }
   0x8   :  { %v949_v11 = vld [vmem:[%s1539_s0 + $0x1c0] sm:$0xff]   ;;  %v800_v14 = vunpack.c.l.bf16 %v941_v10  ;;  %v301_v27 = vmax.f32 %v299_v22, %v300_v18  ;;  %v304_v28 = vsel %vm296_vm0, %v736_v12, -inf  ;;  %v801_v39 = vunpack.c.h.bf16 %v941_v10  ;;  %v1061_v62 = vld [vmem:[%s1539_s0 + $0x1c8] sm:$0xff]  }
   0x9   :  { %v1002_v15 = vld [vmem:[%s1539_s0 + $0x200] sm:$0xff]   ;;  %v832_v21 = vunpack.c.l.bf16 %v949_v11  ;;  %v306_v29 = vsel %vm296_vm0, %v768_v13, -inf  ;;  %v316_v40 = vmax.f32 %v314_v32, %v315_v33  ;;  %v833_v45 = vunpack.c.h.bf16 %v949_v11  ;;  %v1074_v10 = vld [vmem:[%s1539_s0 + $0x208] sm:$0xff]   ;;  %v1090_v32 = vld [vmem:[%s1539_s0 + $0x10] sm:$0xff]  }
   0xa   :  { %v864_v23 = vunpack.c.l.bf16 %v1002_v15  ;;  %v308_v30 = vsel %vm296_vm0, %v800_v14, -inf  ;;  %v303_v37 = vmax.f32 %v301_v27, %v302_v24  ;;  %v319_v46 = vsel %vm296_vm0, %v705_v26, -inf }
   0xb   :  { %v310_v43 = vsel %vm296_vm0, %v832_v21, -inf  ;;  %v318_v48 = vmax.f32 %v316_v40, %v317_v34  ;;  %v865_v52 = vunpack.c.h.bf16 %v1002_v15  ;;  %v321_v53 = vsel %vm296_vm0, %v737_v31, -inf }
   0xc   :  { %v312_v44 = vsel %vm296_vm0, %v864_v23, -inf  ;;  %v305_v47 = vmax.f32 %v303_v37, %v304_v28  ;;  %v676_v54 = vunpack.c.l.bf16 %v910_v41  ;;  %v708_v55 = vunpack.c.l.bf16 %v1031_v42  ;;  %v903_v37 = vld [vmem:[%s1539_s0 + $0x50] sm:$0xff]  }
   0xd   :  { %v320_v57 = vmax.f32 %v318_v48, %v319_v46  ;;  %v323_v58 = vsel %vm296_vm0, %v769_v38, -inf  ;;  %v325_v59 = vsel %vm296_vm0, %v801_v39, -inf  ;;  %v740_v63 = vunpack.c.l.bf16 %v1041_v51 }
   0xe   :  { %v307_v56 = vmax.f32 %v305_v47, %v306_v29  ;;  %v331_v0 = vsel %vm296_vm0, %v612_v49, -inf  ;;  %v332_v1 = vsel %vm296_vm0, %v644_v50, -inf  ;;  %v334_v2 = vsel %vm296_vm0, %v676_v54, -inf }
   0xf   :  { %v322_v4 = vmax.f32 %v320_v57, %v321_v53  ;;  %v327_v5 = vsel %vm296_vm0, %v833_v45, -inf  ;;  %v333_v6 = vmax.f32 %v331_v0, %v332_v1  ;;  %v772_v7 = vunpack.c.l.bf16 %v1051_v60  ;;  %v1142_v0 = vld [vmem:[%s1539_s0 + $0x1d0] sm:$0xff]  }
  0x10   :  { %v309_v3 = vmax.f32 %v307_v56, %v308_v30  ;;  %v804_v8 = vunpack.c.l.bf16 %v1056_v61  ;;  %v836_v9 = vunpack.c.l.bf16 %v1061_v62  ;;  %v336_v11 = vsel %vm296_vm0, %v708_v55, -inf }
  0x11   :  { %v324_v13 = vmax.f32 %v322_v4, %v323_v58  ;;  %v329_v14 = vsel %vm296_vm0, %v865_v52, -inf  ;;  %v335_v15 = vmax.f32 %v333_v6, %v334_v2  ;;  %v338_v16 = vsel %vm296_vm0, %v740_v63, -inf  ;;  %v1119_v52 = vld [vmem:[%s1539_s0 + $0x110] sm:$0xff]  }
  0x12   :  { %v311_v12 = vmax.f32 %v309_v3, %v310_v43  ;;  %v613_v17 = vunpack.c.h.bf16 %v1018_v35  ;;  %v645_v18 = vunpack.c.h.bf16 %v1023_v36  ;;  %v677_v19 = vunpack.c.h.bf16 %v910_v41  ;;  %v1110_v43 = vld [vmem:[%s1539_s0 + $0xd0] sm:$0xff]  }
  0x13   :  { %v326_v21 = vmax.f32 %v324_v13, %v325_v59  ;;  %v868_v22 = vunpack.c.l.bf16 %v1074_v10  ;;  %v337_v23 = vmax.f32 %v335_v15, %v336_v11  ;;  %v340_v24 = vsel %vm296_vm0, %v772_v7, -inf  ;;  %v959_v11 = vld [vmem:[%s1539_s0 + $0x210] sm:$0xff]  }
  0x14   :  { %v313_v20 = vmax.f32 %v311_v12, %v312_v44  ;;  %v342_v25 = vsel %vm296_vm0, %v804_v8, -inf  ;;  %v344_v26 = vsel %vm296_vm0, %v836_v9, -inf  ;;  %v709_v27 = vunpack.c.h.bf16 %v1031_v42  ;;  %v911_v42 = vld [vmem:[%s1539_s0 + $0x90] sm:$0xff]  }
  0x15   :  { %v328_v29 = vmax.f32 %v326_v21, %v327_v5  ;;  %v339_v30 = vmax.f32 %v337_v23, %v338_v16  ;;  %v348_v31 = vsel %vm296_vm0, %v613_v17, -inf  ;;  %v741_v33 = vunpack.c.h.bf16 %v1041_v51 }
  0x16   :  { %v569_v28 = vpack.c.bf16 %v313_v20, %v313_v20  ;;  %v773_v34 = vunpack.c.h.bf16 %v1051_v60  ;;  %v349_v35 = vsel %vm296_vm0, %v645_v18, -inf  ;;  %v351_v36 = vsel %vm296_vm0, %v677_v19, -inf }
  0x17   :  { %v330_v38 = vmax.f32 %v328_v29, %v329_v14  ;;  %v341_v39 = vmax.f32 %v339_v30, %v340_v24  ;;  %v805_v40 = vunpack.c.h.bf16 %v1056_v61  ;;  %v350_v41 = vmax.f32 %v348_v31, %v349_v35  ;;  %v935_v61 = vld [vmem:[%s1539_s0 + $0x150] sm:$0xff]  }
  0x18   :  { %586 = vst.msk [vmem:[%s1540_s1] sm:$0xf] %vm585_vm1, %v569_v28  ;;  %v346_v44 = vsel %vm296_vm0, %v868_v22, -inf  ;;  %v837_v45 = vunpack.c.h.bf16 %v1061_v62  ;;  %v353_v46 = vsel %vm296_vm0, %v709_v27, -inf  ;;  %v616_v47 = vunpack.c.l.bf16 %v1090_v32  ;;  %v1136_v62 = vld [vmem:[%s1539_s0 + $0x190] sm:$0xff]  }
  0x19   :  { %v570_v48 = vpack.c.bf16 %v330_v38, %v330_v38  ;;  %v343_v49 = vmax.f32 %v341_v39, %v342_v25  ;;  %v352_v50 = vmax.f32 %v350_v41, %v351_v36  ;;  %v648_v51 = vunpack.c.l.bf16 %v903_v37  ;;  %v912_v39 = vld [vmem:[%s1539_s0 + $0x98] sm:$0xff]  }
  0x1a   :  { %v869_v53 = vunpack.c.h.bf16 %v1074_v10  ;;  %v355_v54 = vsel %vm296_vm0, %v741_v33, -inf  ;;  %v680_v55 = vunpack.c.l.bf16 %v911_v42  ;;  %v712_v56 = vunpack.c.l.bf16 %v1110_v43  ;;  %v896_v33 = vld [vmem:[%s1539_s0 + $0x18] sm:$0xff]  }
  0x1b   :  { %587 = vst.msk [vmem:[%s1540_s1 + $0x4] sm:$0xf] %vm585_vm1, %v570_v48  ;;  %v345_v57 = vmax.f32 %v343_v49, %v344_v26  ;;  %v354_v58 = vmax.f32 %v352_v50, %v353_v46  ;;  %v357_v59 = vsel %vm296_vm0, %v773_v34, -inf  ;;  %v359_v60 = vsel %vm296_vm0, %v805_v40, -inf  ;;  %v904_v34 = vld [vmem:[%s1539_s0 + $0x58] sm:$0xff]  }
  0x1c   :  { %v744_v63 = vunpack.c.l.bf16 %v1119_v52  ;;  %v365_v1 = vsel %vm296_vm0, %v616_v47, -inf  ;;  %v366_v2 = vsel %vm296_vm0, %v648_v51, -inf  ;;  %v368_v3 = vsel %vm296_vm0, %v680_v55, -inf }
  0x1d   :  { %v347_v4 = vmax.f32 %v345_v57, %v346_v44  ;;  %v356_v5 = vmax.f32 %v354_v58, %v355_v54  ;;  %v361_v6 = vsel %vm296_vm0, %v837_v45, -inf  ;;  %v367_v7 = vmax.f32 %v365_v1, %v366_v2  ;;  %v1184_v44 = vld [vmem:[%s1539_s0 + $0xd8] sm:$0xff]  }
  0x1e   :  { %v363_v8 = vsel %vm296_vm0, %v869_v53, -inf  ;;  %v776_v9 = vunpack.c.l.bf16 %v935_v61  ;;  %v808_v10 = vunpack.c.l.bf16 %v1136_v62  ;;  %v370_v12 = vsel %vm296_vm0, %v712_v56, -inf  ;;  %v928_v53 = vld [vmem:[%s1539_s0 + $0x118] sm:$0xff]  }
  0x1f   :  { %v571_v13 = vpack.c.bf16 %v347_v4, %v347_v4  ;;  %v358_v14 = vmax.f32 %v356_v5, %v357_v59  ;;  %v840_v15 = vunpack.c.l.bf16 %v1142_v0  ;;  %v369_v16 = vmax.f32 %v367_v7, %v368_v3  ;;  %v1196_v58 = vld [vmem:[%s1539_s0 + $0x158] sm:$0xff]  }
  0x20   :  { %v372_v17 = vsel %vm296_vm0, %v744_v63, -inf  ;;  %v617_v18 = vunpack.c.h.bf16 %v1090_v32  ;;  %v649_v19 = vunpack.c.h.bf16 %v903_v37  ;;  %v681_v20 = vunpack.c.h.bf16 %v911_v42  ;;  %v1201_v59 = vld [vmem:[%s1539_s0 + $0x198] sm:$0xff]  }
  0x21   :  { %588 = vst.msk [vmem:[%s1540_s1 + $0x8] sm:$0xf] %vm585_vm1, %v571_v13  ;;  %v360_v21 = vmax.f32 %v358_v14, %v359_v60  ;;  %v872_v22 = vunpack.c.l.bf16 %v959_v11  ;;  %v371_v23 = vmax.f32 %v369_v16, %v370_v12  ;;  %v713_v24 = vunpack.c.h.bf16 %v1110_v43  ;;  %v1212_v63 = vld [vmem:[%s1539_s0 + $0x1d8] sm:$0xff]  }
  0x22   :  { %v374_v25 = vsel %vm296_vm0, %v776_v9, -inf  ;;  %v376_v26 = vsel %vm296_vm0, %v808_v10, -inf  ;;  %v745_v27 = vunpack.c.h.bf16 %v1119_v52  ;;  %v382_v28 = vsel %vm296_vm0, %v617_v18, -inf  ;;  %v1224_v12 = vld [vmem:[%s1539_s0 + $0x218] sm:$0xff]  }
  0x23   :  { %v362_v29 = vmax.f32 %v360_v21, %v361_v6  ;;  %v373_v30 = vmax.f32 %v371_v23, %v372_v17  ;;  %v383_v31 = vsel %vm296_vm0, %v649_v19, -inf  ;;  %v385_v32 = vsel %vm296_vm0, %v681_v20, -inf }
  0x24   :  { %v378_v35 = vsel %vm296_vm0, %v840_v15, -inf  ;;  %v777_v36 = vunpack.c.h.bf16 %v935_v61  ;;  %v809_v37 = vunpack.c.h.bf16 %v1136_v62  ;;  %v384_v38 = vmax.f32 %v382_v28, %v383_v31 }
  0x25   :  { %v364_v40 = vmax.f32 %v362_v29, %v363_v8  ;;  %v375_v41 = vmax.f32 %v373_v30, %v374_v25  ;;  %v841_v42 = vunpack.c.h.bf16 %v1142_v0  ;;  %v387_v43 = vsel %vm296_vm0, %v713_v24, -inf }
  0x26   :  { %v873_v45 = vunpack.c.h.bf16 %v959_v11  ;;  %v386_v46 = vmax.f32 %v384_v38, %v385_v32  ;;  %v620_v47 = vunpack.c.l.bf16 %v896_v33  ;;  %v652_v48 = vunpack.c.l.bf16 %v904_v34 }
  0x27   :  { %v572_v49 = vpack.c.bf16 %v364_v40, %v364_v40  ;;  %v377_v50 = vmax.f32 %v375_v41, %v376_v26  ;;  %v389_v51 = vsel %vm296_vm0, %v745_v27, -inf  ;;  %v684_v52 = vunpack.c.l.bf16 %v912_v39  ;;  %v1255_v41 = vld [vmem:[%s1539_s0 + $0xe0] sm:$0xff]  }
  0x28   :  { %v380_v54 = vsel %vm296_vm0, %v872_v22, -inf  ;;  %v388_v55 = vmax.f32 %v386_v46, %v387_v43  ;;  %v391_v56 = vsel %vm296_vm0, %v777_v36, -inf  ;;  %v716_v57 = vunpack.c.l.bf16 %v1184_v44  ;;  %v913_v36 = vld [vmem:[%s1539_s0 + $0xa0] sm:$0xff]  }
  0x29   :  { %589 = vst.msk [vmem:[%s1540_s1 + $0xc] sm:$0xf] %vm585_vm1, %v572_v49  ;;  %v379_v60 = vmax.f32 %v377_v50, %v378_v35  ;;  %v393_v61 = vsel %vm296_vm0, %v809_v37, -inf  ;;  %v395_v62 = vsel %vm296_vm0, %v841_v42, -inf  ;;  %v399_v0 = vsel %vm296_vm0, %v620_v47, -inf  ;;  %v905_v35 = vld [vmem:[%s1539_s0 + $0x60] sm:$0xff]  }
  0x2a   :  { %v390_v1 = vmax.f32 %v388_v55, %v389_v51  ;;  %v748_v2 = vunpack.c.l.bf16 %v928_v53  ;;  %v400_v3 = vsel %vm296_vm0, %v652_v48, -inf  ;;  %v402_v4 = vsel %vm296_vm0, %v684_v52, -inf  ;;  %v1262_v46 = vld [vmem:[%s1539_s0 + $0x120] sm:$0xff]  }
  0x2b   :  { %v381_v5 = vmax.f32 %v379_v60, %v380_v54  ;;  %v397_v6 = vsel %vm296_vm0, %v873_v45, -inf  ;;  %v780_v7 = vunpack.c.l.bf16 %v1196_v58  ;;  %v401_v8 = vmax.f32 %v399_v0, %v400_v3  ;;  %v1269_v55 = vld [vmem:[%s1539_s0 + $0x160] sm:$0xff]  }
  0x2c   :  { %v392_v9 = vmax.f32 %v390_v1, %v391_v56  ;;  %v812_v10 = vunpack.c.l.bf16 %v1201_v59  ;;  %v844_v11 = vunpack.c.l.bf16 %v1212_v63  ;;  %v404_v13 = vsel %vm296_vm0, %v716_v57, -inf  ;;  %v1282_v60 = vld [vmem:[%s1539_s0 + $0x1a0] sm:$0xff]  }
  0x2d   :  { %v573_v14 = vpack.c.bf16 %v381_v5, %v381_v5  ;;  %v403_v15 = vmax.f32 %v401_v8, %v402_v4  ;;  %v621_v16 = vunpack.c.h.bf16 %v896_v33  ;;  %v653_v17 = vunpack.c.h.bf16 %v904_v34  ;;  %v897_v34 = vld [vmem:[%s1539_s0 + $0x20] sm:$0xff]  }
  0x2e   :  { %v394_v18 = vmax.f32 %v392_v9, %v393_v61  ;;  %v406_v19 = vsel %vm296_vm0, %v748_v2, -inf  ;;  %v685_v20 = vunpack.c.h.bf16 %v912_v39  ;;  %v717_v21 = vunpack.c.h.bf16 %v1184_v44  ;;  %v961_v9 = vld [vmem:[%s1539_s0 + $0x220] sm:$0xff]  }
  0x2f   :  { %590 = vst.msk [vmem:[%s1540_s1 + $0x10] sm:$0xf] %vm585_vm1, %v573_v14  ;;  %v876_v22 = vunpack.c.l.bf16 %v1224_v12  ;;  %v405_v23 = vmax.f32 %v403_v15, %v404_v13  ;;  %v408_v24 = vsel %vm296_vm0, %v780_v7, -inf  ;;  %v749_v25 = vunpack.c.h.bf16 %v928_v53 }
  0x30   :  { %v396_v26 = vmax.f32 %v394_v18, %v395_v62  ;;  %v410_v27 = vsel %vm296_vm0, %v812_v10, -inf  ;;  %v416_v28 = vsel %vm296_vm0, %v621_v16, -inf  ;;  %v417_v29 = vsel %vm296_vm0, %v653_v17, -inf }
  0x31   :  { %v407_v30 = vmax.f32 %v405_v23, %v406_v19  ;;  %v412_v31 = vsel %vm296_vm0, %v844_v11, -inf  ;;  %v418_v32 = vmax.f32 %v416_v28, %v417_v29  ;;  %v419_v33 = vsel %vm296_vm0, %v685_v20, -inf }
  0x32   :  { %v398_v37 = vmax.f32 %v396_v26, %v397_v6  ;;  %v781_v38 = vunpack.c.h.bf16 %v1196_v58  ;;  %v813_v39 = vunpack.c.h.bf16 %v1201_v59  ;;  %v421_v40 = vsel %vm296_vm0, %v717_v21, -inf }
  0x33   :  { %v409_v42 = vmax.f32 %v407_v30, %v408_v24  ;;  %v845_v43 = vunpack.c.h.bf16 %v1212_v63  ;;  %v420_v44 = vmax.f32 %v418_v32, %v419_v33  ;;  %v423_v45 = vsel %vm296_vm0, %v749_v25, -inf  ;;  %v1287_v63 = vld [vmem:[%s1539_s0 + $0x1e0] sm:$0xff]  }
  0x34   :  { %v574_v47 = vpack.c.bf16 %v398_v37, %v398_v37  ;;  %v624_v48 = vunpack.c.l.bf16 %v897_v34  ;;  %v656_v49 = vunpack.c.l.bf16 %v905_v35  ;;  %v688_v50 = vunpack.c.l.bf16 %v913_v36  ;;  %v914_v37 = vld [vmem:[%s1539_s0 + $0xa8] sm:$0xff]  }
  0x35   :  { %v411_v51 = vmax.f32 %v409_v42, %v410_v27  ;;  %v414_v52 = vsel %vm296_vm0, %v876_v22, -inf  ;;  %v422_v53 = vmax.f32 %v420_v44, %v421_v40  ;;  %v720_v54 = vunpack.c.l.bf16 %v1255_v41  ;;  %v1330_v42 = vld [vmem:[%s1539_s0 + $0xe8] sm:$0xff]  }
  0x36   :  { %591 = vst.msk [vmem:[%s1540_s1 + $0x14] sm:$0xf] %vm585_vm1, %v574_v47  ;;  %v877_v56 = vunpack.c.h.bf16 %v1224_v12  ;;  %v425_v57 = vsel %vm296_vm0, %v781_v38, -inf  ;;  %v427_v58 = vsel %vm296_vm0, %v813_v39, -inf  ;;  %v752_v59 = vunpack.c.l.bf16 %v1262_v46 }
  0x37   :  { %v413_v61 = vmax.f32 %v411_v51, %v412_v31  ;;  %v424_v62 = vmax.f32 %v422_v53, %v423_v45  ;;  %v433_v0 = vsel %vm296_vm0, %v624_v48, -inf  ;;  %v434_v1 = vsel %vm296_vm0, %v656_v49, -inf  ;;  %v898_v31 = vld [vmem:[%s1539_s0 + $0x28] sm:$0xff]  }
  0x38   :  { %v429_v2 = vsel %vm296_vm0, %v845_v43, -inf  ;;  %v784_v3 = vunpack.c.l.bf16 %v1269_v55  ;;  %v435_v4 = vmax.f32 %v433_v0, %v434_v1  ;;  %v436_v5 = vsel %vm296_vm0, %v688_v50, -inf  ;;  %v930_v51 = vld [vmem:[%s1539_s0 + $0x128] sm:$0xff]  }
  0x39   :  { %v415_v6 = vmax.f32 %v413_v61, %v414_v52  ;;  %v426_v7 = vmax.f32 %v424_v62, %v425_v57  ;;  %v816_v8 = vunpack.c.l.bf16 %v1282_v60  ;;  %v438_v10 = vsel %vm296_vm0, %v720_v54, -inf  ;;  %v1358_v61 = vld [vmem:[%s1539_s0 + $0x1e8] sm:$0xff]  }
  0x3a   :  { %v848_v11 = vunpack.c.l.bf16 %v1287_v63  ;;  %v437_v12 = vmax.f32 %v435_v4, %v436_v5  ;;  %v440_v13 = vsel %vm296_vm0, %v752_v59, -inf  ;;  %v625_v14 = vunpack.c.h.bf16 %v897_v34 }
  0x3b   :  { %v575_v15 = vpack.c.bf16 %v415_v6, %v415_v6  ;;  %v428_v16 = vmax.f32 %v426_v7, %v427_v58  ;;  %v657_v17 = vunpack.c.h.bf16 %v905_v35  ;;  %v689_v18 = vunpack.c.h.bf16 %v913_v36  ;;  %v906_v36 = vld [vmem:[%s1539_s0 + $0x68] sm:$0xff]  }
  0x3c   :  { %v431_v19 = vsel %vm296_vm0, %v877_v56, -inf  ;;  %v880_v20 = vunpack.c.l.bf16 %v961_v9  ;;  %v439_v21 = vmax.f32 %v437_v12, %v438_v10  ;;  %v721_v22 = vunpack.c.h.bf16 %v1255_v41  ;;  %v1346_v56 = vld [vmem:[%s1539_s0 + $0x168] sm:$0xff]  }
  0x3d   :  { %592 = vst.msk [vmem:[%s1540_s1 + $0x18] sm:$0xf] %vm585_vm1, %v575_v15  ;;  %v430_v23 = vmax.f32 %v428_v16, %v429_v2  ;;  %v442_v24 = vsel %vm296_vm0, %v784_v3, -inf  ;;  %v444_v25 = vsel %vm296_vm0, %v816_v8, -inf  ;;  %v753_v26 = vunpack.c.h.bf16 %v1262_v46  ;;  %v1370_v10 = vld [vmem:[%s1539_s0 + $0x228] sm:$0xff]  }
  0x3e   :  { %v441_v27 = vmax.f32 %v439_v21, %v440_v13  ;;  %v450_v28 = vsel %vm296_vm0, %v625_v14, -inf  ;;  %v451_v29 = vsel %vm296_vm0, %v657_v17, -inf  ;;  %v453_v30 = vsel %vm296_vm0, %v689_v18, -inf }
  0x3f   :  { %v432_v32 = vmax.f32 %v430_v23, %v431_v19  ;;  %v446_v33 = vsel %vm296_vm0, %v848_v11, -inf  ;;  %v785_v34 = vunpack.c.h.bf16 %v1269_v55  ;;  %v452_v35 = vmax.f32 %v450_v28, %v451_v29 }
  0x40   :  { %v443_v38 = vmax.f32 %v441_v27, %v442_v24  ;;  %v817_v39 = vunpack.c.h.bf16 %v1282_v60  ;;  %v849_v40 = vunpack.c.h.bf16 %v1287_v63  ;;  %v455_v41 = vsel %vm296_vm0, %v721_v22, -inf  ;;  %v1353_v60 = vld [vmem:[%s1539_s0 + $0x1a8] sm:$0xff]  }
  0x41   :  { %v576_v43 = vpack.c.bf16 %v432_v32, %v432_v32  ;;  %v881_v44 = vunpack.c.h.bf16 %v961_v9  ;;  %v454_v45 = vmax.f32 %v452_v35, %v453_v30  ;;  %v628_v46 = vunpack.c.l.bf16 %v898_v31  ;;  %v899_v32 = vld [vmem:[%s1539_s0 + $0x30] sm:$0xff]  }
  0x42   :  { %v445_v47 = vmax.f32 %v443_v38, %v444_v25  ;;  %v457_v48 = vsel %vm296_vm0, %v753_v26, -inf  ;;  %v660_v49 = vunpack.c.l.bf16 %v906_v36  ;;  %v692_v50 = vunpack.c.l.bf16 %v914_v37 }
  0x43   :  { %593 = vst.msk [vmem:[%s1540_s1 + $0x1c] sm:$0xf] %vm585_vm1, %v576_v43  ;;  %v448_v52 = vsel %vm296_vm0, %v880_v20, -inf  ;;  %v456_v53 = vmax.f32 %v454_v45, %v455_v41  ;;  %v459_v54 = vsel %vm296_vm0, %v785_v34, -inf  ;;  %v724_v55 = vunpack.c.l.bf16 %v1330_v42  ;;  %v915_v34 = vld [vmem:[%s1539_s0 + $0xb0] sm:$0xff]  }
  0x44   :  { %v447_v57 = vmax.f32 %v445_v47, %v446_v33  ;;  %v461_v58 = vsel %vm296_vm0, %v817_v39, -inf  ;;  %v463_v59 = vsel %vm296_vm0, %v849_v40, -inf  ;;  %v467_v62 = vsel %vm296_vm0, %v628_v46, -inf  ;;  %v907_v33 = vld [vmem:[%s1539_s0 + $0x70] sm:$0xff]  }
  0x45   :  { %v458_v63 = vmax.f32 %v456_v53, %v457_v48  ;;  %v756_v0 = vunpack.c.l.bf16 %v930_v51  ;;  %v468_v1 = vsel %vm296_vm0, %v660_v49, -inf  ;;  %v470_v2 = vsel %vm296_vm0, %v692_v50, -inf  ;;  %v1401_v39 = vld [vmem:[%s1539_s0 + $0xf0] sm:$0xff]  }
  0x46   :  { %v449_v3 = vmax.f32 %v447_v57, %v448_v52  ;;  %v465_v4 = vsel %vm296_vm0, %v881_v44, -inf  ;;  %v788_v5 = vunpack.c.l.bf16 %v1346_v56  ;;  %v469_v6 = vmax.f32 %v467_v62, %v468_v1  ;;  %v1408_v44 = vld [vmem:[%s1539_s0 + $0x130] sm:$0xff]  }
  0x47   :  { %v460_v7 = vmax.f32 %v458_v63, %v459_v54  ;;  %v820_v8 = vunpack.c.l.bf16 %v1353_v60  ;;  %v852_v9 = vunpack.c.l.bf16 %v1358_v61  ;;  %v472_v11 = vsel %vm296_vm0, %v724_v55, -inf }
  0x48   :  { %v577_v12 = vpack.c.bf16 %v449_v3, %v449_v3  ;;  %v471_v13 = vmax.f32 %v469_v6, %v470_v2  ;;  %v629_v14 = vunpack.c.h.bf16 %v898_v31  ;;  %v661_v15 = vunpack.c.h.bf16 %v906_v36 }
  0x49   :  { %v462_v16 = vmax.f32 %v460_v7, %v461_v58  ;;  %v474_v17 = vsel %vm296_vm0, %v756_v0, -inf  ;;  %v693_v18 = vunpack.c.h.bf16 %v914_v37  ;;  %v725_v19 = vunpack.c.h.bf16 %v1330_v42 }
  0x4a   :  { %594 = vst.msk [vmem:[%s1540_s1 + $0x20] sm:$0xf] %vm585_vm1, %v577_v12  ;;  %v884_v20 = vunpack.c.l.bf16 %v1370_v10  ;;  %v473_v21 = vmax.f32 %v471_v13, %v472_v11  ;;  %v476_v22 = vsel %vm296_vm0, %v788_v5, -inf  ;;  %v757_v23 = vunpack.c.h.bf16 %v930_v51  ;;  %v1438_v5 = vld [vmem:[%s1539_s0 + $0x1f0] sm:$0xff]  }
  0x4b   :  { %v464_v24 = vmax.f32 %v462_v16, %v463_v59  ;;  %v478_v25 = vsel %vm296_vm0, %v820_v8, -inf  ;;  %v484_v26 = vsel %vm296_vm0, %v629_v14, -inf  ;;  %v485_v27 = vsel %vm296_vm0, %v661_v15, -inf  ;;  %v1427_v59 = vld [vmem:[%s1539_s0 + $0x1b0] sm:$0xff]  }
  0x4c   :  { %v475_v28 = vmax.f32 %v473_v21, %v474_v17  ;;  %v480_v29 = vsel %vm296_vm0, %v852_v9, -inf  ;;  %v486_v30 = vmax.f32 %v484_v26, %v485_v27  ;;  %v487_v31 = vsel %vm296_vm0, %v693_v18, -inf  ;;  %v1448_v17 = vld [vmem:[%s1539_s0 + $0x230] sm:$0xff]   ;;  %v900_v27 = vld [vmem:[%s1539_s0 + $0x38] sm:$0xff]  }
  0x4d   :  { %v466_v35 = vmax.f32 %v464_v24, %v465_v4  ;;  %v789_v36 = vunpack.c.h.bf16 %v1346_v56  ;;  %v821_v37 = vunpack.c.h.bf16 %v1353_v60  ;;  %v489_v38 = vsel %vm296_vm0, %v725_v19, -inf  ;;  %v1422_v56 = vld [vmem:[%s1539_s0 + $0x170] sm:$0xff]  }
  0x4e   :  { %v477_v40 = vmax.f32 %v475_v28, %v476_v22  ;;  %v853_v41 = vunpack.c.h.bf16 %v1358_v61  ;;  %v488_v42 = vmax.f32 %v486_v30, %v487_v31  ;;  %v491_v43 = vsel %vm296_vm0, %v757_v23, -inf }
  0x4f   :  { %v578_v45 = vpack.c.bf16 %v466_v35, %v466_v35  ;;  %v632_v46 = vunpack.c.l.bf16 %v899_v32  ;;  %v664_v47 = vunpack.c.l.bf16 %v907_v33  ;;  %v696_v48 = vunpack.c.l.bf16 %v915_v34 }
  0x50   :  { %v479_v49 = vmax.f32 %v477_v40, %v478_v25  ;;  %v490_v50 = vmax.f32 %v488_v42, %v489_v38  ;;  %v728_v51 = vunpack.c.l.bf16 %v1401_v39  ;;  %v482_v52 = vsel %vm296_vm0, %v884_v20, -inf  ;;  %v924_v38 = vld [vmem:[%s1539_s0 + $0xf8] sm:$0xff]  }
  0x51   :  { %595 = vst.msk [vmem:[%s1540_s1 + $0x24] sm:$0xf] %vm585_vm1, %v578_v45  ;;  %v885_v53 = vunpack.c.h.bf16 %v1370_v10  ;;  %v493_v54 = vsel %vm296_vm0, %v789_v36, -inf  ;;  %v760_v55 = vunpack.c.l.bf16 %v1408_v44  ;;  %v501_v60 = vsel %vm296_vm0, %v632_v46, -inf }
  0x52   :  { %v481_v57 = vmax.f32 %v479_v49, %v480_v29  ;;  %v492_v58 = vmax.f32 %v490_v50, %v491_v43  ;;  %v502_v61 = vsel %vm296_vm0, %v664_v47, -inf  ;;  %v495_v62 = vsel %vm296_vm0, %v821_v37, -inf  ;;  %v932_v47 = vld [vmem:[%s1539_s0 + $0x138] sm:$0xff]  }
  0x53   :  { %v497_v63 = vsel %vm296_vm0, %v853_v41, -inf  ;;  %v503_v0 = vmax.f32 %v501_v60, %v502_v61  ;;  %v504_v1 = vsel %vm296_vm0, %v696_v48, -inf  ;;  %v792_v4 = vunpack.c.l.bf16 %v1422_v56 }
  0x54   :  { %v483_v2 = vmax.f32 %v481_v57, %v482_v52  ;;  %v494_v3 = vmax.f32 %v492_v58, %v493_v54  ;;  %v506_v6 = vsel %vm296_vm0, %v728_v51, -inf  ;;  %v824_v7 = vunpack.c.l.bf16 %v1427_v59  ;;  %v940_v52 = vld [vmem:[%s1539_s0 + $0x178] sm:$0xff]  }
  0x55   :  { %v505_v8 = vmax.f32 %v503_v0, %v504_v1  ;;  %v508_v9 = vsel %vm296_vm0, %v760_v55, -inf  ;;  %v633_v10 = vunpack.c.h.bf16 %v899_v32  ;;  %v665_v13 = vunpack.c.h.bf16 %v907_v33  ;;  %v908_v32 = vld [vmem:[%s1539_s0 + $0x78] sm:$0xff]  }
  0x56   :  { %v579_v11 = vpack.c.bf16 %v483_v2, %v483_v2  ;;  %v496_v12 = vmax.f32 %v494_v3, %v495_v62  ;;  %v697_v14 = vunpack.c.h.bf16 %v915_v34  ;;  %v499_v15 = vsel %vm296_vm0, %v885_v53, -inf  ;;  %v916_v33 = vld [vmem:[%s1539_s0 + $0xb8] sm:$0xff]  }
  0x57   :  { %v856_v16 = vunpack.c.l.bf16 %v1438_v5  ;;  %v507_v18 = vmax.f32 %v505_v8, %v506_v6  ;;  %v729_v19 = vunpack.c.h.bf16 %v1401_v39  ;;  %v510_v21 = vsel %vm296_vm0, %v792_v4, -inf }
  0x58   :  { %596 = vst.msk [vmem:[%s1540_s1 + $0x28] sm:$0xf] %vm585_vm1, %v579_v11  ;;  %v498_v20 = vmax.f32 %v496_v12, %v497_v63  ;;  %v761_v22 = vunpack.c.h.bf16 %v1408_v44  ;;  %v518_v24 = vsel %vm296_vm0, %v633_v10, -inf  ;;  %v519_v25 = vsel %vm296_vm0, %v665_v13, -inf  ;;  %v964_v12 = vld [vmem:[%s1539_s0 + $0x238] sm:$0xff]  }
  0x59   :  { %v509_v23 = vmax.f32 %v507_v18, %v508_v9  ;;  %v521_v26 = vsel %vm296_vm0, %v697_v14, -inf  ;;  %v888_v29 = vunpack.c.l.bf16 %v1448_v17  ;;  %v512_v30 = vsel %vm296_vm0, %v824_v7, -inf }
  0x5a   :  { %v500_v28 = vmax.f32 %v498_v20, %v499_v15  ;;  %v520_v31 = vmax.f32 %v518_v24, %v519_v25  ;;  %v514_v35 = vsel %vm296_vm0, %v856_v16, -inf  ;;  %v793_v36 = vunpack.c.h.bf16 %v1422_v56  ;;  %v948_v56 = vld [vmem:[%s1539_s0 + $0x1b8] sm:$0xff]  }
  0x5b   :  { %v511_v34 = vmax.f32 %v509_v23, %v510_v21  ;;  %v523_v37 = vsel %vm296_vm0, %v729_v19, -inf  ;;  %v825_v40 = vunpack.c.h.bf16 %v1427_v59  ;;  %v636_v42 = vunpack.c.l.bf16 %v900_v27 }
  0x5c   :  { %v580_v39 = vpack.c.bf16 %v500_v28, %v500_v28  ;;  %v522_v41 = vmax.f32 %v520_v31, %v521_v26  ;;  %v525_v44 = vsel %vm296_vm0, %v761_v22, -inf  ;;  %v668_v45 = vunpack.c.l.bf16 %v908_v32 }
  0x5d   :  { %v513_v43 = vmax.f32 %v511_v34, %v512_v30  ;;  %v700_v46 = vunpack.c.l.bf16 %v916_v33  ;;  %v516_v48 = vsel %vm296_vm0, %v888_v29, -inf  ;;  %v857_v49 = vunpack.c.h.bf16 %v1438_v5  ;;  %v956_v5 = vld [vmem:[%s1539_s0 + $0x1f8] sm:$0xff]  }
  0x5e   :  { %597 = vst.msk [vmem:[%s1540_s1 + $0x2c] sm:$0xf] %vm585_vm1, %v580_v39  ;;  %v524_v50 = vmax.f32 %v522_v41, %v523_v37  ;;  %v732_v51 = vunpack.c.l.bf16 %v924_v38  ;;  %v889_v54 = vunpack.c.h.bf16 %v1448_v17  ;;  %v527_v55 = vsel %vm296_vm0, %v793_v36, -inf }
  0x5f   :  { %v515_v53 = vmax.f32 %v513_v43, %v514_v35  ;;  %v535_v57 = vsel %vm296_vm0, %v636_v42, -inf  ;;  %v764_v59 = vunpack.c.l.bf16 %v932_v47  ;;  %v536_v60 = vsel %vm296_vm0, %v668_v45, -inf }
  0x60   :  { %v526_v58 = vmax.f32 %v524_v50, %v525_v44  ;;  %v538_v61 = vsel %vm296_vm0, %v700_v46, -inf  ;;  %v529_v63 = vsel %vm296_vm0, %v825_v40, -inf  ;;  %v796_v0 = vunpack.c.l.bf16 %v940_v52 }
  0x61   :  { %v517_v62 = vmax.f32 %v515_v53, %v516_v48  ;;  %v537_v1 = vmax.f32 %v535_v57, %v536_v60  ;;  %v531_v3 = vsel %vm296_vm0, %v857_v49, -inf  ;;  %v828_v4 = vunpack.c.l.bf16 %v948_v56 }
  0x62   :  { %v528_v2 = vmax.f32 %v526_v58, %v527_v55  ;;  %v540_v6 = vsel %vm296_vm0, %v732_v51, -inf  ;;  %v637_v9 = vunpack.c.h.bf16 %v900_v27  ;;  %v669_v10 = vunpack.c.h.bf16 %v908_v32 }
  0x63   :  { %v581_v7 = vpack.c.bf16 %v517_v62, %v517_v62  ;;  %v539_v8 = vmax.f32 %v537_v1, %v538_v61  ;;  %v542_v13 = vsel %vm296_vm0, %v764_v59, -inf  ;;  %v701_v14 = vunpack.c.h.bf16 %v916_v33 }
  0x64   :  { %v530_v11 = vmax.f32 %v528_v2, %v529_v63  ;;  %v733_v15 = vunpack.c.h.bf16 %v924_v38  ;;  %v533_v16 = vsel %vm296_vm0, %v889_v54, -inf  ;;  %v860_v17 = vunpack.c.l.bf16 %v956_v5 }
  0x65   :  { %598 = vst.msk [vmem:[%s1540_s1 + $0x30] sm:$0xf] %vm585_vm1, %v581_v7  ;;  %v541_v18 = vmax.f32 %v539_v8, %v540_v6  ;;  %v544_v19 = vsel %vm296_vm0, %v796_v0, -inf  ;;  %v765_v21 = vunpack.c.h.bf16 %v932_v47  ;;  %v552_v22 = vsel %vm296_vm0, %v637_v9, -inf }
  0x66   :  { %v532_v20 = vmax.f32 %v530_v11, %v531_v3  ;;  %v553_v23 = vsel %vm296_vm0, %v669_v10, -inf  ;;  %v892_v24 = vunpack.c.l.bf16 %v964_v12  ;;  %v555_v27 = vsel %vm296_vm0, %v701_v14, -inf }
  0x67   :  { %v543_v25 = vmax.f32 %v541_v18, %v542_v13  ;;  %v554_v26 = vmax.f32 %v552_v22, %v553_v23  ;;  %v546_v29 = vsel %vm296_vm0, %v828_v4, -inf  ;;  %v797_v30 = vunpack.c.h.bf16 %v940_v52 }
  0x68   :  { %v534_v28 = vmax.f32 %v532_v20, %v533_v16  ;;  %v557_v31 = vsel %vm296_vm0, %v733_v15, -inf  ;;  %v548_v35 = vsel %vm296_vm0, %v860_v17, -inf  ;;  %v829_v36 = vunpack.c.h.bf16 %v948_v56 }
  0x69   :  { %v545_v32 = vmax.f32 %v543_v25, %v544_v19  ;;  %v556_v33 = vmax.f32 %v554_v26, %v555_v27  ;;  %v559_v37 = vsel %vm296_vm0, %v765_v21, -inf  ;;  %v550_v40 = vsel %vm296_vm0, %v892_v24, -inf }
  0x6a   :  { %v582_v34 = vpack.c.bf16 %v534_v28, %v534_v28  ;;  %v861_v41 = vunpack.c.h.bf16 %v956_v5  ;;  %v561_v42 = vsel %vm296_vm0, %v797_v30, -inf  ;;  %v893_v45 = vunpack.c.h.bf16 %v964_v12 }
  0x6b   :  { %v547_v38 = vmax.f32 %v545_v32, %v546_v29  ;;  %v558_v39 = vmax.f32 %v556_v33, %v557_v31  ;;  %v563_v46 = vsel %vm296_vm0, %v829_v36, -inf }
  0x6c   :  { %599 = vst.msk [vmem:[%s1540_s1 + $0x34] sm:$0xf] %vm585_vm1, %v582_v34  ;;  %v565_v49 = vsel %vm296_vm0, %v861_v41, -inf  ;;  %v567_v52 = vsel %vm296_vm0, %v893_v45, -inf }
  0x6d   :  { %v549_v43 = vmax.f32 %v547_v38, %v548_v35  ;;  %v560_v44 = vmax.f32 %v558_v39, %v559_v37 }
  0x6f   :  { %v551_v47 = vmax.f32 %v549_v43, %v550_v40  ;;  %v562_v48 = vmax.f32 %v560_v44, %v561_v42 }
  0x71   :  { %v583_v50 = vpack.c.bf16 %v551_v47, %v551_v47  ;;  %v564_v51 = vmax.f32 %v562_v48, %v563_v46 }
  0x73   :  { %600 = vst.msk [vmem:[%s1540_s1 + $0x38] sm:$0xf] %vm585_vm1, %v583_v50  ;;  %v566_v53 = vmax.f32 %v564_v51, %v565_v49 }
  0x75   :  { %v568_v54 = vmax.f32 %v566_v53, %v567_v52 }
  0x77   :  { %v584_v55 = vpack.c.bf16 %v568_v54, %v568_v54 }
  0x79   :  { %601 = vst.msk [vmem:[%s1540_s1 + $0x3c] sm:$0xf] %vm585_vm1, %v584_v55 }

// kernel: densenet121_forward.128
= control target key start
LH: loop header
LB: loop body
LE: loop exit
PB: predicated region body
PF: predicated region fallthrough
CT: control target
= control target key end

     0   :  { %s1020_s1 = inlined_call_operand.vmem [shape: bf16[256,128], index: 1, kind: input, shape index: {}]   ;;  %s1021_s0 = inlined_call_operand.vmem [shape: bf16[128,256], index: 0, kind: input, shape index: {}]   ;;  %s1022_s2 = inlined_call_operand.vmem [shape: f32[1,256], index: 2, kind: input, shape index: {}]   ;;  %s1023_s3 = inlined_call_operand.vmem [shape: f32[1,256], index: 3, kind: input, shape index: {}]   ;;  %s1024_s4 = inlined_call_operand.vmem [shape: f32[1,128], index: 4, kind: input, shape index: {}]   ;;  %s1025_s5 = inlined_call_operand.vmem [shape: f32[1,128], index: 5, kind: input, shape index: {}]   ;;  %s1026_s6 = inlined_call_operand.vmem [shape: bf16[128,128], index: 6, kind: output, shape index: {}]  }
   0x1   :  { %v671_v0 = vld [vmem:[%s1020_s1 + $0x38] sm:$0xff]  ;;  %v670_v2 = vld [vmem:[%s1020_s1 + $0x30] sm:$0xff]  ;;  %v669_v4 = vld [vmem:[%s1020_s1 + $0x28] sm:$0xff] }
   0x2   :  { %v679_v1 = vld [vmem:[%s1020_s1 + $0x78] sm:$0xff]  ;;  %359 = vmatpush.bf16.msra.mxu0 %v671_v0  ;;  %727 = vmatpush.bf16.msra.mxu2 %v671_v0  ;;  %v678_v3 = vld [vmem:[%s1020_s1 + $0x70] sm:$0xff]  ;;  %v677_v5 = vld [vmem:[%s1020_s1 + $0x68] sm:$0xff] }
   0x3   :  { %408 = vmatpush.bf16.msra.mxu1 %v679_v1  ;;  %735 = vmatpush.bf16.msra.mxu3 %v679_v1  ;;  %v43_v6 = vld [vmem:[%s1021_s0] sm:$0xff]  ;;  %v44_v7 = vld [vmem:[%s1021_s0 + $0x8] sm:$0xff]  ;;  %v667_v22 = vld [vmem:[%s1020_s1 + $0x18] sm:$0xff] }
   0x4   :  { %v91_v8 = vld [vmem:[%s1022_s2] sm:$0x3]  ;;  %v52_v10 = vld [vmem:[%s1021_s0 + $0x48] sm:$0xff]  ;;  %v59_v13 = vunpack.c.l.bf16 %v43_v6  ;;  %v61_v14 = vunpack.c.l.bf16 %v44_v7  ;;  %v60_v19 = vunpack.c.h.bf16 %v43_v6  ;;  %v62_v20 = vunpack.c.h.bf16 %v44_v7  ;;  %v675_v25 = vld [vmem:[%s1020_s1 + $0x58] sm:$0xff] }
   0x5   :  { %v51_v9 = vld [vmem:[%s1021_s0 + $0x40] sm:$0xff]  ;;  %v819_v15 = vperm.slane %v91_v8, 0  ;;  %v77_v18 = vunpack.c.l.bf16 %v52_v10  ;;  %v824_v21 = vperm.slane %v91_v8, 1  ;;  %v78_v24 = vunpack.c.h.bf16 %v52_v10  ;;  %v666_v34 = vld [vmem:[%s1020_s1 + $0x10] sm:$0xff]  ;;  %v665_v44 = vld [vmem:[%s1020_s1 + $0x8] sm:$0xff] }
   0x6   :  { %360 = vmatpush.bf16.msra.mxu0 %v670_v2  ;;  %728 = vmatpush.bf16.msra.mxu2 %v670_v2  ;;  %v668_v11 = vld [vmem:[%s1020_s1 + $0x20] sm:$0xff]  ;;  %v75_v17 = vunpack.c.l.bf16 %v51_v9  ;;  %v76_v23 = vunpack.c.h.bf16 %v51_v9  ;;  %v674_v37 = vld [vmem:[%s1020_s1 + $0x50] sm:$0xff]  ;;  %v673_v47 = vld [vmem:[%s1020_s1 + $0x48] sm:$0xff] }
   0x7   :  { %409 = vmatpush.bf16.msra.mxu1 %v678_v3  ;;  %736 = vmatpush.bf16.msra.mxu3 %v678_v3  ;;  %v676_v12 = vld [vmem:[%s1020_s1 + $0x60] sm:$0xff]  ;;  %v97_v27 = vmul.f32 %v819_v15, %v59_v13  ;;  %v99_v28 = vmul.f32 %v819_v15, %v61_v14  ;;  %v115_v30 = vmul.f32 %v819_v15, %v77_v18  ;;  %v45_v54 = vld [vmem:[%s1021_s0 + $0x10] sm:$0xff]  ;;  %v46_v55 = vld [vmem:[%s1021_s0 + $0x18] sm:$0xff] }
   0x8   :  { %v129_v16 = vld [vmem:[%s1023_s3] sm:$0x3]  ;;  %v113_v29 = vmul.f32 %v819_v15, %v75_v17  ;;  %v98_v31 = vmul.f32 %v824_v21, %v60_v19  ;;  %v100_v32 = vmul.f32 %v824_v21, %v62_v20  ;;  %v114_v35 = vmul.f32 %v824_v21, %v76_v23  ;;  %v53_v59 = vld [vmem:[%s1021_s0 + $0x50] sm:$0xff]  ;;  %v54_v60 = vld [vmem:[%s1021_s0 + $0x58] sm:$0xff] }
   0x9   :  { %v832_v26 = vperm.slane %v129_v16, 0  ;;  %v840_v33 = vperm.slane %v129_v16, 1  ;;  %v116_v36 = vmul.f32 %v824_v21, %v78_v24  ;;  %v664_v56 = vld [vmem:[%s1020_s1] sm:$0xff]  ;;  %v63_v0 = vunpack.c.l.bf16 %v45_v54 }
   0xa   :  { %361 = vmatpush.bf16.msra.mxu0 %v669_v4  ;;  %729 = vmatpush.bf16.msra.mxu2 %v669_v4  ;;  %v672_v61 = vld [vmem:[%s1020_s1 + $0x40] sm:$0xff]  ;;  %v65_v1 = vunpack.c.l.bf16 %v46_v55  ;;  %v79_v3 = vunpack.c.l.bf16 %v53_v59  ;;  %v81_v4 = vunpack.c.l.bf16 %v54_v60  ;;  %v66_v7 = vunpack.c.h.bf16 %v46_v55 }
   0xb   :  { %410 = vmatpush.bf16.msra.mxu1 %v677_v5  ;;  %737 = vmatpush.bf16.msra.mxu3 %v677_v5  ;;  %v135_v38 = vadd.f32 %v832_v26, %v97_v27  ;;  %v137_v39 = vadd.f32 %v832_v26, %v99_v28  ;;  %v151_v40 = vadd.f32 %v832_v26, %v113_v29  ;;  %v64_v5 = vunpack.c.h.bf16 %v45_v54  ;;  %v47_v29 = vld [vmem:[%s1021_s0 + $0x20] sm:$0xff] }
   0xc   :  { %v153_v41 = vadd.f32 %v832_v26, %v115_v30  ;;  %v136_v42 = vadd.f32 %v840_v33, %v98_v31  ;;  %v138_v43 = vadd.f32 %v840_v33, %v100_v32  ;;  %v152_v45 = vadd.f32 %v840_v33, %v114_v35  ;;  %v48_v30 = vld [vmem:[%s1021_s0 + $0x28] sm:$0xff] }
   0xd   :  { %v154_v46 = vadd.f32 %v840_v33, %v116_v36  ;;  %v167_v48 = vmax.f32 %v135_v38, 0.0  ;;  %v169_v49 = vmax.f32 %v137_v39, 0.0  ;;  %v183_v50 = vmax.f32 %v151_v40, 0.0  ;;  %v55_v36 = vld [vmem:[%s1021_s0 + $0x60] sm:$0xff] }
   0xe   :  { %362 = vmatpush.bf16.msra.mxu0 %v668_v11  ;;  %730 = vmatpush.bf16.msra.mxu2 %v668_v11  ;;  %v185_v51 = vmax.f32 %v153_v41, 0.0  ;;  %v168_v52 = vmax.f32 %v136_v42, 0.0  ;;  %v170_v53 = vmax.f32 %v138_v43, 0.0  ;;  %v184_v57 = vmax.f32 %v152_v45, 0.0 }
   0xf   :  { %411 = vmatpush.bf16.msra.mxu1 %v676_v12  ;;  %738 = vmatpush.bf16.msra.mxu3 %v676_v12  ;;  %v186_v58 = vmax.f32 %v154_v46, 0.0  ;;  %v199_v62 = vpack.c.bf16 %v169_v49, %v167_v48  ;;  %v80_v8 = vunpack.c.h.bf16 %v53_v59  ;;  %v82_v9 = vunpack.c.h.bf16 %v54_v60 }
  0x10   :  { %v207_v63 = vpack.c.bf16 %v185_v51, %v183_v50  ;;  %v200_v2 = vpack.c.bf16 %v170_v53, %v168_v52  ;;  %v101_v10 = vmul.f32 %v819_v15, %v63_v0  ;;  %v103_v11 = vmul.f32 %v819_v15, %v65_v1 }
  0x11   :  { %v208_v6 = vpack.c.bf16 %v186_v58, %v184_v57  ;;  %v117_v12 = vmul.f32 %v819_v15, %v79_v3  ;;  %v119_v13 = vmul.f32 %v819_v15, %v81_v4  ;;  %v102_v14 = vmul.f32 %v824_v21, %v64_v5 }
  0x12   :  { %363 = vmatpush.bf16.msra.mxu0 %v667_v22  ;;  %731 = vmatpush.bf16.msra.mxu2 %v667_v22  ;;  %v104_v16 = vmul.f32 %v824_v21, %v66_v7  ;;  %v118_v17 = vmul.f32 %v824_v21, %v80_v8  ;;  %v120_v18 = vmul.f32 %v824_v21, %v82_v9  ;;  %v67_v42 = vunpack.c.l.bf16 %v47_v29 }
  0x13   :  { %412 = vmatpush.bf16.msra.mxu1 %v675_v25  ;;  %739 = vmatpush.bf16.msra.mxu3 %v675_v25  ;;  %v139_v19 = vadd.f32 %v832_v26, %v101_v10  ;;  %v141_v20 = vadd.f32 %v832_v26, %v103_v11  ;;  %v155_v22 = vadd.f32 %v832_v26, %v117_v12  ;;  %v69_v43 = vunpack.c.l.bf16 %v48_v30  ;;  %v49_v12 = vld [vmem:[%s1021_s0 + $0x30] sm:$0xff] }
  0x14   :  { %v157_v23 = vadd.f32 %v832_v26, %v119_v13  ;;  %v140_v24 = vadd.f32 %v840_v33, %v102_v14  ;;  %v142_v25 = vadd.f32 %v840_v33, %v104_v16  ;;  %v156_v27 = vadd.f32 %v840_v33, %v118_v17  ;;  %v50_v13 = vld [vmem:[%s1021_s0 + $0x38] sm:$0xff]  ;;  %v57_v17 = vld [vmem:[%s1021_s0 + $0x70] sm:$0xff] }
  0x15   :  { %v158_v28 = vadd.f32 %v840_v33, %v120_v18  ;;  %v171_v31 = vmax.f32 %v139_v19, 0.0  ;;  %v173_v32 = vmax.f32 %v141_v20, 0.0  ;;  %v68_v48 = vunpack.c.h.bf16 %v47_v29  ;;  %v58_v18 = vld [vmem:[%s1021_s0 + $0x78] sm:$0xff] }
  0x16   :  { %364 = vmatpush.bf16.msra.mxu0 %v666_v34  ;;  %732 = vmatpush.bf16.msra.mxu2 %v666_v34  ;;  %v187_v34 = vmax.f32 %v155_v22, 0.0  ;;  %v189_v35 = vmax.f32 %v157_v23, 0.0  ;;  %v172_v38 = vmax.f32 %v140_v24, 0.0  ;;  %v174_v39 = vmax.f32 %v142_v25, 0.0 }
  0x17   :  { %413 = vmatpush.bf16.msra.mxu1 %v674_v37  ;;  %740 = vmatpush.bf16.msra.mxu3 %v674_v37  ;;  %v56_v37 = vld [vmem:[%s1021_s0 + $0x68] sm:$0xff]  ;;  %v188_v40 = vmax.f32 %v156_v27, 0.0  ;;  %v190_v41 = vmax.f32 %v158_v28, 0.0  ;;  %v201_v46 = vpack.c.bf16 %v173_v32, %v171_v31  ;;  %v70_v49 = vunpack.c.h.bf16 %v48_v30 }
  0x18   :  { %v85_v45 = vunpack.c.l.bf16 %v56_v37  ;;  %v202_v50 = vpack.c.bf16 %v174_v39, %v172_v38  ;;  %v84_v52 = vunpack.c.h.bf16 %v55_v36  ;;  %v86_v53 = vunpack.c.h.bf16 %v56_v37 }
  0x19   :  { %v210_v51 = vpack.c.bf16 %v190_v41, %v188_v40  ;;  %v105_v54 = vmul.f32 %v819_v15, %v67_v42  ;;  %v107_v55 = vmul.f32 %v819_v15, %v69_v43  ;;  %v106_v58 = vmul.f32 %v824_v21, %v68_v48 }
  0x1a   :  { %365 = vmatpush.bf16.msra.mxu0 %v665_v44  ;;  %733 = vmatpush.bf16.msra.mxu2 %v665_v44  ;;  %v83_v44 = vunpack.c.l.bf16 %v55_v36  ;;  %v123_v57 = vmul.f32 %v819_v15, %v85_v45  ;;  %v108_v59 = vmul.f32 %v824_v21, %v70_v49  ;;  %v122_v60 = vmul.f32 %v824_v21, %v84_v52 }
  0x1b   :  { %414 = vmatpush.bf16.msra.mxu1 %v673_v47  ;;  %741 = vmatpush.bf16.msra.mxu3 %v673_v47  ;;  %v209_v47 = vpack.c.bf16 %v189_v35, %v187_v34  ;;  %v71_v22 = vunpack.c.l.bf16 %v49_v12  ;;  %v73_v23 = vunpack.c.l.bf16 %v50_v13  ;;  %v87_v25 = vunpack.c.l.bf16 %v57_v17 }
  0x1c   :  { %v161_v1 = vadd.f32 %v832_v26, %v123_v57  ;;  %v146_v3 = vadd.f32 %v840_v33, %v108_v59  ;;  %v160_v4 = vadd.f32 %v840_v33, %v122_v60  ;;  %v89_v27 = vunpack.c.l.bf16 %v58_v18 }
  0x1d   :  { %v72_v28 = vunpack.c.h.bf16 %v49_v12  ;;  %v74_v30 = vunpack.c.h.bf16 %v50_v13  ;;  %v88_v31 = vunpack.c.h.bf16 %v57_v17  ;;  %v90_v32 = vunpack.c.h.bf16 %v58_v18 }
  0x1e   :  { %366 = vmatpush.bf16.msra.mxu0 %v664_v56  ;;  %734 = vmatpush.bf16.msra.mxu2 %v664_v56  ;;  %v121_v56 = vmul.f32 %v819_v15, %v83_v44  ;;  %v193_v9 = vmax.f32 %v161_v1, 0.0  ;;  %v178_v11 = vmax.f32 %v146_v3, 0.0  ;;  %v192_v14 = vmax.f32 %v160_v4, 0.0  ;;  %v963_v1 = vld [vmem:[%s1025_s5] ss:$0 sm:$0xff] }
  0x1f   :  { %415 = vmatpush.bf16.msra.mxu1 %v672_v61  ;;  %742 = vmatpush.bf16.msra.mxu3 %v672_v61  ;;  %v124_v61 = vmul.f32 %v824_v21, %v86_v53  ;;  %v109_v34 = vmul.f32 %v819_v15, %v71_v22  ;;  %v111_v35 = vmul.f32 %v819_v15, %v73_v23 }
  0x20   :  { %v159_v0 = vadd.f32 %v832_v26, %v121_v56  ;;  %v125_v36 = vmul.f32 %v819_v15, %v87_v25  ;;  %v127_v37 = vmul.f32 %v819_v15, %v89_v27  ;;  %v110_v38 = vmul.f32 %v824_v21, %v72_v28 }
  0x21   :  { %367 = vmatmul.bf16.vlgmr.msra.gmra.mxu0 %v199_v62  ;;  %387 = vmatmul.bf16.vlgmr.msra.gmra.mxu2 %v207_v63  ;;  %v143_v62 = vadd.f32 %v832_v26, %v105_v54  ;;  %v145_v63 = vadd.f32 %v832_v26, %v107_v55  ;;  %v162_v5 = vadd.f32 %v840_v33, %v124_v61 }
  0x22   :  { %416 = vmatmul.bf16.vlgmr.msra.gmra.mxu1 %v200_v2  ;;  %436 = vmatmul.bf16.vlgmr.msra.gmra.mxu3 %v208_v6  ;;  %v144_v2 = vadd.f32 %v840_v33, %v106_v58  ;;  %v191_v8 = vmax.f32 %v159_v0, 0.0  ;;  %v112_v39 = vmul.f32 %v824_v21, %v74_v30  ;;  %v126_v40 = vmul.f32 %v824_v21, %v88_v31 }
  0x23   :  { %v175_v6 = vmax.f32 %v143_v62, 0.0  ;;  %v177_v7 = vmax.f32 %v145_v63, 0.0  ;;  %v194_v16 = vmax.f32 %v162_v5, 0.0  ;;  %v128_v41 = vmul.f32 %v824_v21, %v90_v32 }
  0x24   :  { %v176_v10 = vmax.f32 %v144_v2, 0.0  ;;  %v211_v20 = vpack.c.bf16 %v193_v9, %v191_v8  ;;  %v147_v42 = vadd.f32 %v832_v26, %v109_v34  ;;  %v149_v43 = vadd.f32 %v832_v26, %v111_v35 }
  0x25   :  { %v203_v19 = vpack.c.bf16 %v177_v7, %v175_v6  ;;  %v212_v29 = vpack.c.bf16 %v194_v16, %v192_v14  ;;  %v163_v44 = vadd.f32 %v832_v26, %v125_v36  ;;  %v165_v45 = vadd.f32 %v832_v26, %v127_v37 }
  0x26   :  { %v204_v24 = vpack.c.bf16 %v178_v11, %v176_v10  ;;  %v148_v15 = vadd.f32 %v840_v33, %v110_v38  ;;  %v166_v48 = vadd.f32 %v840_v33, %v128_v41  ;;  %v179_v49 = vmax.f32 %v147_v42, 0.0 }
  0x27   :  { %v197_v21 = vmax.f32 %v165_v45, 0.0 }
  0x28   :  { %v180_v52 = vmax.f32 %v148_v15, 0.0  ;;  %v198_v55 = vmax.f32 %v166_v48, 0.0 }
  0x31   :  { %372 = vmatmul.bf16.gmra.mxu0 %v201_v46  ;;  %392 = vmatmul.bf16.gmra.mxu2 %v209_v47  ;;  %v150_v46 = vadd.f32 %v840_v33, %v112_v39  ;;  %v164_v47 = vadd.f32 %v840_v33, %v126_v40  ;;  %v957_v33 = vld [vmem:[%s1024_s4] ss:$0 sm:$0xff] }
  0x32   :  { %421 = vmatmul.bf16.gmra.mxu1 %v202_v50  ;;  %441 = vmatmul.bf16.gmra.mxu3 %v210_v51  ;;  %v181_v50 = vmax.f32 %v149_v43, 0.0  ;;  %v195_v51 = vmax.f32 %v163_v44, 0.0 }
  0x33   :  { %v182_v53 = vmax.f32 %v150_v46, 0.0  ;;  %v196_v54 = vmax.f32 %v164_v47, 0.0 }
  0x34   :  { %v205_v56 = vpack.c.bf16 %v181_v50, %v179_v49  ;;  %v213_v57 = vpack.c.bf16 %v197_v21, %v195_v51 }
  0x35   :  { %v206_v58 = vpack.c.bf16 %v182_v53, %v180_v52  ;;  %v214_v26 = vpack.c.bf16 %v198_v55, %v196_v54 }
  0x41   :  { %377 = vmatmul.bf16.gmra.mxu0 %v203_v19  ;;  %397 = vmatmul.bf16.gmra.mxu2 %v211_v20 }
  0x42   :  { %426 = vmatmul.bf16.gmra.mxu1 %v204_v24  ;;  %446 = vmatmul.bf16.gmra.mxu3 %v212_v29 }
  0x51   :  { %382 = vmatmul.bf16.gmra.mxu0 %v205_v56  ;;  %402 = vmatmul.bf16.gmra.mxu2 %v213_v57 }
  0x52   :  { %431 = vmatmul.bf16.gmra.mxu1 %v206_v58  ;;  %451 = vmatmul.bf16.gmra.mxu3 %v214_v26 }
  0x9e   :  { %v368_v59 = vpop.f32.mrf.mxu0 }
  0x9f   :  { %v417_v60 = vpop.f32.mrf.mxu1 }
  0xa0   :  { %v418_v61 = vadd.f32 %v417_v60, %v368_v59 }
  0xa2   :  { %v512_v0 = vmul.f32 %v957_v33, %v418_v61 }
  0xa4   :  { %v388_v62 = vpop.f32.mrf.mxu2  ;;  %v532_v6 = vadd.f32 %v963_v1, %v512_v0 }
  0xa5   :  { %v437_v63 = vpop.f32.mrf.mxu3 }
  0xa6   :  { %v370_v2 = vpop.f32.mrf.mxu0  ;;  %v438_v4 = vadd.f32 %v437_v63, %v388_v62  ;;  %v548_v12 = vmax.f32 %v532_v6, 0.0 }
  0xa7   :  { %v419_v3 = vpop.f32.mrf.mxu1 }
  0xa8   :  { %v420_v5 = vadd.f32 %v419_v3, %v370_v2  ;;  %v520_v8 = vmul.f32 %v957_v33, %v438_v4 }
  0xaa   :  { %v513_v7 = vmul.f32 %v957_v33, %v420_v5  ;;  %v540_v18 = vadd.f32 %v963_v1, %v520_v8 }
  0xac   :  { %v533_v9 = vadd.f32 %v963_v1, %v513_v7  ;;  %v390_v10 = vpop.f32.mrf.mxu2  ;;  %v556_v24 = vmax.f32 %v540_v18, 0.0 }
  0xad   :  { %v439_v11 = vpop.f32.mrf.mxu3 }
  0xae   :  { %v549_v13 = vmax.f32 %v533_v9, 0.0  ;;  %v440_v14 = vadd.f32 %v439_v11, %v390_v10  ;;  %v373_v16 = vpop.f32.mrf.mxu0 }
  0xaf   :  { %v422_v17 = vpop.f32.mrf.mxu1 }
  0xb0   :  { %v683_v19 = vpack.c.bf16 %v549_v13, %v548_v12  ;;  %v521_v20 = vmul.f32 %v957_v33, %v440_v14  ;;  %v423_v23 = vadd.f32 %v422_v17, %v373_v16 }
  0xb2   :  { %684 = vst [vmem:[%s1026_s6] sm:$0xff] %v683_v19   ;;  %v541_v22 = vadd.f32 %v963_v1, %v521_v20  ;;  %v514_v30 = vmul.f32 %v957_v33, %v423_v23 }
  0xb4   :  { %v557_v25 = vmax.f32 %v541_v22, 0.0  ;;  %v393_v27 = vpop.f32.mrf.mxu2  ;;  %v534_v36 = vadd.f32 %v963_v1, %v514_v30 }
  0xb5   :  { %v442_v28 = vpop.f32.mrf.mxu3 }
  0xb6   :  { %v703_v29 = vpack.c.bf16 %v557_v25, %v556_v24  ;;  %v375_v31 = vpop.f32.mrf.mxu0  ;;  %v443_v34 = vadd.f32 %v442_v28, %v393_v27  ;;  %v550_v42 = vmax.f32 %v534_v36, 0.0 }
  0xb7   :  { %v424_v32 = vpop.f32.mrf.mxu1 }
  0xb8   :  { %723 = vst [vmem:[%s1026_s6 + $0x20] sm:$0xff] %v703_v29   ;;  %v425_v35 = vadd.f32 %v424_v32, %v375_v31  ;;  %v522_v38 = vmul.f32 %v957_v33, %v443_v34 }
  0xba   :  { %v515_v37 = vmul.f32 %v957_v33, %v425_v35  ;;  %v542_v46 = vadd.f32 %v963_v1, %v522_v38 }
  0xbc   :  { %v535_v39 = vadd.f32 %v963_v1, %v515_v37  ;;  %v395_v40 = vpop.f32.mrf.mxu2  ;;  %v558_v51 = vmax.f32 %v542_v46, 0.0 }
  0xbd   :  { %v444_v41 = vpop.f32.mrf.mxu3 }
  0xbe   :  { %v551_v43 = vmax.f32 %v535_v39, 0.0  ;;  %v445_v44 = vadd.f32 %v444_v41, %v395_v40  ;;  %v378_v45 = vpop.f32.mrf.mxu0 }
  0xbf   :  { %v427_v15 = vpop.f32.mrf.mxu1 }
  0xc0   :  { %v688_v47 = vpack.c.bf16 %v551_v43, %v550_v42  ;;  %v523_v48 = vmul.f32 %v957_v33, %v445_v44  ;;  %v428_v50 = vadd.f32 %v427_v15, %v378_v45 }
  0xc2   :  { %720 = vst [vmem:[%s1026_s6 + $0x8] sm:$0xff] %v688_v47   ;;  %v543_v49 = vadd.f32 %v963_v1, %v523_v48  ;;  %v516_v55 = vmul.f32 %v957_v33, %v428_v50 }
  0xc4   :  { %v559_v21 = vmax.f32 %v543_v49, 0.0  ;;  %v398_v52 = vpop.f32.mrf.mxu2  ;;  %v536_v59 = vadd.f32 %v963_v1, %v516_v55 }
  0xc5   :  { %v447_v53 = vpop.f32.mrf.mxu3 }
  0xc6   :  { %v708_v54 = vpack.c.bf16 %v559_v21, %v558_v51  ;;  %v380_v56 = vpop.f32.mrf.mxu0  ;;  %v448_v58 = vadd.f32 %v447_v53, %v398_v52  ;;  %v552_v2 = vmax.f32 %v536_v59, 0.0 }
  0xc7   :  { %v429_v57 = vpop.f32.mrf.mxu1 }
  0xc8   :  { %724 = vst [vmem:[%s1026_s6 + $0x28] sm:$0xff] %v708_v54   ;;  %v430_v26 = vadd.f32 %v429_v57, %v380_v56  ;;  %v524_v61 = vmul.f32 %v957_v33, %v448_v58 }
  0xca   :  { %v517_v60 = vmul.f32 %v957_v33, %v430_v26  ;;  %v544_v7 = vadd.f32 %v963_v1, %v524_v61 }
  0xcc   :  { %v537_v62 = vadd.f32 %v963_v1, %v517_v60  ;;  %v400_v63 = vpop.f32.mrf.mxu2  ;;  %v560_v12 = vmax.f32 %v544_v7, 0.0 }
  0xcd   :  { %v449_v0 = vpop.f32.mrf.mxu3 }
  0xce   :  { %v553_v3 = vmax.f32 %v537_v62, 0.0  ;;  %v450_v4 = vadd.f32 %v449_v0, %v400_v63  ;;  %v383_v5 = vpop.f32.mrf.mxu0 }
  0xcf   :  { %v432_v6 = vpop.f32.mrf.mxu1 }
  0xd0   :  { %v693_v8 = vpack.c.bf16 %v553_v3, %v552_v2  ;;  %v525_v9 = vmul.f32 %v957_v33, %v450_v4  ;;  %v433_v11 = vadd.f32 %v432_v6, %v383_v5 }
  0xd2   :  { %721 = vst [vmem:[%s1026_s6 + $0x10] sm:$0xff] %v693_v8   ;;  %v545_v10 = vadd.f32 %v963_v1, %v525_v9  ;;  %v518_v18 = vmul.f32 %v957_v33, %v433_v11 }
  0xd4   :  { %v561_v13 = vmax.f32 %v545_v10, 0.0  ;;  %v403_v14 = vpop.f32.mrf.mxu2  ;;  %v538_v24 = vadd.f32 %v963_v1, %v518_v18 }
  0xd5   :  { %v452_v16 = vpop.f32.mrf.mxu3 }
  0xd6   :  { %v713_v17 = vpack.c.bf16 %v561_v13, %v560_v12  ;;  %v385_v19 = vpop.f32.mrf.mxu0  ;;  %v453_v22 = vadd.f32 %v452_v16, %v403_v14  ;;  %v554_v31 = vmax.f32 %v538_v24, 0.0 }
  0xd7   :  { %v434_v20 = vpop.f32.mrf.mxu1 }
  0xd8   :  { %725 = vst [vmem:[%s1026_s6 + $0x30] sm:$0xff] %v713_v17   ;;  %v435_v23 = vadd.f32 %v434_v20, %v385_v19  ;;  %v526_v27 = vmul.f32 %v957_v33, %v453_v22 }
  0xda   :  { %v519_v25 = vmul.f32 %v957_v33, %v435_v23  ;;  %v546_v35 = vadd.f32 %v963_v1, %v526_v27 }
  0xdc   :  { %v539_v28 = vadd.f32 %v963_v1, %v519_v25  ;;  %v405_v29 = vpop.f32.mrf.mxu2  ;;  %v562_v39 = vmax.f32 %v546_v35, 0.0 }
  0xdd   :  { %v454_v30 = vpop.f32.mrf.mxu3 }
  0xde   :  { %v555_v32 = vmax.f32 %v539_v28, 0.0  ;;  %v455_v34 = vadd.f32 %v454_v30, %v405_v29 }
  0xe0   :  { %v698_v36 = vpack.c.bf16 %v555_v32, %v554_v31  ;;  %v527_v37 = vmul.f32 %v957_v33, %v455_v34 }
  0xe2   :  { %722 = vst [vmem:[%s1026_s6 + $0x18] sm:$0xff] %v698_v36   ;;  %v547_v38 = vadd.f32 %v963_v1, %v527_v37 }
  0xe4   :  { %v563_v40 = vmax.f32 %v547_v38, 0.0 }
  0xe6   :  { %v718_v41 = vpack.c.bf16 %v563_v40, %v562_v39 }
  0xe8   :  { %726 = vst [vmem:[%s1026_s6 + $0x38] sm:$0xff] %v718_v41  }

// kernel: densenet121_forward.129
= control target key start
LH: loop header
LB: loop body
LE: loop exit
PB: predicated region body
PF: predicated region fallthrough
CT: control target
= control target key end

     0   :  { %s1719_s21 = smov 0   ;;  %s1721_s22 = smov 0   ;;  %s2006_s0 = inlined_call_operand.vmem [shape: bf16[128,1152], index: 0, kind: input, shape index: {}]   ;;  %s2007_s1 = inlined_call_operand.vmem [shape: bf16[1152,128], index: 1, kind: input, shape index: {}]   ;;  %s2008_s2 = inlined_call_operand.vmem [shape: f32[1,1152], index: 2, kind: input, shape index: {}, may-alias: {2,3}]   ;;  %s2009_s3 = inlined_call_operand.vmem [shape: f32[1,1152], index: 3, kind: input, shape index: {}, may-alias: {2,3}]   ;;  %s2010_s4 = inlined_call_operand.vmem [shape: f32[1,128], index: 4, kind: input, shape index: {}, may-alias: {4,5}]   ;;  %s2011_s5 = inlined_call_operand.vmem [shape: f32[1,128], index: 5, kind: input, shape index: {}, may-alias: {4,5}]   ;;  %s2012_s6 = inlined_call_operand.vmem [shape: bf16[128,128], index: 6, kind: output, shape index: {}]  }
   0x1   :  { %s1723_s23 = smov 0   ;;  %s1725_s24 = smov 0  }
   0x2   :  { %s1727_s2 = smov 0  }
   0x3 LB: > { %s28_s3 = sadd.s32 1, %s1677_s24  ;;  %p51_p1 = scmp.ne.s32.totalorder %s1669_s22, %s1665_s21  ;;  %s1681_s2 = sphi %s1727_s2, %s16_s2   ;;  %s1677_s24 = sphi %s1725_s24, %s2016_s24   ;;  %s1673_s23 = sphi %s1723_s23, %s2015_s23   ;;  %s1669_s22 = sphi %s1721_s22, %s2014_s22   ;;  %s1665_s21 = sphi %s1719_s21, %s2013_s21  }
   0x4   : > { %p29_p0 = scmp.ge.s32.totalorder %s28_s3, 3  ;;  %p52_p2 = scmp.eq.s32.totalorder %s1681_s2, 0 }
   0x5   : > { %s44_s5 = sadd.s32 1, %s1669_s22  ;;  %p1246_p5 = scmp.ge.s32.totalorder %s1681_s2, 3 }
   0x6   : > { %s2018_s3 = smov (%p29_p0, %s28_s3), 0  ;;  %p53_p3 = por %p52_p2, %p51_p1 }
   0x7   : > { %s40_s4 = ssub.s32 %s1677_s24, %s2018_s3  ;;  %249 = sbr.rel (%p1246_p5) target bundleno = 49 (0x31), region = 24 }
   0x8   : > { %p42_p4 = scmp.eq.s32.totalorder %s40_s4, 0 }
   0xa   : > { %s1754_s25 = scalar_select %p42_p4, %s1669_s22, %s44_s5  }
   0xc   : > { %252 = sbr.rel (!%p53_p3) target bundleno = 49 (0x31), region = 28  ;;  %s254_s26 = sand.u32 (%p53_p3), 1, %s1669_s22  }
   0xd   : > { %s1480_s27 = smul.u32 (%p53_p3), 12, %s1677_s24 }
   0xe   : > { %s1600_s28 = smul.u32 (%p53_p3), 192, %s254_s26 }
   0xf   : > { %s1762_s7 = scalar_lea.vmem (%p53_p3), %s2006_s0, %s1480_s27 }
  0x10   : > { %v277_v0 = vld [vmem:[%s1762_s7] sm:$0xff] (%p53_p3)  ;;  %v281_v2 = vld [vmem:[%s1762_s7 + $0x48] sm:$0xff] (%p53_p3)  ;;  %s1767_s8 = scalar_lea.vmem (%p53_p3), [#allocation3], %s1600_s28  ;;  %v285_v4 = vld [vmem:[%s1762_s7 + $0x90] sm:$0xff] (%p53_p3) }
  0x11   : > { %v279_v1 = vld [vmem:[%s1762_s7 + $0x24] sm:$0xff]  ;;  %278 = vst [vmem:[%s1767_s8] sm:$0xff] %v277_v0  ;;  %v283_v3 = vld [vmem:[%s1762_s7 + $0x6c] sm:$0xff]  ;;  %v287_v5 = vld [vmem:[%s1762_s7 + $0xb4] sm:$0xff] }
  0x12   : > { %280 = vst [vmem:[%s1767_s8 + $0xc] sm:$0xff] %v279_v1  ;;  %v289_v6 = vld [vmem:[%s1762_s7 + $0xd8] sm:$0xff]  ;;  %v293_v8 = vld [vmem:[%s1762_s7 + $0x120] sm:$0xff]  ;;  %v297_v10 = vld [vmem:[%s1762_s7 + $0x168] sm:$0xff] }
  0x13   : > { %282 = vst [vmem:[%s1767_s8 + $0x18] sm:$0xff] %v281_v2  ;;  %v291_v7 = vld [vmem:[%s1762_s7 + $0xfc] sm:$0xff]  ;;  %v295_v9 = vld [vmem:[%s1762_s7 + $0x144] sm:$0xff]  ;;  %v299_v11 = vld [vmem:[%s1762_s7 + $0x18c] sm:$0xff] }
  0x14   : > { %284 = vst [vmem:[%s1767_s8 + $0x24] sm:$0xff] %v283_v3  ;;  %v301_v12 = vld [vmem:[%s1762_s7 + $0x1b0] sm:$0xff]  ;;  %v305_v14 = vld [vmem:[%s1762_s7 + $0x1f8] sm:$0xff]  ;;  %v1248_v16 = vld [vmem:[%s1762_s7 + $0x8] sm:$0xf] }
  0x15   : > { %286 = vst [vmem:[%s1767_s8 + $0x30] sm:$0xff] %v285_v4  ;;  %v303_v13 = vld [vmem:[%s1762_s7 + $0x1d4] sm:$0xff]  ;;  %v307_v15 = vld [vmem:[%s1762_s7 + $0x21c] sm:$0xff]  ;;  %v1250_v17 = vld [vmem:[%s1762_s7 + $0x2c] sm:$0xf] }
  0x16   : > { %288 = vst [vmem:[%s1767_s8 + $0x3c] sm:$0xff] %v287_v5  ;;  %v1252_v18 = vld [vmem:[%s1762_s7 + $0x50] sm:$0xf]  ;;  %v1254_v19 = vld [vmem:[%s1762_s7 + $0x74] sm:$0xf] }
  0x17   : > { %290 = vst [vmem:[%s1767_s8 + $0x48] sm:$0xff] %v289_v6  ;;  %v1256_v20 = vld [vmem:[%s1762_s7 + $0x98] sm:$0xf]  ;;  %v1258_v21 = vld [vmem:[%s1762_s7 + $0xbc] sm:$0xf] }
  0x18   : > { %292 = vst [vmem:[%s1767_s8 + $0x54] sm:$0xff] %v291_v7  ;;  %v1260_v22 = vld [vmem:[%s1762_s7 + $0xe0] sm:$0xf]  ;;  %v1262_v23 = vld [vmem:[%s1762_s7 + $0x104] sm:$0xf] }
  0x19   : > { %294 = vst [vmem:[%s1767_s8 + $0x60] sm:$0xff] %v293_v8  ;;  %v1264_v24 = vld [vmem:[%s1762_s7 + $0x128] sm:$0xf]  ;;  %v1266_v25 = vld [vmem:[%s1762_s7 + $0x14c] sm:$0xf] }
  0x1a   : > { %296 = vst [vmem:[%s1767_s8 + $0x6c] sm:$0xff] %v295_v9  ;;  %v1268_v26 = vld [vmem:[%s1762_s7 + $0x170] sm:$0xf]  ;;  %v1270_v27 = vld [vmem:[%s1762_s7 + $0x194] sm:$0xf] }
  0x1b   : > { %298 = vst [vmem:[%s1767_s8 + $0x78] sm:$0xff] %v297_v10  ;;  %v1272_v28 = vld [vmem:[%s1762_s7 + $0x1b8] sm:$0xf]  ;;  %v1274_v29 = vld [vmem:[%s1762_s7 + $0x1dc] sm:$0xf] }
  0x1c   : > { %300 = vst [vmem:[%s1767_s8 + $0x84] sm:$0xff] %v299_v11  ;;  %v1276_v30 = vld [vmem:[%s1762_s7 + $0x200] sm:$0xf]  ;;  %v1278_v31 = vld [vmem:[%s1762_s7 + $0x224] sm:$0xf] }
  0x1d   : > { %302 = vst [vmem:[%s1767_s8 + $0x90] sm:$0xff] %v301_v12 }
  0x1e   : > { %304 = vst [vmem:[%s1767_s8 + $0x9c] sm:$0xff] %v303_v13 }
  0x1f   : > { %306 = vst [vmem:[%s1767_s8 + $0xa8] sm:$0xff] %v305_v14 }
  0x20   : > { %308 = vst [vmem:[%s1767_s8 + $0xb4] sm:$0xff] %v307_v15 }
  0x21   : > { %1249 = vst [vmem:[%s1767_s8 + $0x8] sm:$0xf] %v1248_v16 }
  0x22   : > { %1251 = vst [vmem:[%s1767_s8 + $0x14] sm:$0xf] %v1250_v17 }
  0x23   : > { %1253 = vst [vmem:[%s1767_s8 + $0x20] sm:$0xf] %v1252_v18 }
  0x24   : > { %1255 = vst [vmem:[%s1767_s8 + $0x2c] sm:$0xf] %v1254_v19 }
  0x25   : > { %1257 = vst [vmem:[%s1767_s8 + $0x38] sm:$0xf] %v1256_v20 }
  0x26   : > { %1259 = vst [vmem:[%s1767_s8 + $0x44] sm:$0xf] %v1258_v21 }
  0x27   : > { %1261 = vst [vmem:[%s1767_s8 + $0x50] sm:$0xf] %v1260_v22 }
  0x28   : > { %1263 = vst [vmem:[%s1767_s8 + $0x5c] sm:$0xf] %v1262_v23 }
  0x29   : > { %1265 = vst [vmem:[%s1767_s8 + $0x68] sm:$0xf] %v1264_v24 }
  0x2a   : > { %1267 = vst [vmem:[%s1767_s8 + $0x74] sm:$0xf] %v1266_v25 }
  0x2b   : > { %1269 = vst [vmem:[%s1767_s8 + $0x80] sm:$0xf] %v1268_v26 }
  0x2c   : > { %1271 = vst [vmem:[%s1767_s8 + $0x8c] sm:$0xf] %v1270_v27 }
  0x2d   : > { %1273 = vst [vmem:[%s1767_s8 + $0x98] sm:$0xf] %v1272_v28 }
  0x2e   : > { %1275 = vst [vmem:[%s1767_s8 + $0xa4] sm:$0xf] %v1274_v29 }
  0x2f   : > { %1277 = vst [vmem:[%s1767_s8 + $0xb0] sm:$0xf] %v1276_v30 }
  0x30   : > { %1279 = vst [vmem:[%s1767_s8 + $0xbc] sm:$0xf] %v1278_v31 }
  0x31 PF: > { %p1280_p6 = scmp.ge.s32.totalorder %s1681_s2, 1  ;;  %p381_p7 = scmp.lt.s32.totalorder %s1681_s2, 4 }
  0x33   : > { %p382_p8 = pnand %p1280_p6, %p381_p7 }
  0x34   : > { %s388_s9 = sand.u32 (!%p382_p8), 1, %s1665_s21   ;;  %s444_s10 = smul.u32 (!%p382_p8), 48, %s1673_s23 }
  0x35   : > { %385 = sbr.rel (%p382_p8) target bundleno = 350 (0x15e), region = 66  ;;  %p1282_p10 = scmp.ne.s32.totalorder (!%p382_p8), %s1673_s23, 0 }
  0x36   : > { %s1601_s11 = smul.u32 (!%p382_p8), 192, %s388_s9  ;;  %p445_p9 = scmp.lt.s32.totalorder (!%p382_p8), %s444_s10, 143 }
  0x38   : > { %s1839_s16 = scalar_lea.vmem (!%p382_p8), [#allocation3], %s1601_s11 }
  0x3a   : > { %s2020_s10 = smov (!%p445_p9, %s444_s10), 143  ;;  %481 = sbr.rel (%p1282_p10) target bundleno = 80 (0x50), region = 74 }
  0x3b   : > { %s1281_s12 = sshll.u32 %s2020_s10, 2 }
  0x3c   : > { %s1837_s15 = scalar_lea.vmem %s2007_s1, %s1281_s12 }
  0x3f   : > { %v1683_v32 = vmov 0.0  }
  0x40   : > { %482 = vst [vmem:[#allocation2 + $0x30] sm:$0xff] %v1683_v32 }
  0x41   : > { %483 = vst [vmem:[#allocation2] sm:$0xff] %v1683_v32 }
  0x42   : > { %484 = vst [vmem:[#allocation2 + $0x58] sm:$0xff] %v1683_v32 }
  0x43   : > { %485 = vst [vmem:[#allocation2 + $0x18] sm:$0xff] %v1683_v32 }
  0x44   : > { %486 = vst [vmem:[#allocation2 + $0x50] sm:$0xff] %v1683_v32 }
  0x45   : > { %487 = vst [vmem:[#allocation2 + $0x68] sm:$0xff] %v1683_v32 }
  0x46   : > { %488 = vst [vmem:[#allocation2 + $0x8] sm:$0xff] %v1683_v32 }
  0x47   : > { %489 = vst [vmem:[#allocation2 + $0x48] sm:$0xff] %v1683_v32 }
  0x48   : > { %490 = vst [vmem:[#allocation2 + $0x40] sm:$0xff] %v1683_v32 }
  0x49   : > { %491 = vst [vmem:[#allocation2 + $0x20] sm:$0xff] %v1683_v32 }
  0x4a   : > { %492 = vst [vmem:[#allocation2 + $0x10] sm:$0xff] %v1683_v32 }
  0x4b   : > { %493 = vst [vmem:[#allocation2 + $0x38] sm:$0xff] %v1683_v32 }
  0x4c   : > { %494 = vst [vmem:[#allocation2 + $0x60] sm:$0xff] %v1683_v32 }
  0x4d   : > { %495 = vst [vmem:[#allocation2 + $0x70] sm:$0xff] %v1683_v32 }
  0x4e   : > { %496 = vst [vmem:[#allocation2 + $0x78] sm:$0xff] %v1683_v32 }
  0x4f   : > { %497 = vst [vmem:[#allocation2 + $0x28] sm:$0xff] %v1683_v32 }
  0x50 PF: > { %v1512_v33 = vld [vmem:[%s1837_s15 + $0x38] sm:$0xff]  ;;  %v1511_v36 = vld [vmem:[%s1837_s15 + $0x30] sm:$0xff]  ;;  %v1510_v39 = vld [vmem:[%s1837_s15 + $0x28] sm:$0xff]  ;;  %p1475_p11 = scmp.ne.s32.totalorder %s1673_s23, 2 }
  0x51   : > { %v1844_v34 = vld [vmem:[%s1837_s15 + $0x78] sm:$0xff]  ;;  %866 = vmatpush.bf16.msra.mxu0 %v1512_v33  ;;  %1576 = vmatpush.bf16.msra.mxu3 %v1512_v33  ;;  %v1853_v37 = vld [vmem:[%s1837_s15 + $0x70] sm:$0xff]  ;;  %v1518_v40 = vld [vmem:[%s1837_s15 + $0x68] sm:$0xff] }
  0x52   : > { %v1847_v35 = vld [vmem:[%s1837_s15 + $0xb8] sm:$0xff]  ;;  %915 = vmatpush.bf16.msra.mxu1 %v1844_v34  ;;  %v1856_v38 = vld [vmem:[%s1837_s15 + $0xb0] sm:$0xff]  ;;  %v1863_v41 = vld [vmem:[%s1837_s15 + $0xa8] sm:$0xff] }
  0x53   : > { %964 = vmatpush.bf16.msra.mxu2 %v1847_v35  ;;  %v1509_v42 = vld [vmem:[%s1837_s15 + $0x20] sm:$0xff]  ;;  %v1508_v45 = vld [vmem:[%s1837_s15 + $0x18] sm:$0xff]  ;;  %v1507_v48 = vld [vmem:[%s1837_s15 + $0x10] sm:$0xff] }
  0x54   : > { %v1517_v43 = vld [vmem:[%s1837_s15 + $0x60] sm:$0xff]  ;;  %v1516_v46 = vld [vmem:[%s1837_s15 + $0x58] sm:$0xff]  ;;  %v1515_v49 = vld [vmem:[%s1837_s15 + $0x50] sm:$0xff] }
  0x55   : > { %867 = vmatpush.bf16.msra.mxu0 %v1511_v36  ;;  %1577 = vmatpush.bf16.msra.mxu3 %v1511_v36  ;;  %v1869_v44 = vld [vmem:[%s1837_s15 + $0xa0] sm:$0xff]  ;;  %v1875_v47 = vld [vmem:[%s1837_s15 + $0x98] sm:$0xff]  ;;  %v1881_v50 = vld [vmem:[%s1837_s15 + $0x90] sm:$0xff] }
  0x56   : > { %916 = vmatpush.bf16.msra.mxu1 %v1853_v37  ;;  %v1506_v51 = vld [vmem:[%s1837_s15 + $0x8] sm:$0xff]  ;;  %v1505_v54 = vld [vmem:[%s1837_s15] sm:$0xff]  ;;  %v1357_v59 = vld [vmem:[%s1839_s16 + $0x90] sm:$0xf] }
  0x57   : > { %965 = vmatpush.bf16.msra.mxu2 %v1856_v38  ;;  %v1514_v52 = vld [vmem:[%s1837_s15 + $0x48] sm:$0xff]  ;;  %v1513_v55 = vld [vmem:[%s1837_s15 + $0x40] sm:$0xff]  ;;  %v1500_v60 = vld [vmem:[%s1839_s16 + $0x98] sm:$0xf0] }
  0x58   : > { %v1887_v53 = vld [vmem:[%s1837_s15 + $0x88] sm:$0xff]  ;;  %v1892_v56 = vld [vmem:[%s1837_s15 + $0x80] sm:$0xff]  ;;  %v1287_v62 = vld [vmem:[%s1839_s16 + $0xc] sm:$0xf0]  ;;  %v1358_v2 = vor.u32 %v1500_v60, %v1357_v59 }
  0x59   : > { %868 = vmatpush.bf16.msra.mxu0 %v1510_v39  ;;  %1578 = vmatpush.bf16.msra.mxu3 %v1510_v39  ;;  %v1285_v57 = vld [vmem:[%s1839_s16] sm:$0xf]  ;;  %v1482_v58 = vld [vmem:[%s1839_s16 + $0x8] sm:$0xf0]  ;;  %v1481_v61 = vld [vmem:[%s1839_s16 + $0x4] sm:$0xf] }
  0x5a   : > { %917 = vmatpush.bf16.msra.mxu1 %v1518_v40  ;;  %v1293_v63 = vld [vmem:[%s1839_s16 + $0x8] sm:$0xf]  ;;  %v1483_v0 = vld [vmem:[%s1839_s16 + $0x10] sm:$0xf0]  ;;  %v1286_v1 = vor.u32 %v1482_v58, %v1285_v57  ;;  %v1290_v3 = vor.u32 %v1481_v61, %v1287_v62  ;;  %v1297_v5 = vld [vmem:[%s1839_s16 + $0x18] sm:$0xf] }
  0x5b   : > { %966 = vmatpush.bf16.msra.mxu2 %v1863_v41  ;;  %v1294_v4 = vor.u32 %v1483_v0, %v1293_v63  ;;  %v1485_v6 = vld [vmem:[%s1839_s16 + $0x20] sm:$0xf0]  ;;  %v1369_v7 = vld [vmem:[%s1839_s16 + $0xa8] sm:$0xf]  ;;  %v1503_v8 = vld [vmem:[%s1839_s16 + $0xb0] sm:$0xf0] }
  0x5c   : > { %v1484_v9 = vld [vmem:[%s1839_s16 + $0x1c] sm:$0xf]  ;;  %v1299_v10 = vld [vmem:[%s1839_s16 + $0x24] sm:$0xf0]  ;;  %v1305_v11 = vld [vmem:[%s1839_s16 + $0x20] sm:$0xf]  ;;  %v1298_v13 = vor.u32 %v1485_v6, %v1297_v5  ;;  %v1370_v14 = vor.u32 %v1503_v8, %v1369_v7 }
  0x5d   : > { %869 = vmatpush.bf16.msra.mxu0 %v1509_v42  ;;  %1579 = vmatpush.bf16.msra.mxu3 %v1509_v42  ;;  %v1486_v12 = vld [vmem:[%s1839_s16 + $0x28] sm:$0xf0]  ;;  %v1302_v15 = vor.u32 %v1484_v9, %v1299_v10  ;;  %v1309_v17 = vld [vmem:[%s1839_s16 + $0x30] sm:$0xf]  ;;  %v1488_v18 = vld [vmem:[%s1839_s16 + $0x38] sm:$0xf0] }
  0x5e   : > { %918 = vmatpush.bf16.msra.mxu1 %v1517_v43  ;;  %v1306_v16 = vor.u32 %v1486_v12, %v1305_v11  ;;  %v1487_v19 = vld [vmem:[%s1839_s16 + $0x34] sm:$0xf]  ;;  %v1359_v21 = vld [vmem:[%s1839_s16 + $0x9c] sm:$0xf0]  ;;  %v1317_v23 = vld [vmem:[%s1839_s16 + $0x38] sm:$0xf]  ;;  %v1310_v25 = vor.u32 %v1488_v18, %v1309_v17 }
  0x5f   : > { %967 = vmatpush.bf16.msra.mxu2 %v1869_v44  ;;  %v1499_v20 = vld [vmem:[%s1839_s16 + $0x94] sm:$0xf]  ;;  %v1311_v22 = vld [vmem:[%s1839_s16 + $0x3c] sm:$0xf0]  ;;  %v1489_v24 = vld [vmem:[%s1839_s16 + $0x40] sm:$0xf0] }
  0x60   : > { %v1362_v26 = vor.u32 %v1499_v20, %v1359_v21  ;;  %v1314_v27 = vor.u32 %v1487_v19, %v1311_v22  ;;  %v1318_v28 = vor.u32 %v1489_v24, %v1317_v23  ;;  %v1321_v29 = vld [vmem:[%s1839_s16 + $0x48] sm:$0xf]  ;;  %v1491_v30 = vld [vmem:[%s1839_s16 + $0x50] sm:$0xf0]  ;;  %v1490_v31 = vld [vmem:[%s1839_s16 + $0x4c] sm:$0xf] }
  0x61   : > { %870 = vmatpush.bf16.msra.mxu0 %v1508_v45  ;;  %1580 = vmatpush.bf16.msra.mxu3 %v1508_v45  ;;  %v1502_v32 = vld [vmem:[%s1839_s16 + $0xac] sm:$0xf]  ;;  %v1371_v33 = vld [vmem:[%s1839_s16 + $0xb4] sm:$0xf0]  ;;  %v1492_v36 = vld [vmem:[%s1839_s16 + $0x58] sm:$0xf0] }
  0x62   : > { %919 = vmatpush.bf16.msra.mxu1 %v1516_v46  ;;  %v1374_v39 = vor.u32 %v1502_v32, %v1371_v33  ;;  %v1494_v42 = vld [vmem:[%s1839_s16 + $0x68] sm:$0xf0]  ;;  %v1501_v45 = vld [vmem:[%s1839_s16 + $0xa0] sm:$0xf0]  ;;  %v1377_v57 = vld [vmem:[%s1839_s16 + $0xb0] sm:$0xf] }
  0x63   : > { %968 = vmatpush.bf16.msra.mxu2 %v1875_v47  ;;  %v1347_v58 = vld [vmem:[%s1839_s16 + $0x84] sm:$0xf0]  ;;  %v1353_v59 = vld [vmem:[%s1839_s16 + $0x80] sm:$0xf]  ;;  %v1498_v60 = vld [vmem:[%s1839_s16 + $0x88] sm:$0xf0] }
  0x64   : > { %v1354_v0 = vor.u32 %v1498_v60, %v1353_v59  ;;  %v530_v5 = vld [vmem:[#allocation2 + $0x30] sm:$0xff]  ;;  %v532_v21 = vld [vmem:[#allocation2 + $0x58] sm:$0xff] }
  0x65   : > { %871 = vmatpush.bf16.msra.mxu0 %v1507_v48  ;;  %1581 = vmatpush.bf16.msra.mxu3 %v1507_v48  ;;  %v1495_v48 = vld [vmem:[%s1839_s16 + $0x70] sm:$0xf0] }
  0x66   : > { %920 = vmatpush.bf16.msra.mxu1 %v1515_v49 }
  0x67   : > { %969 = vmatpush.bf16.msra.mxu2 %v1881_v50 }
  0x69   : > { %872 = vmatpush.bf16.msra.mxu0 %v1506_v51  ;;  %1582 = vmatpush.bf16.msra.mxu3 %v1506_v51 }
  0x6a   : > { %921 = vmatpush.bf16.msra.mxu1 %v1514_v52 }
  0x6b   : > { %970 = vmatpush.bf16.msra.mxu2 %v1887_v53 }
  0x6d   : > { %873 = vmatpush.bf16.msra.mxu0 %v1505_v54  ;;  %1583 = vmatpush.bf16.msra.mxu3 %v1505_v54  ;;  %v1497_v54 = vld [vmem:[%s1839_s16 + $0x80] sm:$0xf0] }
  0x6e   : > { %922 = vmatpush.bf16.msra.mxu1 %v1513_v55 }
  0x6f   : > { %971 = vmatpush.bf16.msra.mxu2 %v1892_v56 }
  0x70   : > { %874 = vmatmul.bf16.vlgmr.msra.gmra.mxu0 %v1286_v1  ;;  %904 = vmatmul.bf16.vlgmr.msra.gmra.mxu3 %v1358_v2 }
  0x71   : > { %1584 = vmatpush.bf16.msrb.mxu3 %v1844_v34  ;;  %923 = vmatmul.bf16.vlgmr.msra.gmra.mxu1 %v1290_v3  ;;  %v1323_v34 = vld [vmem:[%s1839_s16 + $0x54] sm:$0xf0] }
  0x72   : > { %972 = vmatmul.bf16.vlgmr.msra.gmra.mxu2 %v1294_v4 }
  0x75   : > { %1585 = vmatpush.bf16.msrb.mxu3 %v1853_v37  ;;  %v1322_v37 = vor.u32 %v1491_v30, %v1321_v29  ;;  %v533_v29 = vld [vmem:[#allocation2 + $0x18] sm:$0xff] }
  0x79   : > { %1586 = vmatpush.bf16.msrb.mxu3 %v1518_v40 }
  0x7d   : > { %1587 = vmatpush.bf16.msrb.mxu3 %v1517_v43  ;;  %v1493_v43 = vld [vmem:[%s1839_s16 + $0x64] sm:$0xf] }
  0x80   : > { %879 = vmatmul.bf16.gmra.mxu0 %v1298_v13  ;;  %909 = vmatmul.bf16.gmra.mxu3 %v1370_v14  ;;  %v531_v13 = vld [vmem:[#allocation2] sm:$0xff] }
  0x81   : > { %1588 = vmatpush.bf16.msrb.mxu3 %v1516_v46  ;;  %928 = vmatmul.bf16.gmra.mxu1 %v1302_v15  ;;  %v1335_v46 = vld [vmem:[%s1839_s16 + $0x6c] sm:$0xf0] }
  0x82   : > { %977 = vmatmul.bf16.gmra.mxu2 %v1306_v16  ;;  %v1338_v51 = vor.u32 %v1493_v43, %v1335_v46 }
  0x85   : > { %1589 = vmatpush.bf16.msrb.mxu3 %v1515_v49 }
  0x89   : > { %1590 = vmatpush.bf16.msrb.mxu3 %v1514_v52 }
  0x8d   : > { %1591 = vmatpush.bf16.msrb.mxu3 %v1513_v55  ;;  %v1496_v55 = vld [vmem:[%s1839_s16 + $0x7c] sm:$0xf] }
  0x8e   : > { %v1350_v63 = vor.u32 %v1496_v55, %v1347_v58 }
  0x90   : > { %884 = vmatmul.bf16.gmra.mxu0 %v1310_v25  ;;  %953 = vmatmul.bf16.vlgmr.msrb.gmra.mxu3 %v1362_v26 }
  0x91   : > { %1592 = vmatpush.bf16.msra.mxu3 %v1847_v35  ;;  %933 = vmatmul.bf16.gmra.mxu1 %v1314_v27  ;;  %v1329_v35 = vld [vmem:[%s1839_s16 + $0x50] sm:$0xf] }
  0x92   : > { %982 = vmatmul.bf16.gmra.mxu2 %v1318_v28  ;;  %v1330_v40 = vor.u32 %v1492_v36, %v1329_v35 }
  0x95   : > { %1593 = vmatpush.bf16.msra.mxu3 %v1856_v38  ;;  %v1326_v38 = vor.u32 %v1490_v31, %v1323_v34 }
  0x99   : > { %1594 = vmatpush.bf16.msra.mxu3 %v1863_v41  ;;  %v1333_v41 = vld [vmem:[%s1839_s16 + $0x60] sm:$0xf] }
  0x9a   : > { %v1334_v49 = vor.u32 %v1494_v42, %v1333_v41 }
  0x9d   : > { %1595 = vmatpush.bf16.msra.mxu3 %v1869_v44  ;;  %v1365_v44 = vld [vmem:[%s1839_s16 + $0x98] sm:$0xf] }
  0xa0   : > { %889 = vmatmul.bf16.gmra.mxu0 %v1322_v37  ;;  %958 = vmatmul.bf16.gmra.mxu3 %v1374_v39  ;;  %v534_v37 = vld [vmem:[#allocation2 + $0x50] sm:$0xff] }
  0xa1   : > { %1596 = vmatpush.bf16.msra.mxu3 %v1875_v47  ;;  %938 = vmatmul.bf16.gmra.mxu1 %v1326_v38  ;;  %v1341_v47 = vld [vmem:[%s1839_s16 + $0x68] sm:$0xf] }
  0xa2   : > { %987 = vmatmul.bf16.gmra.mxu2 %v1330_v40  ;;  %v1342_v52 = vor.u32 %v1495_v48, %v1341_v47 }
  0xa5   : > { %1597 = vmatpush.bf16.msra.mxu3 %v1881_v50  ;;  %v1366_v50 = vor.u32 %v1501_v45, %v1365_v44  ;;  %v535_v45 = vld [vmem:[#allocation2 + $0x68] sm:$0xff] }
  0xa9   : > { %1598 = vmatpush.bf16.msra.mxu3 %v1887_v53  ;;  %v1345_v53 = vld [vmem:[%s1839_s16 + $0x78] sm:$0xf] }
  0xaa   : > { %v1346_v61 = vor.u32 %v1497_v54, %v1345_v53  ;;  %v536_v53 = vld [vmem:[#allocation2 + $0x8] sm:$0xff] }
  0xad   : > { %1599 = vmatpush.bf16.msra.mxu3 %v1892_v56  ;;  %v1504_v56 = vld [vmem:[%s1839_s16 + $0xb8] sm:$0xf0] }
  0xae   : > { %v1378_v62 = vor.u32 %v1504_v56, %v1377_v57 }
  0xb0   : > { %894 = vmatmul.bf16.gmra.mxu0 %v1334_v49  ;;  %1002 = vmatmul.bf16.vlgmr.msra.gmra.mxu3 %v1366_v50 }
  0xb1   : > { %943 = vmatmul.bf16.gmra.mxu1 %v1338_v51 }
  0xb2   : > { %992 = vmatmul.bf16.gmra.mxu2 %v1342_v52 }
  0xc0   : > { %899 = vmatmul.bf16.gmra.mxu0 %v1346_v61  ;;  %1007 = vmatmul.bf16.gmra.mxu3 %v1378_v62  ;;  %v537_v61 = vld [vmem:[#allocation2 + $0x48] sm:$0xff] }
  0xc1   : > { %948 = vmatmul.bf16.gmra.mxu1 %v1350_v63 }
  0xc2   : > { %997 = vmatmul.bf16.gmra.mxu2 %v1354_v0 }
  0xed   : > { %v875_v1 = vpop.f32.mrf.mxu0 }
  0xee   : > { %v924_v2 = vpop.f32.mrf.mxu1 }
  0xef   : > { %v925_v3 = vadd.f32 %v924_v2, %v875_v1 }
  0xf3   : > { %v1954_v4 = vpop.f32.mrf.mxu3 }
  0xf5   : > { %v973_v6 = vpop.f32.mrf.mxu2  ;;  %v877_v8 = vpop.f32.mrf.mxu0 }
  0xf6   : > { %v974_v7 = vadd.f32 %v973_v6, %v925_v3  ;;  %v926_v9 = vpop.f32.mrf.mxu1  ;;  %v542_v6 = vld [vmem:[#allocation2 + $0x60] sm:$0xff] }
  0xf7   : > { %v927_v11 = vadd.f32 %v926_v9, %v877_v8  ;;  %v538_v8 = vld [vmem:[#allocation2 + $0x40] sm:$0xff] }
  0xf8   : > { %v1013_v10 = vadd.f32 %v974_v7, %v530_v5 }
  0xfa   : > { %1029 = vst [vmem:[#allocation2 + $0x30] sm:$0xff] %v1013_v10 }
  0xfb   : > { %v1956_v12 = vpop.f32.mrf.mxu3 }
  0xfd   : > { %v975_v14 = vpop.f32.mrf.mxu2  ;;  %v880_v16 = vpop.f32.mrf.mxu0 }
  0xfe   : > { %v976_v15 = vadd.f32 %v975_v14, %v927_v11  ;;  %v929_v17 = vpop.f32.mrf.mxu1 }
  0xff   : > { %v930_v19 = vadd.f32 %v929_v17, %v880_v16 }
 0x100   : > { %v1014_v18 = vadd.f32 %v976_v15, %v531_v13 }
 0x102   : > { %1030 = vst [vmem:[#allocation2] sm:$0xff] %v1014_v18 }
 0x103   : > { %v1958_v20 = vpop.f32.mrf.mxu3 }
 0x105   : > { %v978_v22 = vpop.f32.mrf.mxu2  ;;  %v882_v24 = vpop.f32.mrf.mxu0 }
 0x106   : > { %v979_v23 = vadd.f32 %v978_v22, %v930_v19  ;;  %v931_v25 = vpop.f32.mrf.mxu1  ;;  %v543_v19 = vld [vmem:[#allocation2 + $0x70] sm:$0xff]  ;;  %v539_v22 = vld [vmem:[#allocation2 + $0x20] sm:$0xff] }
 0x107   : > { %v932_v27 = vadd.f32 %v931_v25, %v882_v24 }
 0x108   : > { %v1015_v26 = vadd.f32 %v979_v23, %v532_v21 }
 0x10a   : > { %1031 = vst [vmem:[#allocation2 + $0x58] sm:$0xff] %v1015_v26 }
 0x10b   : > { %v1960_v28 = vpop.f32.mrf.mxu3 }
 0x10d   : > { %v980_v30 = vpop.f32.mrf.mxu2  ;;  %v885_v32 = vpop.f32.mrf.mxu0 }
 0x10e   : > { %v981_v31 = vadd.f32 %v980_v30, %v932_v27  ;;  %v934_v33 = vpop.f32.mrf.mxu1 }
 0x10f   : > { %v935_v35 = vadd.f32 %v934_v33, %v885_v32  ;;  %v544_v32 = vld [vmem:[#allocation2 + $0x78] sm:$0xff] }
 0x110   : > { %v1016_v34 = vadd.f32 %v981_v31, %v533_v29 }
 0x112   : > { %1032 = vst [vmem:[#allocation2 + $0x18] sm:$0xff] %v1016_v34  ;;  %v540_v34 = vld [vmem:[#allocation2 + $0x10] sm:$0xff] }
 0x113   : > { %v954_v36 = vpop.f32.mrf.mxu3 }
 0x114   : > { %v955_v5 = vadd.f32 %v954_v36, %v1954_v4 }
 0x115   : > { %v983_v39 = vpop.f32.mrf.mxu2  ;;  %v887_v40 = vpop.f32.mrf.mxu0 }
 0x116   : > { %v984_v38 = vadd.f32 %v983_v39, %v935_v35  ;;  %v936_v41 = vpop.f32.mrf.mxu1 }
 0x117   : > { %v937_v43 = vadd.f32 %v936_v41, %v887_v40 }
 0x118   : > { %v1017_v42 = vadd.f32 %v984_v38, %v534_v37 }
 0x11a   : > { %1033 = vst [vmem:[#allocation2 + $0x50] sm:$0xff] %v1017_v42 }
 0x11b   : > { %v956_v44 = vpop.f32.mrf.mxu3 }
 0x11c   : > { %v957_v17 = vadd.f32 %v956_v44, %v1956_v12 }
 0x11d   : > { %v985_v46 = vpop.f32.mrf.mxu2  ;;  %v890_v48 = vpop.f32.mrf.mxu0 }
 0x11e   : > { %v986_v47 = vadd.f32 %v985_v46, %v937_v43  ;;  %v939_v49 = vpop.f32.mrf.mxu1  ;;  %v545_v43 = vld [vmem:[#allocation2 + $0x28] sm:$0xff] }
 0x11f   : > { %v940_v51 = vadd.f32 %v939_v49, %v890_v48 }
 0x120   : > { %v1018_v50 = vadd.f32 %v986_v47, %v535_v45  ;;  %v541_v45 = vld [vmem:[#allocation2 + $0x38] sm:$0xff] }
 0x122   : > { %1034 = vst [vmem:[#allocation2 + $0x68] sm:$0xff] %v1018_v50 }
 0x123   : > { %v959_v52 = vpop.f32.mrf.mxu3 }
 0x124   : > { %v960_v31 = vadd.f32 %v959_v52, %v1958_v20 }
 0x125   : > { %v988_v54 = vpop.f32.mrf.mxu2  ;;  %v892_v57 = vpop.f32.mrf.mxu0 }
 0x126   : > { %v989_v55 = vadd.f32 %v988_v54, %v940_v51  ;;  %v941_v56 = vpop.f32.mrf.mxu1 }
 0x127   : > { %v942_v59 = vadd.f32 %v941_v56, %v892_v57 }
 0x128   : > { %v1019_v58 = vadd.f32 %v989_v55, %v536_v53 }
 0x12a   : > { %1035 = vst [vmem:[#allocation2 + $0x8] sm:$0xff] %v1019_v58 }
 0x12b   : > { %v961_v60 = vpop.f32.mrf.mxu3 }
 0x12c   : > { %v962_v41 = vadd.f32 %v961_v60, %v1960_v28 }
 0x12d   : > { %v990_v62 = vpop.f32.mrf.mxu2  ;;  %v895_v0 = vpop.f32.mrf.mxu0 }
 0x12e   : > { %v991_v63 = vadd.f32 %v990_v62, %v942_v59  ;;  %v944_v1 = vpop.f32.mrf.mxu1 }
 0x12f   : > { %v945_v3 = vadd.f32 %v944_v1, %v895_v0 }
 0x130   : > { %v1020_v2 = vadd.f32 %v991_v63, %v537_v61 }
 0x132   : > { %1036 = vst [vmem:[#allocation2 + $0x48] sm:$0xff] %v1020_v2 }
 0x133   : > { %v1003_v7 = vpop.f32.mrf.mxu3 }
 0x134   : > { %v1004_v10 = vadd.f32 %v1003_v7, %v955_v5 }
 0x135   : > { %v993_v9 = vpop.f32.mrf.mxu2  ;;  %v897_v13 = vpop.f32.mrf.mxu0 }
 0x136   : > { %v994_v11 = vadd.f32 %v993_v9, %v945_v3  ;;  %v1025_v14 = vadd.f32 %v1004_v10, %v542_v6  ;;  %v946_v15 = vpop.f32.mrf.mxu1 }
 0x137   : > { %v947_v18 = vadd.f32 %v946_v15, %v897_v13 }
 0x138   : > { %v1021_v16 = vadd.f32 %v994_v11, %v538_v8  ;;  %1041 = vst [vmem:[#allocation2 + $0x60] sm:$0xff] %v1025_v14 }
 0x13a   : > { %1037 = vst [vmem:[#allocation2 + $0x40] sm:$0xff] %v1021_v16 }
 0x13b   : > { %v1005_v21 = vpop.f32.mrf.mxu3 }
 0x13c   : > { %v1006_v4 = vadd.f32 %v1005_v21, %v957_v17 }
 0x13d   : > { %v995_v23 = vpop.f32.mrf.mxu2  ;;  %v900_v26 = vpop.f32.mrf.mxu0 }
 0x13e   : > { %v996_v24 = vadd.f32 %v995_v23, %v947_v18  ;;  %v1026_v25 = vadd.f32 %v1006_v4, %v543_v19  ;;  %v949_v27 = vpop.f32.mrf.mxu1 }
 0x13f   : > { %v950_v30 = vadd.f32 %v949_v27, %v900_v26 }
 0x140   : > { %v1022_v29 = vadd.f32 %v996_v24, %v539_v22  ;;  %1042 = vst [vmem:[#allocation2 + $0x70] sm:$0xff] %v1026_v25 }
 0x142   : > { %1038 = vst [vmem:[#allocation2 + $0x20] sm:$0xff] %v1022_v29 }
 0x143   : > { %v1008_v33 = vpop.f32.mrf.mxu3 }
 0x144   : > { %v1009_v35 = vadd.f32 %v1008_v33, %v960_v31 }
 0x145   : > { %v998_v12 = vpop.f32.mrf.mxu2  ;;  %v902_v38 = vpop.f32.mrf.mxu0 }
 0x146   : > { %v999_v36 = vadd.f32 %v998_v12, %v950_v30  ;;  %v1027_v37 = vadd.f32 %v1009_v35, %v544_v32  ;;  %v951_v40 = vpop.f32.mrf.mxu1 }
 0x147   : > { %v952_v42 = vadd.f32 %v951_v40, %v902_v38 }
 0x148   : > { %v1023_v39 = vadd.f32 %v999_v36, %v540_v34  ;;  %1043 = vst [vmem:[#allocation2 + $0x78] sm:$0xff] %v1027_v37 }
 0x14a   : > { %1039 = vst [vmem:[#allocation2 + $0x10] sm:$0xff] %v1023_v39 }
 0x14b   : > { %v1010_v44 = vpop.f32.mrf.mxu3 }
 0x14c   : > { %v1011_v20 = vadd.f32 %v1010_v44, %v962_v41 }
 0x14d   : > { %v1000_v46 = vpop.f32.mrf.mxu2 }
 0x14e   : > { %v1001_v47 = vadd.f32 %v1000_v46, %v952_v42  ;;  %v1028_v48 = vadd.f32 %v1011_v20, %v545_v43  ;;  %1048 = sbr.rel (%p1475_p11) target bundleno = 350 (0x15e), region = 78 }
 0x150   : > { %v1024_v49 = vadd.f32 %v1001_v47, %v541_v45  ;;  %1044 = vst [vmem:[#allocation2 + $0x28] sm:$0xff] %v1028_v48 }
 0x152   : > { %1040 = vst [vmem:[#allocation2 + $0x38] sm:$0xff] %v1024_v49 }
 0x153   : > { %v1049_v50 = vld [vmem:[#allocation2 + $0x30] sm:$0xff]  ;;  %v1050_v51 = vld [vmem:[#allocation2] sm:$0xff]  ;;  %v1051_v52 = vld [vmem:[#allocation2 + $0x58] sm:$0xff] }
 0x154   : > { %v1532_v53 = vpack.c.bf16 %v1050_v51, %v1049_v50  ;;  %v1052_v54 = vld [vmem:[#allocation2 + $0x18] sm:$0xff]  ;;  %v1053_v28 = vld [vmem:[#allocation2 + $0x50] sm:$0xff]  ;;  %v1054_v55 = vld [vmem:[#allocation2 + $0x68] sm:$0xff] }
 0x155   : > { %v1537_v57 = vpack.c.bf16 %v1052_v54, %v1051_v52  ;;  %v1542_v56 = vpack.c.bf16 %v1054_v55, %v1053_v28  ;;  %v1055_v58 = vld [vmem:[#allocation2 + $0x8] sm:$0xff]  ;;  %v1057_v60 = vld [vmem:[#allocation2 + $0x40] sm:$0xff]  ;;  %v1059_v63 = vld [vmem:[#allocation2 + $0x10] sm:$0xff] }
 0x156   : > { %v1056_v59 = vld [vmem:[#allocation2 + $0x48] sm:$0xff]  ;;  %1533 = vst [vmem:[%s2012_s6] sm:$0xff] %v1532_v53   ;;  %v1058_v62 = vld [vmem:[#allocation2 + $0x20] sm:$0xff]  ;;  %v1062_v5 = vld [vmem:[#allocation2 + $0x70] sm:$0xff] }
 0x157   : > { %v1547_v61 = vpack.c.bf16 %v1056_v59, %v1055_v58  ;;  %1569 = vst [vmem:[%s2012_s6 + $0x8] sm:$0xff] %v1537_v57   ;;  %v1552_v1 = vpack.c.bf16 %v1058_v62, %v1057_v60  ;;  %v1061_v3 = vld [vmem:[#allocation2 + $0x60] sm:$0xff]  ;;  %v1063_v6 = vld [vmem:[#allocation2 + $0x78] sm:$0xff]  ;;  %v1064_v8 = vld [vmem:[#allocation2 + $0x28] sm:$0xff] }
 0x158   : > { %1570 = vst [vmem:[%s2012_s6 + $0x10] sm:$0xff] %v1542_v56   ;;  %v1562_v7 = vpack.c.bf16 %v1062_v5, %v1061_v3  ;;  %v1567_v9 = vpack.c.bf16 %v1064_v8, %v1063_v6 }
 0x159   : > { %v1060_v0 = vld [vmem:[#allocation2 + $0x38] sm:$0xff]  ;;  %1571 = vst [vmem:[%s2012_s6 + $0x18] sm:$0xff] %v1547_v61  }
 0x15a   : > { %v1557_v2 = vpack.c.bf16 %v1060_v0, %v1059_v63  ;;  %1572 = vst [vmem:[%s2012_s6 + $0x20] sm:$0xff] %v1552_v1  }
 0x15b   : > { %1574 = vst [vmem:[%s2012_s6 + $0x30] sm:$0xff] %v1562_v7  }
 0x15c   : > { %1573 = vst [vmem:[%s2012_s6 + $0x28] sm:$0xff] %v1557_v2  }
 0x15d   : > { %1575 = vst [vmem:[%s2012_s6 + $0x38] sm:$0xff] %v1567_v9  }
 0x15e PF: > { %s16_s2 = sadd.s32 1, %s1681_s2   ;;  %s2013_s21 = smov %s1669_s22 }
 0x15f   : > { %p13_p12 = scmp.ge.s32.totalorder %s16_s2, 5   ;;  %s2014_s22 = smov %s1754_s25 }
 0x160   : > { %s2015_s23 = smov %s1677_s24  ;;  %s2016_s24 = smov %s2018_s3 }
 0x161   :  { %15 = sbr.rel (!%p13_p12) target bundleno = 3 (0x3), region = 134 }

// kernel: densenet121_forward.140
= control target key start
LH: loop header
LB: loop body
LE: loop exit
PB: predicated region body
PF: predicated region fallthrough
CT: control target
= control target key end

     0   :  { %s920_s1 = inlined_call_operand.vmem [shape: bf16[256,128], index: 1, kind: input, shape index: {}]   ;;  %s921_s4 = inlined_call_operand.vmem [shape: f32[1,128], index: 4, kind: input, shape index: {}, may-alias: {4,5}]   ;;  %s922_s5 = inlined_call_operand.vmem [shape: f32[1,128], index: 5, kind: input, shape index: {}, may-alias: {4,5}]   ;;  %s923_s0 = inlined_call_operand.vmem [shape: bf16[128,256], index: 0, kind: input, shape index: {}]   ;;  %s924_s2 = inlined_call_operand.vmem [shape: f32[1,256], index: 2, kind: input, shape index: {}]   ;;  %s925_s3 = inlined_call_operand.vmem [shape: f32[1,256], index: 3, kind: input, shape index: {}]   ;;  %s926_s6 = inlined_call_operand.vmem [shape: bf16[128,128], index: 6, kind: output, shape index: {}]  }
   0x1   :  { %v615_v0 = vld [vmem:[%s920_s1 + $0x38] sm:$0xff]  ;;  %v614_v2 = vld [vmem:[%s920_s1 + $0x30] sm:$0xff]  ;;  %v613_v4 = vld [vmem:[%s920_s1 + $0x28] sm:$0xff] }
   0x2   :  { %v623_v1 = vld [vmem:[%s920_s1 + $0x78] sm:$0xff]  ;;  %359 = vmatpush.bf16.msra.mxu0 %v615_v0  ;;  %671 = vmatpush.bf16.msra.mxu2 %v615_v0  ;;  %v622_v3 = vld [vmem:[%s920_s1 + $0x70] sm:$0xff]  ;;  %v621_v5 = vld [vmem:[%s920_s1 + $0x68] sm:$0xff] }
   0x3   :  { %408 = vmatpush.bf16.msra.mxu1 %v623_v1  ;;  %679 = vmatpush.bf16.msra.mxu3 %v623_v1  ;;  %v43_v6 = vld [vmem:[%s923_s0] sm:$0xff]  ;;  %v44_v7 = vld [vmem:[%s923_s0 + $0x8] sm:$0xff]  ;;  %v611_v22 = vld [vmem:[%s920_s1 + $0x18] sm:$0xff] }
   0x4   :  { %v91_v8 = vld [vmem:[%s924_s2] sm:$0x3]  ;;  %v52_v10 = vld [vmem:[%s923_s0 + $0x48] sm:$0xff]  ;;  %v59_v13 = vunpack.c.l.bf16 %v43_v6  ;;  %v61_v14 = vunpack.c.l.bf16 %v44_v7  ;;  %v60_v19 = vunpack.c.h.bf16 %v43_v6  ;;  %v62_v20 = vunpack.c.h.bf16 %v44_v7  ;;  %v619_v25 = vld [vmem:[%s920_s1 + $0x58] sm:$0xff] }
   0x5   :  { %v51_v9 = vld [vmem:[%s923_s0 + $0x40] sm:$0xff]  ;;  %v761_v15 = vperm.slane %v91_v8, 0  ;;  %v77_v18 = vunpack.c.l.bf16 %v52_v10  ;;  %v766_v21 = vperm.slane %v91_v8, 1  ;;  %v78_v24 = vunpack.c.h.bf16 %v52_v10  ;;  %v610_v34 = vld [vmem:[%s920_s1 + $0x10] sm:$0xff]  ;;  %v609_v44 = vld [vmem:[%s920_s1 + $0x8] sm:$0xff] }
   0x6   :  { %360 = vmatpush.bf16.msra.mxu0 %v614_v2  ;;  %672 = vmatpush.bf16.msra.mxu2 %v614_v2  ;;  %v612_v11 = vld [vmem:[%s920_s1 + $0x20] sm:$0xff]  ;;  %v75_v17 = vunpack.c.l.bf16 %v51_v9  ;;  %v76_v23 = vunpack.c.h.bf16 %v51_v9  ;;  %v618_v37 = vld [vmem:[%s920_s1 + $0x50] sm:$0xff]  ;;  %v617_v47 = vld [vmem:[%s920_s1 + $0x48] sm:$0xff] }
   0x7   :  { %409 = vmatpush.bf16.msra.mxu1 %v622_v3  ;;  %680 = vmatpush.bf16.msra.mxu3 %v622_v3  ;;  %v620_v12 = vld [vmem:[%s920_s1 + $0x60] sm:$0xff]  ;;  %v97_v27 = vmul.f32 %v761_v15, %v59_v13  ;;  %v99_v28 = vmul.f32 %v761_v15, %v61_v14  ;;  %v115_v30 = vmul.f32 %v761_v15, %v77_v18  ;;  %v45_v54 = vld [vmem:[%s923_s0 + $0x10] sm:$0xff]  ;;  %v46_v55 = vld [vmem:[%s923_s0 + $0x18] sm:$0xff] }
   0x8   :  { %v129_v16 = vld [vmem:[%s925_s3] sm:$0x3]  ;;  %v113_v29 = vmul.f32 %v761_v15, %v75_v17  ;;  %v98_v31 = vmul.f32 %v766_v21, %v60_v19  ;;  %v100_v32 = vmul.f32 %v766_v21, %v62_v20  ;;  %v114_v35 = vmul.f32 %v766_v21, %v76_v23  ;;  %v53_v59 = vld [vmem:[%s923_s0 + $0x50] sm:$0xff]  ;;  %v54_v60 = vld [vmem:[%s923_s0 + $0x58] sm:$0xff] }
   0x9   :  { %v774_v26 = vperm.slane %v129_v16, 0  ;;  %v782_v33 = vperm.slane %v129_v16, 1  ;;  %v116_v36 = vmul.f32 %v766_v21, %v78_v24  ;;  %v608_v56 = vld [vmem:[%s920_s1] sm:$0xff]  ;;  %v63_v0 = vunpack.c.l.bf16 %v45_v54 }
   0xa   :  { %361 = vmatpush.bf16.msra.mxu0 %v613_v4  ;;  %673 = vmatpush.bf16.msra.mxu2 %v613_v4  ;;  %v616_v61 = vld [vmem:[%s920_s1 + $0x40] sm:$0xff]  ;;  %v65_v1 = vunpack.c.l.bf16 %v46_v55  ;;  %v79_v3 = vunpack.c.l.bf16 %v53_v59  ;;  %v81_v4 = vunpack.c.l.bf16 %v54_v60  ;;  %v66_v7 = vunpack.c.h.bf16 %v46_v55 }
   0xb   :  { %410 = vmatpush.bf16.msra.mxu1 %v621_v5  ;;  %681 = vmatpush.bf16.msra.mxu3 %v621_v5  ;;  %v135_v38 = vadd.f32 %v774_v26, %v97_v27  ;;  %v137_v39 = vadd.f32 %v774_v26, %v99_v28  ;;  %v151_v40 = vadd.f32 %v774_v26, %v113_v29  ;;  %v64_v5 = vunpack.c.h.bf16 %v45_v54  ;;  %v47_v29 = vld [vmem:[%s923_s0 + $0x20] sm:$0xff] }
   0xc   :  { %v153_v41 = vadd.f32 %v774_v26, %v115_v30  ;;  %v136_v42 = vadd.f32 %v782_v33, %v98_v31  ;;  %v138_v43 = vadd.f32 %v782_v33, %v100_v32  ;;  %v152_v45 = vadd.f32 %v782_v33, %v114_v35  ;;  %v48_v30 = vld [vmem:[%s923_s0 + $0x28] sm:$0xff] }
   0xd   :  { %v154_v46 = vadd.f32 %v782_v33, %v116_v36  ;;  %v167_v48 = vmax.f32 %v135_v38, 0.0  ;;  %v169_v49 = vmax.f32 %v137_v39, 0.0  ;;  %v183_v50 = vmax.f32 %v151_v40, 0.0  ;;  %v55_v36 = vld [vmem:[%s923_s0 + $0x60] sm:$0xff] }
   0xe   :  { %362 = vmatpush.bf16.msra.mxu0 %v612_v11  ;;  %674 = vmatpush.bf16.msra.mxu2 %v612_v11  ;;  %v185_v51 = vmax.f32 %v153_v41, 0.0  ;;  %v168_v52 = vmax.f32 %v136_v42, 0.0  ;;  %v170_v53 = vmax.f32 %v138_v43, 0.0  ;;  %v184_v57 = vmax.f32 %v152_v45, 0.0 }
   0xf   :  { %411 = vmatpush.bf16.msra.mxu1 %v620_v12  ;;  %682 = vmatpush.bf16.msra.mxu3 %v620_v12  ;;  %v186_v58 = vmax.f32 %v154_v46, 0.0  ;;  %v199_v62 = vpack.c.bf16 %v169_v49, %v167_v48  ;;  %v80_v8 = vunpack.c.h.bf16 %v53_v59  ;;  %v82_v9 = vunpack.c.h.bf16 %v54_v60 }
  0x10   :  { %v207_v63 = vpack.c.bf16 %v185_v51, %v183_v50  ;;  %v200_v2 = vpack.c.bf16 %v170_v53, %v168_v52  ;;  %v101_v10 = vmul.f32 %v761_v15, %v63_v0  ;;  %v103_v11 = vmul.f32 %v761_v15, %v65_v1 }
  0x11   :  { %v208_v6 = vpack.c.bf16 %v186_v58, %v184_v57  ;;  %v117_v12 = vmul.f32 %v761_v15, %v79_v3  ;;  %v119_v13 = vmul.f32 %v761_v15, %v81_v4  ;;  %v102_v14 = vmul.f32 %v766_v21, %v64_v5 }
  0x12   :  { %363 = vmatpush.bf16.msra.mxu0 %v611_v22  ;;  %675 = vmatpush.bf16.msra.mxu2 %v611_v22  ;;  %v104_v16 = vmul.f32 %v766_v21, %v66_v7  ;;  %v118_v17 = vmul.f32 %v766_v21, %v80_v8  ;;  %v120_v18 = vmul.f32 %v766_v21, %v82_v9  ;;  %v67_v42 = vunpack.c.l.bf16 %v47_v29 }
  0x13   :  { %412 = vmatpush.bf16.msra.mxu1 %v619_v25  ;;  %683 = vmatpush.bf16.msra.mxu3 %v619_v25  ;;  %v139_v19 = vadd.f32 %v774_v26, %v101_v10  ;;  %v141_v20 = vadd.f32 %v774_v26, %v103_v11  ;;  %v155_v22 = vadd.f32 %v774_v26, %v117_v12  ;;  %v69_v43 = vunpack.c.l.bf16 %v48_v30  ;;  %v49_v12 = vld [vmem:[%s923_s0 + $0x30] sm:$0xff] }
  0x14   :  { %v157_v23 = vadd.f32 %v774_v26, %v119_v13  ;;  %v140_v24 = vadd.f32 %v782_v33, %v102_v14  ;;  %v142_v25 = vadd.f32 %v782_v33, %v104_v16  ;;  %v156_v27 = vadd.f32 %v782_v33, %v118_v17  ;;  %v50_v13 = vld [vmem:[%s923_s0 + $0x38] sm:$0xff]  ;;  %v57_v17 = vld [vmem:[%s923_s0 + $0x70] sm:$0xff] }
  0x15   :  { %v158_v28 = vadd.f32 %v782_v33, %v120_v18  ;;  %v171_v31 = vmax.f32 %v139_v19, 0.0  ;;  %v173_v32 = vmax.f32 %v141_v20, 0.0  ;;  %v68_v48 = vunpack.c.h.bf16 %v47_v29  ;;  %v58_v18 = vld [vmem:[%s923_s0 + $0x78] sm:$0xff] }
  0x16   :  { %364 = vmatpush.bf16.msra.mxu0 %v610_v34  ;;  %676 = vmatpush.bf16.msra.mxu2 %v610_v34  ;;  %v187_v34 = vmax.f32 %v155_v22, 0.0  ;;  %v189_v35 = vmax.f32 %v157_v23, 0.0  ;;  %v172_v38 = vmax.f32 %v140_v24, 0.0  ;;  %v174_v39 = vmax.f32 %v142_v25, 0.0 }
  0x17   :  { %413 = vmatpush.bf16.msra.mxu1 %v618_v37  ;;  %684 = vmatpush.bf16.msra.mxu3 %v618_v37  ;;  %v56_v37 = vld [vmem:[%s923_s0 + $0x68] sm:$0xff]  ;;  %v188_v40 = vmax.f32 %v156_v27, 0.0  ;;  %v190_v41 = vmax.f32 %v158_v28, 0.0  ;;  %v201_v46 = vpack.c.bf16 %v173_v32, %v171_v31  ;;  %v70_v49 = vunpack.c.h.bf16 %v48_v30 }
  0x18   :  { %v85_v45 = vunpack.c.l.bf16 %v56_v37  ;;  %v202_v50 = vpack.c.bf16 %v174_v39, %v172_v38  ;;  %v84_v52 = vunpack.c.h.bf16 %v55_v36  ;;  %v86_v53 = vunpack.c.h.bf16 %v56_v37 }
  0x19   :  { %v210_v51 = vpack.c.bf16 %v190_v41, %v188_v40  ;;  %v105_v54 = vmul.f32 %v761_v15, %v67_v42  ;;  %v107_v55 = vmul.f32 %v761_v15, %v69_v43  ;;  %v106_v58 = vmul.f32 %v766_v21, %v68_v48 }
  0x1a   :  { %365 = vmatpush.bf16.msra.mxu0 %v609_v44  ;;  %677 = vmatpush.bf16.msra.mxu2 %v609_v44  ;;  %v83_v44 = vunpack.c.l.bf16 %v55_v36  ;;  %v123_v57 = vmul.f32 %v761_v15, %v85_v45  ;;  %v108_v59 = vmul.f32 %v766_v21, %v70_v49  ;;  %v122_v60 = vmul.f32 %v766_v21, %v84_v52 }
  0x1b   :  { %414 = vmatpush.bf16.msra.mxu1 %v617_v47  ;;  %685 = vmatpush.bf16.msra.mxu3 %v617_v47  ;;  %v209_v47 = vpack.c.bf16 %v189_v35, %v187_v34  ;;  %v71_v22 = vunpack.c.l.bf16 %v49_v12  ;;  %v73_v23 = vunpack.c.l.bf16 %v50_v13  ;;  %v87_v25 = vunpack.c.l.bf16 %v57_v17 }
  0x1c   :  { %v161_v1 = vadd.f32 %v774_v26, %v123_v57  ;;  %v146_v3 = vadd.f32 %v782_v33, %v108_v59  ;;  %v160_v4 = vadd.f32 %v782_v33, %v122_v60  ;;  %v89_v27 = vunpack.c.l.bf16 %v58_v18 }
  0x1d   :  { %v72_v28 = vunpack.c.h.bf16 %v49_v12  ;;  %v74_v30 = vunpack.c.h.bf16 %v50_v13  ;;  %v88_v31 = vunpack.c.h.bf16 %v57_v17  ;;  %v90_v32 = vunpack.c.h.bf16 %v58_v18 }
  0x1e   :  { %366 = vmatpush.bf16.msra.mxu0 %v608_v56  ;;  %678 = vmatpush.bf16.msra.mxu2 %v608_v56  ;;  %v121_v56 = vmul.f32 %v761_v15, %v83_v44  ;;  %v193_v9 = vmax.f32 %v161_v1, 0.0  ;;  %v178_v11 = vmax.f32 %v146_v3, 0.0  ;;  %v192_v14 = vmax.f32 %v160_v4, 0.0 }
  0x1f   :  { %415 = vmatpush.bf16.msra.mxu1 %v616_v61  ;;  %686 = vmatpush.bf16.msra.mxu3 %v616_v61  ;;  %v124_v61 = vmul.f32 %v766_v21, %v86_v53  ;;  %v109_v34 = vmul.f32 %v761_v15, %v71_v22  ;;  %v111_v35 = vmul.f32 %v761_v15, %v73_v23 }
  0x20   :  { %v159_v0 = vadd.f32 %v774_v26, %v121_v56  ;;  %v125_v36 = vmul.f32 %v761_v15, %v87_v25  ;;  %v127_v37 = vmul.f32 %v761_v15, %v89_v27  ;;  %v110_v38 = vmul.f32 %v766_v21, %v72_v28 }
  0x21   :  { %367 = vmatmul.bf16.vlgmr.msra.gmra.mxu0 %v199_v62  ;;  %387 = vmatmul.bf16.vlgmr.msra.gmra.mxu2 %v207_v63  ;;  %v143_v62 = vadd.f32 %v774_v26, %v105_v54  ;;  %v145_v63 = vadd.f32 %v774_v26, %v107_v55  ;;  %v162_v5 = vadd.f32 %v782_v33, %v124_v61 }
  0x22   :  { %416 = vmatmul.bf16.vlgmr.msra.gmra.mxu1 %v200_v2  ;;  %436 = vmatmul.bf16.vlgmr.msra.gmra.mxu3 %v208_v6  ;;  %v144_v2 = vadd.f32 %v782_v33, %v106_v58  ;;  %v191_v8 = vmax.f32 %v159_v0, 0.0  ;;  %v112_v39 = vmul.f32 %v766_v21, %v74_v30  ;;  %v126_v40 = vmul.f32 %v766_v21, %v88_v31 }
  0x23   :  { %v175_v6 = vmax.f32 %v143_v62, 0.0  ;;  %v177_v7 = vmax.f32 %v145_v63, 0.0  ;;  %v194_v16 = vmax.f32 %v162_v5, 0.0  ;;  %v128_v41 = vmul.f32 %v766_v21, %v90_v32 }
  0x24   :  { %v176_v10 = vmax.f32 %v144_v2, 0.0  ;;  %v211_v20 = vpack.c.bf16 %v193_v9, %v191_v8  ;;  %v147_v42 = vadd.f32 %v774_v26, %v109_v34  ;;  %v149_v43 = vadd.f32 %v774_v26, %v111_v35 }
  0x25   :  { %v203_v19 = vpack.c.bf16 %v177_v7, %v175_v6  ;;  %v212_v29 = vpack.c.bf16 %v194_v16, %v192_v14  ;;  %v163_v44 = vadd.f32 %v774_v26, %v125_v36  ;;  %v165_v45 = vadd.f32 %v774_v26, %v127_v37 }
  0x26   :  { %v204_v24 = vpack.c.bf16 %v178_v11, %v176_v10  ;;  %v148_v15 = vadd.f32 %v782_v33, %v110_v38  ;;  %v166_v48 = vadd.f32 %v782_v33, %v128_v41  ;;  %v179_v49 = vmax.f32 %v147_v42, 0.0 }
  0x27   :  { %v197_v21 = vmax.f32 %v165_v45, 0.0 }
  0x28   :  { %v180_v52 = vmax.f32 %v148_v15, 0.0  ;;  %v198_v55 = vmax.f32 %v166_v48, 0.0 }
  0x31   :  { %372 = vmatmul.bf16.gmra.mxu0 %v201_v46  ;;  %392 = vmatmul.bf16.gmra.mxu2 %v209_v47  ;;  %v150_v46 = vadd.f32 %v782_v33, %v112_v39  ;;  %v164_v47 = vadd.f32 %v782_v33, %v126_v40 }
  0x32   :  { %421 = vmatmul.bf16.gmra.mxu1 %v202_v50  ;;  %441 = vmatmul.bf16.gmra.mxu3 %v210_v51  ;;  %v181_v50 = vmax.f32 %v149_v43, 0.0  ;;  %v195_v51 = vmax.f32 %v163_v44, 0.0 }
  0x33   :  { %v182_v53 = vmax.f32 %v150_v46, 0.0  ;;  %v196_v54 = vmax.f32 %v164_v47, 0.0 }
  0x34   :  { %v205_v56 = vpack.c.bf16 %v181_v50, %v179_v49  ;;  %v213_v57 = vpack.c.bf16 %v197_v21, %v195_v51 }
  0x35   :  { %v206_v58 = vpack.c.bf16 %v182_v53, %v180_v52  ;;  %v214_v26 = vpack.c.bf16 %v198_v55, %v196_v54 }
  0x41   :  { %377 = vmatmul.bf16.gmra.mxu0 %v203_v19  ;;  %397 = vmatmul.bf16.gmra.mxu2 %v211_v20 }
  0x42   :  { %426 = vmatmul.bf16.gmra.mxu1 %v204_v24  ;;  %446 = vmatmul.bf16.gmra.mxu3 %v212_v29 }
  0x51   :  { %382 = vmatmul.bf16.gmra.mxu0 %v205_v56  ;;  %402 = vmatmul.bf16.gmra.mxu2 %v213_v57 }
  0x52   :  { %431 = vmatmul.bf16.gmra.mxu1 %v206_v58  ;;  %451 = vmatmul.bf16.gmra.mxu3 %v214_v26 }
  0x9e   :  { %v368_v59 = vpop.f32.mrf.mxu0 }
  0x9f   :  { %v417_v60 = vpop.f32.mrf.mxu1 }
  0xa0   :  { %v418_v0 = vadd.f32 %v417_v60, %v368_v59 }
  0xa4   :  { %v388_v61 = vpop.f32.mrf.mxu2 }
  0xa5   :  { %v437_v33 = vpop.f32.mrf.mxu3 }
  0xa6   :  { %v370_v62 = vpop.f32.mrf.mxu0  ;;  %v438_v5 = vadd.f32 %v437_v33, %v388_v61 }
  0xa7   :  { %v419_v63 = vpop.f32.mrf.mxu1 }
  0xa8   :  { %v420_v1 = vadd.f32 %v419_v63, %v370_v62 }
  0xaa   :  { %v627_v2 = vpack.c.bf16 %v420_v1, %v418_v0 }
  0xac   :  { %628 = vst [vmem:[%s926_s6] sm:$0xff] %v627_v2   ;;  %v390_v3 = vpop.f32.mrf.mxu2 }
  0xad   :  { %v439_v4 = vpop.f32.mrf.mxu3 }
  0xae   :  { %v440_v6 = vadd.f32 %v439_v4, %v390_v3  ;;  %v373_v7 = vpop.f32.mrf.mxu0 }
  0xaf   :  { %v422_v8 = vpop.f32.mrf.mxu1 }
  0xb0   :  { %v647_v9 = vpack.c.bf16 %v440_v6, %v438_v5  ;;  %v423_v14 = vadd.f32 %v422_v8, %v373_v7 }
  0xb2   :  { %667 = vst [vmem:[%s926_s6 + $0x20] sm:$0xff] %v647_v9  }
  0xb4   :  { %v393_v10 = vpop.f32.mrf.mxu2 }
  0xb5   :  { %v442_v11 = vpop.f32.mrf.mxu3 }
  0xb6   :  { %v375_v12 = vpop.f32.mrf.mxu0  ;;  %v443_v20 = vadd.f32 %v442_v11, %v393_v10 }
  0xb7   :  { %v424_v13 = vpop.f32.mrf.mxu1 }
  0xb8   :  { %v425_v16 = vadd.f32 %v424_v13, %v375_v12 }
  0xba   :  { %v632_v17 = vpack.c.bf16 %v425_v16, %v423_v14 }
  0xbc   :  { %664 = vst [vmem:[%s926_s6 + $0x8] sm:$0xff] %v632_v17   ;;  %v395_v18 = vpop.f32.mrf.mxu2 }
  0xbd   :  { %v444_v19 = vpop.f32.mrf.mxu3 }
  0xbe   :  { %v445_v22 = vadd.f32 %v444_v19, %v395_v18  ;;  %v378_v23 = vpop.f32.mrf.mxu0 }
  0xbf   :  { %v427_v24 = vpop.f32.mrf.mxu1 }
  0xc0   :  { %v652_v25 = vpack.c.bf16 %v445_v22, %v443_v20  ;;  %v428_v31 = vadd.f32 %v427_v24, %v378_v23 }
  0xc2   :  { %668 = vst [vmem:[%s926_s6 + $0x28] sm:$0xff] %v652_v25  }
  0xc4   :  { %v398_v27 = vpop.f32.mrf.mxu2 }
  0xc5   :  { %v447_v28 = vpop.f32.mrf.mxu3 }
  0xc6   :  { %v380_v29 = vpop.f32.mrf.mxu0  ;;  %v448_v37 = vadd.f32 %v447_v28, %v398_v27 }
  0xc7   :  { %v429_v30 = vpop.f32.mrf.mxu1 }
  0xc8   :  { %v430_v32 = vadd.f32 %v429_v30, %v380_v29 }
  0xca   :  { %v637_v34 = vpack.c.bf16 %v430_v32, %v428_v31 }
  0xcc   :  { %665 = vst [vmem:[%s926_s6 + $0x10] sm:$0xff] %v637_v34   ;;  %v400_v35 = vpop.f32.mrf.mxu2 }
  0xcd   :  { %v449_v36 = vpop.f32.mrf.mxu3 }
  0xce   :  { %v450_v38 = vadd.f32 %v449_v36, %v400_v35  ;;  %v383_v39 = vpop.f32.mrf.mxu0 }
  0xcf   :  { %v432_v40 = vpop.f32.mrf.mxu1 }
  0xd0   :  { %v657_v41 = vpack.c.bf16 %v450_v38, %v448_v37  ;;  %v433_v15 = vadd.f32 %v432_v40, %v383_v39 }
  0xd2   :  { %669 = vst [vmem:[%s926_s6 + $0x30] sm:$0xff] %v657_v41  }
  0xd4   :  { %v403_v42 = vpop.f32.mrf.mxu2 }
  0xd5   :  { %v452_v43 = vpop.f32.mrf.mxu3 }
  0xd6   :  { %v385_v44 = vpop.f32.mrf.mxu0  ;;  %v453_v50 = vadd.f32 %v452_v43, %v403_v42 }
  0xd7   :  { %v434_v45 = vpop.f32.mrf.mxu1 }
  0xd8   :  { %v435_v46 = vadd.f32 %v434_v45, %v385_v44 }
  0xda   :  { %v642_v47 = vpack.c.bf16 %v435_v46, %v433_v15 }
  0xdc   :  { %666 = vst [vmem:[%s926_s6 + $0x18] sm:$0xff] %v642_v47   ;;  %v405_v48 = vpop.f32.mrf.mxu2 }
  0xdd   :  { %v454_v49 = vpop.f32.mrf.mxu3 }
  0xde   :  { %v455_v51 = vadd.f32 %v454_v49, %v405_v48 }
  0xe0   :  { %v662_v21 = vpack.c.bf16 %v455_v51, %v453_v50 }
  0xe2   :  { %670 = vst [vmem:[%s926_s6 + $0x38] sm:$0xff] %v662_v21  }

// kernel: densenet121_forward.141
= control target key start
LH: loop header
LB: loop body
LE: loop exit
PB: predicated region body
PF: predicated region fallthrough
CT: control target
= control target key end

     0   :  { %s158_s0 = inlined_call_operand.vmem [shape: bf16[4,32,128], index: 0, kind: input, shape index: {}]   ;;  %s159_s1 = inlined_call_operand.vmem [shape: bf16[32,128], index: 1, kind: output, shape index: {}]  }
   0x1   :  { %v69_v0 = vld [vmem:[%s158_s0] sm:$0xff]   ;;  %v111_v1 = vld [vmem:[%s158_s0 + $0x10] sm:$0xff]   ;;  %v110_v8 = vld [vmem:[%s158_s0 + $0x8] sm:$0xff]  }
   0x2   :  { %v113_v2 = vld [vmem:[%s158_s0 + $0x20] sm:$0xff]   ;;  %v70_v3 = vunpack.c.l.bf16 %v69_v0  ;;  %v71_v4 = vunpack.c.h.bf16 %v69_v0  ;;  %v78_v5 = vunpack.c.l.bf16 %v111_v1  ;;  %v79_v6 = vunpack.c.h.bf16 %v111_v1  ;;  %v115_v7 = vld [vmem:[%s158_s0 + $0x30] sm:$0xff]   ;;  %v112_v9 = vld [vmem:[%s158_s0 + $0x18] sm:$0xff]  }
   0x3   :  { %v86_v10 = vunpack.c.l.bf16 %v113_v2  ;;  %v87_v11 = vunpack.c.h.bf16 %v113_v2  ;;  %v94_v12 = vunpack.c.l.bf16 %v115_v7  ;;  %v95_v13 = vunpack.c.h.bf16 %v115_v7  ;;  %v114_v14 = vld [vmem:[%s158_s0 + $0x28] sm:$0xff]   ;;  %v116_v19 = vld [vmem:[%s158_s0 + $0x38] sm:$0xff]  }
   0x4   :  { %v40_v15 = vadd.f32 %v78_v5, %v70_v3  ;;  %v43_v16 = vadd.f32 %v79_v6, %v71_v4  ;;  %v74_v17 = vunpack.c.l.bf16 %v110_v8  ;;  %v75_v18 = vunpack.c.h.bf16 %v110_v8 }
   0x5   :  { %v82_v20 = vunpack.c.l.bf16 %v112_v9  ;;  %v83_v21 = vunpack.c.h.bf16 %v112_v9  ;;  %v90_v22 = vunpack.c.l.bf16 %v114_v14  ;;  %v91_v23 = vunpack.c.h.bf16 %v114_v14 }
   0x6   :  { %v41_v24 = vadd.f32 %v86_v10, %v40_v15  ;;  %v44_v25 = vadd.f32 %v87_v11, %v43_v16  ;;  %v98_v26 = vunpack.c.l.bf16 %v116_v19  ;;  %v99_v27 = vunpack.c.h.bf16 %v116_v19 }
   0x7   :  { %v46_v28 = vadd.f32 %v82_v20, %v74_v17  ;;  %v49_v29 = vadd.f32 %v83_v21, %v75_v18 }
   0x8   :  { %v42_v30 = vadd.f32 %v94_v12, %v41_v24  ;;  %v45_v31 = vadd.f32 %v95_v13, %v44_v25 }
   0x9   :  { %v47_v32 = vadd.f32 %v90_v22, %v46_v28  ;;  %v50_v33 = vadd.f32 %v91_v23, %v49_v29 }
   0xa   :  { %v52_v34 = vmul.f32 0.25, %v42_v30  ;;  %v53_v35 = vmul.f32 0.25, %v45_v31 }
   0xb   :  { %v48_v36 = vadd.f32 %v98_v26, %v47_v32  ;;  %v51_v37 = vadd.f32 %v99_v27, %v50_v33 }
   0xc   :  { %v103_v38 = vpack.c.bf16 %v53_v35, %v52_v34 }
   0xd   :  { %v54_v39 = vmul.f32 0.25, %v48_v36  ;;  %v55_v40 = vmul.f32 0.25, %v51_v37 }
   0xe   :  { %104 = vst [vmem:[%s159_s1] sm:$0xff] %v103_v38  }
   0xf   :  { %v108_v41 = vpack.c.bf16 %v55_v40, %v54_v39 }
  0x11   :  { %117 = vst [vmem:[%s159_s1 + $0x8] sm:$0xff] %v108_v41  }

// kernel: densenet121_forward.142
= control target key start
LH: loop header
LB: loop body
LE: loop exit
PB: predicated region body
PF: predicated region fallthrough
CT: control target
= control target key end

     0   :  { %s908_s1 = inlined_call_operand.vmem [shape: bf16[512,128], index: 1, kind: input, shape index: {}]   ;;  %s909_s0 = inlined_call_operand.vmem [shape: bf16[32,512], index: 0, kind: input, shape index: {}]   ;;  %s910_s2 = inlined_call_operand.vmem [shape: f32[1,512], index: 2, kind: input, shape index: {}]   ;;  %s911_s3 = inlined_call_operand.vmem [shape: f32[1,512], index: 3, kind: input, shape index: {}]   ;;  %s912_s4 = inlined_call_operand.vmem [shape: f32[1,128], index: 4, kind: input, shape index: {}]   ;;  %s913_s5 = inlined_call_operand.vmem [shape: f32[1,128], index: 5, kind: input, shape index: {}]   ;;  %s914_s6 = inlined_call_operand.vmem [shape: bf16[32,128], index: 6, kind: output, shape index: {}]  }
   0x1   :  { %v649_v0 = vld [vmem:[%s908_s1 + $0x38] sm:$0xff]  ;;  %v648_v4 = vld [vmem:[%s908_s1 + $0x30] sm:$0xff]  ;;  %v647_v8 = vld [vmem:[%s908_s1 + $0x28] sm:$0xff] }
   0x2   :  { %v657_v1 = vld [vmem:[%s908_s1 + $0x78] sm:$0xff]  ;;  %391 = vmatpush.bf16.msra.mxu0 %v649_v0  ;;  %v656_v5 = vld [vmem:[%s908_s1 + $0x70] sm:$0xff]  ;;  %v655_v9 = vld [vmem:[%s908_s1 + $0x68] sm:$0xff] }
   0x3   :  { %v665_v2 = vld [vmem:[%s908_s1 + $0xb8] sm:$0xff]  ;;  %410 = vmatpush.bf16.msra.mxu1 %v657_v1  ;;  %v664_v6 = vld [vmem:[%s908_s1 + $0xb0] sm:$0xff]  ;;  %v663_v10 = vld [vmem:[%s908_s1 + $0xa8] sm:$0xff] }
   0x4   :  { %v673_v3 = vld [vmem:[%s908_s1 + $0xf8] sm:$0xff]  ;;  %429 = vmatpush.bf16.msra.mxu2 %v665_v2  ;;  %v672_v7 = vld [vmem:[%s908_s1 + $0xf0] sm:$0xff]  ;;  %v671_v11 = vld [vmem:[%s908_s1 + $0xe8] sm:$0xff] }
   0x5   :  { %448 = vmatpush.bf16.msra.mxu3 %v673_v3  ;;  %v646_v12 = vld [vmem:[%s908_s1 + $0x20] sm:$0xff]  ;;  %v33_v17 = vld [vmem:[%s909_s0 + $0x10] sm:$0xff]  ;;  %v32_v25 = vld [vmem:[%s909_s0 + $0x8] sm:$0xff] }
   0x6   :  { %392 = vmatpush.bf16.msra.mxu0 %v648_v4  ;;  %v654_v13 = vld [vmem:[%s908_s1 + $0x60] sm:$0xff]  ;;  %v43_v20 = vunpack.c.l.bf16 %v33_v17  ;;  %v44_v24 = vunpack.c.h.bf16 %v33_v17  ;;  %v34_v26 = vld [vmem:[%s909_s0 + $0x18] sm:$0xff]  ;;  %v41_v28 = vunpack.c.l.bf16 %v32_v25  ;;  %v42_v37 = vunpack.c.h.bf16 %v32_v25  ;;  %v644_v47 = vld [vmem:[%s908_s1 + $0x10] sm:$0xff] }
   0x7   :  { %411 = vmatpush.bf16.msra.mxu1 %v656_v5  ;;  %v662_v14 = vld [vmem:[%s908_s1 + $0xa0] sm:$0xff]  ;;  %v45_v29 = vunpack.c.l.bf16 %v34_v26  ;;  %v645_v30 = vld [vmem:[%s908_s1 + $0x18] sm:$0xff]  ;;  %v46_v38 = vunpack.c.h.bf16 %v34_v26  ;;  %v652_v48 = vld [vmem:[%s908_s1 + $0x50] sm:$0xff] }
   0x8   :  { %430 = vmatpush.bf16.msra.mxu2 %v664_v6  ;;  %v31_v15 = vld [vmem:[%s909_s0] sm:$0xff]  ;;  %v653_v31 = vld [vmem:[%s908_s1 + $0x58] sm:$0xff]  ;;  %v660_v50 = vld [vmem:[%s908_s1 + $0x90] sm:$0xff] }
   0x9   :  { %449 = vmatpush.bf16.msra.mxu3 %v672_v7  ;;  %v670_v16 = vld [vmem:[%s908_s1 + $0xe0] sm:$0xff]  ;;  %v39_v18 = vunpack.c.l.bf16 %v31_v15  ;;  %v40_v23 = vunpack.c.h.bf16 %v31_v15  ;;  %v661_v33 = vld [vmem:[%s908_s1 + $0x98] sm:$0xff]  ;;  %v668_v51 = vld [vmem:[%s908_s1 + $0xd0] sm:$0xff] }
   0xa   :  { %393 = vmatpush.bf16.msra.mxu0 %v647_v8  ;;  %v55_v19 = vld [vmem:[%s910_s2] sm:$0xf]  ;;  %v669_v34 = vld [vmem:[%s908_s1 + $0xd8] sm:$0xff]  ;;  %v643_v60 = vld [vmem:[%s908_s1 + $0x8] sm:$0xff] }
   0xb   :  { %412 = vmatpush.bf16.msra.mxu1 %v655_v9  ;;  %v779_v21 = vperm.slane %v55_v19, 0  ;;  %v81_v22 = vld [vmem:[%s911_s3] sm:$0xf]  ;;  %v790_v27 = vperm.slane %v55_v19, 1  ;;  %v798_v32 = vperm.slane %v55_v19, 2  ;;  %v818_v46 = vperm.slane %v55_v19, 3 }
   0xc   :  { %431 = vmatpush.bf16.msra.mxu2 %v663_v10  ;;  %v806_v35 = vperm.slane %v81_v22, 0  ;;  %v808_v36 = vperm.slane %v81_v22, 1  ;;  %v816_v45 = vperm.slane %v81_v22, 2  ;;  %v826_v49 = vperm.slane %v81_v22, 3  ;;  %v651_v61 = vld [vmem:[%s908_s1 + $0x48] sm:$0xff]  ;;  %v35_v8 = vld [vmem:[%s909_s0 + $0x20] sm:$0xff] }
   0xd   :  { %450 = vmatpush.bf16.msra.mxu3 %v671_v11  ;;  %v65_v39 = vmul.f32 %v779_v21, %v39_v18  ;;  %v69_v40 = vmul.f32 %v779_v21, %v43_v20  ;;  %v66_v41 = vmul.f32 %v790_v27, %v40_v23  ;;  %v70_v42 = vmul.f32 %v790_v27, %v44_v24  ;;  %v659_v0 = vld [vmem:[%s908_s1 + $0x88] sm:$0xff]  ;;  %v37_v9 = vld [vmem:[%s909_s0 + $0x30] sm:$0xff]  ;;  %v642_v10 = vld [vmem:[%s908_s1] sm:$0xff] }
   0xe   :  { %394 = vmatpush.bf16.msra.mxu0 %v646_v12  ;;  %v67_v43 = vmul.f32 %v798_v32, %v41_v28  ;;  %v71_v44 = vmul.f32 %v798_v32, %v45_v29  ;;  %v68_v52 = vmul.f32 %v818_v46, %v42_v37  ;;  %v72_v53 = vmul.f32 %v818_v46, %v46_v38  ;;  %v667_v1 = vld [vmem:[%s908_s1 + $0xc8] sm:$0xff]  ;;  %v650_v11 = vld [vmem:[%s908_s1 + $0x40] sm:$0xff]  ;;  %v38_v17 = vld [vmem:[%s909_s0 + $0x38] sm:$0xff] }
   0xf   :  { %413 = vmatpush.bf16.msra.mxu1 %v654_v13  ;;  %v91_v54 = vadd.f32 %v806_v35, %v65_v39  ;;  %v95_v55 = vadd.f32 %v806_v35, %v69_v40  ;;  %v92_v56 = vadd.f32 %v808_v36, %v66_v41  ;;  %v96_v57 = vadd.f32 %v808_v36, %v70_v42  ;;  %v658_v15 = vld [vmem:[%s908_s1 + $0x80] sm:$0xff] }
  0x10   :  { %432 = vmatpush.bf16.msra.mxu2 %v662_v14  ;;  %v93_v58 = vadd.f32 %v816_v45, %v67_v43  ;;  %v97_v59 = vadd.f32 %v816_v45, %v71_v44  ;;  %v94_v62 = vadd.f32 %v826_v49, %v68_v52  ;;  %v98_v63 = vadd.f32 %v826_v49, %v72_v53  ;;  %v36_v14 = vld [vmem:[%s909_s0 + $0x28] sm:$0xff] }
  0x11   :  { %451 = vmatpush.bf16.msra.mxu3 %v670_v16  ;;  %v107_v2 = vmax.f32 %v91_v54, 0.0  ;;  %v111_v3 = vmax.f32 %v95_v55, 0.0  ;;  %v108_v4 = vmax.f32 %v92_v56, 0.0  ;;  %v112_v5 = vmax.f32 %v96_v57, 0.0  ;;  %v666_v16 = vld [vmem:[%s908_s1 + $0xc0] sm:$0xff] }
  0x12   :  { %395 = vmatpush.bf16.msra.mxu0 %v645_v30  ;;  %v109_v6 = vmax.f32 %v93_v58, 0.0  ;;  %v113_v7 = vmax.f32 %v97_v59, 0.0  ;;  %v110_v12 = vmax.f32 %v94_v62, 0.0  ;;  %v114_v13 = vmax.f32 %v98_v63, 0.0 }
  0x13   :  { %414 = vmatpush.bf16.msra.mxu1 %v653_v31  ;;  %v123_v18 = vpack.c.bf16 %v111_v3, %v107_v2  ;;  %v124_v19 = vpack.c.bf16 %v112_v5, %v108_v4  ;;  %v47_v20 = vunpack.c.l.bf16 %v35_v8  ;;  %v51_v22 = vunpack.c.l.bf16 %v37_v9  ;;  %v685_v3 = vld [vmem:[%s912_s4] ss:$0 sm:$0xff] }
  0x14   :  { %433 = vmatpush.bf16.msra.mxu2 %v661_v33  ;;  %v125_v23 = vpack.c.bf16 %v113_v7, %v109_v6  ;;  %v48_v24 = vunpack.c.h.bf16 %v35_v8  ;;  %v52_v25 = vunpack.c.h.bf16 %v37_v9  ;;  %v49_v26 = vunpack.c.l.bf16 %v36_v14  ;;  %v686_v8 = vld [vmem:[%s913_s5] ss:$0 sm:$0xff] }
  0x15   :  { %452 = vmatpush.bf16.msra.mxu3 %v669_v34  ;;  %v126_v28 = vpack.c.bf16 %v114_v13, %v110_v12  ;;  %v53_v29 = vunpack.c.l.bf16 %v38_v17  ;;  %v50_v30 = vunpack.c.h.bf16 %v36_v14  ;;  %v54_v31 = vunpack.c.h.bf16 %v38_v17 }
  0x16   :  { %396 = vmatpush.bf16.msra.mxu0 %v644_v47  ;;  %v73_v33 = vmul.f32 %v779_v21, %v47_v20  ;;  %v77_v34 = vmul.f32 %v779_v21, %v51_v22  ;;  %v74_v37 = vmul.f32 %v790_v27, %v48_v24  ;;  %v78_v38 = vmul.f32 %v790_v27, %v52_v25 }
  0x17   :  { %415 = vmatpush.bf16.msra.mxu1 %v652_v48  ;;  %v75_v39 = vmul.f32 %v798_v32, %v49_v26  ;;  %v79_v40 = vmul.f32 %v798_v32, %v53_v29  ;;  %v76_v41 = vmul.f32 %v818_v46, %v50_v30  ;;  %v80_v42 = vmul.f32 %v818_v46, %v54_v31 }
  0x18   :  { %434 = vmatpush.bf16.msra.mxu2 %v660_v50  ;;  %v99_v43 = vadd.f32 %v806_v35, %v73_v33  ;;  %v103_v21 = vadd.f32 %v806_v35, %v77_v34  ;;  %v100_v44 = vadd.f32 %v808_v36, %v74_v37  ;;  %v104_v47 = vadd.f32 %v808_v36, %v78_v38 }
  0x19   :  { %453 = vmatpush.bf16.msra.mxu3 %v668_v51  ;;  %v101_v27 = vadd.f32 %v816_v45, %v75_v39  ;;  %v105_v48 = vadd.f32 %v816_v45, %v79_v40  ;;  %v102_v50 = vadd.f32 %v826_v49, %v76_v41  ;;  %v106_v32 = vadd.f32 %v826_v49, %v80_v42 }
  0x1a   :  { %397 = vmatpush.bf16.msra.mxu0 %v643_v60  ;;  %v115_v51 = vmax.f32 %v99_v43, 0.0  ;;  %v119_v52 = vmax.f32 %v103_v21, 0.0  ;;  %v116_v53 = vmax.f32 %v100_v44, 0.0  ;;  %v120_v46 = vmax.f32 %v104_v47, 0.0 }
  0x1b   :  { %416 = vmatpush.bf16.msra.mxu1 %v651_v61  ;;  %v117_v54 = vmax.f32 %v101_v27, 0.0  ;;  %v121_v55 = vmax.f32 %v105_v48, 0.0  ;;  %v118_v56 = vmax.f32 %v102_v50, 0.0  ;;  %v122_v35 = vmax.f32 %v106_v32, 0.0 }
  0x1c   :  { %435 = vmatpush.bf16.msra.mxu2 %v659_v0  ;;  %v127_v57 = vpack.c.bf16 %v119_v52, %v115_v51  ;;  %v128_v58 = vpack.c.bf16 %v120_v46, %v116_v53 }
  0x1d   :  { %454 = vmatpush.bf16.msra.mxu3 %v667_v1  ;;  %v129_v59 = vpack.c.bf16 %v121_v55, %v117_v54  ;;  %v130_v36 = vpack.c.bf16 %v122_v35, %v118_v56 }
  0x1e   :  { %398 = vmatpush.bf16.msra.mxu0 %v642_v10 }
  0x1f   :  { %417 = vmatpush.bf16.msra.mxu1 %v650_v11 }
  0x20   :  { %436 = vmatpush.bf16.msra.mxu2 %v658_v15 }
  0x21   :  { %455 = vmatpush.bf16.msra.mxu3 %v666_v16  ;;  %399 = vmatmul.bf16.vlgmr.msra.gmra.mxu0 %v123_v18 }
  0x22   :  { %418 = vmatmul.bf16.vlgmr.msra.gmra.mxu1 %v124_v19 }
  0x23   :  { %437 = vmatmul.bf16.vlgmr.msra.gmra.mxu2 %v125_v23 }
  0x24   :  { %456 = vmatmul.bf16.vlgmr.msra.gmra.mxu3 %v126_v28 }
  0x31   :  { %404 = vmatmul.bf16.gmra.mxu0 %v127_v57 }
  0x32   :  { %423 = vmatmul.bf16.gmra.mxu1 %v128_v58 }
  0x33   :  { %442 = vmatmul.bf16.gmra.mxu2 %v129_v59 }
  0x34   :  { %461 = vmatmul.bf16.gmra.mxu3 %v130_v36 }
  0x9e   :  { %v400_v45 = vpop.f32.mrf.mxu0 }
  0x9f   :  { %v419_v60 = vpop.f32.mrf.mxu1 }
  0xa0   :  { %v420_v61 = vadd.f32 %v419_v60, %v400_v45 }
  0xa6   :  { %v438_v49 = vpop.f32.mrf.mxu2  ;;  %v402_v0 = vpop.f32.mrf.mxu0 }
  0xa7   :  { %v457_v62 = vpop.f32.mrf.mxu3  ;;  %v439_v63 = vadd.f32 %v438_v49, %v420_v61  ;;  %v421_v1 = vpop.f32.mrf.mxu1 }
  0xa8   :  { %v422_v4 = vadd.f32 %v421_v1, %v402_v0 }
  0xa9   :  { %v458_v2 = vadd.f32 %v457_v62, %v439_v63 }
  0xab   :  { %v486_v7 = vmul.f32 %v685_v3, %v458_v2 }
  0xad   :  { %v494_v13 = vadd.f32 %v686_v8, %v486_v7 }
  0xae   :  { %v440_v5 = vpop.f32.mrf.mxu2  ;;  %v405_v10 = vpop.f32.mrf.mxu0 }
  0xaf   :  { %v459_v6 = vpop.f32.mrf.mxu3  ;;  %v441_v9 = vadd.f32 %v440_v5, %v422_v4  ;;  %v424_v11 = vpop.f32.mrf.mxu1  ;;  %v498_v19 = vmax.f32 %v494_v13, 0.0 }
  0xb0   :  { %v425_v15 = vadd.f32 %v424_v11, %v405_v10 }
  0xb1   :  { %v460_v12 = vadd.f32 %v459_v6, %v441_v9 }
  0xb3   :  { %v487_v14 = vmul.f32 %v685_v3, %v460_v12 }
  0xb5   :  { %v495_v16 = vadd.f32 %v686_v8, %v487_v14 }
  0xb6   :  { %v443_v17 = vpop.f32.mrf.mxu2  ;;  %v407_v24 = vpop.f32.mrf.mxu0 }
  0xb7   :  { %v462_v18 = vpop.f32.mrf.mxu3  ;;  %v499_v20 = vmax.f32 %v495_v16, 0.0  ;;  %v444_v22 = vadd.f32 %v443_v17, %v425_v15  ;;  %v426_v25 = vpop.f32.mrf.mxu1 }
  0xb8   :  { %v427_v28 = vadd.f32 %v426_v25, %v407_v24 }
  0xb9   :  { %v677_v23 = vpack.c.bf16 %v499_v20, %v498_v19  ;;  %v463_v26 = vadd.f32 %v462_v18, %v444_v22 }
  0xbb   :  { %678 = vst [vmem:[%s914_s6] sm:$0xff] %v677_v23   ;;  %v488_v30 = vmul.f32 %v685_v3, %v463_v26 }
  0xbd   :  { %v496_v37 = vadd.f32 %v686_v8, %v488_v30 }
  0xbe   :  { %v445_v29 = vpop.f32.mrf.mxu2 }
  0xbf   :  { %v446_v31 = vadd.f32 %v445_v29, %v427_v28  ;;  %v464_v33 = vpop.f32.mrf.mxu3  ;;  %v500_v40 = vmax.f32 %v496_v37, 0.0 }
  0xc1   :  { %v465_v34 = vadd.f32 %v464_v33, %v446_v31 }
  0xc3   :  { %v489_v38 = vmul.f32 %v685_v3, %v465_v34 }
  0xc5   :  { %v497_v39 = vadd.f32 %v686_v8, %v489_v38 }
  0xc7   :  { %v501_v41 = vmax.f32 %v497_v39, 0.0 }
  0xc9   :  { %v682_v42 = vpack.c.bf16 %v501_v41, %v500_v40 }
  0xcb   :  { %684 = vst [vmem:[%s914_s6 + $0x8] sm:$0xff] %v682_v42  }

// kernel: densenet121_forward.143
= control target key start
LH: loop header
LB: loop body
LE: loop exit
PB: predicated region body
PF: predicated region fallthrough
CT: control target
= control target key end

     0   :  { %s1211_s21 = smov 0   ;;  %s1213_s22 = smov 0   ;;  %s1324_s0 = inlined_call_operand.vmem [shape: bf16[32,1152], index: 0, kind: input, shape index: {}]   ;;  %s1325_s1 = inlined_call_operand.vmem [shape: bf16[1152,128], index: 1, kind: input, shape index: {}]   ;;  %s1326_s2 = inlined_call_operand.vmem [shape: f32[1,1152], index: 2, kind: input, shape index: {}, may-alias: {2,3}]   ;;  %s1327_s3 = inlined_call_operand.vmem [shape: f32[1,1152], index: 3, kind: input, shape index: {}, may-alias: {2,3}]   ;;  %s1328_s4 = inlined_call_operand.vmem [shape: f32[1,128], index: 4, kind: input, shape index: {}, may-alias: {4,5}]   ;;  %s1329_s5 = inlined_call_operand.vmem [shape: f32[1,128], index: 5, kind: input, shape index: {}, may-alias: {4,5}]   ;;  %s1330_s6 = inlined_call_operand.vmem [shape: bf16[32,128], index: 6, kind: output, shape index: {}]  }
   0x1   :  { %s1215_s23 = smov 0   ;;  %s1217_s24 = smov 0  }
   0x2   :  { %s1219_s2 = smov 0  }
   0x3 LB: > { %s28_s3 = sadd.s32 1, %s1169_s24  ;;  %p51_p1 = scmp.ne.s32.totalorder %s1161_s22, %s1157_s21  ;;  %s1173_s2 = sphi %s1219_s2, %s16_s2   ;;  %s1169_s24 = sphi %s1217_s24, %s1334_s24   ;;  %s1165_s23 = sphi %s1215_s23, %s1333_s23   ;;  %s1161_s22 = sphi %s1213_s22, %s1332_s22   ;;  %s1157_s21 = sphi %s1211_s21, %s1331_s21  }
   0x4   : > { %p29_p0 = scmp.ge.s32.totalorder %s28_s3, 3  ;;  %p52_p2 = scmp.eq.s32.totalorder %s1173_s2, 0 }
   0x5   : > { %s44_s5 = sadd.s32 1, %s1161_s22  ;;  %p904_p5 = scmp.ge.s32.totalorder %s1173_s2, 3 }
   0x6   : > { %s1336_s3 = smov (%p29_p0, %s28_s3), 0  ;;  %p53_p3 = por %p52_p2, %p51_p1 }
   0x7   : > { %s40_s4 = ssub.s32 %s1169_s24, %s1336_s3  ;;  %249 = sbr.rel (%p904_p5) target bundleno = 25 (0x19), region = 24 }
   0x8   : > { %p42_p4 = scmp.eq.s32.totalorder %s40_s4, 0 }
   0xa   : > { %s1246_s25 = scalar_select %p42_p4, %s1161_s22, %s44_s5  }
   0xc   : > { %252 = sbr.rel (!%p53_p3) target bundleno = 25 (0x19), region = 28  ;;  %s254_s26 = sand.u32 (%p53_p3), 1, %s1161_s22  }
   0xd   : > { %s1042_s27 = smul.u32 (%p53_p3), 12, %s1169_s24 }
   0xe   : > { %s1092_s28 = smul.u32 (%p53_p3), 48, %s254_s26 }
   0xf   : > { %s262_s7 = scalar_lea.vmem (%p53_p3), %s1324_s0, %s1042_s27 }
  0x10   : > { %v277_v0 = vld [vmem:[%s262_s7] sm:$0xff] (%p53_p3)  ;;  %v281_v2 = vld [vmem:[%s262_s7 + $0x48] sm:$0xff] (%p53_p3)  ;;  %s256_s8 = scalar_lea.vmem (%p53_p3), [#allocation3], %s1092_s28  ;;  %v910_v6 = vld [vmem:[%s262_s7 + $0x50] sm:$0xf] (%p53_p3) }
  0x11   : > { %v279_v1 = vld [vmem:[%s262_s7 + $0x24] sm:$0xff]  ;;  %278 = vst [vmem:[%s256_s8] sm:$0xff] %v277_v0  ;;  %v283_v3 = vld [vmem:[%s262_s7 + $0x6c] sm:$0xff]  ;;  %v912_v7 = vld [vmem:[%s262_s7 + $0x74] sm:$0xf] }
  0x12   : > { %280 = vst [vmem:[%s256_s8 + $0xc] sm:$0xff] %v279_v1  ;;  %v906_v4 = vld [vmem:[%s262_s7 + $0x8] sm:$0xf]  ;;  %v908_v5 = vld [vmem:[%s262_s7 + $0x2c] sm:$0xf] }
  0x13   : > { %282 = vst [vmem:[%s256_s8 + $0x18] sm:$0xff] %v281_v2 }
  0x14   : > { %284 = vst [vmem:[%s256_s8 + $0x24] sm:$0xff] %v283_v3 }
  0x15   : > { %907 = vst [vmem:[%s256_s8 + $0x8] sm:$0xf] %v906_v4 }
  0x16   : > { %909 = vst [vmem:[%s256_s8 + $0x14] sm:$0xf] %v908_v5 }
  0x17   : > { %911 = vst [vmem:[%s256_s8 + $0x20] sm:$0xf] %v910_v6 }
  0x18   : > { %913 = vst [vmem:[%s256_s8 + $0x2c] sm:$0xf] %v912_v7 }
  0x19 PF: > { %p914_p6 = scmp.ge.s32.totalorder %s1173_s2, 1  ;;  %p333_p7 = scmp.lt.s32.totalorder %s1173_s2, 4 }
  0x1b   : > { %p334_p8 = pnand %p914_p6, %p333_p7 }
  0x1c   : > { %s340_s9 = sand.u32 (!%p334_p8), 1, %s1157_s21   ;;  %s396_s10 = smul.u32 (!%p334_p8), 48, %s1165_s23 }
  0x1d   : > { %337 = sbr.rel (%p334_p8) target bundleno = 249 (0xf9), region = 66  ;;  %p916_p10 = scmp.ne.s32.totalorder (!%p334_p8), %s1165_s23, 0 }
  0x1e   : > { %s1093_s11 = smul.u32 (!%p334_p8), 48, %s340_s9  ;;  %p397_p9 = scmp.lt.s32.totalorder (!%p334_p8), %s396_s10, 143 }
  0x20   : > { %s1263_s16 = scalar_lea.vmem (!%p334_p8), [#allocation3], %s1093_s11 }
  0x22   : > { %s1338_s10 = smov (!%p397_p9, %s396_s10), 143  ;;  %433 = sbr.rel (%p916_p10) target bundleno = 44 (0x2c), region = 74 }
  0x23   : > { %s915_s12 = sshll.u32 %s1338_s10, 2 }
  0x24   : > { %s1261_s15 = scalar_lea.vmem %s1325_s1, %s915_s12 }
  0x27   : > { %v1175_v8 = vmov 0.0  }
  0x28   : > { %434 = vst [vmem:[#allocation2 + $0x10] sm:$0xff] %v1175_v8 }
  0x29   : > { %435 = vst [vmem:[#allocation2] sm:$0xff] %v1175_v8 }
  0x2a   : > { %436 = vst [vmem:[#allocation2 + $0x18] sm:$0xff] %v1175_v8 }
  0x2b   : > { %437 = vst [vmem:[#allocation2 + $0x8] sm:$0xff] %v1175_v8 }
  0x2c PF: > { %v1056_v9 = vld [vmem:[%s1261_s15 + $0x38] sm:$0xff]  ;;  %v1055_v12 = vld [vmem:[%s1261_s15 + $0x30] sm:$0xff]  ;;  %v1054_v15 = vld [vmem:[%s1261_s15 + $0x28] sm:$0xff]  ;;  %p1037_p11 = scmp.ne.s32.totalorder %s1165_s23, 2 }
  0x2d   : > { %v1064_v10 = vld [vmem:[%s1261_s15 + $0x78] sm:$0xff]  ;;  %674 = vmatpush.bf16.msra.mxu0 %v1056_v9  ;;  %v1063_v13 = vld [vmem:[%s1261_s15 + $0x70] sm:$0xff]  ;;  %1084 = vmatpush.bf16.msra.mxu3 %v1056_v9  ;;  %v1062_v16 = vld [vmem:[%s1261_s15 + $0x68] sm:$0xff] }
  0x2e   : > { %v1072_v11 = vld [vmem:[%s1261_s15 + $0xb8] sm:$0xff]  ;;  %693 = vmatpush.bf16.msra.mxu1 %v1064_v10  ;;  %v1071_v14 = vld [vmem:[%s1261_s15 + $0xb0] sm:$0xff]  ;;  %v1070_v17 = vld [vmem:[%s1261_s15 + $0xa8] sm:$0xff] }
  0x2f   : > { %712 = vmatpush.bf16.msra.mxu2 %v1072_v11  ;;  %v1053_v18 = vld [vmem:[%s1261_s15 + $0x20] sm:$0xff]  ;;  %v1052_v21 = vld [vmem:[%s1261_s15 + $0x18] sm:$0xff]  ;;  %v1051_v24 = vld [vmem:[%s1261_s15 + $0x10] sm:$0xff] }
  0x30   : > { %v1061_v19 = vld [vmem:[%s1261_s15 + $0x60] sm:$0xff]  ;;  %v1060_v22 = vld [vmem:[%s1261_s15 + $0x58] sm:$0xff]  ;;  %v1059_v25 = vld [vmem:[%s1261_s15 + $0x50] sm:$0xff] }
  0x31   : > { %675 = vmatpush.bf16.msra.mxu0 %v1055_v12  ;;  %1085 = vmatpush.bf16.msra.mxu3 %v1055_v12  ;;  %v1069_v20 = vld [vmem:[%s1261_s15 + $0xa0] sm:$0xff]  ;;  %v1068_v23 = vld [vmem:[%s1261_s15 + $0x98] sm:$0xff]  ;;  %v1067_v26 = vld [vmem:[%s1261_s15 + $0x90] sm:$0xff] }
  0x32   : > { %694 = vmatpush.bf16.msra.mxu1 %v1063_v13  ;;  %v1050_v27 = vld [vmem:[%s1261_s15 + $0x8] sm:$0xff]  ;;  %v1049_v30 = vld [vmem:[%s1261_s15] sm:$0xff]  ;;  %v446_v54 = vld [vmem:[#allocation2 + $0x10] sm:$0xff] }
  0x33   : > { %713 = vmatpush.bf16.msra.mxu2 %v1071_v14  ;;  %v1058_v28 = vld [vmem:[%s1261_s15 + $0x48] sm:$0xff]  ;;  %v1057_v31 = vld [vmem:[%s1261_s15 + $0x40] sm:$0xff]  ;;  %v448_v4 = vld [vmem:[#allocation2 + $0x18] sm:$0xff] }
  0x34   : > { %v1066_v29 = vld [vmem:[%s1261_s15 + $0x88] sm:$0xff]  ;;  %v1065_v32 = vld [vmem:[%s1261_s15 + $0x80] sm:$0xff] }
  0x35   : > { %676 = vmatpush.bf16.msra.mxu0 %v1054_v15  ;;  %1086 = vmatpush.bf16.msra.mxu3 %v1054_v15  ;;  %v919_v33 = vld [vmem:[%s1263_s16] sm:$0xf]  ;;  %v1044_v34 = vld [vmem:[%s1263_s16 + $0x8] sm:$0xf0]  ;;  %v1043_v35 = vld [vmem:[%s1263_s16 + $0x4] sm:$0xf] }
  0x36   : > { %695 = vmatpush.bf16.msra.mxu1 %v1062_v16  ;;  %v921_v36 = vld [vmem:[%s1263_s16 + $0xc] sm:$0xf0]  ;;  %v927_v37 = vld [vmem:[%s1263_s16 + $0x8] sm:$0xf]  ;;  %v1045_v38 = vld [vmem:[%s1263_s16 + $0x10] sm:$0xf0]  ;;  %v920_v41 = vor.u32 %v1044_v34, %v919_v33 }
  0x37   : > { %714 = vmatpush.bf16.msra.mxu2 %v1070_v17  ;;  %v931_v39 = vld [vmem:[%s1263_s16 + $0x18] sm:$0xf]  ;;  %v1047_v40 = vld [vmem:[%s1263_s16 + $0x20] sm:$0xf0]  ;;  %v924_v42 = vor.u32 %v1043_v35, %v921_v36  ;;  %v928_v43 = vor.u32 %v1045_v38, %v927_v37  ;;  %v1046_v45 = vld [vmem:[%s1263_s16 + $0x1c] sm:$0xf] }
  0x38   : > { %v932_v44 = vor.u32 %v1047_v40, %v931_v39  ;;  %v933_v46 = vld [vmem:[%s1263_s16 + $0x24] sm:$0xf0]  ;;  %v939_v47 = vld [vmem:[%s1263_s16 + $0x20] sm:$0xf]  ;;  %v1048_v48 = vld [vmem:[%s1263_s16 + $0x28] sm:$0xf0] }
  0x39   : > { %677 = vmatpush.bf16.msra.mxu0 %v1053_v18  ;;  %1087 = vmatpush.bf16.msra.mxu3 %v1053_v18  ;;  %v936_v49 = vor.u32 %v1046_v45, %v933_v46  ;;  %v940_v50 = vor.u32 %v1048_v48, %v939_v47  ;;  %v447_v61 = vld [vmem:[#allocation2] sm:$0xff]  ;;  %v449_v11 = vld [vmem:[#allocation2 + $0x8] sm:$0xff] }
  0x3a   : > { %696 = vmatpush.bf16.msra.mxu1 %v1061_v19 }
  0x3b   : > { %715 = vmatpush.bf16.msra.mxu2 %v1069_v20 }
  0x3d   : > { %678 = vmatpush.bf16.msra.mxu0 %v1052_v21  ;;  %1088 = vmatpush.bf16.msra.mxu3 %v1052_v21 }
  0x3e   : > { %697 = vmatpush.bf16.msra.mxu1 %v1060_v22 }
  0x3f   : > { %716 = vmatpush.bf16.msra.mxu2 %v1068_v23 }
  0x41   : > { %679 = vmatpush.bf16.msra.mxu0 %v1051_v24  ;;  %1089 = vmatpush.bf16.msra.mxu3 %v1051_v24 }
  0x42   : > { %698 = vmatpush.bf16.msra.mxu1 %v1059_v25 }
  0x43   : > { %717 = vmatpush.bf16.msra.mxu2 %v1067_v26 }
  0x45   : > { %680 = vmatpush.bf16.msra.mxu0 %v1050_v27  ;;  %1090 = vmatpush.bf16.msra.mxu3 %v1050_v27 }
  0x46   : > { %699 = vmatpush.bf16.msra.mxu1 %v1058_v28 }
  0x47   : > { %718 = vmatpush.bf16.msra.mxu2 %v1066_v29 }
  0x49   : > { %681 = vmatpush.bf16.msra.mxu0 %v1049_v30  ;;  %1091 = vmatpush.bf16.msra.mxu3 %v1049_v30 }
  0x4a   : > { %700 = vmatpush.bf16.msra.mxu1 %v1057_v31 }
  0x4b   : > { %719 = vmatpush.bf16.msra.mxu2 %v1065_v32 }
  0x4c   : > { %682 = vmatmul.bf16.vlgmr.msra.gmra.mxu0 %v920_v41  ;;  %687 = vmatmul.bf16.vlgmr.msra.gmra.mxu3 %v932_v44 }
  0x4d   : > { %701 = vmatmul.bf16.vlgmr.msra.gmra.mxu1 %v924_v42 }
  0x4e   : > { %720 = vmatmul.bf16.vlgmr.msra.gmra.mxu2 %v928_v43 }
  0x5d   : > { %706 = vmatmul.bf16.gmra.mxu1 %v936_v49 }
  0x5e   : > { %725 = vmatmul.bf16.gmra.mxu2 %v940_v50 }
  0xc9   : > { %v683_v52 = vpop.f32.mrf.mxu0 }
  0xca   : > { %v702_v51 = vpop.f32.mrf.mxu1 }
  0xcb   : > { %v703_v53 = vadd.f32 %v702_v51, %v683_v52 }
  0xcf   : > { %v688_v2 = vpop.f32.mrf.mxu3 }
  0xd1   : > { %v721_v55 = vpop.f32.mrf.mxu2  ;;  %v685_v59 = vpop.f32.mrf.mxu0 }
  0xd2   : > { %v722_v56 = vadd.f32 %v721_v55, %v703_v53  ;;  %v704_v57 = vpop.f32.mrf.mxu1 }
  0xd3   : > { %v705_v60 = vadd.f32 %v704_v57, %v685_v59 }
  0xd4   : > { %v731_v58 = vadd.f32 %v722_v56, %v446_v54 }
  0xd6   : > { %735 = vst [vmem:[#allocation2 + $0x10] sm:$0xff] %v731_v58 }
  0xd7   : > { %v690_v9 = vpop.f32.mrf.mxu3 }
  0xd9   : > { %v723_v62 = vpop.f32.mrf.mxu2 }
  0xda   : > { %v724_v63 = vadd.f32 %v723_v62, %v705_v60  ;;  %v707_v0 = vpop.f32.mrf.mxu1 }
  0xdb   : > { %v708_v3 = vadd.f32 %v707_v0, %v688_v2 }
  0xdc   : > { %v732_v1 = vadd.f32 %v724_v63, %v447_v61 }
  0xde   : > { %736 = vst [vmem:[#allocation2] sm:$0xff] %v732_v1 }
  0xe1   : > { %v726_v5 = vpop.f32.mrf.mxu2 }
  0xe2   : > { %v727_v6 = vadd.f32 %v726_v5, %v708_v3  ;;  %v709_v8 = vpop.f32.mrf.mxu1 }
  0xe3   : > { %v710_v10 = vadd.f32 %v709_v8, %v690_v9 }
  0xe4   : > { %v733_v7 = vadd.f32 %v727_v6, %v448_v4 }
  0xe6   : > { %737 = vst [vmem:[#allocation2 + $0x18] sm:$0xff] %v733_v7 }
  0xe9   : > { %v728_v12 = vpop.f32.mrf.mxu2 }
  0xea   : > { %v729_v13 = vadd.f32 %v728_v12, %v710_v10  ;;  %742 = sbr.rel (%p1037_p11) target bundleno = 249 (0xf9), region = 78 }
  0xec   : > { %v734_v14 = vadd.f32 %v729_v13, %v449_v11 }
  0xee   : > { %738 = vst [vmem:[#allocation2 + $0x8] sm:$0xff] %v734_v14 }
  0xef   : > { %v743_v15 = vld [vmem:[#allocation2 + $0x10] sm:$0xff]  ;;  %v744_v16 = vld [vmem:[#allocation2] sm:$0xff]  ;;  %v745_v17 = vld [vmem:[#allocation2 + $0x18] sm:$0xff] }
  0xf0   : > { %v1076_v18 = vpack.c.bf16 %v744_v16, %v743_v15 }
  0xf2   : > { %1077 = vst [vmem:[%s1330_s6] sm:$0xff] %v1076_v18  }
  0xf5   : > { %v746_v19 = vld [vmem:[#allocation2 + $0x8] sm:$0xff] }
  0xf6   : > { %v1081_v20 = vpack.c.bf16 %v746_v19, %v745_v17 }
  0xf8   : > { %1083 = vst [vmem:[%s1330_s6 + $0x8] sm:$0xff] %v1081_v20  }
  0xf9 PF: > { %s16_s2 = sadd.s32 1, %s1173_s2   ;;  %s1331_s21 = smov %s1161_s22 }
  0xfa   : > { %p13_p12 = scmp.ge.s32.totalorder %s16_s2, 5   ;;  %s1332_s22 = smov %s1246_s25 }
  0xfb   : > { %s1333_s23 = smov %s1169_s24  ;;  %s1334_s24 = smov %s1336_s3 }
  0xfc   :  { %15 = sbr.rel (!%p13_p12) target bundleno = 3 (0x3), region = 134 }

// kernel: densenet121_forward.166
= control target key start
LH: loop header
LB: loop body
LE: loop exit
PB: predicated region body
PF: predicated region fallthrough
CT: control target
= control target key end

     0   :  { %s1681_s1 = inlined_call_operand.vmem [shape: bf16[512,256], index: 1, kind: input, shape index: {}]   ;;  %s1682_s4 = inlined_call_operand.vmem [shape: f32[1,256], index: 4, kind: input, shape index: {}, may-alias: {4,5}]   ;;  %s1683_s5 = inlined_call_operand.vmem [shape: f32[1,256], index: 5, kind: input, shape index: {}, may-alias: {4,5}]   ;;  %s1684_s0 = inlined_call_operand.vmem [shape: bf16[32,512], index: 0, kind: input, shape index: {}]   ;;  %s1685_s2 = inlined_call_operand.vmem [shape: f32[1,512], index: 2, kind: input, shape index: {}]   ;;  %s1686_s3 = inlined_call_operand.vmem [shape: f32[1,512], index: 3, kind: input, shape index: {}]   ;;  %s1687_s6 = inlined_call_operand.vmem [shape: bf16[32,256], index: 6, kind: output, shape index: {}]  }
   0x1   :  { %v776_v0 = vld [vmem:[%s1681_s1 + $0x70] sm:$0xf]  ;;  %v989_v1 = vld [vmem:[%s1681_s1 + $0x74] sm:$0xf0]  ;;  %v768_v11 = vld [vmem:[%s1681_s1 + $0x60] sm:$0xf] }
   0x2   :  { %v840_v2 = vld [vmem:[%s1681_s1 + $0xf0] sm:$0xf]  ;;  %v777_v3 = vor.u32 %v989_v1, %v776_v0  ;;  %v1005_v4 = vld [vmem:[%s1681_s1 + $0xf4] sm:$0xf0]  ;;  %v987_v13 = vld [vmem:[%s1681_s1 + $0x64] sm:$0xf0] }
   0x3   :  { %v904_v5 = vld [vmem:[%s1681_s1 + $0x170] sm:$0xf]  ;;  %v1021_v6 = vld [vmem:[%s1681_s1 + $0x174] sm:$0xf0]  ;;  %v841_v7 = vor.u32 %v1005_v4, %v840_v2  ;;  %v832_v14 = vld [vmem:[%s1681_s1 + $0xe0] sm:$0xf]  ;;  %v769_v16 = vor.u32 %v987_v13, %v768_v11 }
   0x4   :  { %v905_v8 = vor.u32 %v1021_v6, %v904_v5  ;;  %v968_v9 = vld [vmem:[%s1681_s1 + $0x1f0] sm:$0xf]  ;;  %v1037_v10 = vld [vmem:[%s1681_s1 + $0x1f4] sm:$0xf0]  ;;  %527 = vmatpush.bf16.msra.mxu0 %v777_v3  ;;  %v1003_v15 = vld [vmem:[%s1681_s1 + $0xe4] sm:$0xf0] }
   0x5   :  { %v969_v12 = vor.u32 %v1037_v10, %v968_v9  ;;  %546 = vmatpush.bf16.msra.mxu1 %v841_v7  ;;  %v833_v17 = vor.u32 %v1003_v15, %v832_v14  ;;  %v896_v18 = vld [vmem:[%s1681_s1 + $0x160] sm:$0xf]  ;;  %v1019_v19 = vld [vmem:[%s1681_s1 + $0x164] sm:$0xf0]  ;;  %v760_v23 = vld [vmem:[%s1681_s1 + $0x50] sm:$0xf] }
   0x6   :  { %565 = vmatpush.bf16.msra.mxu2 %v905_v8  ;;  %v960_v20 = vld [vmem:[%s1681_s1 + $0x1e0] sm:$0xf]  ;;  %v897_v21 = vor.u32 %v1019_v19, %v896_v18  ;;  %v1035_v22 = vld [vmem:[%s1681_s1 + $0x1e4] sm:$0xf0]  ;;  %v985_v24 = vld [vmem:[%s1681_s1 + $0x54] sm:$0xf0] }
   0x7   :  { %584 = vmatpush.bf16.msra.mxu3 %v969_v12  ;;  %v961_v25 = vor.u32 %v1035_v22, %v960_v20  ;;  %v824_v26 = vld [vmem:[%s1681_s1 + $0xd0] sm:$0xf]  ;;  %v1001_v27 = vld [vmem:[%s1681_s1 + $0xd4] sm:$0xf0]  ;;  %v761_v29 = vor.u32 %v985_v24, %v760_v23  ;;  %v752_v35 = vld [vmem:[%s1681_s1 + $0x40] sm:$0xf] }
   0x8   :  { %v888_v28 = vld [vmem:[%s1681_s1 + $0x150] sm:$0xf]  ;;  %528 = vmatpush.bf16.msra.mxu0 %v769_v16  ;;  %v1017_v30 = vld [vmem:[%s1681_s1 + $0x154] sm:$0xf0]  ;;  %v825_v33 = vor.u32 %v1001_v27, %v824_v26  ;;  %v983_v36 = vld [vmem:[%s1681_s1 + $0x44] sm:$0xf0] }
   0x9   :  { %v952_v31 = vld [vmem:[%s1681_s1 + $0x1d0] sm:$0xf]  ;;  %v1033_v32 = vld [vmem:[%s1681_s1 + $0x1d4] sm:$0xf0]  ;;  %547 = vmatpush.bf16.msra.mxu1 %v833_v17  ;;  %v889_v34 = vor.u32 %v1017_v30, %v888_v28  ;;  %v816_v37 = vld [vmem:[%s1681_s1 + $0xc0] sm:$0xf]  ;;  %v753_v44 = vor.u32 %v983_v36, %v752_v35 }
   0xa   :  { %566 = vmatpush.bf16.msra.mxu2 %v897_v21  ;;  %v953_v38 = vor.u32 %v1033_v32, %v952_v31  ;;  %v999_v39 = vld [vmem:[%s1681_s1 + $0xc4] sm:$0xf0]  ;;  %v880_v40 = vld [vmem:[%s1681_s1 + $0x140] sm:$0xf]  ;;  %v744_v45 = vld [vmem:[%s1681_s1 + $0x30] sm:$0xf] }
   0xb   :  { %585 = vmatpush.bf16.msra.mxu3 %v961_v25  ;;  %v1015_v41 = vld [vmem:[%s1681_s1 + $0x144] sm:$0xf0]  ;;  %v944_v42 = vld [vmem:[%s1681_s1 + $0x1c0] sm:$0xf]  ;;  %v981_v46 = vld [vmem:[%s1681_s1 + $0x34] sm:$0xf0]  ;;  %v817_v47 = vor.u32 %v999_v39, %v816_v37 }
   0xc   :  { %v1031_v43 = vld [vmem:[%s1681_s1 + $0x1c4] sm:$0xf0]  ;;  %529 = vmatpush.bf16.msra.mxu0 %v761_v29  ;;  %v881_v48 = vor.u32 %v1015_v41, %v880_v40  ;;  %v808_v49 = vld [vmem:[%s1681_s1 + $0xb0] sm:$0xf]  ;;  %v997_v50 = vld [vmem:[%s1681_s1 + $0xb4] sm:$0xf0]  ;;  %v745_v61 = vor.u32 %v981_v46, %v744_v45 }
   0xd   :  { %548 = vmatpush.bf16.msra.mxu1 %v825_v33  ;;  %v872_v51 = vld [vmem:[%s1681_s1 + $0x130] sm:$0xf]  ;;  %v945_v52 = vor.u32 %v1031_v43, %v944_v42  ;;  %v1013_v53 = vld [vmem:[%s1681_s1 + $0x134] sm:$0xf0]  ;;  %v736_v56 = vld [vmem:[%s1681_s1 + $0x20] sm:$0xf]  ;;  %v809_v1 = vor.u32 %v997_v50, %v808_v49 }
   0xe   :  { %567 = vmatpush.bf16.msra.mxu2 %v889_v34  ;;  %v936_v54 = vld [vmem:[%s1681_s1 + $0x1b0] sm:$0xf]  ;;  %v1029_v55 = vld [vmem:[%s1681_s1 + $0x1b4] sm:$0xf0]  ;;  %v979_v57 = vld [vmem:[%s1681_s1 + $0x24] sm:$0xf0]  ;;  %v873_v2 = vor.u32 %v1013_v53, %v872_v51 }
   0xf   :  { %586 = vmatpush.bf16.msra.mxu3 %v953_v38  ;;  %v1202_v58 = vld [vmem:[%s1681_s1 + $0xa0] sm:$0xf]  ;;  %v995_v59 = vld [vmem:[%s1681_s1 + $0xa4] sm:$0xf0]  ;;  %v1224_v3 = vld [vmem:[%s1681_s1 + $0x10] sm:$0xf]  ;;  %v937_v6 = vor.u32 %v1029_v55, %v936_v54  ;;  %v737_v13 = vor.u32 %v979_v57, %v736_v56 }
  0x10   :  { %v864_v60 = vld [vmem:[%s1681_s1 + $0x120] sm:$0xf]  ;;  %530 = vmatpush.bf16.msra.mxu0 %v753_v44  ;;  %v1011_v62 = vld [vmem:[%s1681_s1 + $0x124] sm:$0xf0]  ;;  %v1229_v4 = vld [vmem:[%s1681_s1 + $0x14] sm:$0xf0]  ;;  %v801_v14 = vor.u32 %v995_v59, %v1202_v58 }
  0x11   :  { %v1216_v63 = vld [vmem:[%s1681_s1 + $0x1a0] sm:$0xf]  ;;  %v1027_v0 = vld [vmem:[%s1681_s1 + $0x1a4] sm:$0xf0]  ;;  %549 = vmatpush.bf16.msra.mxu1 %v817_v47  ;;  %v1234_v5 = vld [vmem:[%s1681_s1 + $0x90] sm:$0xf]  ;;  %v865_v15 = vor.u32 %v1011_v62, %v864_v60  ;;  %v729_v20 = vor.u32 %v1229_v4, %v1224_v3 }
  0x12   :  { %568 = vmatpush.bf16.msra.mxu2 %v881_v48  ;;  %v1239_v7 = vld [vmem:[%s1681_s1 + $0x94] sm:$0xf0]  ;;  %v1244_v8 = vld [vmem:[%s1681_s1 + $0x110] sm:$0xf]  ;;  %v1264_v12 = vld [vmem:[%s1681_s1] sm:$0xf]  ;;  %v929_v16 = vor.u32 %v1027_v0, %v1216_v63 }
  0x13   :  { %587 = vmatpush.bf16.msra.mxu3 %v945_v52  ;;  %v1249_v9 = vld [vmem:[%s1681_s1 + $0x114] sm:$0xf0]  ;;  %v1254_v10 = vld [vmem:[%s1681_s1 + $0x190] sm:$0xf]  ;;  %v1271_v17 = vld [vmem:[%s1681_s1 + $0x4] sm:$0xf0]  ;;  %v793_v21 = vor.u32 %v1239_v7, %v1234_v5 }
  0x14   :  { %v1259_v11 = vld [vmem:[%s1681_s1 + $0x194] sm:$0xf0]  ;;  %531 = vmatpush.bf16.msra.mxu0 %v745_v61  ;;  %v1276_v18 = vld [vmem:[%s1681_s1 + $0x80] sm:$0xf]  ;;  %v1281_v19 = vld [vmem:[%s1681_s1 + $0x84] sm:$0xf0]  ;;  %v857_v22 = vor.u32 %v1249_v9, %v1244_v8  ;;  %v721_v27 = vor.u32 %v1271_v17, %v1264_v12 }
  0x15   :  { %550 = vmatpush.bf16.msra.mxu1 %v809_v1  ;;  %v1292_v23 = vld [vmem:[%s1681_s1 + $0x100] sm:$0xf]  ;;  %v1297_v24 = vld [vmem:[%s1681_s1 + $0x104] sm:$0xf0]  ;;  %v921_v26 = vor.u32 %v1259_v11, %v1254_v10  ;;  %v785_v28 = vor.u32 %v1281_v19, %v1276_v18  ;;  %v37_v32 = vld [vmem:[%s1684_s0 + $0x10] sm:$0xff] }
  0x16   :  { %569 = vmatpush.bf16.msra.mxu2 %v873_v2  ;;  %v1302_v25 = vld [vmem:[%s1681_s1 + $0x180] sm:$0xf]  ;;  %v849_v29 = vor.u32 %v1297_v24, %v1292_v23  ;;  %v1315_v30 = vld [vmem:[%s1681_s1 + $0x184] sm:$0xf0]  ;;  %v47_v35 = vunpack.c.l.bf16 %v37_v32  ;;  %v48_v42 = vunpack.c.h.bf16 %v37_v32  ;;  %v38_v44 = vld [vmem:[%s1684_s0 + $0x18] sm:$0xff] }
  0x17   :  { %588 = vmatpush.bf16.msra.mxu3 %v937_v6  ;;  %v35_v31 = vld [vmem:[%s1684_s0] sm:$0xff]  ;;  %v913_v33 = vor.u32 %v1315_v30, %v1302_v25  ;;  %v36_v39 = vld [vmem:[%s1684_s0 + $0x8] sm:$0xff]  ;;  %v49_v47 = vunpack.c.l.bf16 %v38_v44  ;;  %v1020_v57 = vld [vmem:[%s1681_s1 + $0x174] sm:$0xf]  ;;  %v50_v5 = vunpack.c.h.bf16 %v38_v44 }
  0x18   :  { %v43_v34 = vunpack.c.l.bf16 %v35_v31  ;;  %v59_v36 = vld [vmem:[%s1685_s2] sm:$0xf]  ;;  %v44_v38 = vunpack.c.h.bf16 %v35_v31  ;;  %532 = vmatpush.bf16.msra.mxu0 %v737_v13  ;;  %v45_v46 = vunpack.c.l.bf16 %v36_v39  ;;  %v46_v56 = vunpack.c.h.bf16 %v36_v39  ;;  %v906_v58 = vld [vmem:[%s1681_s1 + $0x178] sm:$0xf0]  ;;  %v1368_v63 = vld [vmem:[%s1681_s1 + $0x74] sm:$0xf] }
  0x19   :  { %v85_v37 = vld [vmem:[%s1686_s3] sm:$0xf]  ;;  %v1334_v40 = vperm.slane %v59_v36, 0  ;;  %v1338_v43 = vperm.slane %v59_v36, 1  ;;  %551 = vmatpush.bf16.msra.mxu1 %v801_v14  ;;  %v1345_v48 = vperm.slane %v59_v36, 2  ;;  %v1383_v6 = vperm.slane %v59_v36, 3 }
  0x1a   :  { %v1336_v41 = vperm.slane %v85_v37, 0  ;;  %570 = vmatpush.bf16.msra.mxu2 %v865_v15  ;;  %v1343_v45 = vperm.slane %v85_v37, 1  ;;  %v1353_v55 = vperm.slane %v85_v37, 2  ;;  %v1373_v0 = vld [vmem:[%s1681_s1 + $0x78] sm:$0xf0]  ;;  %v1394_v9 = vld [vmem:[%s1684_s0 + $0x20] sm:$0xff] }
  0x1b   :  { %589 = vmatpush.bf16.msra.mxu3 %v929_v16  ;;  %v69_v49 = vmul.f32 %v1334_v40, %v43_v34  ;;  %v73_v50 = vmul.f32 %v1334_v40, %v47_v35  ;;  %v70_v51 = vmul.f32 %v1338_v43, %v44_v38  ;;  %v74_v52 = vmul.f32 %v1338_v43, %v48_v42  ;;  %v1004_v1 = vld [vmem:[%s1681_s1 + $0xf4] sm:$0xf]  ;;  %v842_v2 = vld [vmem:[%s1681_s1 + $0xf8] sm:$0xf0]  ;;  %v1018_v15 = vld [vmem:[%s1681_s1 + $0x164] sm:$0xf] }
  0x1c   :  { %v71_v53 = vmul.f32 %v1345_v48, %v45_v46  ;;  %v75_v54 = vmul.f32 %v1345_v48, %v49_v47  ;;  %533 = vmatpush.bf16.msra.mxu0 %v729_v20  ;;  %v1036_v7 = vld [vmem:[%s1681_s1 + $0x1f4] sm:$0xf]  ;;  %v970_v8 = vld [vmem:[%s1681_s1 + $0x1f8] sm:$0xf0]  ;;  %v898_v16 = vld [vmem:[%s1681_s1 + $0x168] sm:$0xf0]  ;;  %v76_v31 = vmul.f32 %v1383_v6, %v50_v5  ;;  %v909_v42 = vor.u32 %v1020_v57, %v906_v58 }
  0x1d   :  { %v95_v59 = vadd.f32 %v1336_v41, %v69_v49  ;;  %v99_v60 = vadd.f32 %v1336_v41, %v73_v50  ;;  %v96_v61 = vadd.f32 %v1343_v45, %v70_v51  ;;  %v100_v62 = vadd.f32 %v1343_v45, %v74_v52  ;;  %552 = vmatpush.bf16.msra.mxu1 %v793_v21  ;;  %v1412_v32 = vld [vmem:[%s1681_s1 + $0x68] sm:$0xf0]  ;;  %v1002_v34 = vld [vmem:[%s1681_s1 + $0xe4] sm:$0xf]  ;;  %v1438_v12 = vld [vmem:[%s1681_s1 + $0x154] sm:$0xf] }
  0x1e   :  { %571 = vmatpush.bf16.msra.mxu2 %v857_v22  ;;  %v97_v3 = vadd.f32 %v1353_v55, %v71_v53  ;;  %v101_v4 = vadd.f32 %v1353_v55, %v75_v54  ;;  %v72_v22 = vmul.f32 %v1383_v6, %v46_v56  ;;  %v834_v35 = vld [vmem:[%s1681_s1 + $0xe8] sm:$0xf0]  ;;  %v1427_v39 = vperm.slane %v85_v37, 3  ;;  %v1034_v44 = vld [vmem:[%s1681_s1 + $0x1e4] sm:$0xf]  ;;  %v41_v17 = vld [vmem:[%s1684_s0 + $0x30] sm:$0xff] }
  0x1f   :  { %590 = vmatpush.bf16.msra.mxu3 %v921_v26  ;;  %v111_v10 = vmax.f32 %v95_v59, 0.0  ;;  %v115_v11 = vmax.f32 %v99_v60, 0.0  ;;  %v112_v13 = vmax.f32 %v96_v61, 0.0  ;;  %v116_v14 = vmax.f32 %v100_v62, 0.0  ;;  %v1407_v26 = vld [vmem:[%s1681_s1 + $0x64] sm:$0xf] }
  0x20   :  { %v113_v20 = vmax.f32 %v97_v3, 0.0  ;;  %v117_v21 = vmax.f32 %v101_v4, 0.0  ;;  %534 = vmatpush.bf16.msra.mxu0 %v721_v27  ;;  %v962_v46 = vld [vmem:[%s1681_s1 + $0x1e8] sm:$0xf0]  ;;  %v781_v37 = vor.u32 %v1368_v63, %v1373_v0  ;;  %v845_v47 = vor.u32 %v1004_v1, %v842_v2  ;;  %v890_v49 = vld [vmem:[%s1681_s1 + $0x158] sm:$0xf0] }
  0x21   :  { %v1423_v36 = vpack.c.bf16 %v115_v11, %v111_v10  ;;  %v1425_v38 = vpack.c.bf16 %v116_v14, %v112_v13  ;;  %553 = vmatpush.bf16.msra.mxu1 %v785_v28  ;;  %v1459_v50 = vld [vmem:[%s1681_s1 + $0x54] sm:$0xf]  ;;  %v1464_v18 = vld [vmem:[%s1681_s1 + $0x58] sm:$0xf0]  ;;  %v98_v19 = vadd.f32 %v1427_v39, %v72_v22  ;;  %v102_v23 = vadd.f32 %v1427_v39, %v76_v31  ;;  %v1492_v53 = vld [vmem:[%s1681_s1 + $0x144] sm:$0xf] }
  0x22   :  { %572 = vmatpush.bf16.msra.mxu2 %v849_v29  ;;  %v1449_v27 = vpack.c.bf16 %v117_v21, %v113_v20  ;;  %v973_v24 = vor.u32 %v1036_v7, %v970_v8  ;;  %v1000_v28 = vld [vmem:[%s1681_s1 + $0xd4] sm:$0xf]  ;;  %v826_v29 = vld [vmem:[%s1681_s1 + $0xd8] sm:$0xf0]  ;;  %v51_v25 = vunpack.c.l.bf16 %v1394_v9  ;;  %v901_v30 = vor.u32 %v1018_v15, %v898_v16  ;;  %v1497_v54 = vld [vmem:[%s1681_s1 + $0x148] sm:$0xf0] }
  0x23   :  { %591 = vmatpush.bf16.msra.mxu3 %v913_v33  ;;  %v1480_v51 = vld [vmem:[%s1681_s1 + $0x1d4] sm:$0xf]  ;;  %535 = vmatmul.bf16.vlgmr.msra.gmra.mxu0 %v1423_v36  ;;  %v837_v33 = vor.u32 %v1002_v34, %v834_v35  ;;  %v1487_v52 = vld [vmem:[%s1681_s1 + $0x1d8] sm:$0xf0]  ;;  %v55_v56 = vunpack.c.l.bf16 %v41_v17  ;;  %v52_v57 = vunpack.c.h.bf16 %v1394_v9  ;;  %v114_v58 = vmax.f32 %v98_v19, 0.0  ;;  %v40_v3 = vld [vmem:[%s1684_s0 + $0x28] sm:$0xff] }
  0x24   :  { %554 = vmatmul.bf16.vlgmr.msra.gmra.mxu1 %v1425_v38  ;;  %v118_v59 = vmax.f32 %v102_v23, 0.0  ;;  %v773_v60 = vor.u32 %v1407_v26, %v1412_v32  ;;  %v1507_v61 = vld [vmem:[%s1681_s1 + $0xc4] sm:$0xf]  ;;  %603 = vmatpush.bf16.msrb.mxu0 %v781_v37  ;;  %v965_v62 = vor.u32 %v1034_v44, %v962_v46  ;;  %v893_v63 = vor.u32 %v1438_v12, %v890_v49  ;;  %v818_v1 = vld [vmem:[%s1681_s1 + $0xc8] sm:$0xf0]  ;;  %v42_v9 = vld [vmem:[%s1684_s0 + $0x38] sm:$0xff] }
  0x25   :  { %622 = vmatpush.bf16.msrb.mxu1 %v845_v47  ;;  %573 = vmatmul.bf16.vlgmr.msra.gmra.mxu2 %v1449_v27  ;;  %v765_v0 = vor.u32 %v1459_v50, %v1464_v18  ;;  %v56_v2 = vunpack.c.h.bf16 %v41_v17  ;;  %v829_v5 = vor.u32 %v1000_v28, %v826_v29  ;;  %v957_v7 = vor.u32 %v1480_v51, %v1487_v52  ;;  %v982_v22 = vld [vmem:[%s1681_s1 + $0x44] sm:$0xf]  ;;  %v754_v31 = vld [vmem:[%s1681_s1 + $0x48] sm:$0xf0]  ;;  %v1012_v12 = vld [vmem:[%s1681_s1 + $0x134] sm:$0xf] }
  0x26   :  { %641 = vmatpush.bf16.msrb.mxu2 %v909_v42  ;;  %v1518_v4 = vpack.c.bf16 %v118_v59, %v114_v58  ;;  %v885_v8 = vor.u32 %v1492_v53, %v1497_v54  ;;  %v821_v10 = vor.u32 %v1507_v61, %v818_v1  ;;  %v77_v11 = vmul.f32 %v1334_v40, %v51_v25  ;;  %v1030_v34 = vld [vmem:[%s1681_s1 + $0x1c4] sm:$0xf]  ;;  %v946_v35 = vld [vmem:[%s1681_s1 + $0x1c8] sm:$0xf0]  ;;  %v996_v23 = vld [vmem:[%s1681_s1 + $0xb4] sm:$0xf] }
  0x27   :  { %660 = vmatpush.bf16.msrb.mxu3 %v973_v24  ;;  %v81_v13 = vmul.f32 %v1334_v40, %v55_v56  ;;  %v78_v14 = vmul.f32 %v1338_v43, %v52_v57  ;;  %v82_v15 = vmul.f32 %v1338_v43, %v56_v2  ;;  %v53_v16 = vunpack.c.l.bf16 %v40_v3  ;;  %v810_v24 = vld [vmem:[%s1681_s1 + $0xb8] sm:$0xf0]  ;;  %v1028_v52 = vld [vmem:[%s1681_s1 + $0x1b4] sm:$0xf]  ;;  %v1010_v56 = vld [vmem:[%s1681_s1 + $0x124] sm:$0xf] }
  0x28   :  { %592 = vmatmul.bf16.vlgmr.msra.gmra.mxu3 %v1518_v4  ;;  %v57_v20 = vunpack.c.l.bf16 %v42_v9  ;;  %v54_v21 = vunpack.c.h.bf16 %v40_v3  ;;  %604 = vmatpush.bf16.msrb.mxu0 %v773_v60  ;;  %v103_v40 = vadd.f32 %v1336_v41, %v77_v11  ;;  %v58_v43 = vunpack.c.h.bf16 %v42_v9  ;;  %v746_v51 = vld [vmem:[%s1681_s1 + $0x38] sm:$0xf0]  ;;  %v866_v57 = vld [vmem:[%s1681_s1 + $0x128] sm:$0xf0]  ;;  %v978_v2 = vld [vmem:[%s1681_s1 + $0x24] sm:$0xf] }
  0x29   :  { %623 = vmatpush.bf16.msrb.mxu1 %v837_v33  ;;  %v107_v26 = vadd.f32 %v1336_v41, %v81_v13  ;;  %v104_v32 = vadd.f32 %v1343_v45, %v78_v14  ;;  %v108_v42 = vadd.f32 %v1343_v45, %v82_v15  ;;  %v79_v44 = vmul.f32 %v1345_v48, %v53_v16  ;;  %v874_v45 = vld [vmem:[%s1681_s1 + $0x138] sm:$0xf0]  ;;  %v992_v14 = vld [vmem:[%s1681_s1 + $0x94] sm:$0xf] }
  0x2a   :  { %642 = vmatpush.bf16.msrb.mxu2 %v901_v30  ;;  %v83_v46 = vmul.f32 %v1345_v48, %v57_v20  ;;  %v80_v41 = vmul.f32 %v1383_v6, %v54_v21  ;;  %v119_v17 = vmax.f32 %v103_v40, 0.0  ;;  %v84_v49 = vmul.f32 %v1383_v6, %v58_v43  ;;  %v858_v11 = vld [vmem:[%s1681_s1 + $0x118] sm:$0xf0]  ;;  %v976_v21 = vld [vmem:[%s1681_s1 + $0x14] sm:$0xf] }
  0x2b   :  { %661 = vmatpush.bf16.msrb.mxu3 %v965_v62  ;;  %v123_v37 = vmax.f32 %v107_v26, 0.0  ;;  %v120_v47 = vmax.f32 %v104_v32, 0.0  ;;  %v124_v50 = vmax.f32 %v108_v42, 0.0  ;;  %v105_v18 = vadd.f32 %v1353_v55, %v79_v44  ;;  %v994_v62 = vld [vmem:[%s1681_s1 + $0xa4] sm:$0xf] }
  0x2c   :  { %v109_v48 = vadd.f32 %v1353_v55, %v83_v46  ;;  %v106_v19 = vadd.f32 %v1427_v39, %v80_v41  ;;  %605 = vmatpush.bf16.msrb.mxu0 %v765_v0  ;;  %v757_v6 = vor.u32 %v982_v22, %v754_v31  ;;  %v949_v28 = vor.u32 %v1030_v34, %v946_v35  ;;  %v980_v55 = vld [vmem:[%s1681_s1 + $0x34] sm:$0xf]  ;;  %v794_v15 = vld [vmem:[%s1681_s1 + $0x98] sm:$0xf0]  ;;  %v1006_v43 = vld [vmem:[%s1681_s1 + $0x104] sm:$0xf] }
  0x2d   :  { %624 = vmatpush.bf16.msrb.mxu1 %v829_v5  ;;  %v110_v29 = vadd.f32 %v1427_v39, %v84_v49  ;;  %v121_v25 = vmax.f32 %v105_v18, 0.0  ;;  %v877_v33 = vor.u32 %v1012_v12, %v874_v45  ;;  %v938_v39 = vld [vmem:[%s1681_s1 + $0x1b8] sm:$0xf0]  ;;  %v1581_v53 = vpack.c.bf16 %v123_v37, %v119_v17  ;;  %v738_v5 = vld [vmem:[%s1681_s1 + $0x28] sm:$0xf0] }
  0x2e   :  { %643 = vmatpush.bf16.msrb.mxu2 %v893_v63  ;;  %v125_v30 = vmax.f32 %v109_v48, 0.0  ;;  %v813_v54 = vor.u32 %v996_v23, %v810_v24  ;;  %v1589_v58 = vpack.c.bf16 %v124_v50, %v120_v47  ;;  %v122_v60 = vmax.f32 %v106_v19, 0.0  ;;  %v802_v63 = vld [vmem:[%s1681_s1 + $0xa8] sm:$0xf0]  ;;  %v730_v31 = vld [vmem:[%s1681_s1 + $0x18] sm:$0xf0] }
  0x2f   :  { %662 = vmatpush.bf16.msrb.mxu3 %v957_v7  ;;  %v126_v61 = vmax.f32 %v110_v29, 0.0  ;;  %v749_v0 = vor.u32 %v980_v55, %v746_v51  ;;  %v941_v1 = vor.u32 %v1028_v52, %v938_v39  ;;  %v869_v3 = vor.u32 %v1010_v56, %v866_v57  ;;  %v1026_v7 = vld [vmem:[%s1681_s1 + $0x1a4] sm:$0xf]  ;;  %v1024_v40 = vld [vmem:[%s1681_s1 + $0x194] sm:$0xf] }
  0x30   :  { %v1591_v59 = vpack.c.bf16 %v125_v30, %v121_v25  ;;  %606 = vmatpush.bf16.msrb.mxu0 %v757_v6  ;;  %v805_v9 = vor.u32 %v994_v62, %v802_v63  ;;  %v741_v16 = vor.u32 %v978_v2, %v738_v5  ;;  %v922_v26 = vld [vmem:[%s1681_s1 + $0x198] sm:$0xf0]  ;;  %v797_v32 = vor.u32 %v992_v14, %v794_v15  ;;  %v850_v34 = vld [vmem:[%s1681_s1 + $0x108] sm:$0xf0]  ;;  %v990_v35 = vld [vmem:[%s1681_s1 + $0x84] sm:$0xf] }
  0x31   :  { %625 = vmatpush.bf16.msrb.mxu1 %v821_v10  ;;  %v1008_v10 = vld [vmem:[%s1681_s1 + $0x114] sm:$0xf]  ;;  %v134_v13 = vpack.c.bf16 %v126_v61, %v122_v60  ;;  %v786_v42 = vld [vmem:[%s1681_s1 + $0x88] sm:$0xf0]  ;;  %v733_v44 = vor.u32 %v976_v21, %v730_v31  ;;  %v925_v46 = vor.u32 %v1024_v40, %v922_v26  ;;  %v974_v41 = vld [vmem:[%s1681_s1 + $0x4] sm:$0xf]  ;;  %v853_v12 = vor.u32 %v1006_v43, %v850_v34 }
  0x32   :  { %644 = vmatpush.bf16.msrb.mxu2 %v885_v8  ;;  %v930_v8 = vld [vmem:[%s1681_s1 + $0x1a8] sm:$0xf0]  ;;  %v861_v22 = vor.u32 %v1008_v10, %v858_v11  ;;  %v1022_v37 = vld [vmem:[%s1681_s1 + $0x184] sm:$0xf]  ;;  %v789_v49 = vor.u32 %v990_v35, %v786_v42 }
  0x33   :  { %663 = vmatpush.bf16.msrb.mxu3 %v949_v28  ;;  %540 = vmatmul.bf16.gmra.mxu0 %v1581_v53  ;;  %v933_v20 = vor.u32 %v1026_v7, %v930_v8  ;;  %v722_v17 = vld [vmem:[%s1681_s1 + $0x8] sm:$0xf0] }
  0x34   :  { %559 = vmatmul.bf16.gmra.mxu1 %v1589_v58  ;;  %607 = vmatpush.bf16.msrb.mxu0 %v749_v0  ;;  %v914_v47 = vld [vmem:[%s1681_s1 + $0x188] sm:$0xf0]  ;;  %v725_v45 = vor.u32 %v974_v41, %v722_v17 }
  0x35   :  { %626 = vmatpush.bf16.msrb.mxu1 %v813_v54  ;;  %578 = vmatmul.bf16.gmra.mxu2 %v1591_v59  ;;  %v917_v50 = vor.u32 %v1022_v37, %v914_v47 }
  0x36   :  { %645 = vmatpush.bf16.msrb.mxu2 %v877_v33 }
  0x37   :  { %664 = vmatpush.bf16.msrb.mxu3 %v941_v1 }
  0x38   :  { %597 = vmatmul.bf16.gmra.mxu3 %v134_v13  ;;  %608 = vmatpush.bf16.msrb.mxu0 %v741_v16 }
  0x39   :  { %627 = vmatpush.bf16.msrb.mxu1 %v805_v9 }
  0x3a   :  { %646 = vmatpush.bf16.msrb.mxu2 %v869_v3 }
  0x3b   :  { %665 = vmatpush.bf16.msrb.mxu3 %v933_v20 }
  0x3c   :  { %609 = vmatpush.bf16.msrb.mxu0 %v733_v44 }
  0x3d   :  { %628 = vmatpush.bf16.msrb.mxu1 %v797_v32 }
  0x3e   :  { %647 = vmatpush.bf16.msrb.mxu2 %v861_v22 }
  0x3f   :  { %666 = vmatpush.bf16.msrb.mxu3 %v925_v46 }
  0x40   :  { %610 = vmatpush.bf16.msrb.mxu0 %v725_v45 }
  0x41   :  { %629 = vmatpush.bf16.msrb.mxu1 %v789_v49 }
  0x42   :  { %648 = vmatpush.bf16.msrb.mxu2 %v853_v12 }
  0x43   :  { %667 = vmatpush.bf16.msrb.mxu3 %v917_v50  ;;  %611 = vmatmul.bf16.vlgmr.msrb.gmra.mxu0 %v1423_v36 }
  0x44   :  { %630 = vmatmul.bf16.vlgmr.msrb.gmra.mxu1 %v1425_v38 }
  0x45   :  { %649 = vmatmul.bf16.vlgmr.msrb.gmra.mxu2 %v1449_v27 }
  0x48   :  { %668 = vmatmul.bf16.vlgmr.msrb.gmra.mxu3 %v1518_v4 }
  0x53   :  { %616 = vmatmul.bf16.gmra.mxu0 %v1581_v53 }
  0x54   :  { %635 = vmatmul.bf16.gmra.mxu1 %v1589_v58 }
  0x55   :  { %654 = vmatmul.bf16.gmra.mxu2 %v1591_v59 }
  0x58   :  { %673 = vmatmul.bf16.gmra.mxu3 %v134_v13 }
  0xa0   :  { %v536_v18 = vpop.f32.mrf.mxu0 }
  0xa1   :  { %v555_v48 = vpop.f32.mrf.mxu1 }
  0xa2   :  { %v556_v39 = vadd.f32 %v555_v48, %v536_v18 }
  0xa8   :  { %v574_v19 = vpop.f32.mrf.mxu2  ;;  %v538_v23 = vpop.f32.mrf.mxu0 }
  0xa9   :  { %v557_v24 = vpop.f32.mrf.mxu1  ;;  %v575_v54 = vadd.f32 %v574_v19, %v556_v39 }
  0xaa   :  { %v558_v63 = vadd.f32 %v557_v24, %v538_v23 }
  0xab   :  { %v593_v6 = vpop.f32.mrf.mxu3 }
  0xac   :  { %v594_v61 = vadd.f32 %v593_v6, %v575_v54 }
  0xb0   :  { %v576_v36 = vpop.f32.mrf.mxu2  ;;  %v541_v28 = vpop.f32.mrf.mxu0 }
  0xb1   :  { %v560_v38 = vpop.f32.mrf.mxu1  ;;  %v577_v2 = vadd.f32 %v576_v36, %v558_v63 }
  0xb2   :  { %v561_v11 = vadd.f32 %v560_v38, %v541_v28 }
  0xb3   :  { %v595_v29 = vpop.f32.mrf.mxu3 }
  0xb4   :  { %v596_v10 = vadd.f32 %v595_v29, %v577_v2 }
  0xb8   :  { %v579_v27 = vpop.f32.mrf.mxu2  ;;  %v543_v55 = vpop.f32.mrf.mxu0 }
  0xb9   :  { %v562_v4 = vpop.f32.mrf.mxu1  ;;  %v580_v16 = vadd.f32 %v579_v27, %v561_v11 }
  0xba   :  { %v563_v43 = vadd.f32 %v562_v4, %v543_v55 }
  0xbb   :  { %v598_v51 = vpop.f32.mrf.mxu3 }
  0xbc   :  { %v599_v31 = vadd.f32 %v598_v51, %v580_v16 }
  0xc0   :  { %v581_v25 = vpop.f32.mrf.mxu2  ;;  %v612_v30 = vpop.f32.mrf.mxu0 }
  0xc1   :  { %v631_v33 = vpop.f32.mrf.mxu1  ;;  %v582_v42 = vadd.f32 %v581_v25, %v563_v43 }
  0xc2   :  { %v632_v53 = vadd.f32 %v631_v33, %v612_v30 }
  0xc3   :  { %v600_v52 = vpop.f32.mrf.mxu3 }
  0xc4   :  { %v601_v12 = vadd.f32 %v600_v52, %v582_v42 }
  0xc8   :  { %v650_v56 = vpop.f32.mrf.mxu2  ;;  %v614_v58 = vpop.f32.mrf.mxu0 }
  0xc9   :  { %v651_v57 = vadd.f32 %v650_v56, %v632_v53  ;;  %v633_v59 = vpop.f32.mrf.mxu1 }
  0xca   :  { %v634_v1 = vadd.f32 %v633_v59, %v614_v58 }
  0xcb   :  { %v669_v60 = vpop.f32.mrf.mxu3 }
  0xcc   :  { %v670_v62 = vadd.f32 %v669_v60, %v651_v57 }
  0xce   :  { %v706_v0 = vpack.c.bf16 %v670_v62, %v594_v61 }
  0xd0   :  { %710 = vst [vmem:[%s1687_s6] sm:$0xff] %v706_v0  ;;  %v652_v3 = vpop.f32.mrf.mxu2  ;;  %v617_v7 = vpop.f32.mrf.mxu0 }
  0xd1   :  { %v653_v5 = vadd.f32 %v652_v3, %v634_v1  ;;  %v636_v8 = vpop.f32.mrf.mxu1 }
  0xd2   :  { %v637_v14 = vadd.f32 %v636_v8, %v617_v7 }
  0xd3   :  { %v671_v9 = vpop.f32.mrf.mxu3 }
  0xd4   :  { %v672_v13 = vadd.f32 %v671_v9, %v653_v5 }
  0xd6   :  { %v707_v15 = vpack.c.bf16 %v672_v13, %v596_v10 }
  0xd8   :  { %711 = vst [vmem:[%s1687_s6 + $0x8] sm:$0xff] %v707_v15  ;;  %v655_v20 = vpop.f32.mrf.mxu2  ;;  %v619_v26 = vpop.f32.mrf.mxu0 }
  0xd9   :  { %v656_v21 = vadd.f32 %v655_v20, %v637_v14  ;;  %v638_v32 = vpop.f32.mrf.mxu1 }
  0xda   :  { %v639_v35 = vadd.f32 %v638_v32, %v619_v26 }
  0xdb   :  { %v674_v22 = vpop.f32.mrf.mxu3 }
  0xdc   :  { %v675_v40 = vadd.f32 %v674_v22, %v656_v21 }
  0xde   :  { %v708_v34 = vpack.c.bf16 %v675_v40, %v599_v31 }
  0xe0   :  { %712 = vst [vmem:[%s1687_s6 + $0x10] sm:$0xff] %v708_v34  ;;  %v657_v44 = vpop.f32.mrf.mxu2 }
  0xe1   :  { %v658_v46 = vadd.f32 %v657_v44, %v639_v35 }
  0xe3   :  { %v676_v41 = vpop.f32.mrf.mxu3 }
  0xe4   :  { %v677_v17 = vadd.f32 %v676_v41, %v658_v46 }
  0xe6   :  { %v709_v37 = vpack.c.bf16 %v677_v17, %v601_v12 }
  0xe8   :  { %713 = vst [vmem:[%s1687_s6 + $0x18] sm:$0xff] %v709_v37 }

// kernel: densenet121_forward.167
= control target key start
LH: loop header
LB: loop body
LE: loop exit
PB: predicated region body
PF: predicated region fallthrough
CT: control target
= control target key end

     0   :  { %s59_s0 = inlined_call_operand.vmem [shape: bf16[4,8,256], index: 0, kind: input, shape index: {}]   ;;  %s60_s1 = inlined_call_operand.vmem [shape: bf16[8,256], index: 1, kind: output, shape index: {}]  }
   0x1   :  { %v8_v0 = vld [vmem:[%s59_s0] sm:$0xff]  ;;  %v9_v1 = vld [vmem:[%s59_s0 + $0x8] sm:$0xff]  ;;  %v10_v2 = vld [vmem:[%s59_s0 + $0x10] sm:$0xff] }
   0x2   :  { %v11_v3 = vld [vmem:[%s59_s0 + $0x18] sm:$0xff]  ;;  %v12_v4 = vunpack.c.l.bf16 %v8_v0  ;;  %v13_v5 = vunpack.c.h.bf16 %v8_v0  ;;  %v14_v6 = vunpack.c.l.bf16 %v9_v1  ;;  %v15_v7 = vunpack.c.h.bf16 %v9_v1 }
   0x3   :  { %v16_v8 = vunpack.c.l.bf16 %v10_v2  ;;  %v17_v9 = vunpack.c.h.bf16 %v10_v2  ;;  %v18_v10 = vunpack.c.l.bf16 %v11_v3  ;;  %v19_v11 = vunpack.c.h.bf16 %v11_v3 }
   0x4   :  { %v20_v12 = vadd.f32 %v14_v6, %v12_v4  ;;  %v23_v13 = vadd.f32 %v15_v7, %v13_v5 }
   0x6   :  { %v21_v14 = vadd.f32 %v20_v12, %v16_v8  ;;  %v24_v15 = vadd.f32 %v23_v13, %v17_v9 }
   0x8   :  { %v22_v16 = vadd.f32 %v21_v14, %v18_v10  ;;  %v25_v17 = vadd.f32 %v24_v15, %v19_v11 }
   0xa   :  { %v26_v18 = vmul.f32 0.25, %v22_v16  ;;  %v27_v19 = vmul.f32 0.25, %v25_v17 }
   0xc   :  { %v28_v20 = vpack.c.bf16 %v27_v19, %v26_v18 }
   0xe   :  { %29 = vst [vmem:[%s60_s1] sm:$0xff] %v28_v20 }

// kernel: densenet121_forward.168
= control target key start
LH: loop header
LB: loop body
LE: loop exit
PB: predicated region body
PF: predicated region fallthrough
CT: control target
= control target key end

     0   :  { %s1167_s21 = smov 0   ;;  %s1169_s22 = smov 0   ;;  %s1274_s0 = inlined_call_operand.vmem [shape: bf16[8,1024], index: 0, kind: input, shape index: {}]   ;;  %s1275_s1 = inlined_call_operand.vmem [shape: bf16[1024,128], index: 1, kind: input, shape index: {}]   ;;  %s1276_s2 = inlined_call_operand.vmem [shape: f32[1,1024], index: 2, kind: input, shape index: {}]   ;;  %s1277_s3 = inlined_call_operand.vmem [shape: f32[1,1024], index: 3, kind: input, shape index: {}]   ;;  %s1278_s4 = inlined_call_operand.vmem [shape: f32[1,128], index: 4, kind: input, shape index: {}]   ;;  %s1279_s5 = inlined_call_operand.vmem [shape: f32[1,128], index: 5, kind: input, shape index: {}]   ;;  %s1280_s6 = inlined_call_operand.vmem [shape: bf16[8,128], index: 6, kind: output, shape index: {}]  }
   0x1   :  { %s1171_s23 = smov 0  }
   0x2 LB: > { %s28_s24 = sadd.s32 1, %s1125_s22  ;;  %p908_p0 = scmp.ge.s32.totalorder %s1129_s23, 1  ;;  %s1129_s23 = sphi %s1171_s23, %s16_s23   ;;  %s1125_s22 = sphi %s1169_s22, %s1282_s22   ;;  %s1121_s21 = sphi %s1167_s21, %s1281_s21  }
   0x3   : > { %p29_p1 = scmp.ge.s32.totalorder %s28_s24, 2  ;;  %p292_p2 = scmp.lt.s32.totalorder %s1129_s23, 3 }
   0x5   : > { %s1284_s24 = smov (%p29_p1, %s28_s24), 0  ;;  %p293_p3 = pnand %p908_p0, %p292_p2 }
   0x6   : > { %s909_s25 = sshll.u32 (!%p293_p3), %s1121_s21, 2  ;;  %s911_s26 = sshll.u32 (!%p293_p3), %s1121_s21, 6 }
   0x7   : > { %296 = sbr.rel (%p293_p3) target bundleno = 212 (0xd4), region = 44  ;;  %p353_p4 = scmp.lt.s32.totalorder (!%p293_p3), %s909_s25, 7 }
   0x8   : > { %p361_p5 = scmp.lt.s32.totalorder (!%p293_p3), %s911_s26, 127  ;;  %p915_p6 = scmp.ne.s32.totalorder (!%p293_p3), %s1121_s21, 0 }
   0xc   : > { %s1286_s25 = smov (!%p353_p4, %s909_s25), 7  ;;  %s1288_s26 = smov (!%p361_p5, %s911_s26), 127 }
   0xd   : > { %s910_s27 = sshll.u32 %s1286_s25, 2  ;;  %s372_s30 = scalar_lea.vmem %s1276_s2, %s1286_s25 }
   0xe   : > { %s1199_s9 = scalar_lea.vmem %s1274_s0, %s910_s27  ;;  %s912_s10 = sshll.u32 %s1288_s26, 2 }
   0xf   : > { %s1204_s13 = scalar_lea.vmem %s1275_s1, %s912_s10  ;;  %s377_s16 = scalar_lea.vmem %s1277_s3, %s1286_s25 }
  0x10   : > { %395 = sbr.rel (%p915_p6) target bundleno = 23 (0x17), region = 48 }
  0x15   : > { %v1131_v0 = vmov 0.0  }
  0x16   : > { %396 = vst [vmem:[#allocation2] sm:$0xff] %v1131_v0 }
  0x17 PF: > { %v1055_v1 = vld [vmem:[%s1204_s13 + $0x38] sm:$0xff]  ;;  %v1054_v5 = vld [vmem:[%s1204_s13 + $0x30] sm:$0xff]  ;;  %v1053_v9 = vld [vmem:[%s1204_s13 + $0x28] sm:$0xff]  ;;  %p1044_p7 = scmp.ne.s32.totalorder %s1121_s21, 1 }
  0x18   : > { %v1063_v2 = vld [vmem:[%s1204_s13 + $0x78] sm:$0xff]  ;;  %696 = vmatpush.bf16.msra.mxu0 %v1055_v1  ;;  %v1062_v6 = vld [vmem:[%s1204_s13 + $0x70] sm:$0xff]  ;;  %v1061_v10 = vld [vmem:[%s1204_s13 + $0x68] sm:$0xff] }
  0x19   : > { %v1071_v3 = vld [vmem:[%s1204_s13 + $0xb8] sm:$0xff]  ;;  %709 = vmatpush.bf16.msra.mxu1 %v1063_v2  ;;  %v1070_v7 = vld [vmem:[%s1204_s13 + $0xb0] sm:$0xff]  ;;  %v1069_v11 = vld [vmem:[%s1204_s13 + $0xa8] sm:$0xff] }
  0x1a   : > { %v1079_v4 = vld [vmem:[%s1204_s13 + $0xf8] sm:$0xff]  ;;  %722 = vmatpush.bf16.msra.mxu2 %v1071_v3  ;;  %v1078_v8 = vld [vmem:[%s1204_s13 + $0xf0] sm:$0xff]  ;;  %v1077_v12 = vld [vmem:[%s1204_s13 + $0xe8] sm:$0xff] }
  0x1b   : > { %735 = vmatpush.bf16.msra.mxu3 %v1079_v4  ;;  %v1052_v13 = vld [vmem:[%s1204_s13 + $0x20] sm:$0xff]  ;;  %v398_v19 = vld [vmem:[%s1199_s9 + $0x8] sm:$0xff]  ;;  %v1051_v24 = vld [vmem:[%s1204_s13 + $0x18] sm:$0xff] }
  0x1c   : > { %697 = vmatpush.bf16.msra.mxu0 %v1054_v5  ;;  %v1060_v14 = vld [vmem:[%s1204_s13 + $0x60] sm:$0xff]  ;;  %v1059_v25 = vld [vmem:[%s1204_s13 + $0x58] sm:$0xff]  ;;  %v401_v27 = vunpack.c.l.bf16 %v398_v19  ;;  %v402_v29 = vunpack.c.h.bf16 %v398_v19  ;;  %v1050_v37 = vld [vmem:[%s1204_s13 + $0x10] sm:$0xff] }
  0x1d   : > { %710 = vmatpush.bf16.msra.mxu1 %v1062_v6  ;;  %v1068_v15 = vld [vmem:[%s1204_s13 + $0xa0] sm:$0xff]  ;;  %v1067_v31 = vld [vmem:[%s1204_s13 + $0x98] sm:$0xff]  ;;  %v1058_v38 = vld [vmem:[%s1204_s13 + $0x50] sm:$0xff] }
  0x1e   : > { %723 = vmatpush.bf16.msra.mxu2 %v1070_v7  ;;  %v397_v16 = vld [vmem:[%s1199_s9] sm:$0xff]  ;;  %v1075_v32 = vld [vmem:[%s1204_s13 + $0xd8] sm:$0xff]  ;;  %v1066_v43 = vld [vmem:[%s1204_s13 + $0x90] sm:$0xff] }
  0x1f   : > { %736 = vmatpush.bf16.msra.mxu3 %v1078_v8  ;;  %v1076_v17 = vld [vmem:[%s1204_s13 + $0xe0] sm:$0xff]  ;;  %v399_v20 = vunpack.c.l.bf16 %v397_v16  ;;  %v400_v22 = vunpack.c.h.bf16 %v397_v16  ;;  %v1074_v44 = vld [vmem:[%s1204_s13 + $0xd0] sm:$0xff]  ;;  %v1049_v47 = vld [vmem:[%s1204_s13 + $0x8] sm:$0xff] }
  0x20   : > { %698 = vmatpush.bf16.msra.mxu0 %v1053_v9  ;;  %v403_v18 = vld [vmem:[%s372_s30] sm:$0xf]  ;;  %v1057_v48 = vld [vmem:[%s1204_s13 + $0x48] sm:$0xff] }
  0x21   : > { %711 = vmatpush.bf16.msra.mxu1 %v1061_v10  ;;  %v405_v21 = vperm.slane %v403_v18, 0  ;;  %v406_v23 = vperm.slane %v403_v18, 1  ;;  %v417_v26 = vld [vmem:[%s377_s16] sm:$0xf]  ;;  %v407_v28 = vperm.slane %v403_v18, 2  ;;  %v408_v30 = vperm.slane %v403_v18, 3 }
  0x22   : > { %724 = vmatpush.bf16.msra.mxu2 %v1069_v11  ;;  %v419_v34 = vperm.slane %v417_v26, 0  ;;  %v420_v36 = vperm.slane %v417_v26, 1  ;;  %v421_v40 = vperm.slane %v417_v26, 2  ;;  %v422_v42 = vperm.slane %v417_v26, 3  ;;  %v1065_v51 = vld [vmem:[%s1204_s13 + $0x88] sm:$0xff]  ;;  %v1048_v55 = vld [vmem:[%s1204_s13] sm:$0xff] }
  0x23   : > { %737 = vmatpush.bf16.msra.mxu3 %v1077_v12  ;;  %v413_v33 = vmul.f32 %v405_v21, %v399_v20  ;;  %v414_v35 = vmul.f32 %v406_v23, %v400_v22  ;;  %v415_v39 = vmul.f32 %v407_v28, %v401_v27  ;;  %v416_v41 = vmul.f32 %v408_v30, %v402_v29  ;;  %v1073_v52 = vld [vmem:[%s1204_s13 + $0xc8] sm:$0xff]  ;;  %v1056_v56 = vld [vmem:[%s1204_s13 + $0x40] sm:$0xff] }
  0x24   : > { %699 = vmatpush.bf16.msra.mxu0 %v1052_v13  ;;  %v1064_v59 = vld [vmem:[%s1204_s13 + $0x80] sm:$0xff] }
  0x25   : > { %712 = vmatpush.bf16.msra.mxu1 %v1060_v14  ;;  %v427_v45 = vadd.f32 %v419_v34, %v413_v33  ;;  %v428_v46 = vadd.f32 %v420_v36, %v414_v35  ;;  %v429_v49 = vadd.f32 %v421_v40, %v415_v39  ;;  %v430_v50 = vadd.f32 %v422_v42, %v416_v41  ;;  %v1072_v60 = vld [vmem:[%s1204_s13 + $0xc0] sm:$0xff] }
  0x26   : > { %725 = vmatpush.bf16.msra.mxu2 %v1068_v15  ;;  %v439_v9 = vld [vmem:[#allocation2] sm:$0xff] }
  0x27   : > { %738 = vmatpush.bf16.msra.mxu3 %v1076_v17  ;;  %v431_v53 = vmax.f32 %v427_v45, 0.0  ;;  %v432_v54 = vmax.f32 %v428_v46, 0.0  ;;  %v433_v57 = vmax.f32 %v429_v49, 0.0  ;;  %v434_v58 = vmax.f32 %v430_v50, 0.0 }
  0x28   : > { %700 = vmatpush.bf16.msra.mxu0 %v1051_v24 }
  0x29   : > { %713 = vmatpush.bf16.msra.mxu1 %v1059_v25  ;;  %v435_v61 = vpack.c.bf16 %v431_v53, %v431_v53  ;;  %v436_v62 = vpack.c.bf16 %v432_v54, %v432_v54  ;;  %v437_v63 = vpack.c.bf16 %v433_v57, %v433_v57  ;;  %v438_v0 = vpack.c.bf16 %v434_v58, %v434_v58 }
  0x2a   : > { %726 = vmatpush.bf16.msra.mxu2 %v1067_v31 }
  0x2b   : > { %739 = vmatpush.bf16.msra.mxu3 %v1075_v32 }
  0x2c   : > { %701 = vmatpush.bf16.msra.mxu0 %v1050_v37 }
  0x2d   : > { %714 = vmatpush.bf16.msra.mxu1 %v1058_v38 }
  0x2e   : > { %727 = vmatpush.bf16.msra.mxu2 %v1066_v43 }
  0x2f   : > { %740 = vmatpush.bf16.msra.mxu3 %v1074_v44 }
  0x30   : > { %702 = vmatpush.bf16.msra.mxu0 %v1049_v47 }
  0x31   : > { %715 = vmatpush.bf16.msra.mxu1 %v1057_v48 }
  0x32   : > { %728 = vmatpush.bf16.msra.mxu2 %v1065_v51 }
  0x33   : > { %741 = vmatpush.bf16.msra.mxu3 %v1073_v52 }
  0x34   : > { %703 = vmatpush.bf16.msra.mxu0 %v1048_v55 }
  0x35   : > { %716 = vmatpush.bf16.msra.mxu1 %v1056_v56 }
  0x36   : > { %729 = vmatpush.bf16.msra.mxu2 %v1064_v59 }
  0x37   : > { %742 = vmatpush.bf16.msra.mxu3 %v1072_v60  ;;  %704 = vmatmul.bf16.vlgmr.msra.gmra.mxu0 %v435_v61 }
  0x38   : > { %717 = vmatmul.bf16.vlgmr.msra.gmra.mxu1 %v436_v62 }
  0x39   : > { %730 = vmatmul.bf16.vlgmr.msra.gmra.mxu2 %v437_v63 }
  0x3a   : > { %743 = vmatmul.bf16.vlgmr.msra.gmra.mxu3 %v438_v0 }
  0xb4   : > { %v705_v1 = vpop.f32.mrf.mxu0 }
  0xb5   : > { %v718_v2 = vpop.f32.mrf.mxu1 }
  0xb6   : > { %v719_v3 = vadd.f32 %v718_v2, %v705_v1 }
  0xbc   : > { %v731_v4 = vpop.f32.mrf.mxu2  ;;  %v707_v7 = vpop.f32.mrf.mxu0 }
  0xbd   : > { %v744_v5 = vpop.f32.mrf.mxu3  ;;  %v732_v6 = vadd.f32 %v731_v4, %v719_v3  ;;  %v720_v8 = vpop.f32.mrf.mxu1 }
  0xbf   : > { %v745_v10 = vadd.f32 %v744_v5, %v732_v6 }
  0xc1   : > { %v748_v11 = vadd.f32 %v745_v10, %v439_v9  ;;  %753 = sbr.rel (%p1044_p7) target bundleno = 212 (0xd4), region = 52 }
  0xc3   : > { %749 = vst [vmem:[#allocation2] sm:$0xff] %v748_v11 }
  0xc4   : > { %v733_v12 = vpop.f32.mrf.mxu2 }
  0xc5   : > { %v746_v13 = vpop.f32.mrf.mxu3 }
  0xc6   : > { %v1105_v15 = vld [vmem:[%s1278_s4] ss:$0 sm:$0xff] }
  0xc7   : > { %v1106_v16 = vld [vmem:[%s1279_s5] ss:$0 sm:$0xff] }
  0xca   : > { %v754_v14 = vld [vmem:[#allocation2] sm:$0xff] }
  0xcb   : > { %v759_v17 = vmul.f32 %v1105_v15, %v754_v14 }
  0xcd   : > { %v764_v18 = vadd.f32 %v1106_v16, %v759_v17 }
  0xcf   : > { %v765_v19 = vmax.f32 %v764_v18, 0.0 }
  0xd1   : > { %v766_v20 = vpack.c.bf16 %v765_v19, %v765_v19 }
  0xd3   : > { %767 = vst [vmem:[%s1280_s6] sm:$0xf] %v766_v20 }
  0xd4 PF: > { %s16_s23 = sadd.s32 1, %s1129_s23   ;;  %s1281_s21 = smov %s1125_s22 }
  0xd5   : > { %p13_p8 = scmp.ge.s32.totalorder %s16_s23, 4   ;;  %s1282_s22 = smov %s1284_s24 }
  0xd7   :  { %15 = sbr.rel (!%p13_p8) target bundleno = 2 (0x2), region = 97 }

// kernel: densenet121_forward.169
= control target key start
LH: loop header
LB: loop body
LE: loop exit
PB: predicated region body
PF: predicated region fallthrough
CT: control target
= control target key end

     0   :  { %s1004_s21 = smov 0   ;;  %s1006_s22 = smov 0   ;;  %s1076_s0 = inlined_call_operand.vmem [shape: bf16[8,1152], index: 0, kind: input, shape index: {}]   ;;  %s1077_s1 = inlined_call_operand.vmem [shape: bf16[1152,128], index: 1, kind: input, shape index: {}]   ;;  %s1078_s2 = inlined_call_operand.vmem [shape: f32[1,1152], index: 2, kind: input, shape index: {}, may-alias: {2,3}]   ;;  %s1079_s3 = inlined_call_operand.vmem [shape: f32[1,1152], index: 3, kind: input, shape index: {}, may-alias: {2,3}]   ;;  %s1080_s4 = inlined_call_operand.vmem [shape: f32[1,128], index: 4, kind: input, shape index: {}, may-alias: {4,5}]   ;;  %s1081_s5 = inlined_call_operand.vmem [shape: f32[1,128], index: 5, kind: input, shape index: {}, may-alias: {4,5}]   ;;  %s1082_s6 = inlined_call_operand.vmem [shape: bf16[8,128], index: 6, kind: output, shape index: {}]  }
   0x1   :  { %s1008_s23 = smov 0  }
   0x2 LB: > { %s28_s2 = sadd.s32 1, %s962_s22  ;;  %p791_p0 = scmp.ge.s32.totalorder %s966_s23, 1  ;;  %s966_s23 = sphi %s1008_s23, %s16_s23   ;;  %s962_s22 = sphi %s1006_s22, %s1084_s22   ;;  %s958_s21 = sphi %s1004_s21, %s1083_s21  }
   0x3   : > { %p29_p1 = scmp.ge.s32.totalorder %s28_s2, 3  ;;  %p292_p2 = scmp.lt.s32.totalorder %s966_s23, 4 }
   0x5   : > { %s1086_s2 = smov (%p29_p1, %s28_s2), 0  ;;  %p293_p3 = pnand %p791_p0, %p292_p2 }
   0x6   : > { %s350_s3 = smul.u32 (!%p293_p3), 3, %s958_s21  ;;  %p794_p6 = scmp.ne.s32.totalorder (!%p293_p3), %s958_s21, 0 }
   0x7   : > { %296 = sbr.rel (%p293_p3) target bundleno = 203 (0xcb), region = 44 }
   0x8   : > { %s360_s4 = smul.u32 (!%p293_p3), 48, %s958_s21  ;;  %p353_p4 = scmp.lt.s32.totalorder (!%p293_p3), %s350_s3, 8 }
   0xa   : > { %p361_p5 = scmp.lt.s32.totalorder (!%p293_p3), %s360_s4, 143 }
   0xc   : > { %s1088_s3 = smov (!%p353_p4, %s350_s3), 8  ;;  %s1090_s4 = smov (!%p361_p5, %s360_s4), 143 }
   0xd   : > { %s792_s5 = sshll.u32 %s1088_s3, 2  ;;  %s793_s27 = sshll.u32 %s1090_s4, 2 }
   0xe   : > { %s1029_s26 = scalar_lea.vmem %s1076_s0, %s792_s5  ;;  %s1034_s30 = scalar_lea.vmem %s1077_s1, %s793_s27 }
   0xf   : > { %395 = sbr.rel (%p794_p6) target bundleno = 22 (0x16), region = 48 }
  0x14   : > { %v968_v0 = vmov 0.0  }
  0x15   : > { %396 = vst [vmem:[#allocation2] sm:$0xff] %v968_v0 }
  0x16 PF: > { %v902_v1 = vld [vmem:[%s1034_s30 + $0x38] sm:$0xff]  ;;  %v901_v4 = vld [vmem:[%s1034_s30 + $0x30] sm:$0xff]  ;;  %v900_v7 = vld [vmem:[%s1034_s30 + $0x28] sm:$0xff]  ;;  %p891_p7 = scmp.ne.s32.totalorder %s958_s21, 2 }
  0x17   : > { %v910_v2 = vld [vmem:[%s1034_s30 + $0x78] sm:$0xff]  ;;  %603 = vmatpush.bf16.msra.mxu0 %v902_v1  ;;  %v909_v5 = vld [vmem:[%s1034_s30 + $0x70] sm:$0xff]  ;;  %v908_v8 = vld [vmem:[%s1034_s30 + $0x68] sm:$0xff] }
  0x18   : > { %v918_v3 = vld [vmem:[%s1034_s30 + $0xb8] sm:$0xff]  ;;  %616 = vmatpush.bf16.msra.mxu1 %v910_v2  ;;  %v917_v6 = vld [vmem:[%s1034_s30 + $0xb0] sm:$0xff]  ;;  %v916_v9 = vld [vmem:[%s1034_s30 + $0xa8] sm:$0xff] }
  0x19   : > { %629 = vmatpush.bf16.msra.mxu2 %v918_v3  ;;  %v899_v10 = vld [vmem:[%s1034_s30 + $0x20] sm:$0xff]  ;;  %v898_v13 = vld [vmem:[%s1034_s30 + $0x18] sm:$0xff]  ;;  %v897_v16 = vld [vmem:[%s1034_s30 + $0x10] sm:$0xff] }
  0x1a   : > { %v907_v11 = vld [vmem:[%s1034_s30 + $0x60] sm:$0xff]  ;;  %v906_v14 = vld [vmem:[%s1034_s30 + $0x58] sm:$0xff]  ;;  %v905_v17 = vld [vmem:[%s1034_s30 + $0x50] sm:$0xff] }
  0x1b   : > { %604 = vmatpush.bf16.msra.mxu0 %v901_v4  ;;  %v915_v12 = vld [vmem:[%s1034_s30 + $0xa0] sm:$0xff]  ;;  %v914_v15 = vld [vmem:[%s1034_s30 + $0x98] sm:$0xff]  ;;  %v913_v18 = vld [vmem:[%s1034_s30 + $0x90] sm:$0xff] }
  0x1c   : > { %617 = vmatpush.bf16.msra.mxu1 %v909_v5  ;;  %v896_v19 = vld [vmem:[%s1034_s30 + $0x8] sm:$0xff]  ;;  %v397_v21 = vld [vmem:[%s1029_s26] sm:$0xff] }
  0x1d   : > { %630 = vmatpush.bf16.msra.mxu2 %v917_v6  ;;  %v904_v20 = vld [vmem:[%s1034_s30 + $0x48] sm:$0xff]  ;;  %v450_v24 = vunpack.c.l.b16 %v397_v21  ;;  %v451_v25 = vunpack.c.h.b16 %v397_v21  ;;  %v895_v26 = vld [vmem:[%s1034_s30] sm:$0xff] }
  0x1e   : > { %v912_v22 = vld [vmem:[%s1034_s30 + $0x88] sm:$0xff]  ;;  %v903_v27 = vld [vmem:[%s1034_s30 + $0x40] sm:$0xff] }
  0x1f   : > { %605 = vmatpush.bf16.msra.mxu0 %v900_v7  ;;  %v398_v23 = vld [vmem:[%s1029_s26 + $0x8] sm:$0xf]  ;;  %v911_v29 = vld [vmem:[%s1034_s30 + $0x80] sm:$0xff]  ;;  %v453_v30 = vpack.c.b16 %v450_v24, %v450_v24  ;;  %v454_v31 = vpack.c.b16 %v451_v25, %v451_v25 }
  0x20   : > { %618 = vmatpush.bf16.msra.mxu1 %v908_v8  ;;  %v452_v28 = vunpack.c.l.b16 %v398_v23  ;;  %v399_v36 = vld [vmem:[#allocation2] sm:$0xff] }
  0x21   : > { %631 = vmatpush.bf16.msra.mxu2 %v916_v9 }
  0x22   : > { %v455_v32 = vpack.c.b16 %v452_v28, %v452_v28 }
  0x23   : > { %606 = vmatpush.bf16.msra.mxu0 %v899_v10 }
  0x24   : > { %619 = vmatpush.bf16.msra.mxu1 %v907_v11 }
  0x25   : > { %632 = vmatpush.bf16.msra.mxu2 %v915_v12 }
  0x27   : > { %607 = vmatpush.bf16.msra.mxu0 %v898_v13 }
  0x28   : > { %620 = vmatpush.bf16.msra.mxu1 %v906_v14 }
  0x29   : > { %633 = vmatpush.bf16.msra.mxu2 %v914_v15 }
  0x2b   : > { %608 = vmatpush.bf16.msra.mxu0 %v897_v16 }
  0x2c   : > { %621 = vmatpush.bf16.msra.mxu1 %v905_v17 }
  0x2d   : > { %634 = vmatpush.bf16.msra.mxu2 %v913_v18 }
  0x2f   : > { %609 = vmatpush.bf16.msra.mxu0 %v896_v19 }
  0x30   : > { %622 = vmatpush.bf16.msra.mxu1 %v904_v20 }
  0x31   : > { %635 = vmatpush.bf16.msra.mxu2 %v912_v22 }
  0x33   : > { %610 = vmatpush.bf16.msra.mxu0 %v895_v26 }
  0x34   : > { %623 = vmatpush.bf16.msra.mxu1 %v903_v27 }
  0x35   : > { %636 = vmatpush.bf16.msra.mxu2 %v911_v29 }
  0x36   : > { %611 = vmatmul.bf16.vlgmr.msra.gmra.mxu0 %v453_v30 }
  0x37   : > { %624 = vmatmul.bf16.vlgmr.msra.gmra.mxu1 %v454_v31 }
  0x38   : > { %637 = vmatmul.bf16.vlgmr.msra.gmra.mxu2 %v455_v32 }
  0xb3   : > { %v612_v33 = vpop.f32.mrf.mxu0 }
  0xb4   : > { %v625_v34 = vpop.f32.mrf.mxu1 }
  0xb5   : > { %v626_v35 = vadd.f32 %v625_v34, %v612_v33 }
  0xbb   : > { %v638_v37 = vpop.f32.mrf.mxu2  ;;  %v614_v39 = vpop.f32.mrf.mxu0 }
  0xbc   : > { %v639_v38 = vadd.f32 %v638_v37, %v626_v35  ;;  %v627_v40 = vpop.f32.mrf.mxu1 }
  0xbe   : > { %v642_v41 = vadd.f32 %v639_v38, %v399_v36 }
  0xbf   : > { %647 = sbr.rel (%p891_p7) target bundleno = 203 (0xcb), region = 52 }
  0xc0   : > { %643 = vst [vmem:[#allocation2] sm:$0xff] %v642_v41 }
  0xc3   : > { %v640_v42 = vpop.f32.mrf.mxu2 }
  0xc7   : > { %v648_v43 = vld [vmem:[#allocation2] sm:$0xff] }
  0xc8   : > { %v649_v44 = vpack.c.bf16 %v648_v43, %v648_v43 }
  0xca   : > { %650 = vst [vmem:[%s1082_s6] sm:$0xf] %v649_v44 }
  0xcb PF: > { %s16_s23 = sadd.s32 1, %s966_s23   ;;  %s1083_s21 = smov %s962_s22 }
  0xcc   : > { %p13_p8 = scmp.ge.s32.totalorder %s16_s23, 5   ;;  %s1084_s22 = smov %s1086_s2 }
  0xce   :  { %15 = sbr.rel (!%p13_p8) target bundleno = 2 (0x2), region = 97 }

// kernel: densenet121_forward.216
= control target key start
LH: loop header
LB: loop body
LE: loop exit
PB: predicated region body
PF: predicated region fallthrough
CT: control target
= control target key end

     0   :  { %s1880_s21 = smov 0   ;;  %s1882_s22 = smov 0   ;;  %s2286_s0 = inlined_call_operand.vmem [shape: bf16[8,1024], index: 0, kind: input, shape index: {}]   ;;  %s2287_s1 = inlined_call_operand.vmem [shape: bf16[1024,512], index: 1, kind: input, shape index: {}]   ;;  %s2288_s2 = inlined_call_operand.vmem [shape: f32[1,1024], index: 2, kind: input, shape index: {}]   ;;  %s2289_s3 = inlined_call_operand.vmem [shape: f32[1,1024], index: 3, kind: input, shape index: {}]   ;;  %s2290_s4 = inlined_call_operand.vmem [shape: f32[1,512], index: 4, kind: input, shape index: {}, may-alias: {4,5}]   ;;  %s2291_s5 = inlined_call_operand.vmem [shape: f32[1,512], index: 5, kind: input, shape index: {}, may-alias: {4,5}]   ;;  %s2292_s6 = inlined_call_operand.vmem [shape: bf16[8,512], index: 6, kind: output, shape index: {}]  }
   0x1   :  { %s1884_s23 = smov 0   ;;  %s1886_s24 = smov 0  }
   0x2   :  { %s1888_s25 = smov 0   ;;  %s1890_s26 = smov 0  }
   0x3   :  { %s1892_s27 = smov 0  }
   0x4 LB: > { %s28_s4 = sadd.s32 1, %s1834_s25  ;;  %s31_s5 = sadd.s32 1, %s1838_s26  ;;  %s1842_s27 = sphi %s1892_s27, %s16_s27   ;;  %s1838_s26 = sphi %s1890_s26, %s2298_s26   ;;  %s1834_s25 = sphi %s1888_s25, %s2297_s25   ;;  %s1830_s24 = sphi %s1886_s24, %s2296_s24   ;;  %s1826_s23 = sphi %s1884_s23, %s2295_s23   ;;  %s1822_s22 = sphi %s1882_s22, %s2294_s22   ;;  %s1818_s21 = sphi %s1880_s21, %s2293_s21  }
   0x5   : > { %p29_p0 = scmp.ge.s32.totalorder %s28_s4, 2  ;;  %p79_p1 = scmp.ne.s32.totalorder %s1822_s22, %s1818_s21 }
   0x6   : > { %p80_p2 = scmp.eq.s32.totalorder %s1842_s27, 0  ;;  %s72_s7 = sadd.s32 1, %s1822_s22 }
   0x7   : > { %s2300_s4 = smov (%p29_p0, %s28_s4), 0  ;;  %s2302_s5 = smov (!%p29_p0, %s31_s5), %s1838_s26 }
   0x8   : > { %p81_p3 = por %p80_p2, %p79_p1  ;;  %p33_p4 = scmp.ge.s32.totalorder %s2302_s5, 2 }
   0x9   : > { %s67_s28 = ssub.s32 %s1834_s25, %s2300_s4  ;;  %p1392_p6 = scmp.ge.s32.totalorder %s1842_s27, 4 }
   0xa   : > { %s2304_s5 = smov (%p33_p4, %s2302_s5), 0 }
   0xb   : > { %s68_s29 = ssub.s32 %s1838_s26, %s2304_s5  ;;  %237 = sbr.rel (%p1392_p6) target bundleno = 87 (0x57), region = 16 }
   0xc   : > { %s69_s30 = sor.u32 %s68_s29, %s67_s28 }
   0xd   : > { %p70_p5 = scmp.eq.s32.totalorder %s69_s30, 0 }
   0xf   : > { %s1931_s8 = scalar_select %p70_p5, %s1822_s22, %s72_s7  }
  0x10   : > { %253 = sbr.rel (!%p81_p3) target bundleno = 87 (0x57), region = 24  ;;  %s255_s9 = sand.u32 (%p81_p3), 1, %s1822_s22  }
  0x11   : > { %s1395_s10 = sshll.u32 (%p81_p3), %s1838_s26, 1  ;;  %s1393_s11 = sshll.u32 (%p81_p3), %s255_s9, 9 }
  0x12   : > { %s1666_s12 = sshll.u32 (%p81_p3), %s1834_s25, 8  ;;  %s1945_s18 = scalar_lea.vmem (%p81_p3), [#allocation3], %s1393_s11 }
  0x13   : > { %s261_s13 = sadd.s32 (%p81_p3), %s1666_s12, %s1395_s10 }
  0x14   : > { %s1397_s14 = sshll.u32 (%p81_p3), %s261_s13, 2 }
  0x15   : > { %s1940_s17 = scalar_lea.vmem %s2287_s1, %s1397_s14 }
  0x16   : > { %v418_v0 = vld [vmem:[%s1940_s17] sm:$0xff]  ;;  %v420_v1 = vld [vmem:[%s1940_s17 + $0x10] sm:$0xff] }
  0x17   : > { %v422_v2 = vld [vmem:[%s1940_s17 + $0x20] sm:$0xff]  ;;  %419 = vst [vmem:[%s1945_s18] sm:$0xff] %v418_v0  ;;  %v424_v3 = vld [vmem:[%s1940_s17 + $0x30] sm:$0xff] }
  0x18   : > { %421 = vst [vmem:[%s1945_s18 + $0x8] sm:$0xff] %v420_v1  ;;  %v426_v4 = vld [vmem:[%s1940_s17 + $0x40] sm:$0xff]  ;;  %v428_v5 = vld [vmem:[%s1940_s17 + $0x50] sm:$0xff] }
  0x19   : > { %423 = vst [vmem:[%s1945_s18 + $0x10] sm:$0xff] %v422_v2  ;;  %v430_v6 = vld [vmem:[%s1940_s17 + $0x60] sm:$0xff]  ;;  %v432_v7 = vld [vmem:[%s1940_s17 + $0x70] sm:$0xff] }
  0x1a   : > { %425 = vst [vmem:[%s1945_s18 + $0x18] sm:$0xff] %v424_v3  ;;  %v434_v8 = vld [vmem:[%s1940_s17 + $0x80] sm:$0xff]  ;;  %v436_v9 = vld [vmem:[%s1940_s17 + $0x90] sm:$0xff] }
  0x1b   : > { %427 = vst [vmem:[%s1945_s18 + $0x20] sm:$0xff] %v426_v4  ;;  %v438_v10 = vld [vmem:[%s1940_s17 + $0xa0] sm:$0xff]  ;;  %v440_v11 = vld [vmem:[%s1940_s17 + $0xb0] sm:$0xff] }
  0x1c   : > { %429 = vst [vmem:[%s1945_s18 + $0x28] sm:$0xff] %v428_v5  ;;  %v442_v12 = vld [vmem:[%s1940_s17 + $0xc0] sm:$0xff]  ;;  %v444_v13 = vld [vmem:[%s1940_s17 + $0xd0] sm:$0xff] }
  0x1d   : > { %431 = vst [vmem:[%s1945_s18 + $0x30] sm:$0xff] %v430_v6  ;;  %v446_v14 = vld [vmem:[%s1940_s17 + $0xe0] sm:$0xff]  ;;  %v448_v15 = vld [vmem:[%s1940_s17 + $0xf0] sm:$0xff] }
  0x1e   : > { %433 = vst [vmem:[%s1945_s18 + $0x38] sm:$0xff] %v432_v7  ;;  %v450_v16 = vld [vmem:[%s1940_s17 + $0x100] sm:$0xff]  ;;  %v452_v17 = vld [vmem:[%s1940_s17 + $0x110] sm:$0xff] }
  0x1f   : > { %435 = vst [vmem:[%s1945_s18 + $0x40] sm:$0xff] %v434_v8  ;;  %v454_v18 = vld [vmem:[%s1940_s17 + $0x120] sm:$0xff]  ;;  %v456_v19 = vld [vmem:[%s1940_s17 + $0x130] sm:$0xff] }
  0x20   : > { %437 = vst [vmem:[%s1945_s18 + $0x48] sm:$0xff] %v436_v9  ;;  %v458_v20 = vld [vmem:[%s1940_s17 + $0x140] sm:$0xff]  ;;  %v460_v21 = vld [vmem:[%s1940_s17 + $0x150] sm:$0xff] }
  0x21   : > { %439 = vst [vmem:[%s1945_s18 + $0x50] sm:$0xff] %v438_v10  ;;  %v462_v22 = vld [vmem:[%s1940_s17 + $0x160] sm:$0xff]  ;;  %v464_v23 = vld [vmem:[%s1940_s17 + $0x170] sm:$0xff] }
  0x22   : > { %441 = vst [vmem:[%s1945_s18 + $0x58] sm:$0xff] %v440_v11  ;;  %v466_v24 = vld [vmem:[%s1940_s17 + $0x180] sm:$0xff]  ;;  %v468_v25 = vld [vmem:[%s1940_s17 + $0x190] sm:$0xff] }
  0x23   : > { %443 = vst [vmem:[%s1945_s18 + $0x60] sm:$0xff] %v442_v12  ;;  %v470_v26 = vld [vmem:[%s1940_s17 + $0x1a0] sm:$0xff]  ;;  %v472_v27 = vld [vmem:[%s1940_s17 + $0x1b0] sm:$0xff] }
  0x24   : > { %445 = vst [vmem:[%s1945_s18 + $0x68] sm:$0xff] %v444_v13  ;;  %v474_v28 = vld [vmem:[%s1940_s17 + $0x1c0] sm:$0xff]  ;;  %v476_v29 = vld [vmem:[%s1940_s17 + $0x1d0] sm:$0xff] }
  0x25   : > { %447 = vst [vmem:[%s1945_s18 + $0x70] sm:$0xff] %v446_v14  ;;  %v478_v30 = vld [vmem:[%s1940_s17 + $0x1e0] sm:$0xff]  ;;  %v480_v31 = vld [vmem:[%s1940_s17 + $0x1f0] sm:$0xff] }
  0x26   : > { %449 = vst [vmem:[%s1945_s18 + $0x78] sm:$0xff] %v448_v15  ;;  %v482_v32 = vld [vmem:[%s1940_s17 + $0x200] sm:$0xff]  ;;  %v484_v33 = vld [vmem:[%s1940_s17 + $0x210] sm:$0xff] }
  0x27   : > { %451 = vst [vmem:[%s1945_s18 + $0x80] sm:$0xff] %v450_v16  ;;  %v486_v34 = vld [vmem:[%s1940_s17 + $0x220] sm:$0xff]  ;;  %v488_v35 = vld [vmem:[%s1940_s17 + $0x230] sm:$0xff] }
  0x28   : > { %453 = vst [vmem:[%s1945_s18 + $0x88] sm:$0xff] %v452_v17  ;;  %v490_v36 = vld [vmem:[%s1940_s17 + $0x240] sm:$0xff]  ;;  %v492_v37 = vld [vmem:[%s1940_s17 + $0x250] sm:$0xff] }
  0x29   : > { %455 = vst [vmem:[%s1945_s18 + $0x90] sm:$0xff] %v454_v18  ;;  %v494_v38 = vld [vmem:[%s1940_s17 + $0x260] sm:$0xff]  ;;  %v496_v39 = vld [vmem:[%s1940_s17 + $0x270] sm:$0xff] }
  0x2a   : > { %457 = vst [vmem:[%s1945_s18 + $0x98] sm:$0xff] %v456_v19  ;;  %v498_v40 = vld [vmem:[%s1940_s17 + $0x280] sm:$0xff]  ;;  %v500_v41 = vld [vmem:[%s1940_s17 + $0x290] sm:$0xff] }
  0x2b   : > { %459 = vst [vmem:[%s1945_s18 + $0xa0] sm:$0xff] %v458_v20  ;;  %v502_v42 = vld [vmem:[%s1940_s17 + $0x2a0] sm:$0xff]  ;;  %v504_v43 = vld [vmem:[%s1940_s17 + $0x2b0] sm:$0xff] }
  0x2c   : > { %461 = vst [vmem:[%s1945_s18 + $0xa8] sm:$0xff] %v460_v21  ;;  %v506_v44 = vld [vmem:[%s1940_s17 + $0x2c0] sm:$0xff]  ;;  %v508_v45 = vld [vmem:[%s1940_s17 + $0x2d0] sm:$0xff] }
  0x2d   : > { %463 = vst [vmem:[%s1945_s18 + $0xb0] sm:$0xff] %v462_v22  ;;  %v510_v46 = vld [vmem:[%s1940_s17 + $0x2e0] sm:$0xff]  ;;  %v512_v47 = vld [vmem:[%s1940_s17 + $0x2f0] sm:$0xff] }
  0x2e   : > { %465 = vst [vmem:[%s1945_s18 + $0xb8] sm:$0xff] %v464_v23  ;;  %v514_v48 = vld [vmem:[%s1940_s17 + $0x300] sm:$0xff]  ;;  %v516_v49 = vld [vmem:[%s1940_s17 + $0x310] sm:$0xff] }
  0x2f   : > { %467 = vst [vmem:[%s1945_s18 + $0xc0] sm:$0xff] %v466_v24  ;;  %v518_v50 = vld [vmem:[%s1940_s17 + $0x320] sm:$0xff]  ;;  %v520_v51 = vld [vmem:[%s1940_s17 + $0x330] sm:$0xff] }
  0x30   : > { %469 = vst [vmem:[%s1945_s18 + $0xc8] sm:$0xff] %v468_v25  ;;  %v522_v52 = vld [vmem:[%s1940_s17 + $0x340] sm:$0xff]  ;;  %v524_v53 = vld [vmem:[%s1940_s17 + $0x350] sm:$0xff] }
  0x31   : > { %471 = vst [vmem:[%s1945_s18 + $0xd0] sm:$0xff] %v470_v26  ;;  %v526_v54 = vld [vmem:[%s1940_s17 + $0x360] sm:$0xff]  ;;  %v528_v55 = vld [vmem:[%s1940_s17 + $0x370] sm:$0xff] }
  0x32   : > { %473 = vst [vmem:[%s1945_s18 + $0xd8] sm:$0xff] %v472_v27  ;;  %v530_v56 = vld [vmem:[%s1940_s17 + $0x380] sm:$0xff]  ;;  %v532_v57 = vld [vmem:[%s1940_s17 + $0x390] sm:$0xff] }
  0x33   : > { %475 = vst [vmem:[%s1945_s18 + $0xe0] sm:$0xff] %v474_v28  ;;  %v534_v58 = vld [vmem:[%s1940_s17 + $0x3a0] sm:$0xff]  ;;  %v536_v59 = vld [vmem:[%s1940_s17 + $0x3b0] sm:$0xff] }
  0x34   : > { %477 = vst [vmem:[%s1945_s18 + $0xe8] sm:$0xff] %v476_v29  ;;  %v538_v60 = vld [vmem:[%s1940_s17 + $0x3c0] sm:$0xff]  ;;  %v540_v61 = vld [vmem:[%s1940_s17 + $0x3d0] sm:$0xff] }
  0x35   : > { %479 = vst [vmem:[%s1945_s18 + $0xf0] sm:$0xff] %v478_v30  ;;  %v542_v62 = vld [vmem:[%s1940_s17 + $0x3e0] sm:$0xff]  ;;  %v544_v63 = vld [vmem:[%s1940_s17 + $0x3f0] sm:$0xff] }
  0x36   : > { %481 = vst [vmem:[%s1945_s18 + $0xf8] sm:$0xff] %v480_v31 }
  0x37   : > { %483 = vst [vmem:[%s1945_s18 + $0x100] sm:$0xff] %v482_v32 }
  0x38   : > { %485 = vst [vmem:[%s1945_s18 + $0x108] sm:$0xff] %v484_v33 }
  0x39   : > { %487 = vst [vmem:[%s1945_s18 + $0x110] sm:$0xff] %v486_v34 }
  0x3a   : > { %489 = vst [vmem:[%s1945_s18 + $0x118] sm:$0xff] %v488_v35 }
  0x3b   : > { %491 = vst [vmem:[%s1945_s18 + $0x120] sm:$0xff] %v490_v36 }
  0x3c   : > { %493 = vst [vmem:[%s1945_s18 + $0x128] sm:$0xff] %v492_v37 }
  0x3d   : > { %495 = vst [vmem:[%s1945_s18 + $0x130] sm:$0xff] %v494_v38 }
  0x3e   : > { %497 = vst [vmem:[%s1945_s18 + $0x138] sm:$0xff] %v496_v39 }
  0x3f   : > { %499 = vst [vmem:[%s1945_s18 + $0x140] sm:$0xff] %v498_v40 }
  0x40   : > { %501 = vst [vmem:[%s1945_s18 + $0x148] sm:$0xff] %v500_v41 }
  0x41   : > { %503 = vst [vmem:[%s1945_s18 + $0x150] sm:$0xff] %v502_v42 }
  0x42   : > { %505 = vst [vmem:[%s1945_s18 + $0x158] sm:$0xff] %v504_v43 }
  0x43   : > { %507 = vst [vmem:[%s1945_s18 + $0x160] sm:$0xff] %v506_v44 }
  0x44   : > { %509 = vst [vmem:[%s1945_s18 + $0x168] sm:$0xff] %v508_v45 }
  0x45   : > { %511 = vst [vmem:[%s1945_s18 + $0x170] sm:$0xff] %v510_v46 }
  0x46   : > { %513 = vst [vmem:[%s1945_s18 + $0x178] sm:$0xff] %v512_v47 }
  0x47   : > { %515 = vst [vmem:[%s1945_s18 + $0x180] sm:$0xff] %v514_v48 }
  0x48   : > { %517 = vst [vmem:[%s1945_s18 + $0x188] sm:$0xff] %v516_v49 }
  0x49   : > { %519 = vst [vmem:[%s1945_s18 + $0x190] sm:$0xff] %v518_v50 }
  0x4a   : > { %521 = vst [vmem:[%s1945_s18 + $0x198] sm:$0xff] %v520_v51 }
  0x4b   : > { %523 = vst [vmem:[%s1945_s18 + $0x1a0] sm:$0xff] %v522_v52 }
  0x4c   : > { %525 = vst [vmem:[%s1945_s18 + $0x1a8] sm:$0xff] %v524_v53 }
  0x4d   : > { %527 = vst [vmem:[%s1945_s18 + $0x1b0] sm:$0xff] %v526_v54 }
  0x4e   : > { %529 = vst [vmem:[%s1945_s18 + $0x1b8] sm:$0xff] %v528_v55 }
  0x4f   : > { %531 = vst [vmem:[%s1945_s18 + $0x1c0] sm:$0xff] %v530_v56 }
  0x50   : > { %533 = vst [vmem:[%s1945_s18 + $0x1c8] sm:$0xff] %v532_v57 }
  0x51   : > { %535 = vst [vmem:[%s1945_s18 + $0x1d0] sm:$0xff] %v534_v58 }
  0x52   : > { %537 = vst [vmem:[%s1945_s18 + $0x1d8] sm:$0xff] %v536_v59 }
  0x53   : > { %539 = vst [vmem:[%s1945_s18 + $0x1e0] sm:$0xff] %v538_v60 }
  0x54   : > { %541 = vst [vmem:[%s1945_s18 + $0x1e8] sm:$0xff] %v540_v61 }
  0x55   : > { %543 = vst [vmem:[%s1945_s18 + $0x1f0] sm:$0xff] %v542_v62 }
  0x56   : > { %545 = vst [vmem:[%s1945_s18 + $0x1f8] sm:$0xff] %v544_v63 }
  0x57 PF: > { %p1398_p7 = scmp.ge.s32.totalorder %s1842_s27, 1  ;;  %p582_p8 = scmp.lt.s32.totalorder %s1842_s27, 5 }
  0x59   : > { %p583_p9 = pnand %p1398_p7, %p582_p8 }
  0x5a   : > { %s589_s19 = sand.u32 (!%p583_p9), 1, %s1818_s21   ;;  %s1400_s20 = sshll.u32 (!%p583_p9), %s1826_s23, 2 }
  0x5b   : > { %586 = sbr.rel (%p583_p9) target bundleno = 324 (0x144), region = 78  ;;  %s1399_s28 = sshll.u32 (!%p583_p9), %s589_s19, 9 }
  0x5c   : > { %p650_p10 = scmp.lt.s32.totalorder (!%p583_p9), %s1400_s20, 7  ;;  %s1404_s29 = sshll.u32 (!%p583_p9), %s1830_s24, 1 }
  0x5d   : > { %p682_p11 = scmp.lt.s32.totalorder (!%p583_p9), %s1404_s29, 3  ;;  %s2098_s19 = scalar_lea.vmem (!%p583_p9), [#allocation3], %s1399_s28 }
  0x5e   : > { %p1406_p12 = scmp.ne.s32.totalorder (!%p583_p9), %s1826_s23, 0 }
  0x60   : > { %s2306_s20 = smov (!%p650_p10, %s1400_s20), 7  ;;  %s2308_s29 = smov (!%p682_p11, %s1404_s29), 3 }
  0x61   : > { %s1401_s30 = sshll.u32 %s2306_s20, 2  ;;  %s662_s10 = scalar_lea.vmem %s2288_s2, %s2306_s20 }
  0x62   : > { %s2087_s13 = scalar_lea.vmem %s2286_s0, %s1401_s30  ;;  %s667_s24 = scalar_lea.vmem %s2289_s3, %s2306_s20 }
  0x63   : > { %s1405_s15 = sshll.u32 %s2308_s29, 2  ;;  %692 = sbr.rel (%p1406_p12) target bundleno = 107 (0x6b), region = 86 }
  0x64   : > { %s2096_s18 = scalar_lea.vmem %s2292_s6, %s1405_s15 }
  0x68   : > { %v1844_v0 = vmov 0.0  }
  0x69   : > { %693 = vst [vmem:[#allocation2] sm:$0xff] %v1844_v0 }
  0x6a   : > { %694 = vst [vmem:[#allocation2 + $0x8] sm:$0xff] %v1844_v0 }
  0x6b PF: > { %v1465_v1 = vld [vmem:[%s2098_s19 + $0x70] sm:$0xf]  ;;  %v1682_v2 = vld [vmem:[%s2098_s19 + $0x74] sm:$0xf0]  ;;  %v1457_v12 = vld [vmem:[%s2098_s19 + $0x60] sm:$0xf] }
  0x6c   : > { %v1529_v3 = vld [vmem:[%s2098_s19 + $0xf0] sm:$0xf]  ;;  %v1466_v4 = vor.u32 %v1682_v2, %v1465_v1  ;;  %v1698_v5 = vld [vmem:[%s2098_s19 + $0xf4] sm:$0xf0]  ;;  %v1680_v14 = vld [vmem:[%s2098_s19 + $0x64] sm:$0xf0] }
  0x6d   : > { %v1593_v6 = vld [vmem:[%s2098_s19 + $0x170] sm:$0xf]  ;;  %v1714_v7 = vld [vmem:[%s2098_s19 + $0x174] sm:$0xf0]  ;;  %v1530_v8 = vor.u32 %v1698_v5, %v1529_v3  ;;  %v1521_v15 = vld [vmem:[%s2098_s19 + $0xe0] sm:$0xf]  ;;  %v1458_v17 = vor.u32 %v1680_v14, %v1457_v12 }
  0x6e   : > { %v1594_v9 = vor.u32 %v1714_v7, %v1593_v6  ;;  %v1657_v10 = vld [vmem:[%s2098_s19 + $0x1f0] sm:$0xf]  ;;  %v1730_v11 = vld [vmem:[%s2098_s19 + $0x1f4] sm:$0xf0]  ;;  %1123 = vmatpush.bf16.msra.mxu0 %v1466_v4  ;;  %v1696_v16 = vld [vmem:[%s2098_s19 + $0xe4] sm:$0xf0] }
  0x6f   : > { %v1658_v13 = vor.u32 %v1730_v11, %v1657_v10  ;;  %1136 = vmatpush.bf16.msra.mxu1 %v1530_v8  ;;  %v1522_v18 = vor.u32 %v1696_v16, %v1521_v15  ;;  %v1585_v19 = vld [vmem:[%s2098_s19 + $0x160] sm:$0xf]  ;;  %v1712_v20 = vld [vmem:[%s2098_s19 + $0x164] sm:$0xf0]  ;;  %v1449_v24 = vld [vmem:[%s2098_s19 + $0x50] sm:$0xf] }
  0x70   : > { %1149 = vmatpush.bf16.msra.mxu2 %v1594_v9  ;;  %v1649_v21 = vld [vmem:[%s2098_s19 + $0x1e0] sm:$0xf]  ;;  %v1586_v22 = vor.u32 %v1712_v20, %v1585_v19  ;;  %v1728_v23 = vld [vmem:[%s2098_s19 + $0x1e4] sm:$0xf0]  ;;  %v1678_v25 = vld [vmem:[%s2098_s19 + $0x54] sm:$0xf0] }
  0x71   : > { %1162 = vmatpush.bf16.msra.mxu3 %v1658_v13  ;;  %v1650_v26 = vor.u32 %v1728_v23, %v1649_v21  ;;  %v1513_v27 = vld [vmem:[%s2098_s19 + $0xd0] sm:$0xf]  ;;  %v1694_v28 = vld [vmem:[%s2098_s19 + $0xd4] sm:$0xf0]  ;;  %v1450_v30 = vor.u32 %v1678_v25, %v1449_v24  ;;  %v1441_v36 = vld [vmem:[%s2098_s19 + $0x40] sm:$0xf] }
  0x72   : > { %v1577_v29 = vld [vmem:[%s2098_s19 + $0x150] sm:$0xf]  ;;  %1124 = vmatpush.bf16.msra.mxu0 %v1458_v17  ;;  %v1710_v31 = vld [vmem:[%s2098_s19 + $0x154] sm:$0xf0]  ;;  %v1514_v34 = vor.u32 %v1694_v28, %v1513_v27  ;;  %v1676_v37 = vld [vmem:[%s2098_s19 + $0x44] sm:$0xf0] }
  0x73   : > { %v1641_v32 = vld [vmem:[%s2098_s19 + $0x1d0] sm:$0xf]  ;;  %v1726_v33 = vld [vmem:[%s2098_s19 + $0x1d4] sm:$0xf0]  ;;  %1137 = vmatpush.bf16.msra.mxu1 %v1522_v18  ;;  %v1578_v35 = vor.u32 %v1710_v31, %v1577_v29  ;;  %v1505_v38 = vld [vmem:[%s2098_s19 + $0xc0] sm:$0xf]  ;;  %v1442_v45 = vor.u32 %v1676_v37, %v1441_v36 }
  0x74   : > { %1150 = vmatpush.bf16.msra.mxu2 %v1586_v22  ;;  %v1642_v39 = vor.u32 %v1726_v33, %v1641_v32  ;;  %v1692_v40 = vld [vmem:[%s2098_s19 + $0xc4] sm:$0xf0]  ;;  %v1569_v41 = vld [vmem:[%s2098_s19 + $0x140] sm:$0xf]  ;;  %v1433_v48 = vld [vmem:[%s2098_s19 + $0x30] sm:$0xf] }
  0x75   : > { %1163 = vmatpush.bf16.msra.mxu3 %v1650_v26  ;;  %v1708_v42 = vld [vmem:[%s2098_s19 + $0x144] sm:$0xf0]  ;;  %v1633_v43 = vld [vmem:[%s2098_s19 + $0x1c0] sm:$0xf]  ;;  %v1506_v46 = vor.u32 %v1692_v40, %v1505_v38  ;;  %v1674_v49 = vld [vmem:[%s2098_s19 + $0x34] sm:$0xf0] }
  0x76   : > { %v1724_v44 = vld [vmem:[%s2098_s19 + $0x1c4] sm:$0xf0]  ;;  %1125 = vmatpush.bf16.msra.mxu0 %v1450_v30  ;;  %v1570_v47 = vor.u32 %v1708_v42, %v1569_v41  ;;  %v1497_v50 = vld [vmem:[%s2098_s19 + $0xb0] sm:$0xf]  ;;  %v1690_v52 = vld [vmem:[%s2098_s19 + $0xb4] sm:$0xf0]  ;;  %v1434_v57 = vor.u32 %v1674_v49, %v1433_v48 }
  0x77   : > { %1138 = vmatpush.bf16.msra.mxu1 %v1514_v34  ;;  %v1634_v51 = vor.u32 %v1724_v44, %v1633_v43  ;;  %v1561_v53 = vld [vmem:[%s2098_s19 + $0x130] sm:$0xf]  ;;  %v1706_v54 = vld [vmem:[%s2098_s19 + $0x134] sm:$0xf0]  ;;  %v1498_v58 = vor.u32 %v1690_v52, %v1497_v50  ;;  %v1425_v60 = vld [vmem:[%s2098_s19 + $0x20] sm:$0xf] }
  0x78   : > { %1151 = vmatpush.bf16.msra.mxu2 %v1578_v35  ;;  %v1625_v55 = vld [vmem:[%s2098_s19 + $0x1b0] sm:$0xf]  ;;  %v1722_v56 = vld [vmem:[%s2098_s19 + $0x1b4] sm:$0xf0]  ;;  %v1562_v59 = vor.u32 %v1706_v54, %v1561_v53  ;;  %v1672_v61 = vld [vmem:[%s2098_s19 + $0x24] sm:$0xf0] }
  0x79   : > { %1164 = vmatpush.bf16.msra.mxu3 %v1642_v39  ;;  %v1489_v62 = vld [vmem:[%s2098_s19 + $0xa0] sm:$0xf]  ;;  %v1626_v63 = vor.u32 %v1722_v56, %v1625_v55  ;;  %v1688_v0 = vld [vmem:[%s2098_s19 + $0xa4] sm:$0xf0]  ;;  %v1426_v5 = vor.u32 %v1672_v61, %v1425_v60  ;;  %v1417_v6 = vld [vmem:[%s2098_s19 + $0x10] sm:$0xf] }
  0x7a   : > { %1126 = vmatpush.bf16.msra.mxu0 %v1442_v45  ;;  %v1553_v1 = vld [vmem:[%s2098_s19 + $0x120] sm:$0xf]  ;;  %v1704_v2 = vld [vmem:[%s2098_s19 + $0x124] sm:$0xf0]  ;;  %v1670_v7 = vld [vmem:[%s2098_s19 + $0x14] sm:$0xf0]  ;;  %v1490_v8 = vor.u32 %v1688_v0, %v1489_v62 }
  0x7b   : > { %1139 = vmatpush.bf16.msra.mxu1 %v1506_v46  ;;  %v1617_v3 = vld [vmem:[%s2098_s19 + $0x1a0] sm:$0xf]  ;;  %v1720_v4 = vld [vmem:[%s2098_s19 + $0x1a4] sm:$0xf0]  ;;  %v1554_v9 = vor.u32 %v1704_v2, %v1553_v1  ;;  %v1481_v10 = vld [vmem:[%s2098_s19 + $0x90] sm:$0xf]  ;;  %v1418_v20 = vor.u32 %v1670_v7, %v1417_v6 }
  0x7c   : > { %1152 = vmatpush.bf16.msra.mxu2 %v1570_v47  ;;  %v1686_v11 = vld [vmem:[%s2098_s19 + $0x94] sm:$0xf0]  ;;  %v1545_v12 = vld [vmem:[%s2098_s19 + $0x110] sm:$0xf]  ;;  %v1618_v13 = vor.u32 %v1720_v4, %v1617_v3  ;;  %v1409_v17 = vld [vmem:[%s2098_s19] sm:$0xf] }
  0x7d   : > { %1165 = vmatpush.bf16.msra.mxu3 %v1634_v51  ;;  %v1702_v14 = vld [vmem:[%s2098_s19 + $0x114] sm:$0xf0]  ;;  %v1609_v15 = vld [vmem:[%s2098_s19 + $0x190] sm:$0xf]  ;;  %v1668_v18 = vld [vmem:[%s2098_s19 + $0x4] sm:$0xf0]  ;;  %v1482_v24 = vor.u32 %v1686_v11, %v1481_v10 }
  0x7e   : > { %1127 = vmatpush.bf16.msra.mxu0 %v1434_v57  ;;  %v1718_v16 = vld [vmem:[%s2098_s19 + $0x194] sm:$0xf0]  ;;  %v1473_v19 = vld [vmem:[%s2098_s19 + $0x80] sm:$0xf]  ;;  %v1684_v21 = vld [vmem:[%s2098_s19 + $0x84] sm:$0xf0]  ;;  %v1546_v25 = vor.u32 %v1702_v14, %v1545_v12  ;;  %v1410_v33 = vor.u32 %v1668_v18, %v1409_v17 }
  0x7f   : > { %1140 = vmatpush.bf16.msra.mxu1 %v1498_v58  ;;  %v1537_v22 = vld [vmem:[%s2098_s19 + $0x100] sm:$0xf]  ;;  %v1700_v23 = vld [vmem:[%s2098_s19 + $0x104] sm:$0xf0]  ;;  %v1681_v28 = vld [vmem:[%s2098_s19 + $0x74] sm:$0xf]  ;;  %v1610_v29 = vor.u32 %v1718_v16, %v1609_v15  ;;  %v1474_v37 = vor.u32 %v1684_v21, %v1473_v19 }
  0x80   : > { %1153 = vmatpush.bf16.msra.mxu2 %v1562_v59  ;;  %v1601_v26 = vld [vmem:[%s2098_s19 + $0x180] sm:$0xf]  ;;  %v1716_v27 = vld [vmem:[%s2098_s19 + $0x184] sm:$0xf0]  ;;  %v1467_v30 = vld [vmem:[%s2098_s19 + $0x78] sm:$0xf0]  ;;  %v1538_v38 = vor.u32 %v1700_v23, %v1537_v22 }
  0x81   : > { %1166 = vmatpush.bf16.msra.mxu3 %v1626_v63  ;;  %v1697_v31 = vld [vmem:[%s2098_s19 + $0xf4] sm:$0xf]  ;;  %v1531_v32 = vld [vmem:[%s2098_s19 + $0xf8] sm:$0xf0]  ;;  %v701_v41 = vld [vmem:[%s662_s10] sm:$0xf]  ;;  %v1602_v49 = vor.u32 %v1716_v27, %v1601_v26  ;;  %v1470_v50 = vor.u32 %v1681_v28, %v1467_v30 }
  0x82   : > { %1128 = vmatpush.bf16.msra.mxu0 %v1426_v5  ;;  %v1713_v34 = vld [vmem:[%s2098_s19 + $0x174] sm:$0xf]  ;;  %v1595_v35 = vld [vmem:[%s2098_s19 + $0x178] sm:$0xf0]  ;;  %v2183_v42 = vld [vmem:[%s667_s24] sm:$0xf]  ;;  %v1534_v53 = vor.u32 %v1697_v31, %v1531_v32 }
  0x83   : > { %1141 = vmatpush.bf16.msra.mxu1 %v1490_v8  ;;  %v696_v36 = vld [vmem:[%s2087_s13 + $0x8] sm:$0xff]  ;;  %v1729_v39 = vld [vmem:[%s2098_s19 + $0x1f4] sm:$0xf]  ;;  %v705_v45 = vperm.slane %v701_v41, 2  ;;  %v719_v46 = vperm.slane %v2183_v42, 2  ;;  %v706_v47 = vperm.slane %v701_v41, 3  ;;  %v1598_v54 = vor.u32 %v1713_v34, %v1595_v35 }
  0x84   : > { %1154 = vmatpush.bf16.msra.mxu2 %v1554_v9  ;;  %v699_v40 = vunpack.c.l.bf16 %v696_v36  ;;  %v700_v43 = vunpack.c.h.bf16 %v696_v36  ;;  %v1659_v44 = vld [vmem:[%s2098_s19 + $0x1f8] sm:$0xf0]  ;;  %v720_v48 = vperm.slane %v2183_v42, 3  ;;  %v1679_v51 = vld [vmem:[%s2098_s19 + $0x64] sm:$0xf]  ;;  %v695_v62 = vld [vmem:[%s2087_s13] sm:$0xff] }
  0x85   : > { %1167 = vmatpush.bf16.msra.mxu3 %v1618_v13  ;;  %v1459_v52 = vld [vmem:[%s2098_s19 + $0x68] sm:$0xf0]  ;;  %v1695_v55 = vld [vmem:[%s2098_s19 + $0xe4] sm:$0xf]  ;;  %v1662_v60 = vor.u32 %v1729_v39, %v1659_v44  ;;  %v703_v63 = vperm.slane %v701_v41, 0  ;;  %v717_v0 = vperm.slane %v2183_v42, 0  ;;  %v697_v5 = vunpack.c.l.bf16 %v695_v62 }
  0x86   : > { %1129 = vmatpush.bf16.msra.mxu0 %v1418_v20  ;;  %v1523_v56 = vld [vmem:[%s2098_s19 + $0xe8] sm:$0xf0]  ;;  %v1711_v57 = vld [vmem:[%s2098_s19 + $0x164] sm:$0xf]  ;;  %v713_v58 = vmul.f32 %v705_v45, %v699_v40  ;;  %v714_v59 = vmul.f32 %v706_v47, %v700_v43  ;;  %v698_v6 = vunpack.c.h.bf16 %v695_v62  ;;  %v1462_v7 = vor.u32 %v1679_v51, %v1459_v52  ;;  %v1677_v9 = vld [vmem:[%s2098_s19 + $0x54] sm:$0xf] }
  0x87   : > { %1142 = vmatpush.bf16.msra.mxu1 %v1482_v24  ;;  %v1587_v61 = vld [vmem:[%s2098_s19 + $0x168] sm:$0xf0]  ;;  %v1727_v1 = vld [vmem:[%s2098_s19 + $0x1e4] sm:$0xf]  ;;  %v1526_v8 = vor.u32 %v1695_v55, %v1523_v56  ;;  %v704_v10 = vperm.slane %v701_v41, 1  ;;  %v718_v11 = vperm.slane %v2183_v42, 1  ;;  %v711_v17 = vmul.f32 %v703_v63, %v697_v5 }
  0x88   : > { %1155 = vmatpush.bf16.msra.mxu2 %v1546_v25  ;;  %v1651_v2 = vld [vmem:[%s2098_s19 + $0x1e8] sm:$0xf0]  ;;  %v727_v3 = vadd.f32 %v719_v46, %v713_v58  ;;  %v728_v4 = vadd.f32 %v720_v48, %v714_v59  ;;  %v1590_v12 = vor.u32 %v1711_v57, %v1587_v61  ;;  %v1451_v15 = vld [vmem:[%s2098_s19 + $0x58] sm:$0xf0]  ;;  %v1693_v16 = vld [vmem:[%s2098_s19 + $0xd4] sm:$0xf] }
  0x89   : > { %1168 = vmatpush.bf16.msra.mxu3 %v1610_v29  ;;  %v1654_v18 = vor.u32 %v1727_v1, %v1651_v2  ;;  %v1515_v19 = vld [vmem:[%s2098_s19 + $0xd8] sm:$0xf0]  ;;  %v1709_v20 = vld [vmem:[%s2098_s19 + $0x154] sm:$0xf]  ;;  %v712_v22 = vmul.f32 %v704_v10, %v698_v6  ;;  %v725_v27 = vadd.f32 %v717_v0, %v711_v17  ;;  %v1454_v28 = vor.u32 %v1677_v9, %v1451_v15  ;;  %v1675_v30 = vld [vmem:[%s2098_s19 + $0x44] sm:$0xf] }
  0x8a   : > { %1130 = vmatpush.bf16.msra.mxu0 %v1410_v33  ;;  %v731_v13 = vmax.f32 %v727_v3, 0.0  ;;  %v732_v14 = vmax.f32 %v728_v4, 0.0  ;;  %v1579_v21 = vld [vmem:[%s2098_s19 + $0x158] sm:$0xf0]  ;;  %v1725_v25 = vld [vmem:[%s2098_s19 + $0x1d4] sm:$0xf]  ;;  %v1518_v32 = vor.u32 %v1693_v16, %v1515_v19 }
  0x8b   : > { %1143 = vmatpush.bf16.msra.mxu1 %v1474_v37  ;;  %v1643_v26 = vld [vmem:[%s2098_s19 + $0x1d8] sm:$0xf0]  ;;  %v726_v29 = vadd.f32 %v718_v11, %v712_v22  ;;  %v1443_v31 = vld [vmem:[%s2098_s19 + $0x48] sm:$0xf0]  ;;  %v1582_v33 = vor.u32 %v1709_v20, %v1579_v21  ;;  %v729_v34 = vmax.f32 %v725_v27, 0.0  ;;  %p1663_p13 = scmp.ne.s32.totalorder %s1826_s23, 1 }
  0x8c   : > { %1156 = vmatpush.bf16.msra.mxu2 %v1538_v38  ;;  %v2205_v23 = vpack.c.bf16 %v731_v13, %v731_v13  ;;  %v2207_v24 = vpack.c.bf16 %v732_v14, %v732_v14  ;;  %v1691_v35 = vld [vmem:[%s2098_s19 + $0xc4] sm:$0xf]  ;;  %v1507_v36 = vld [vmem:[%s2098_s19 + $0xc8] sm:$0xf0]  ;;  %v1646_v37 = vor.u32 %v1725_v25, %v1643_v26  ;;  %v1446_v45 = vor.u32 %v1675_v30, %v1443_v31  ;;  %v1673_v48 = vld [vmem:[%s2098_s19 + $0x34] sm:$0xf] }
  0x8d   : > { %1169 = vmatpush.bf16.msra.mxu3 %v1602_v49  ;;  %v730_v38 = vmax.f32 %v726_v29, 0.0  ;;  %v1707_v39 = vld [vmem:[%s2098_s19 + $0x144] sm:$0xf]  ;;  %v1571_v40 = vld [vmem:[%s2098_s19 + $0x148] sm:$0xf0]  ;;  %v2219_v41 = vpack.c.bf16 %v729_v34, %v729_v34  ;;  %v1510_v46 = vor.u32 %v1691_v35, %v1507_v36 }
  0x8e   : > { %1175 = vmatpush.bf16.msrb.mxu0 %v1470_v50  ;;  %v1723_v42 = vld [vmem:[%s2098_s19 + $0x1c4] sm:$0xf]  ;;  %v1635_v43 = vld [vmem:[%s2098_s19 + $0x1c8] sm:$0xf0]  ;;  %v1574_v47 = vor.u32 %v1707_v39, %v1571_v40  ;;  %v1435_v49 = vld [vmem:[%s2098_s19 + $0x38] sm:$0xf0] }
  0x8f   : > { %1188 = vmatpush.bf16.msrb.mxu1 %v1534_v53  ;;  %1157 = vmatmul.bf16.vlgmr.msra.gmra.mxu2 %v2205_v23  ;;  %v2223_v44 = vpack.c.bf16 %v730_v38, %v730_v38  ;;  %v1689_v50 = vld [vmem:[%s2098_s19 + $0xb4] sm:$0xf]  ;;  %v1638_v51 = vor.u32 %v1723_v42, %v1635_v43  ;;  %v1499_v52 = vld [vmem:[%s2098_s19 + $0xb8] sm:$0xf0]  ;;  %v1438_v57 = vor.u32 %v1673_v48, %v1435_v49  ;;  %v1427_v61 = vld [vmem:[%s2098_s19 + $0x28] sm:$0xf0] }
  0x90   : > { %1201 = vmatpush.bf16.msrb.mxu2 %v1598_v54  ;;  %1170 = vmatmul.bf16.vlgmr.msra.gmra.mxu3 %v2207_v24  ;;  %v1705_v53 = vld [vmem:[%s2098_s19 + $0x134] sm:$0xf]  ;;  %v1563_v54 = vld [vmem:[%s2098_s19 + $0x138] sm:$0xf0]  ;;  %v1502_v58 = vor.u32 %v1689_v50, %v1499_v52  ;;  %v1687_v62 = vld [vmem:[%s2098_s19 + $0xa4] sm:$0xf] }
  0x91   : > { %1214 = vmatpush.bf16.msrb.mxu3 %v1662_v60  ;;  %1131 = vmatmul.bf16.vlgmr.msra.gmra.mxu0 %v2219_v41  ;;  %v1721_v55 = vld [vmem:[%s2098_s19 + $0x1b4] sm:$0xf]  ;;  %v1627_v56 = vld [vmem:[%s2098_s19 + $0x1b8] sm:$0xf0]  ;;  %v1566_v59 = vor.u32 %v1705_v53, %v1563_v54  ;;  %v1671_v60 = vld [vmem:[%s2098_s19 + $0x24] sm:$0xf] }
  0x92   : > { %1176 = vmatpush.bf16.msrb.mxu0 %v1462_v7  ;;  %1144 = vmatmul.bf16.vlgmr.msra.gmra.mxu1 %v2223_v44  ;;  %v1630_v63 = vor.u32 %v1721_v55, %v1627_v56  ;;  %v1491_v0 = vld [vmem:[%s2098_s19 + $0xa8] sm:$0xf0]  ;;  %v1703_v1 = vld [vmem:[%s2098_s19 + $0x124] sm:$0xf]  ;;  %v1430_v5 = vor.u32 %v1671_v60, %v1427_v61  ;;  %v1419_v9 = vld [vmem:[%s2098_s19 + $0x18] sm:$0xf0] }
  0x93   : > { %1189 = vmatpush.bf16.msrb.mxu1 %v1526_v8  ;;  %v1555_v2 = vld [vmem:[%s2098_s19 + $0x128] sm:$0xf0]  ;;  %v1719_v3 = vld [vmem:[%s2098_s19 + $0x1a4] sm:$0xf]  ;;  %v1494_v6 = vor.u32 %v1687_v62, %v1491_v0  ;;  %v1669_v8 = vld [vmem:[%s2098_s19 + $0x14] sm:$0xf] }
  0x94   : > { %1202 = vmatpush.bf16.msrb.mxu2 %v1590_v12  ;;  %v1619_v4 = vld [vmem:[%s2098_s19 + $0x1a8] sm:$0xf0]  ;;  %v1558_v7 = vor.u32 %v1703_v1, %v1555_v2  ;;  %v1685_v10 = vld [vmem:[%s2098_s19 + $0x94] sm:$0xf]  ;;  %v1483_v12 = vld [vmem:[%s2098_s19 + $0x98] sm:$0xf0]  ;;  %v1422_v17 = vor.u32 %v1669_v8, %v1419_v9 }
  0x95   : > { %1215 = vmatpush.bf16.msrb.mxu3 %v1654_v18  ;;  %v1622_v11 = vor.u32 %v1719_v3, %v1619_v4  ;;  %v1701_v13 = vld [vmem:[%s2098_s19 + $0x114] sm:$0xf]  ;;  %v1547_v14 = vld [vmem:[%s2098_s19 + $0x118] sm:$0xf0]  ;;  %v1486_v18 = vor.u32 %v1685_v10, %v1483_v12  ;;  %v1667_v20 = vld [vmem:[%s2098_s19 + $0x4] sm:$0xf] }
  0x96   : > { %1177 = vmatpush.bf16.msrb.mxu0 %v1454_v28  ;;  %v1717_v15 = vld [vmem:[%s2098_s19 + $0x194] sm:$0xf]  ;;  %v1611_v16 = vld [vmem:[%s2098_s19 + $0x198] sm:$0xf0]  ;;  %v1550_v19 = vor.u32 %v1701_v13, %v1547_v14  ;;  %v1411_v21 = vld [vmem:[%s2098_s19 + $0x8] sm:$0xf0] }
  0x97   : > { %1190 = vmatpush.bf16.msrb.mxu1 %v1518_v32  ;;  %v1683_v22 = vld [vmem:[%s2098_s19 + $0x84] sm:$0xf]  ;;  %v1614_v25 = vor.u32 %v1717_v15, %v1611_v16  ;;  %v1475_v26 = vld [vmem:[%s2098_s19 + $0x88] sm:$0xf0]  ;;  %v1414_v31 = vor.u32 %v1667_v20, %v1411_v21  ;;  %v737_v42 = vld [vmem:[#allocation2] sm:$0xff] }
  0x98   : > { %1203 = vmatpush.bf16.msrb.mxu2 %v1582_v33  ;;  %v1699_v27 = vld [vmem:[%s2098_s19 + $0x104] sm:$0xf]  ;;  %v1539_v28 = vld [vmem:[%s2098_s19 + $0x108] sm:$0xf0]  ;;  %v1478_v32 = vor.u32 %v1683_v22, %v1475_v26  ;;  %v738_v53 = vld [vmem:[#allocation2 + $0x8] sm:$0xff] }
  0x99   : > { %1216 = vmatpush.bf16.msrb.mxu3 %v1646_v37  ;;  %v1715_v29 = vld [vmem:[%s2098_s19 + $0x184] sm:$0xf]  ;;  %v1603_v30 = vld [vmem:[%s2098_s19 + $0x188] sm:$0xf0]  ;;  %v1542_v33 = vor.u32 %v1699_v27, %v1539_v28 }
  0x9a   : > { %1178 = vmatpush.bf16.msrb.mxu0 %v1446_v45  ;;  %v1606_v34 = vor.u32 %v1715_v29, %v1603_v30 }
  0x9b   : > { %1191 = vmatpush.bf16.msrb.mxu1 %v1510_v46 }
  0x9c   : > { %1204 = vmatpush.bf16.msrb.mxu2 %v1574_v47 }
  0x9d   : > { %1217 = vmatpush.bf16.msrb.mxu3 %v1638_v51 }
  0x9e   : > { %1179 = vmatpush.bf16.msrb.mxu0 %v1438_v57 }
  0x9f   : > { %1192 = vmatpush.bf16.msrb.mxu1 %v1502_v58 }
  0xa0   : > { %1205 = vmatpush.bf16.msrb.mxu2 %v1566_v59 }
  0xa1   : > { %1218 = vmatpush.bf16.msrb.mxu3 %v1630_v63 }
  0xa2   : > { %1180 = vmatpush.bf16.msrb.mxu0 %v1430_v5 }
  0xa3   : > { %1193 = vmatpush.bf16.msrb.mxu1 %v1494_v6 }
  0xa4   : > { %1206 = vmatpush.bf16.msrb.mxu2 %v1558_v7 }
  0xa5   : > { %1219 = vmatpush.bf16.msrb.mxu3 %v1622_v11 }
  0xa6   : > { %1181 = vmatpush.bf16.msrb.mxu0 %v1422_v17 }
  0xa7   : > { %1194 = vmatpush.bf16.msrb.mxu1 %v1486_v18 }
  0xa8   : > { %1207 = vmatpush.bf16.msrb.mxu2 %v1550_v19 }
  0xa9   : > { %1220 = vmatpush.bf16.msrb.mxu3 %v1614_v25 }
  0xaa   : > { %1182 = vmatpush.bf16.msrb.mxu0 %v1414_v31 }
  0xab   : > { %1195 = vmatpush.bf16.msrb.mxu1 %v1478_v32 }
  0xac   : > { %1208 = vmatpush.bf16.msrb.mxu2 %v1542_v33 }
  0xad   : > { %1221 = vmatpush.bf16.msrb.mxu3 %v1606_v34  ;;  %1183 = vmatmul.bf16.vlgmr.msrb.gmra.mxu0 %v2219_v41 }
  0xae   : > { %1196 = vmatmul.bf16.vlgmr.msrb.gmra.mxu1 %v2223_v44 }
  0xaf   : > { %1209 = vmatmul.bf16.vlgmr.msrb.gmra.mxu2 %v2205_v23 }
  0xb0   : > { %1222 = vmatmul.bf16.vlgmr.msrb.gmra.mxu3 %v2207_v24 }
 0x10e   : > { %v1132_v35 = vpop.f32.mrf.mxu0 }
 0x10f   : > { %v1145_v36 = vpop.f32.mrf.mxu1 }
 0x110   : > { %v1146_v37 = vadd.f32 %v1145_v36, %v1132_v35 }
 0x112   : > { %v1158_v38 = vpop.f32.mrf.mxu2 }
 0x113   : > { %v1171_v39 = vpop.f32.mrf.mxu3  ;;  %v1159_v40 = vadd.f32 %v1158_v38, %v1146_v37 }
 0x115   : > { %v1172_v43 = vadd.f32 %v1171_v39, %v1159_v40 }
 0x116   : > { %v1134_v46 = vpop.f32.mrf.mxu0 }
 0x117   : > { %v1227_v45 = vadd.f32 %v1172_v43, %v737_v42  ;;  %v1147_v47 = vpop.f32.mrf.mxu1 }
 0x119   : > { %1229 = vst [vmem:[#allocation2] sm:$0xff] %v1227_v45 }
 0x11a   : > { %v1160_v48 = vpop.f32.mrf.mxu2 }
 0x11b   : > { %v1173_v41 = vpop.f32.mrf.mxu3 }
 0x12a   : > { %v1184_v49 = vpop.f32.mrf.mxu0 }
 0x12b   : > { %v1197_v44 = vpop.f32.mrf.mxu1 }
 0x12c   : > { %v1198_v50 = vadd.f32 %v1197_v44, %v1184_v49 }
 0x132   : > { %v1210_v23 = vpop.f32.mrf.mxu2  ;;  %v1186_v52 = vpop.f32.mrf.mxu0 }
 0x133   : > { %v1211_v51 = vadd.f32 %v1210_v23, %v1198_v50  ;;  %v1223_v24 = vpop.f32.mrf.mxu3  ;;  %v1199_v54 = vpop.f32.mrf.mxu1 }
 0x135   : > { %v1224_v55 = vadd.f32 %v1223_v24, %v1211_v51 }
 0x137   : > { %v1228_v56 = vadd.f32 %v1224_v55, %v738_v53  ;;  %1234 = sbr.rel (%p1663_p13) target bundleno = 324 (0x144), region = 90 }
 0x139   : > { %1230 = vst [vmem:[#allocation2 + $0x8] sm:$0xff] %v1228_v56 }
 0x13a   : > { %v1212_v57 = vpop.f32.mrf.mxu2 }
 0x13b   : > { %v1225_v58 = vpop.f32.mrf.mxu3 }
 0x13c   : > { %v1235_v59 = vld [vmem:[#allocation2] sm:$0xff] }
 0x140   : > { %v1236_v60 = vld [vmem:[#allocation2 + $0x8] sm:$0xff] }
 0x141   : > { %v1237_v61 = vpack.c.bf16 %v1236_v60, %v1235_v59 }
 0x143   : > { %1238 = vst [vmem:[%s2096_s18] sm:$0xff] %v1237_v61 }
 0x144 PF: > { %s16_s27 = sadd.s32 1, %s1842_s27   ;;  %s2293_s21 = smov %s1822_s22 }
 0x145   : > { %p13_p0 = scmp.ge.s32.totalorder %s16_s27, 6   ;;  %s2294_s22 = smov %s1931_s8 }
 0x146   : > { %s2295_s23 = smov %s1834_s25  ;;  %s2296_s24 = smov %s1838_s26 }
 0x147   : > { %s2297_s25 = smov %s2300_s4  ;;  %s2298_s26 = smov %s2304_s5 }
 0x148   :  { %15 = sbr.rel (!%p13_p0) target bundleno = 4 (0x4), region = 140 }

// kernel: densenet121_forward.217
= control target key start
LH: loop header
LB: loop body
LE: loop exit
PB: predicated region body
PF: predicated region fallthrough
CT: control target
= control target key end

     0   :  { %s96_s0 = inlined_call_operand.vmem [shape: bf16[4,8,512], index: 0, kind: input, shape index: {}]   ;;  %s97_s1 = inlined_call_operand.vmem [shape: bf16[8,512], index: 1, kind: output, shape index: {}]  }
   0x1   :  { %v8_v0 = vld [vmem:[%s96_s0] sm:$0xff]  ;;  %v10_v1 = vld [vmem:[%s96_s0 + $0x10] sm:$0xff]  ;;  %v9_v8 = vld [vmem:[%s96_s0 + $0x8] sm:$0xff] }
   0x2   :  { %v12_v2 = vld [vmem:[%s96_s0 + $0x20] sm:$0xff]  ;;  %v14_v3 = vld [vmem:[%s96_s0 + $0x30] sm:$0xff]  ;;  %v16_v4 = vunpack.c.l.bf16 %v8_v0  ;;  %v17_v5 = vunpack.c.h.bf16 %v8_v0  ;;  %v20_v6 = vunpack.c.l.bf16 %v10_v1  ;;  %v21_v7 = vunpack.c.h.bf16 %v10_v1  ;;  %v11_v9 = vld [vmem:[%s96_s0 + $0x18] sm:$0xff] }
   0x3   :  { %v24_v10 = vunpack.c.l.bf16 %v12_v2  ;;  %v25_v11 = vunpack.c.h.bf16 %v12_v2  ;;  %v28_v12 = vunpack.c.l.bf16 %v14_v3  ;;  %v29_v13 = vunpack.c.h.bf16 %v14_v3  ;;  %v13_v14 = vld [vmem:[%s96_s0 + $0x28] sm:$0xff]  ;;  %v15_v17 = vld [vmem:[%s96_s0 + $0x38] sm:$0xff] }
   0x4   :  { %v32_v15 = vadd.f32 %v20_v6, %v16_v4  ;;  %v35_v16 = vadd.f32 %v21_v7, %v17_v5  ;;  %v18_v18 = vunpack.c.l.bf16 %v9_v8  ;;  %v19_v19 = vunpack.c.h.bf16 %v9_v8 }
   0x5   :  { %v22_v20 = vunpack.c.l.bf16 %v11_v9  ;;  %v23_v21 = vunpack.c.h.bf16 %v11_v9  ;;  %v26_v22 = vunpack.c.l.bf16 %v13_v14  ;;  %v27_v23 = vunpack.c.h.bf16 %v13_v14 }
   0x6   :  { %v33_v24 = vadd.f32 %v32_v15, %v24_v10  ;;  %v36_v25 = vadd.f32 %v35_v16, %v25_v11  ;;  %v30_v26 = vunpack.c.l.bf16 %v15_v17  ;;  %v31_v27 = vunpack.c.h.bf16 %v15_v17 }
   0x7   :  { %v38_v28 = vadd.f32 %v22_v20, %v18_v18  ;;  %v41_v29 = vadd.f32 %v23_v21, %v19_v19 }
   0x8   :  { %v34_v30 = vadd.f32 %v33_v24, %v28_v12  ;;  %v37_v31 = vadd.f32 %v36_v25, %v29_v13 }
   0x9   :  { %v39_v32 = vadd.f32 %v38_v28, %v26_v22  ;;  %v42_v33 = vadd.f32 %v41_v29, %v27_v23 }
   0xa   :  { %v44_v34 = vmul.f32 0.25, %v34_v30  ;;  %v45_v35 = vmul.f32 0.25, %v37_v31 }
   0xb   :  { %v40_v36 = vadd.f32 %v39_v32, %v30_v26  ;;  %v43_v37 = vadd.f32 %v42_v33, %v31_v27 }
   0xc   :  { %v48_v38 = vpack.c.bf16 %v45_v35, %v44_v34 }
   0xd   :  { %v46_v39 = vmul.f32 0.25, %v40_v36  ;;  %v47_v40 = vmul.f32 0.25, %v43_v37 }
   0xe   :  { %50 = vst [vmem:[%s97_s1] sm:$0xff] %v48_v38 }
   0xf   :  { %v49_v41 = vpack.c.bf16 %v47_v40, %v46_v39 }
  0x11   :  { %51 = vst [vmem:[%s97_s1 + $0x8] sm:$0xff] %v49_v41 }

// kernel: densenet121_forward.250
= control target key start
LH: loop header
LB: loop body
LE: loop exit
PB: predicated region body
PF: predicated region fallthrough
CT: control target
= control target key end

     0   :  { %s393_s12 = smov 0   ;;  %s468_s0 = inlined_call_operand.vmem [shape: bf16[2,1,1024], index: 0, kind: input, shape index: {}]   ;;  %s469_s1 = inlined_call_operand.vmem [shape: f32[1,1024], index: 1, kind: input, shape index: {}]   ;;  %s470_s2 = inlined_call_operand.vmem [shape: f32[1,1024], index: 2, kind: input, shape index: {}]   ;;  %s471_s3 = inlined_call_operand.vmem [shape: bf16[2,1,1024], index: 3, kind: output, shape index: {}]  }
   0x1 LB: > { %s344_s13 = sadd.s32 4294967295, %s369_s12   ;;  %p348_p0 = scmp.ge.s32.totalorder %s369_s12, 1  ;;  %s369_s12 = sphi %s393_s12, %s13_s12  }
   0x2   : > { %p136_p1 = scmp.lt.s32.totalorder %s369_s12, 3 }
   0x4   : > { %p137_p2 = pnand %p348_p0, %p136_p1 }
   0x5   : > { %p158_p3 = scmp.lt.s32.totalorder (!%p137_p2), %s344_s13, 1 }
   0x6   : > { %140 = sbr.rel (%p137_p2) target bundleno = 36 (0x24), region = 32 }
   0xb   : > { %v371_v0 = vmov 857870592   ;;  %v372_v2 = vmov 2003195204   ;;  %vm472_vm0 = vcmask 1040384   ;;  %s487_s13 = smov (!%p158_p3, %s344_s13), 1 }
   0xc   : > { %v172_v1 = vunpack.c.l.s4 %v371_v0  ;;  %v176_v3 = vunpack.c.l.s4 %v372_v2  ;;  %v169_v4 = vld [vmem:[%s469_s1] sm:$0xff]  ;;  %vm473_vm1 = vcmask 1042434   ;;  %vm258_vm2 = vsmask.f32 256  ;;  %s349_s18 = sshll.u32 %s487_s13, 3 }
   0xd   : > { %v183_v7 = vld [vmem:[%s470_s2] sm:$0xff]  ;;  %vm411_vm3 = vmand %vm472_vm0, %vm258_vm2  ;;  %vm260_vm4 = vcmask 1041409   ;;  %vm261_vm5 = vsmask.f32 1280  ;;  %vm265_vm6 = vsmask.f32 2304  ;;  %s161_s21 = scalar_lea.vmem %s468_s0, %s349_s18  ;;  %s165_s24 = scalar_lea.vmem %s471_s3, %s349_s18 }
   0xe   : > { %v173_v5 = vunpack.c.0.s8 %v172_v1  ;;  %v177_v6 = vunpack.c.0.s8 %v176_v3  ;;  %vm262_vm7 = vmand %vm260_vm4, %vm261_vm5  ;;  %v166_v11 = vld [vmem:[%s161_s21] sm:$0xff]  ;;  %vm268_vm9 = vcmask 1043459   ;;  %vm269_vm10 = vsmask.f32 3328 }
   0xf   : > { %vm263_vm8 = vmor %vm262_vm7, %vm411_vm3  ;;  %v167_v12 = vunpack.c.l.bf16 %v166_v11  ;;  %v168_v13 = vunpack.c.h.bf16 %v166_v11  ;;  %vm244_vm12 = vcmask 1044484   ;;  %vm273_vm14 = vsmask.f32 4352  ;;  %v288_v50 = vld [vmem:[%s165_s24] sm:$0xff] }
  0x10   : > { %v174_v9 = vperm.slane %v169_v4, %v173_v5  ;;  %v178_v10 = vperm.slane %v169_v4, %v177_v6  ;;  %v188_v14 = vperm.slane %v183_v7, %v173_v5  ;;  %v192_v15 = vperm.slane %v183_v7, %v177_v6  ;;  %vm266_vm11 = vmand %vm473_vm1, %vm265_vm6 }
  0x11   : > { %vm267_vm13 = vmor %vm266_vm11, %vm263_vm8  ;;  %vm276_vm4 = vcmask 1045509   ;;  %vm277_vm5 = vsmask.f32 5376  ;;  %vm248_vm7 = vcmask 1046534   ;;  %vm281_vm1 = vsmask.f32 6400 }
  0x12   : > { %v181_v16 = vmul.f32 %v174_v9, %v167_v12  ;;  %v182_v17 = vmul.f32 %v178_v10, %v168_v13  ;;  %vm270_vm15 = vmand %vm268_vm9, %vm269_vm10  ;;  %vm284_vm9 = vcmask 1047559   ;;  %vm285_vm10 = vsmask.f32 7424 }
  0x13   : > { %vm271_vm2 = vmor %vm270_vm15, %vm267_vm13  ;;  %vm242_vm13 = vcmask 1041408  }
  0x14   : > { %v195_v18 = vadd.f32 %v188_v14, %v181_v16  ;;  %v196_v19 = vadd.f32 %v192_v15, %v182_v17  ;;  %vm274_vm3 = vmand %vm244_vm12, %vm273_vm14 }
  0x15   : > { %vm424_vm0 = vmor %vm274_vm3, %vm271_vm2  ;;  %vm485_vm2 = vcmask 1042434  }
  0x16   : > { %v197_v21 = vmax.f32 %v195_v18, 0.0  ;;  %v198_v22 = vmax.f32 %v196_v19, 0.0  ;;  %vm428_vm6 = vmand %vm276_vm4, %vm277_vm5  ;;  %vm254_vm4 = vcmask 1043456  }
  0x17   : > { %vm279_vm8 = vmor %vm428_vm6, %vm424_vm0  ;;  %vm484_vm0 = vcmask 1040384  }
  0x18   : > { %v203_v24 = vperm.slane %v197_v21, 0  ;;  %v204_v25 = vperm.slane %v197_v21, 2  ;;  %v205_v26 = vperm.slane %v197_v21, 4  ;;  %v206_v27 = vperm.slane %v197_v21, 6  ;;  %vm282_vm11 = vmand %vm248_vm7, %vm281_vm1 }
  0x19   : > { %v207_v28 = vperm.slane %v198_v22, 0  ;;  %v208_v29 = vperm.slane %v198_v22, 2  ;;  %v209_v30 = vperm.slane %v198_v22, 4  ;;  %v210_v31 = vperm.slane %v198_v22, 6  ;;  %vm442_vm14 = vmor %vm282_vm11, %vm279_vm8 }
  0x1a   : > { %v219_v32 = vpack.c.bf16 %v204_v25, %v203_v24  ;;  %v220_v33 = vpack.c.bf16 %v206_v27, %v205_v26  ;;  %vm252_vm1 = vcmask 1045508   ;;  %vm453_vm15 = vmand %vm284_vm9, %vm285_vm10 }
  0x1b   : > { %v221_v34 = vpack.c.bf16 %v208_v29, %v207_v28  ;;  %v222_v35 = vpack.c.bf16 %v210_v31, %v209_v30  ;;  %vm287_vm5 = vmor %vm453_vm15, %vm442_vm14 }
  0x1c   : > { %v227_v37 = vrot.slane %v219_v32, 3  ;;  %v228_v38 = vrot.slane %v220_v33, 6  ;;  %v229_v39 = vrot.slane %v220_v33, 1 }
  0x1d   : > { %v230_v41 = vrot.slane %v221_v34, 4  ;;  %v231_v42 = vrot.slane %v221_v34, 7  ;;  %v232_v43 = vrot.slane %v222_v35, 2  ;;  %v233_v44 = vrot.slane %v222_v35, 5 }
  0x1e   : > { %v237_v45 = vsel %vm484_vm0, %v219_v32, %v227_v37  ;;  %v241_v46 = vsel %vm485_vm2, %v228_v38, %v229_v39 }
  0x1f   : > { %v243_v47 = vsel %vm242_vm13, %v237_v45, %v241_v46  ;;  %v247_v48 = vsel %vm244_vm12, %v230_v41, %v231_v42  ;;  %v251_v49 = vsel %vm248_vm7, %v232_v43, %v233_v44 }
  0x20   : > { %v253_v51 = vsel %vm252_vm1, %v247_v48, %v251_v49 }
  0x21   : > { %v255_v52 = vsel %vm254_vm4, %v243_v47, %v253_v51 }
  0x22   : > { %v289_v53 = vsel %vm287_vm5, %v255_v52, %v288_v50 }
  0x23   : > { %290 = vst [vmem:[%s165_s24] sm:$0xff] %v289_v53 }
  0x24 PF: > { %s13_s12 = sadd.s32 1, %s369_s12  }
  0x25   : > { %p10_p4 = scmp.ge.s32.totalorder %s13_s12, 4  }
  0x27   :  { %12 = sbr.rel (!%p10_p4) target bundleno = 1 (0x1), region = 62 }

// kernel: densenet121_forward.251
= control target key start
LH: loop header
LB: loop body
LE: loop exit
PB: predicated region body
PF: predicated region fallthrough
CT: control target
= control target key end

     0   :  { %s1158_s21 = smov 0   ;;  %s1160_s22 = smov 0   ;;  %s1241_s0 = inlined_call_operand.vmem [shape: bf16[8,1024], index: 0, kind: input, shape index: {}]   ;;  %s1242_s1 = inlined_call_operand.vmem [shape: bf16[1024,128], index: 1, kind: input, shape index: {}]   ;;  %s1243_s2 = inlined_call_operand.vmem [shape: f32[1,1024], index: 2, kind: input, shape index: {}, may-alias: {2,3}]   ;;  %s1244_s3 = inlined_call_operand.vmem [shape: f32[1,1024], index: 3, kind: input, shape index: {}, may-alias: {2,3}]   ;;  %s1245_s4 = inlined_call_operand.vmem [shape: f32[1,128], index: 4, kind: input, shape index: {}]   ;;  %s1246_s5 = inlined_call_operand.vmem [shape: f32[1,128], index: 5, kind: input, shape index: {}]   ;;  %s1247_s6 = inlined_call_operand.vmem [shape: f32[8,128], index: 6, kind: output, shape index: {}]  }
   0x1   :  { %s1162_s23 = smov 0  }
   0x2 LB: > { %s28_s2 = sadd.s32 1, %s1116_s22  ;;  %p898_p0 = scmp.ge.s32.totalorder %s1120_s23, 1  ;;  %s1120_s23 = sphi %s1162_s23, %s16_s23   ;;  %s1116_s22 = sphi %s1160_s22, %s1249_s22   ;;  %s1112_s21 = sphi %s1158_s21, %s1248_s21  }
   0x3   : > { %p29_p1 = scmp.ge.s32.totalorder %s28_s2, 2  ;;  %p292_p2 = scmp.lt.s32.totalorder %s1120_s23, 3 }
   0x5   : > { %s1251_s2 = smov (%p29_p1, %s28_s2), 0  ;;  %p293_p3 = pnand %p898_p0, %p292_p2 }
   0x6   : > { %s899_s3 = sshll.u32 (!%p293_p3), %s1112_s21, 2  ;;  %s901_s4 = sshll.u32 (!%p293_p3), %s1112_s21, 6 }
   0x7   : > { %296 = sbr.rel (%p293_p3) target bundleno = 240 (0xf0), region = 44  ;;  %p353_p4 = scmp.lt.s32.totalorder (!%p293_p3), %s899_s3, 7 }
   0x8   : > { %p361_p5 = scmp.lt.s32.totalorder (!%p293_p3), %s901_s4, 127  ;;  %p903_p6 = scmp.ne.s32.totalorder (!%p293_p3), %s1112_s21, 0 }
   0xc   : > { %s1253_s3 = smov (!%p353_p4, %s899_s3), 7  ;;  %s1255_s4 = smov (!%p361_p5, %s901_s4), 127 }
   0xd   : > { %s900_s24 = sshll.u32 %s1253_s3, 2  ;;  %s902_s28 = sshll.u32 %s1255_s4, 2 }
   0xe   : > { %s1183_s27 = scalar_lea.vmem %s1241_s0, %s900_s24  ;;  %s1188_s7 = scalar_lea.vmem %s1242_s1, %s902_s28 }
   0xf   : > { %395 = sbr.rel (%p903_p6) target bundleno = 22 (0x16), region = 48 }
  0x14   : > { %v1122_v0 = vmov 0.0  }
  0x15   : > { %396 = vst [vmem:[#allocation2] sm:$0xff] %v1122_v0 }
  0x16 PF: > { %v1043_v1 = vld [vmem:[%s1188_s7 + $0x38] sm:$0xff]  ;;  %v1042_v5 = vld [vmem:[%s1188_s7 + $0x30] sm:$0xff]  ;;  %v1041_v9 = vld [vmem:[%s1188_s7 + $0x28] sm:$0xff]  ;;  %p1032_p7 = scmp.ne.s32.totalorder %s1112_s21, 1 }
  0x17   : > { %v1051_v2 = vld [vmem:[%s1188_s7 + $0x78] sm:$0xff]  ;;  %670 = vmatpush.bf16.msra.mxu0 %v1043_v1  ;;  %v1050_v6 = vld [vmem:[%s1188_s7 + $0x70] sm:$0xff]  ;;  %v1049_v10 = vld [vmem:[%s1188_s7 + $0x68] sm:$0xff] }
  0x18   : > { %v1059_v3 = vld [vmem:[%s1188_s7 + $0xb8] sm:$0xff]  ;;  %683 = vmatpush.bf16.msra.mxu1 %v1051_v2  ;;  %v1058_v7 = vld [vmem:[%s1188_s7 + $0xb0] sm:$0xff]  ;;  %v1057_v11 = vld [vmem:[%s1188_s7 + $0xa8] sm:$0xff] }
  0x19   : > { %v1067_v4 = vld [vmem:[%s1188_s7 + $0xf8] sm:$0xff]  ;;  %696 = vmatpush.bf16.msra.mxu2 %v1059_v3  ;;  %v1066_v8 = vld [vmem:[%s1188_s7 + $0xf0] sm:$0xff]  ;;  %v1065_v12 = vld [vmem:[%s1188_s7 + $0xe8] sm:$0xff] }
  0x1a   : > { %709 = vmatpush.bf16.msra.mxu3 %v1067_v4  ;;  %v1040_v13 = vld [vmem:[%s1188_s7 + $0x20] sm:$0xff]  ;;  %v1039_v17 = vld [vmem:[%s1188_s7 + $0x18] sm:$0xff]  ;;  %v1038_v21 = vld [vmem:[%s1188_s7 + $0x10] sm:$0xff] }
  0x1b   : > { %671 = vmatpush.bf16.msra.mxu0 %v1042_v5  ;;  %v1048_v14 = vld [vmem:[%s1188_s7 + $0x60] sm:$0xff]  ;;  %v1047_v18 = vld [vmem:[%s1188_s7 + $0x58] sm:$0xff]  ;;  %v1046_v22 = vld [vmem:[%s1188_s7 + $0x50] sm:$0xff] }
  0x1c   : > { %684 = vmatpush.bf16.msra.mxu1 %v1050_v6  ;;  %v1056_v15 = vld [vmem:[%s1188_s7 + $0xa0] sm:$0xff]  ;;  %v1055_v19 = vld [vmem:[%s1188_s7 + $0x98] sm:$0xff]  ;;  %v1054_v23 = vld [vmem:[%s1188_s7 + $0x90] sm:$0xff] }
  0x1d   : > { %697 = vmatpush.bf16.msra.mxu2 %v1058_v7  ;;  %v1064_v16 = vld [vmem:[%s1188_s7 + $0xe0] sm:$0xff]  ;;  %v1063_v20 = vld [vmem:[%s1188_s7 + $0xd8] sm:$0xff]  ;;  %v1062_v24 = vld [vmem:[%s1188_s7 + $0xd0] sm:$0xff] }
  0x1e   : > { %710 = vmatpush.bf16.msra.mxu3 %v1066_v8  ;;  %v1037_v25 = vld [vmem:[%s1188_s7 + $0x8] sm:$0xff]  ;;  %v397_v27 = vld [vmem:[%s1183_s27] sm:$0xff] }
  0x1f   : > { %672 = vmatpush.bf16.msra.mxu0 %v1041_v9  ;;  %v1045_v26 = vld [vmem:[%s1188_s7 + $0x48] sm:$0xff]  ;;  %v466_v31 = vunpack.c.l.b16 %v397_v27  ;;  %v467_v32 = vunpack.c.h.b16 %v397_v27  ;;  %v1036_v33 = vld [vmem:[%s1188_s7] sm:$0xff] }
  0x20   : > { %685 = vmatpush.bf16.msra.mxu1 %v1049_v10  ;;  %v1053_v28 = vld [vmem:[%s1188_s7 + $0x88] sm:$0xff]  ;;  %v1044_v34 = vld [vmem:[%s1188_s7 + $0x40] sm:$0xff] }
  0x21   : > { %698 = vmatpush.bf16.msra.mxu2 %v1057_v11  ;;  %v1061_v29 = vld [vmem:[%s1188_s7 + $0xc8] sm:$0xff]  ;;  %v1052_v37 = vld [vmem:[%s1188_s7 + $0x80] sm:$0xff]  ;;  %v470_v39 = vpack.c.b16 %v466_v31, %v466_v31  ;;  %v471_v40 = vpack.c.b16 %v467_v32, %v467_v32 }
  0x22   : > { %711 = vmatpush.bf16.msra.mxu3 %v1065_v12  ;;  %v398_v30 = vld [vmem:[%s1183_s27 + $0x8] sm:$0xff]  ;;  %v1060_v38 = vld [vmem:[%s1188_s7 + $0xc0] sm:$0xff] }
  0x23   : > { %673 = vmatpush.bf16.msra.mxu0 %v1040_v13  ;;  %v468_v35 = vunpack.c.l.b16 %v398_v30  ;;  %v469_v36 = vunpack.c.h.b16 %v398_v30  ;;  %v399_v51 = vld [vmem:[#allocation2] sm:$0xff] }
  0x24   : > { %686 = vmatpush.bf16.msra.mxu1 %v1048_v14 }
  0x25   : > { %699 = vmatpush.bf16.msra.mxu2 %v1056_v15  ;;  %v472_v41 = vpack.c.b16 %v468_v35, %v468_v35  ;;  %v473_v42 = vpack.c.b16 %v469_v36, %v469_v36 }
  0x26   : > { %712 = vmatpush.bf16.msra.mxu3 %v1064_v16 }
  0x27   : > { %674 = vmatpush.bf16.msra.mxu0 %v1039_v17 }
  0x28   : > { %687 = vmatpush.bf16.msra.mxu1 %v1047_v18 }
  0x29   : > { %700 = vmatpush.bf16.msra.mxu2 %v1055_v19 }
  0x2a   : > { %713 = vmatpush.bf16.msra.mxu3 %v1063_v20 }
  0x2b   : > { %675 = vmatpush.bf16.msra.mxu0 %v1038_v21 }
  0x2c   : > { %688 = vmatpush.bf16.msra.mxu1 %v1046_v22 }
  0x2d   : > { %701 = vmatpush.bf16.msra.mxu2 %v1054_v23 }
  0x2e   : > { %714 = vmatpush.bf16.msra.mxu3 %v1062_v24 }
  0x2f   : > { %676 = vmatpush.bf16.msra.mxu0 %v1037_v25 }
  0x30   : > { %689 = vmatpush.bf16.msra.mxu1 %v1045_v26 }
  0x31   : > { %702 = vmatpush.bf16.msra.mxu2 %v1053_v28 }
  0x32   : > { %715 = vmatpush.bf16.msra.mxu3 %v1061_v29 }
  0x33   : > { %677 = vmatpush.bf16.msra.mxu0 %v1036_v33 }
  0x34   : > { %690 = vmatpush.bf16.msra.mxu1 %v1044_v34 }
  0x35   : > { %703 = vmatpush.bf16.msra.mxu2 %v1052_v37 }
  0x36   : > { %716 = vmatpush.bf16.msra.mxu3 %v1060_v38  ;;  %678 = vmatmul.bf16.vlgmr.msra.gmra.mxu0 %v470_v39 }
  0x37   : > { %691 = vmatmul.bf16.vlgmr.msra.gmra.mxu1 %v471_v40 }
  0x38   : > { %704 = vmatmul.bf16.vlgmr.msra.gmra.mxu2 %v472_v41 }
  0x39   : > { %717 = vmatmul.bf16.vlgmr.msra.gmra.mxu3 %v473_v42 }
  0xb3   : > { %v679_v43 = vpop.f32.mrf.mxu0 }
  0xb4   : > { %v692_v44 = vpop.f32.mrf.mxu1 }
  0xb5   : > { %v693_v45 = vadd.f32 %v692_v44, %v679_v43 }
  0xbb   : > { %v705_v46 = vpop.f32.mrf.mxu2  ;;  %v681_v49 = vpop.f32.mrf.mxu0 }
  0xbc   : > { %v718_v47 = vpop.f32.mrf.mxu3  ;;  %v706_v48 = vadd.f32 %v705_v46, %v693_v45  ;;  %v694_v50 = vpop.f32.mrf.mxu1 }
  0xbe   : > { %v719_v52 = vadd.f32 %v718_v47, %v706_v48 }
  0xc0   : > { %v722_v53 = vadd.f32 %v719_v52, %v399_v51  ;;  %727 = sbr.rel (%p1032_p7) target bundleno = 240 (0xf0), region = 52 }
  0xc2   : > { %723 = vst [vmem:[#allocation2] sm:$0xff] %v722_v53 }
  0xc3   : > { %v707_v54 = vpop.f32.mrf.mxu2 }
  0xc4   : > { %v720_v55 = vpop.f32.mrf.mxu3 }
  0xc5   : > { %v1093_v57 = vld [vmem:[%s1246_s5] ss:$0 sm:$0xff] }
  0xc9   : > { %v728_v56 = vld [vmem:[#allocation2] sm:$0xff] }
  0xca   : > { %v733_v58 = vadd.f32 %v1093_v57, %v728_v56 }
  0xcc   : > { %v734_v59 = vand.u32 2147483647, %v733_v58  ;;  %vm738_vm4 = vcmp.ge.f32.partialorder %v733_v58, 0.0 }
  0xce   : > { %v735_v60 = vsub.f32 0.0, %v734_v59 }
  0xd0   : > { %v736_v61 = vmul.f32 1.442695, %v735_v60 }
  0xd2   : > { %1094 = vpow2.f32 %v736_v61 }
  0xd8   : > { %v1095_v62 = vpop.eup %1094 }
  0xd9   : > { %v739_v63 = vadd.f32 1.0, %v1095_v62 }
  0xdb   : > { %1096 = vrcp.f32 %v739_v63  ;;  %v751_v2 = vand.u32 2147483648, %v739_v63  ;;  %vm745_vm0 = vweird.f32 %v739_v63  ;;  %v749_v4 = vand.u32 2147483647, %v739_v63 }
  0xdd   : > { %v752_v6 = vor.u32 1.1754944e-38, %v751_v2  ;;  %vm750_vm3 = vcmp.eq.f32.partialorder %v749_v4, 8.507059e+37 }
  0xe1   : > { %v1097_v0 = vpop.eup %1096 }
  0xe2   : > { %v741_v1 = vmul.f32 %v1097_v0, %v739_v63  ;;  %vm746_vm1 = vweird.f32 %v1097_v0 }
  0xe3   : > { %vm747_vm2 = vmor %vm745_vm0, %vm746_vm1 }
  0xe4   : > { %v742_v3 = vsub.f32 1.0, %v741_v1 }
  0xe6   : > { %v743_v5 = vmul.f32 %v1097_v0, %v742_v3 }
  0xe8   : > { %v744_v7 = vadd.f32 %v1097_v0, %v743_v5 }
  0xea   : > { %v748_v8 = vsel %vm747_vm2, %v1097_v0, %v744_v7 }
  0xeb   : > { %v753_v9 = vsel %vm750_vm3, %v752_v6, %v748_v8 }
  0xec   : > { %v755_v10 = vmul.f32 %v1095_v62, %v753_v9 }
  0xee   : > { %v756_v11 = vsel %vm738_vm4, %v753_v9, %v755_v10 }
  0xef   : > { %757 = vst [vmem:[%s1247_s6] sm:$0xff] %v756_v11 }
  0xf0 PF: > { %s16_s23 = sadd.s32 1, %s1120_s23   ;;  %s1248_s21 = smov %s1116_s22 }
  0xf1   : > { %p13_p8 = scmp.ge.s32.totalorder %s16_s23, 4   ;;  %s1249_s22 = smov %s1251_s2 }
  0xf3   :  { %15 = sbr.rel (!%p13_p8) target bundleno = 2 (0x2), region = 97 }

</bundles_post_ra>
